<compile_context>
chip_gen: v7x
topology: tpu7x:2x2x1
jax: 0.10.0
libtpu: 0.0.40
codegen_flags: <defaults>
</compile_context>

<pallas_src>
import functools

import numpy as np
import jax
import jax.numpy as jnp
from jax.experimental import pallas as pl
from jax.experimental.pallas import tpu as pltpu

BN_EPS = 1e-5


# ---------------------------------------------------------------------------
# small static helpers (run at trace time)
# ---------------------------------------------------------------------------

def _interp_matrix(n_in, n_out):
    """Linear interpolation matrix (n_out, n_in), align_corners=True (numpy)."""
    m = np.zeros((n_out, n_in), dtype=np.float32)
    if n_out == 1 or n_in == 1:
        m[:, 0] = 1.0
        return m
    scale = (n_in - 1) / (n_out - 1)
    for i in range(n_out):
        src = i * scale
        i0 = min(int(np.floor(src)), n_in - 1)
        i1 = min(i0 + 1, n_in - 1)
        f = src - i0
        m[i, i0] += 1.0 - f
        m[i, i1] += f
    return m


def _pick_cout_tile(cout):
    # Prefer a single Cout tile (no input re-reads / upsample recompute per
    # tile); only tile very wide layers to bound VMEM (matters on v7x, 64 MiB).
    if cout > 256 and cout % 256 == 0:
        return 256
    if cout > 256 and cout % 128 == 0:
        return 128
    return cout


def _pick_row_strip(H, W, cin, cout):
    # Largest divisor of H whose (th*W, 9*cin) bf16 patch plus (th*W, cout)
    # f32 matmul result stay within ~1 MiB (bounds vreg pressure / spills).
    budget = 1 << 20
    for th in range(H, 0, -1):
        if H % th:
            continue
        if th * W * (9 * cin * 2 + cout * 4) <= budget:
            return th
    return 1


def _vmem_limit(in_out_bytes, scratch_bytes):
    # Double-buffered pipeline blocks + persistent scratch + headroom, clamped
    # so the request also fits v7x's 64 MiB per-TensorCore VMEM.
    need = 2 * in_out_bytes + scratch_bytes + (4 << 20)
    return int(min(56 << 20, max(32 << 20, need)))


# ---------------------------------------------------------------------------
# Pallas kernels
# ---------------------------------------------------------------------------

def _zero_xp_border(xp_ref):
    Hp, Wp, C = xp_ref.shape
    zr = jnp.zeros((1, Wp, C), xp_ref.dtype)
    xp_ref[0:1, :, :] = zr
    xp_ref[Hp - 1:Hp, :, :] = zr
    zc = jnp.zeros((Hp, 1, C), xp_ref.dtype)
    xp_ref[:, 0:1, :] = zc
    xp_ref[:, Wp - 1:Wp, :] = zc


def _im2col_conv(xp_ref, patch_ref, w_ref, y_ref, stats_ref, *, th):
    """Row-strip im2col + ONE deep-K (9*Cin) MXU matmul per strip, plus the
    per-channel (sum, sumsq) batch statistics taken from the f32 accumulator."""
    H, W, cout = y_ref.shape[1], y_ref.shape[2], y_ref.shape[3]
    cin = xp_ref.shape[2]
    s1 = jnp.zeros((1, cout), jnp.float32)
    s2 = jnp.zeros((1, cout), jnp.float32)
    for s in range(H // th):
        r0 = s * th
        # Build the (th*W, 9*cin) bf16 patch matrix once for this strip.
        for dy in range(3):
            for dx in range(3):
                k = 3 * dy + dx
                tap = xp_ref[r0 + dy:r0 + dy + th, dx:dx + W, :]
                patch_ref[:, k * cin:(k + 1) * cin] = tap.reshape(th * W, cin)
        acc = jnp.dot(patch_ref[...], w_ref[...],
                      preferred_element_type=jnp.float32)        # (th*W, cout)
        y_ref[0, r0:r0 + th, :, :] = acc.reshape(th, W, cout).astype(y_ref.dtype)
        s1 = s1 + jnp.sum(acc, axis=0, keepdims=True)
        s2 = s2 + jnp.sum(acc * acc, axis=0, keepdims=True)
    stats_ref[0, 0:1, :] = s1
    stats_ref[0, 1:2, :] = s2


def _conv1_kernel(x2_ref, x1_ref, mk_ref, w_ref, y_ref, stats_ref,
                  xp_ref, patch_ref, *, pad_top, pad_left, th):
    # x2_ref: (1, H, W, C2)  bf16 skip connection (NHWC)
    # x1_ref: (1, H1, W1, C1) f32 coarse map (NHWC)
    # mk_ref: (Ho*Wo, H1*W1) f32 kron(mh, mw) bilinear upsample operator
    # w_ref:  (9*Cin, TCout) bf16 conv1 weights, row = (3*dy+dx)*Cin + c
    # y_ref:  (1, H, W, TCout) bf16 pre-BN conv1 output
    # stats_ref: (1, 2, TCout) f32 per-batch partial (sum, sumsq)
    H, W = y_ref.shape[1], y_ref.shape[2]
    C2 = x2_ref.shape[3]
    H1, W1, C1 = x1_ref.shape[1], x1_ref.shape[2], x1_ref.shape[3]
    Ho, Wo = 2 * H1, 2 * W1

    # Zero the whole padded scratch every step: covers the conv halo and the
    # asymmetric F.pad region, and is safe under parallel grid semantics (no
    # reliance on a "first step" a given TensorCore may never execute).
    xp_ref[...] = jnp.zeros_like(xp_ref)

    # Skip connection -> channels [0:C2] of the padded interior (fused concat).
    xp_ref[1:H + 1, 1:W + 1, 0:C2] = x2_ref[0]

    # Fused bilinear x2 upsample (align_corners=True): a single lane-dense
    # matmul with kron(mh, mw); the result is already in HWC order.  The
    # F.pad offsets are folded into the destination slice (fused pad).
    x1_flat = x1_ref[0].astype(jnp.float32).reshape(H1 * W1, C1)
    up = jnp.dot(mk_ref[...], x1_flat, preferred_element_type=jnp.float32)
    xp_ref[1 + pad_top:1 + pad_top + Ho,
           1 + pad_left:1 + pad_left + Wo,
           C2:C2 + C1] = up.reshape(Ho, Wo, C1).astype(jnp.bfloat16)

    _im2col_conv(xp_ref, patch_ref, w_ref, y_ref, stats_ref, th=th)


def _conv2_kernel(y1_ref, scale_ref, shift_ref, w_ref, y_ref, stats_ref,
                  xp_ref, patch_ref, *, th):
    # y1_ref: (1, H, W, Cmid) bf16 stage-1 pre-BN output
    # scale/shift: (1, Cmid) f32 fused BatchNorm1 (batch stats) affine
    H, W = y_ref.shape[1], y_ref.shape[2]
    _zero_xp_border(xp_ref)
    # Fused BatchNorm(stage 1) + ReLU in f32, cast to bf16 for the MXU.
    x = jnp.maximum(y1_ref[0].astype(jnp.float32) * scale_ref[...]
                    + shift_ref[...], 0.0)
    xp_ref[1:H + 1, 1:W + 1, :] = x.astype(jnp.bfloat16)
    _im2col_conv(xp_ref, patch_ref, w_ref, y_ref, stats_ref, th=th)


def _bn_relu_kernel(y_ref, scale_ref, shift_ref, o_ref):
    # y_ref: (1, TH, W, C) bf16; scale/shift: (1, C) f32; o_ref: f32.
    o_ref[...] = jnp.maximum(
        y_ref[...].astype(jnp.float32) * scale_ref[...] + shift_ref[...], 0.0)


# ---------------------------------------------------------------------------
# pallas_call wrappers
# ---------------------------------------------------------------------------

def _conv_stage1(x2_nhwc, x1_nhwc, mk, w1, pad_top, pad_left):
    N, H, W, C2 = x2_nhwc.shape
    _, H1, W1, C1 = x1_nhwc.shape
    Ho, Wo = 2 * H1, 2 * W1
    cin = C1 + C2
    cout = w1.shape[1]
    tc = _pick_cout_tile(cout)
    th = _pick_row_strip(H, W, cin, tc)

    in_out = (H * W * C2 * 2 + H1 * W1 * C1 * 4 + Ho * Wo * H1 * W1 * 4
              + 9 * cin * tc * 2 + H * W * tc * 2 + 2 * tc * 4)
    scratch = (H + 2) * (W + 2) * cin * 2 + th * W * 9 * cin * 2

    kern = functools.partial(_conv1_kernel, pad_top=pad_top,
                             pad_left=pad_left, th=th)
    return pl.pallas_call(
        kern,
        out_shape=(jax.ShapeDtypeStruct((N, H, W, cout), jnp.bfloat16),
                   jax.ShapeDtypeStruct((N, 2, cout), jnp.float32)),
        grid=(N, cout // tc),
        in_specs=[
            pl.BlockSpec((1, H, W, C2), lambda n, j: (n, 0, 0, 0)),
            pl.BlockSpec((1, H1, W1, C1), lambda n, j: (n, 0, 0, 0)),
            pl.BlockSpec((Ho * Wo, H1 * W1), lambda n, j: (0, 0)),
            pl.BlockSpec((9 * cin, tc), lambda n, j: (0, j)),
        ],
        out_specs=(
            pl.BlockSpec((1, H, W, tc), lambda n, j: (n, 0, 0, j)),
            pl.BlockSpec((1, 2, tc), lambda n, j: (n, 0, j)),
        ),
        scratch_shapes=[
            pltpu.VMEM((H + 2, W + 2, cin), jnp.bfloat16),
            pltpu.VMEM((th * W, 9 * cin), jnp.bfloat16),
        ],
        compiler_params=pltpu.CompilerParams(
            dimension_semantics=("parallel", "arbitrary"),
            vmem_limit_bytes=_vmem_limit(in_out, scratch)),
    )(x2_nhwc, x1_nhwc, mk, w1)


def _conv_stage2(y1, scale, shift, w2):
    N, H, W, cin = y1.shape
    cout = w2.shape[1]
    tc = _pick_cout_tile(cout)
    th = _pick_row_strip(H, W, cin, tc)

    in_out = (H * W * cin * 2 + 2 * cin * 4 * 2
              + 9 * cin * tc * 2 + H * W * tc * 2 + 2 * tc * 4)
    scratch = (H + 2) * (W + 2) * cin * 2 + th * W * 9 * cin * 2

    kern = functools.partial(_conv2_kernel, th=th)
    return pl.pallas_call(
        kern,
        out_shape=(jax.ShapeDtypeStruct((N, H, W, cout), jnp.bfloat16),
                   jax.ShapeDtypeStruct((N, 2, cout), jnp.float32)),
        grid=(N, cout // tc),
        in_specs=[
            pl.BlockSpec((1, H, W, cin), lambda n, j: (n, 0, 0, 0)),
            pl.BlockSpec((1, cin), lambda n, j: (0, 0)),
            pl.BlockSpec((1, cin), lambda n, j: (0, 0)),
            pl.BlockSpec((9 * cin, tc), lambda n, j: (0, j)),
        ],
        out_specs=(
            pl.BlockSpec((1, H, W, tc), lambda n, j: (n, 0, 0, j)),
            pl.BlockSpec((1, 2, tc), lambda n, j: (n, 0, j)),
        ),
        scratch_shapes=[
            pltpu.VMEM((H + 2, W + 2, cin), jnp.bfloat16),
            pltpu.VMEM((th * W, 9 * cin), jnp.bfloat16),
        ],
        compiler_params=pltpu.CompilerParams(
            dimension_semantics=("parallel", "arbitrary"),
            vmem_limit_bytes=_vmem_limit(in_out, scratch)),
    )(y1, scale, shift, w2)


def _bn_relu(y, scale, shift):
    """Final BatchNorm(affine form) + ReLU, tiled over row strips."""
    N, H, W, C = y.shape
    th = 1
    for cand in range(H, 0, -1):
        if H % cand == 0 and cand * W * C * 4 <= (2 << 20):
            th = cand
            break
    return pl.pallas_call(
        _bn_relu_kernel,
        out_shape=jax.ShapeDtypeStruct((N, H, W, C), jnp.float32),
        grid=(N, H // th),
        in_specs=[
            pl.BlockSpec((1, th, W, C), lambda n, h: (n, h, 0, 0)),
            pl.BlockSpec((1, C), lambda n, h: (0, 0)),
            pl.BlockSpec((1, C), lambda n, h: (0, 0)),
        ],
        out_specs=pl.BlockSpec((1, th, W, C), lambda n, h: (n, h, 0, 0)),
        compiler_params=pltpu.CompilerParams(
            dimension_semantics=("parallel", "parallel")),
    )(y, scale, shift)


def _bn_affine(stats_sum, gamma, beta, count):
    """Fold training-mode BatchNorm (batch statistics) into scale/shift."""
    mean = stats_sum[0] / count
    var = stats_sum[1] / count - mean * mean        # biased variance
    inv = jax.lax.rsqrt(var + BN_EPS)
    scale = gamma.reshape(-1) * inv
    shift = beta.reshape(-1) - mean * scale
    return scale.reshape(1, -1), shift.reshape(1, -1)


def up_forward(params, x1, x2):
    """Up.forward(x1, x2): bilinear x2 upsample of x1, pad, concat [x2, x1],
    DoubleConv (conv-BN-ReLU twice, training-mode batch statistics)."""
    (w1, g1, b1), (w2, g2, b2) = params
    N, C1, H1, W1 = x1.shape
    _, C2, H, W = x2.shape
    Ho, Wo = 2 * H1, 2 * W1
    assert Ho <= H and Wo <= W, "negative F.pad (crop) is not supported"
    pad_top, pad_left = (H - Ho) // 2, (W - Wo) // 2

    # Only remaining XLA glue before the kernels: NCHW->NHWC of the two
    # (small) inputs, fused with the bf16 cast of the skip connection.
    x2_nhwc = jnp.transpose(x2, (0, 2, 3, 1)).astype(jnp.bfloat16)
    x1_nhwc = jnp.transpose(x1, (0, 2, 3, 1)).astype(jnp.float32)

    # Precomputed bilinear (align_corners=True) x2 upsample operator.
    mk = jnp.asarray(np.kron(_interp_matrix(H1, Ho), _interp_matrix(W1, Wo)))

    cnt = float(N * H * W)

    # Stage 1: fused upsample/pad/concat + conv1; per-batch partial BN stats.
    y1, st1 = _conv_stage1(x2_nhwc, x1_nhwc, mk, w1, pad_top, pad_left)
    scale1, shift1 = _bn_affine(jnp.sum(st1, axis=0), g1, b1, cnt)

    # Stage 2: BN1+ReLU fused into conv2's input path (no extra HBM pass).
    y2, st2 = _conv_stage2(y1, scale1, shift1, w2)
    scale2, shift2 = _bn_affine(jnp.sum(st2, axis=0), g2, b2, cnt)

    out = _bn_relu(y2, scale2, shift2)                        # (N, H, W, Cout) f32
    # TODO(synk): keep NHWC for a fused downstream consumer; transposed back
    # to NCHW here only to match the PyTorch module's output layout.
    return jnp.transpose(out, (0, 3, 1, 2))


def init_up_params(key, in_channels, out_channels):
    """Deterministic synthetic params for DoubleConv(in, out, mid=in//2)."""
    mid = in_channels // 2

    def conv_w(k, cin, cout):
        # PyTorch Conv2d weight (cout, cin, 3, 3), He init; stored flat as
        # (9*cin, cout) with row index (3*dy + dx)*cin + c to match the
        # in-kernel im2col column order.  bf16 (MXU operand dtype).
        w = jax.random.normal(k, (cout, cin, 3, 3), jnp.float32)
        w = w * (2.0 / (cin * 9)) ** 0.5
        return jnp.transpose(w, (2, 3, 1, 0)).reshape(9 * cin, cout).astype(jnp.bfloat16)

    k1, k2, k3, k4, k5, k6 = jax.random.split(key, 6)
    w1 = conv_w(k1, in_channels, mid)
    g1 = 1.0 + 0.1 * jax.random.normal(k2, (mid,), jnp.float32)
    b1 = 0.1 * jax.random.normal(k3, (mid,), jnp.float32)
    w2 = conv_w(k4, mid, out_channels)
    g2 = 1.0 + 0.1 * jax.random.normal(k5, (out_channels,), jnp.float32)
    b2 = 0.1 * jax.random.normal(k6, (out_channels,), jnp.float32)
    return [(w1, g1, b1), (w2, g2, b2)]


if __name__ == "__main__":
    key = jax.random.PRNGKey(0)
    kx1, kx2, kp = jax.random.split(key, 3)

    in_channels, out_channels = 8, 8              # Up(8, 8, bilinear=True)
    # x1: coarse feature map (upsampled 8 -> 16); x2: skip connection.
    x1 = jax.random.normal(kx1, (2, in_channels // 2, 8, 8), jnp.float32)
    x2 = jax.random.normal(kx2, (2, in_channels // 2, 16, 16), jnp.float32)

    params = init_up_params(kp, in_channels, out_channels)

    fwd = jax.jit(up_forward)
    out = fwd(params, x1, x2)
    jax.block_until_ready(out)
    assert out.shape == (2, out_channels, 16, 16), out.shape
    assert bool(jnp.all(jnp.isfinite(out)))
    print("KERNEL_OK")
</pallas_src>

<mosaic_0001>
module attributes {stable_mosaic.version = 11 : i64} {
  func.func @_conv1_kernel(%arg0: i32, %arg1: i32, %arg2: memref<1x16x16x4xbf16, #tpu.memory_space<vmem>>, %arg3: memref<1x8x8x4xf32, #tpu.memory_space<vmem>>, %arg4: memref<256x64xf32, #tpu.memory_space<vmem>>, %arg5: memref<72x4xbf16, #tpu.memory_space<vmem>>, %arg6: memref<1x16x16x4xbf16, #tpu.memory_space<vmem>>, %arg7: memref<1x2x4xf32, #tpu.memory_space<vmem>>, %arg8: memref<18x18x8xbf16, #tpu.memory_space<vmem>>, %arg9: memref<256x72xbf16, #tpu.memory_space<vmem>>) attributes {dimension_semantics = [#tpu.dimension_semantics<parallel>, #tpu.dimension_semantics<arbitrary>], iteration_bounds = array<i64: 2, 1>, scalar_prefetch = 0 : i64, scratch_operands = 2 : i64, tpu.core_type = #tpu.core_type<tc>, window_params = [{transform_indices = @transform_0, window_bounds = array<i64: 1, 16, 16, 4>}, {transform_indices = @transform_1, window_bounds = array<i64: 1, 8, 8, 4>}, {pipeline_mode = #tpu.pipeline_mode<synchronous>, transform_indices = @transform_2, window_bounds = array<i64: 256, 64>}, {transform_indices = @transform_3, window_bounds = array<i64: 72, 4>}, {transform_indices = @transform_4, window_bounds = array<i64: 1, 16, 16, 4>}, {transform_indices = @transform_5, window_bounds = array<i64: 1, 2, 4>}]} {
    %cst = arith.constant 0.000000e+00 : bf16
    %0 = vector.broadcast %cst : bf16 to vector<18x18x8xbf16>
    %c0 = arith.constant 0 : index
    %c0_0 = arith.constant 0 : index
    %c0_1 = arith.constant 0 : index
    %1 = vector.load %arg8[%c0, %c0_0, %c0_1] : memref<18x18x8xbf16, #tpu.memory_space<vmem>>, vector<18x18x8xbf16>
    tpu.vector_store %arg8[%c0, %c0_0, %c0_1], %0 {strides = array<i32>} : memref<18x18x8xbf16, #tpu.memory_space<vmem>>, vector<18x18x8xbf16>,
    %c0_2 = arith.constant 0 : index
    %c0_3 = arith.constant 0 : index
    %c0_4 = arith.constant 0 : index
    %c0_5 = arith.constant 0 : index
    %2 = vector.load %arg2[%c0_2, %c0_3, %c0_4, %c0_5] : memref<1x16x16x4xbf16, #tpu.memory_space<vmem>>, vector<1x16x16x4xbf16>
    %3 = vector.shape_cast %2 : vector<1x16x16x4xbf16> to vector<16x16x4xbf16>
    %c1 = arith.constant 1 : index
    %c1_6 = arith.constant 1 : index
    %c0_7 = arith.constant 0 : index
    %4 = vector.load %arg8[%c1, %c1_6, %c0_7] : memref<18x18x8xbf16, #tpu.memory_space<vmem>>, vector<16x16x4xbf16>
    tpu.vector_store %arg8[%c1, %c1_6, %c0_7], %3 {strides = array<i32>} : memref<18x18x8xbf16, #tpu.memory_space<vmem>>, vector<16x16x4xbf16>,
    %c0_8 = arith.constant 0 : index
    %c0_9 = arith.constant 0 : index
    %c0_10 = arith.constant 0 : index
    %c0_11 = arith.constant 0 : index
    %5 = vector.load %arg3[%c0_8, %c0_9, %c0_10, %c0_11] : memref<1x8x8x4xf32, #tpu.memory_space<vmem>>, vector<1x8x8x4xf32>
    %6 = vector.shape_cast %5 : vector<1x8x8x4xf32> to vector<8x8x4xf32>
    %7 = vector.shape_cast %6 : vector<8x8x4xf32> to vector<64x4xf32>
    %c0_12 = arith.constant 0 : index
    %c0_13 = arith.constant 0 : index
    %8 = vector.load %arg4[%c0_12, %c0_13] : memref<256x64xf32, #tpu.memory_space<vmem>>, vector<256x64xf32>
    %cst_14 = arith.constant dense<0.000000e+00> : vector<256x4xf32>
    %9 = tpu.matmul %8, %7, %cst_14 {dimension_numbers = #tpu.dot_dimension_numbers<[1], [0], [0], [1], [0, 0, 1, 1], [], []>} : vector<256x64xf32>, vector<64x4xf32>, vector<256x4xf32> -> vector<256x4xf32>
    %10 = vector.shape_cast %9 : vector<256x4xf32> to vector<16x16x4xf32>
    %11 = arith.truncf %10 : vector<16x16x4xf32> to vector<16x16x4xbf16>
    %c1_15 = arith.constant 1 : index
    %c1_16 = arith.constant 1 : index
    %c4 = arith.constant 4 : index
    %12 = vector.load %arg8[%c1_15, %c1_16, %c4] : memref<18x18x8xbf16, #tpu.memory_space<vmem>>, vector<16x16x4xbf16>
    tpu.vector_store %arg8[%c1_15, %c1_16, %c4], %11 {strides = array<i32>} : memref<18x18x8xbf16, #tpu.memory_space<vmem>>, vector<16x16x4xbf16>,
    %cst_17 = arith.constant 0.000000e+00 : f32
    %13 = vector.broadcast %cst_17 : f32 to vector<1x4xf32>
    %cst_18 = arith.constant 0.000000e+00 : f32
    %14 = vector.broadcast %cst_18 : f32 to vector<1x4xf32>
    %c0_19 = arith.constant 0 : index
    %c0_20 = arith.constant 0 : index
    %c0_21 = arith.constant 0 : index
    %15 = vector.load %arg8[%c0_19, %c0_20, %c0_21] : memref<18x18x8xbf16, #tpu.memory_space<vmem>>, vector<16x16x8xbf16>
    %16 = vector.shape_cast %15 : vector<16x16x8xbf16> to vector<256x8xbf16>
    %c0_22 = arith.constant 0 : index
    %c0_23 = arith.constant 0 : index
    %17 = vector.load %arg9[%c0_22, %c0_23] : memref<256x72xbf16, #tpu.memory_space<vmem>>, vector<256x8xbf16>
    tpu.vector_store %arg9[%c0_22, %c0_23], %16 {strides = array<i32>} : memref<256x72xbf16, #tpu.memory_space<vmem>>, vector<256x8xbf16>,
    %c0_24 = arith.constant 0 : index
    %c1_25 = arith.constant 1 : index
    %c0_26 = arith.constant 0 : index
    %18 = vector.load %arg8[%c0_24, %c1_25, %c0_26] : memref<18x18x8xbf16, #tpu.memory_space<vmem>>, vector<16x16x8xbf16>
    %19 = vector.shape_cast %18 : vector<16x16x8xbf16> to vector<256x8xbf16>
    %c0_27 = arith.constant 0 : index
    %c8 = arith.constant 8 : index
    %20 = vector.load %arg9[%c0_27, %c8] : memref<256x72xbf16, #tpu.memory_space<vmem>>, vector<256x8xbf16>
    tpu.vector_store %arg9[%c0_27, %c8], %19 {strides = array<i32>} : memref<256x72xbf16, #tpu.memory_space<vmem>>, vector<256x8xbf16>,
    %c0_28 = arith.constant 0 : index
    %c2 = arith.constant 2 : index
    %c0_29 = arith.constant 0 : index
    %21 = vector.load %arg8[%c0_28, %c2, %c0_29] : memref<18x18x8xbf16, #tpu.memory_space<vmem>>, vector<16x16x8xbf16>
    %22 = vector.shape_cast %21 : vector<16x16x8xbf16> to vector<256x8xbf16>
    %c0_30 = arith.constant 0 : index
    %c16 = arith.constant 16 : index
    %23 = vector.load %arg9[%c0_30, %c16] : memref<256x72xbf16, #tpu.memory_space<vmem>>, vector<256x8xbf16>
    tpu.vector_store %arg9[%c0_30, %c16], %22 {strides = array<i32>} : memref<256x72xbf16, #tpu.memory_space<vmem>>, vector<256x8xbf16>,
    %c1_31 = arith.constant 1 : index
    %c0_32 = arith.constant 0 : index
    %c0_33 = arith.constant 0 : index
    %24 = vector.load %arg8[%c1_31, %c0_32, %c0_33] : memref<18x18x8xbf16, #tpu.memory_space<vmem>>, vector<16x16x8xbf16>
    %25 = vector.shape_cast %24 : vector<16x16x8xbf16> to vector<256x8xbf16>
    %c0_34 = arith.constant 0 : index
    %c24 = arith.constant 24 : index
    %26 = vector.load %arg9[%c0_34, %c24] : memref<256x72xbf16, #tpu.memory_space<vmem>>, vector<256x8xbf16>
    tpu.vector_store %arg9[%c0_34, %c24], %25 {strides = array<i32>} : memref<256x72xbf16, #tpu.memory_space<vmem>>, vector<256x8xbf16>,
    %c1_35 = arith.constant 1 : index
    %c1_36 = arith.constant 1 : index
    %c0_37 = arith.constant 0 : index
    %27 = vector.load %arg8[%c1_35, %c1_36, %c0_37] : memref<18x18x8xbf16, #tpu.memory_space<vmem>>, vector<16x16x8xbf16>
    %28 = vector.shape_cast %27 : vector<16x16x8xbf16> to vector<256x8xbf16>
    %c0_38 = arith.constant 0 : index
    %c32 = arith.constant 32 : index
    %29 = vector.load %arg9[%c0_38, %c32] : memref<256x72xbf16, #tpu.memory_space<vmem>>, vector<256x8xbf16>
    tpu.vector_store %arg9[%c0_38, %c32], %28 {strides = array<i32>} : memref<256x72xbf16, #tpu.memory_space<vmem>>, vector<256x8xbf16>,
    %c1_39 = arith.constant 1 : index
    %c2_40 = arith.constant 2 : index
    %c0_41 = arith.constant 0 : index
    %30 = vector.load %arg8[%c1_39, %c2_40, %c0_41] : memref<18x18x8xbf16, #tpu.memory_space<vmem>>, vector<16x16x8xbf16>
    %31 = vector.shape_cast %30 : vector<16x16x8xbf16> to vector<256x8xbf16>
    %c0_42 = arith.constant 0 : index
    %c40 = arith.constant 40 : index
    %32 = vector.load %arg9[%c0_42, %c40] : memref<256x72xbf16, #tpu.memory_space<vmem>>, vector<256x8xbf16>
    tpu.vector_store %arg9[%c0_42, %c40], %31 {strides = array<i32>} : memref<256x72xbf16, #tpu.memory_space<vmem>>, vector<256x8xbf16>,
    %c2_43 = arith.constant 2 : index
    %c0_44 = arith.constant 0 : index
    %c0_45 = arith.constant 0 : index
    %33 = vector.load %arg8[%c2_43, %c0_44, %c0_45] : memref<18x18x8xbf16, #tpu.memory_space<vmem>>, vector<16x16x8xbf16>
    %34 = vector.shape_cast %33 : vector<16x16x8xbf16> to vector<256x8xbf16>
    %c0_46 = arith.constant 0 : index
    %c48 = arith.constant 48 : index
    %35 = vector.load %arg9[%c0_46, %c48] : memref<256x72xbf16, #tpu.memory_space<vmem>>, vector<256x8xbf16>
    tpu.vector_store %arg9[%c0_46, %c48], %34 {strides = array<i32>} : memref<256x72xbf16, #tpu.memory_space<vmem>>, vector<256x8xbf16>,
    %c2_47 = arith.constant 2 : index
    %c1_48 = arith.constant 1 : index
    %c0_49 = arith.constant 0 : index
    %36 = vector.load %arg8[%c2_47, %c1_48, %c0_49] : memref<18x18x8xbf16, #tpu.memory_space<vmem>>, vector<16x16x8xbf16>
    %37 = vector.shape_cast %36 : vector<16x16x8xbf16> to vector<256x8xbf16>
    %c0_50 = arith.constant 0 : index
    %c56 = arith.constant 56 : index
    %38 = vector.load %arg9[%c0_50, %c56] : memref<256x72xbf16, #tpu.memory_space<vmem>>, vector<256x8xbf16>
    tpu.vector_store %arg9[%c0_50, %c56], %37 {strides = array<i32>} : memref<256x72xbf16, #tpu.memory_space<vmem>>, vector<256x8xbf16>,
    %c2_51 = arith.constant 2 : index
    %c2_52 = arith.constant 2 : index
    %c0_53 = arith.constant 0 : index
    %39 = vector.load %arg8[%c2_51, %c2_52, %c0_53] : memref<18x18x8xbf16, #tpu.memory_space<vmem>>, vector<16x16x8xbf16>
    %40 = vector.shape_cast %39 : vector<16x16x8xbf16> to vector<256x8xbf16>
    %c0_54 = arith.constant 0 : index
    %c64 = arith.constant 64 : index
    %41 = vector.load %arg9[%c0_54, %c64] : memref<256x72xbf16, #tpu.memory_space<vmem>>, vector<256x8xbf16>
    tpu.vector_store %arg9[%c0_54, %c64], %40 {strides = array<i32>} : memref<256x72xbf16, #tpu.memory_space<vmem>>, vector<256x8xbf16>,
    %c0_55 = arith.constant 0 : index
    %c0_56 = arith.constant 0 : index
    %42 = vector.load %arg9[%c0_55, %c0_56] : memref<256x72xbf16, #tpu.memory_space<vmem>>, vector<256x72xbf16>
    %c0_57 = arith.constant 0 : index
    %c0_58 = arith.constant 0 : index
    %43 = vector.load %arg5[%c0_57, %c0_58] : memref<72x4xbf16, #tpu.memory_space<vmem>>, vector<72x4xbf16>
    %cst_59 = arith.constant dense<0.000000e+00> : vector<256x4xf32>
    %44 = tpu.matmul %42, %43, %cst_59 {dimension_numbers = #tpu.dot_dimension_numbers<[1], [0], [0], [1], [0, 0, 1, 1], [], []>} : vector<256x72xbf16>, vector<72x4xbf16>, vector<256x4xf32> -> vector<256x4xf32>
    %45 = vector.shape_cast %44 : vector<256x4xf32> to vector<16x16x4xf32>
    %46 = arith.truncf %45 : vector<16x16x4xf32> to vector<16x16x4xbf16>
    %c0_60 = arith.constant 0 : index
    %c0_61 = arith.constant 0 : index
    %c0_62 = arith.constant 0 : index
    %c0_63 = arith.constant 0 : index
    %47 = vector.load %arg6[%c0_60, %c0_61, %c0_62, %c0_63] : memref<1x16x16x4xbf16, #tpu.memory_space<vmem>>, vector<1x16x16x4xbf16>
    %48 = vector.shape_cast %47 : vector<1x16x16x4xbf16> to vector<16x16x4xbf16>
    %49 = vector.shape_cast %46 : vector<16x16x4xbf16> to vector<1x16x16x4xbf16>
    tpu.vector_store %arg6[%c0_60, %c0_61, %c0_62, %c0_63], %49 {strides = array<i32>} : memref<1x16x16x4xbf16, #tpu.memory_space<vmem>>, vector<1x16x16x4xbf16>,
    %cst_64 = arith.constant dense<0.000000e+00> : vector<4xf32>
    %50 = vector.multi_reduction <add>, %44, %cst_64 [0] : vector<256x4xf32> to vector<4xf32>
    %51 = vector.shape_cast %50 : vector<4xf32> to vector<1x4xf32>
    %52 = arith.addf %13, %51 : vector<1x4xf32>
    %53 = arith.mulf %44, %44 : vector<256x4xf32>
    %cst_65 = arith.constant dense<0.000000e+00> : vector<4xf32>
    %54 = vector.multi_reduction <add>, %53, %cst_65 [0] : vector<256x4xf32> to vector<4xf32>
    %55 = vector.shape_cast %54 : vector<4xf32> to vector<1x4xf32>
    %56 = arith.addf %14, %55 : vector<1x4xf32>
    %c0_66 = arith.constant 0 : index
    %c0_67 = arith.constant 0 : index
    %c0_68 = arith.constant 0 : index
    %57 = vector.load %arg7[%c0_66, %c0_67, %c0_68] : memref<1x2x4xf32, #tpu.memory_space<vmem>>, vector<1x1x4xf32>
    %58 = vector.shape_cast %57 : vector<1x1x4xf32> to vector<1x4xf32>
    %59 = vector.shape_cast %52 : vector<1x4xf32> to vector<1x1x4xf32>
    tpu.vector_store %arg7[%c0_66, %c0_67, %c0_68], %59 {strides = array<i32>} : memref<1x2x4xf32, #tpu.memory_space<vmem>>, vector<1x1x4xf32>,
    %c0_69 = arith.constant 0 : index
    %c1_70 = arith.constant 1 : index
    %c0_71 = arith.constant 0 : index
    %60 = vector.load %arg7[%c0_69, %c1_70, %c0_71] : memref<1x2x4xf32, #tpu.memory_space<vmem>>, vector<1x1x4xf32>
    %61 = vector.shape_cast %60 : vector<1x1x4xf32> to vector<1x4xf32>
    %62 = vector.shape_cast %56 : vector<1x4xf32> to vector<1x1x4xf32>
    tpu.vector_store %arg7[%c0_69, %c1_70, %c0_71], %62 {strides = array<i32>} : memref<1x2x4xf32, #tpu.memory_space<vmem>>, vector<1x1x4xf32>,
    return
  }
  func.func @transform_0(%arg0: i32, %arg1: i32) -> (i32, i32, i32, i32) {
    %c0_i32 = arith.constant 0 : i32
    %c0_i32_0 = arith.constant 0 : i32
    %c0_i32_1 = arith.constant 0 : i32
    %c0_i32_2 = arith.constant 0 : i32
    return %arg0, %c0_i32, %c0_i32_0, %c0_i32_1 : i32, i32, i32, i32
  }
  func.func @transform_1(%arg0: i32, %arg1: i32) -> (i32, i32, i32, i32) {
    %c0_i32 = arith.constant 0 : i32
    %c0_i32_0 = arith.constant 0 : i32
    %c0_i32_1 = arith.constant 0 : i32
    %c0_i32_2 = arith.constant 0 : i32
    return %arg0, %c0_i32, %c0_i32_0, %c0_i32_1 : i32, i32, i32, i32
  }
  func.func @transform_2(%arg0: i32, %arg1: i32) -> (i32, i32) {
    %c0_i32 = arith.constant 0 : i32
    %c0_i32_0 = arith.constant 0 : i32
    %c0_i32_1 = arith.constant 0 : i32
    return %c0_i32, %c0_i32_0 : i32, i32
  }
  func.func @transform_3(%arg0: i32, %arg1: i32) -> (i32, i32) {
    %c0_i32 = arith.constant 0 : i32
    %c0_i32_0 = arith.constant 0 : i32
    return %c0_i32, %arg1 : i32, i32
  }
  func.func @transform_4(%arg0: i32, %arg1: i32) -> (i32, i32, i32, i32) {
    %c0_i32 = arith.constant 0 : i32
    %c0_i32_0 = arith.constant 0 : i32
    %c0_i32_1 = arith.constant 0 : i32
    return %arg0, %c0_i32, %c0_i32_0, %arg1 : i32, i32, i32, i32
  }
  func.func @transform_5(%arg0: i32, %arg1: i32) -> (i32, i32, i32) {
    %c0_i32 = arith.constant 0 : i32
    %c0_i32_0 = arith.constant 0 : i32
    return %arg0, %c0_i32, %arg1 : i32, i32, i32
  }
}

module attributes {stable_mosaic.version = 11 : i64} {
  func.func @_conv2_kernel(%arg0: i32, %arg1: i32, %arg2: memref<1x16x16x4xbf16, #tpu.memory_space<vmem>>, %arg3: memref<1x4xf32, #tpu.memory_space<vmem>>, %arg4: memref<1x4xf32, #tpu.memory_space<vmem>>, %arg5: memref<36x8xbf16, #tpu.memory_space<vmem>>, %arg6: memref<1x16x16x8xbf16, #tpu.memory_space<vmem>>, %arg7: memref<1x2x8xf32, #tpu.memory_space<vmem>>, %arg8: memref<18x18x4xbf16, #tpu.memory_space<vmem>>, %arg9: memref<256x36xbf16, #tpu.memory_space<vmem>>) attributes {dimension_semantics = [#tpu.dimension_semantics<parallel>, #tpu.dimension_semantics<arbitrary>], iteration_bounds = array<i64: 2, 1>, scalar_prefetch = 0 : i64, scratch_operands = 2 : i64, tpu.core_type = #tpu.core_type<tc>, window_params = [{transform_indices = @transform_0, window_bounds = array<i64: 1, 16, 16, 4>}, {pipeline_mode = #tpu.pipeline_mode<synchronous>, transform_indices = @transform_1, window_bounds = array<i64: 1, 4>}, {pipeline_mode = #tpu.pipeline_mode<synchronous>, transform_indices = @transform_2, window_bounds = array<i64: 1, 4>}, {transform_indices = @transform_3, window_bounds = array<i64: 36, 8>}, {transform_indices = @transform_4, window_bounds = array<i64: 1, 16, 16, 8>}, {transform_indices = @transform_5, window_bounds = array<i64: 1, 2, 8>}]} {
    %cst = arith.constant 0.000000e+00 : bf16
    %0 = vector.broadcast %cst : bf16 to vector<1x18x4xbf16>
    %c0 = arith.constant 0 : index
    %c0_0 = arith.constant 0 : index
    %c0_1 = arith.constant 0 : index
    %1 = vector.load %arg8[%c0, %c0_0, %c0_1] : memref<18x18x4xbf16, #tpu.memory_space<vmem>>, vector<1x18x4xbf16>
    tpu.vector_store %arg8[%c0, %c0_0, %c0_1], %0 {strides = array<i32>} : memref<18x18x4xbf16, #tpu.memory_space<vmem>>, vector<1x18x4xbf16>,
    %c17 = arith.constant 17 : index
    %c0_2 = arith.constant 0 : index
    %c0_3 = arith.constant 0 : index
    %2 = vector.load %arg8[%c17, %c0_2, %c0_3] : memref<18x18x4xbf16, #tpu.memory_space<vmem>>, vector<1x18x4xbf16>
    tpu.vector_store %arg8[%c17, %c0_2, %c0_3], %0 {strides = array<i32>} : memref<18x18x4xbf16, #tpu.memory_space<vmem>>, vector<1x18x4xbf16>,
    %cst_4 = arith.constant 0.000000e+00 : bf16
    %3 = vector.broadcast %cst_4 : bf16 to vector<18x1x4xbf16>
    %c0_5 = arith.constant 0 : index
    %c0_6 = arith.constant 0 : index
    %c0_7 = arith.constant 0 : index
    %4 = vector.load %arg8[%c0_5, %c0_6, %c0_7] : memref<18x18x4xbf16, #tpu.memory_space<vmem>>, vector<18x1x4xbf16>
    tpu.vector_store %arg8[%c0_5, %c0_6, %c0_7], %3 {strides = array<i32>} : memref<18x18x4xbf16, #tpu.memory_space<vmem>>, vector<18x1x4xbf16>,
    %c0_8 = arith.constant 0 : index
    %c17_9 = arith.constant 17 : index
    %c0_10 = arith.constant 0 : index
    %5 = vector.load %arg8[%c0_8, %c17_9, %c0_10] : memref<18x18x4xbf16, #tpu.memory_space<vmem>>, vector<18x1x4xbf16>
    tpu.vector_store %arg8[%c0_8, %c17_9, %c0_10], %3 {strides = array<i32>} : memref<18x18x4xbf16, #tpu.memory_space<vmem>>, vector<18x1x4xbf16>,
    %c0_11 = arith.constant 0 : index
    %c0_12 = arith.constant 0 : index
    %c0_13 = arith.constant 0 : index
    %c0_14 = arith.constant 0 : index
    %6 = vector.load %arg2[%c0_11, %c0_12, %c0_13, %c0_14] : memref<1x16x16x4xbf16, #tpu.memory_space<vmem>>, vector<1x16x16x4xbf16>
    %7 = vector.shape_cast %6 : vector<1x16x16x4xbf16> to vector<16x16x4xbf16>
    %8 = arith.extf %7 : vector<16x16x4xbf16> to vector<16x16x4xf32>
    %c0_15 = arith.constant 0 : index
    %c0_16 = arith.constant 0 : index
    %9 = vector.load %arg3[%c0_15, %c0_16] : memref<1x4xf32, #tpu.memory_space<vmem>>, vector<1x4xf32>
    %10 = vector.shape_cast %9 : vector<1x4xf32> to vector<1x1x4xf32>
    %11 = vector.broadcast %10 : vector<1x1x4xf32> to vector<16x16x4xf32>
    %12 = arith.mulf %8, %11 : vector<16x16x4xf32>
    %c0_17 = arith.constant 0 : index
    %c0_18 = arith.constant 0 : index
    %13 = vector.load %arg4[%c0_17, %c0_18] : memref<1x4xf32, #tpu.memory_space<vmem>>, vector<1x4xf32>
    %14 = vector.shape_cast %13 : vector<1x4xf32> to vector<1x1x4xf32>
    %15 = vector.broadcast %14 : vector<1x1x4xf32> to vector<16x16x4xf32>
    %16 = arith.addf %12, %15 : vector<16x16x4xf32>
    %cst_19 = arith.constant 0.000000e+00 : f32
    %17 = vector.broadcast %cst_19 : f32 to vector<16x16x4xf32>
    %18 = arith.maximumf %16, %17 : vector<16x16x4xf32>
    %19 = arith.truncf %18 : vector<16x16x4xf32> to vector<16x16x4xbf16>
    %c1 = arith.constant 1 : index
    %c1_20 = arith.constant 1 : index
    %c0_21 = arith.constant 0 : index
    %20 = vector.load %arg8[%c1, %c1_20, %c0_21] : memref<18x18x4xbf16, #tpu.memory_space<vmem>>, vector<16x16x4xbf16>
    tpu.vector_store %arg8[%c1, %c1_20, %c0_21], %19 {strides = array<i32>} : memref<18x18x4xbf16, #tpu.memory_space<vmem>>, vector<16x16x4xbf16>,
    %cst_22 = arith.constant 0.000000e+00 : f32
    %21 = vector.broadcast %cst_22 : f32 to vector<1x8xf32>
    %cst_23 = arith.constant 0.000000e+00 : f32
    %22 = vector.broadcast %cst_23 : f32 to vector<1x8xf32>
    %c0_24 = arith.constant 0 : index
    %c0_25 = arith.constant 0 : index
    %c0_26 = arith.constant 0 : index
    %23 = vector.load %arg8[%c0_24, %c0_25, %c0_26] : memref<18x18x4xbf16, #tpu.memory_space<vmem>>, vector<16x16x4xbf16>
    %24 = vector.shape_cast %23 : vector<16x16x4xbf16> to vector<256x4xbf16>
    %c0_27 = arith.constant 0 : index
    %c0_28 = arith.constant 0 : index
    %25 = vector.load %arg9[%c0_27, %c0_28] : memref<256x36xbf16, #tpu.memory_space<vmem>>, vector<256x4xbf16>
    tpu.vector_store %arg9[%c0_27, %c0_28], %24 {strides = array<i32>} : memref<256x36xbf16, #tpu.memory_space<vmem>>, vector<256x4xbf16>,
    %c0_29 = arith.constant 0 : index
    %c1_30 = arith.constant 1 : index
    %c0_31 = arith.constant 0 : index
    %26 = vector.load %arg8[%c0_29, %c1_30, %c0_31] : memref<18x18x4xbf16, #tpu.memory_space<vmem>>, vector<16x16x4xbf16>
    %27 = vector.shape_cast %26 : vector<16x16x4xbf16> to vector<256x4xbf16>
    %c0_32 = arith.constant 0 : index
    %c4 = arith.constant 4 : index
    %28 = vector.load %arg9[%c0_32, %c4] : memref<256x36xbf16, #tpu.memory_space<vmem>>, vector<256x4xbf16>
    tpu.vector_store %arg9[%c0_32, %c4], %27 {strides = array<i32>} : memref<256x36xbf16, #tpu.memory_space<vmem>>, vector<256x4xbf16>,
    %c0_33 = arith.constant 0 : index
    %c2 = arith.constant 2 : index
    %c0_34 = arith.constant 0 : index
    %29 = vector.load %arg8[%c0_33, %c2, %c0_34] : memref<18x18x4xbf16, #tpu.memory_space<vmem>>, vector<16x16x4xbf16>
    %30 = vector.shape_cast %29 : vector<16x16x4xbf16> to vector<256x4xbf16>
    %c0_35 = arith.constant 0 : index
    %c8 = arith.constant 8 : index
    %31 = vector.load %arg9[%c0_35, %c8] : memref<256x36xbf16, #tpu.memory_space<vmem>>, vector<256x4xbf16>
    tpu.vector_store %arg9[%c0_35, %c8], %30 {strides = array<i32>} : memref<256x36xbf16, #tpu.memory_space<vmem>>, vector<256x4xbf16>,
    %c1_36 = arith.constant 1 : index
    %c0_37 = arith.constant 0 : index
    %c0_38 = arith.constant 0 : index
    %32 = vector.load %arg8[%c1_36, %c0_37, %c0_38] : memref<18x18x4xbf16, #tpu.memory_space<vmem>>, vector<16x16x4xbf16>
    %33 = vector.shape_cast %32 : vector<16x16x4xbf16> to vector<256x4xbf16>
    %c0_39 = arith.constant 0 : index
    %c12 = arith.constant 12 : index
    %34 = vector.load %arg9[%c0_39, %c12] : memref<256x36xbf16, #tpu.memory_space<vmem>>, vector<256x4xbf16>
    tpu.vector_store %arg9[%c0_39, %c12], %33 {strides = array<i32>} : memref<256x36xbf16, #tpu.memory_space<vmem>>, vector<256x4xbf16>,
    %c1_40 = arith.constant 1 : index
    %c1_41 = arith.constant 1 : index
    %c0_42 = arith.constant 0 : index
    %35 = vector.load %arg8[%c1_40, %c1_41, %c0_42] : memref<18x18x4xbf16, #tpu.memory_space<vmem>>, vector<16x16x4xbf16>
    %36 = vector.shape_cast %35 : vector<16x16x4xbf16> to vector<256x4xbf16>
    %c0_43 = arith.constant 0 : index
    %c16 = arith.constant 16 : index
    %37 = vector.load %arg9[%c0_43, %c16] : memref<256x36xbf16, #tpu.memory_space<vmem>>, vector<256x4xbf16>
    tpu.vector_store %arg9[%c0_43, %c16], %36 {strides = array<i32>} : memref<256x36xbf16, #tpu.memory_space<vmem>>, vector<256x4xbf16>,
    %c1_44 = arith.constant 1 : index
    %c2_45 = arith.constant 2 : index
    %c0_46 = arith.constant 0 : index
    %38 = vector.load %arg8[%c1_44, %c2_45, %c0_46] : memref<18x18x4xbf16, #tpu.memory_space<vmem>>, vector<16x16x4xbf16>
    %39 = vector.shape_cast %38 : vector<16x16x4xbf16> to vector<256x4xbf16>
    %c0_47 = arith.constant 0 : index
    %c20 = arith.constant 20 : index
    %40 = vector.load %arg9[%c0_47, %c20] : memref<256x36xbf16, #tpu.memory_space<vmem>>, vector<256x4xbf16>
    tpu.vector_store %arg9[%c0_47, %c20], %39 {strides = array<i32>} : memref<256x36xbf16, #tpu.memory_space<vmem>>, vector<256x4xbf16>,
    %c2_48 = arith.constant 2 : index
    %c0_49 = arith.constant 0 : index
    %c0_50 = arith.constant 0 : index
    %41 = vector.load %arg8[%c2_48, %c0_49, %c0_50] : memref<18x18x4xbf16, #tpu.memory_space<vmem>>, vector<16x16x4xbf16>
    %42 = vector.shape_cast %41 : vector<16x16x4xbf16> to vector<256x4xbf16>
    %c0_51 = arith.constant 0 : index
    %c24 = arith.constant 24 : index
    %43 = vector.load %arg9[%c0_51, %c24] : memref<256x36xbf16, #tpu.memory_space<vmem>>, vector<256x4xbf16>
    tpu.vector_store %arg9[%c0_51, %c24], %42 {strides = array<i32>} : memref<256x36xbf16, #tpu.memory_space<vmem>>, vector<256x4xbf16>,
    %c2_52 = arith.constant 2 : index
    %c1_53 = arith.constant 1 : index
    %c0_54 = arith.constant 0 : index
    %44 = vector.load %arg8[%c2_52, %c1_53, %c0_54] : memref<18x18x4xbf16, #tpu.memory_space<vmem>>, vector<16x16x4xbf16>
    %45 = vector.shape_cast %44 : vector<16x16x4xbf16> to vector<256x4xbf16>
    %c0_55 = arith.constant 0 : index
    %c28 = arith.constant 28 : index
    %46 = vector.load %arg9[%c0_55, %c28] : memref<256x36xbf16, #tpu.memory_space<vmem>>, vector<256x4xbf16>
    tpu.vector_store %arg9[%c0_55, %c28], %45 {strides = array<i32>} : memref<256x36xbf16, #tpu.memory_space<vmem>>, vector<256x4xbf16>,
    %c2_56 = arith.constant 2 : index
    %c2_57 = arith.constant 2 : index
    %c0_58 = arith.constant 0 : index
    %47 = vector.load %arg8[%c2_56, %c2_57, %c0_58] : memref<18x18x4xbf16, #tpu.memory_space<vmem>>, vector<16x16x4xbf16>
    %48 = vector.shape_cast %47 : vector<16x16x4xbf16> to vector<256x4xbf16>
    %c0_59 = arith.constant 0 : index
    %c32 = arith.constant 32 : index
    %49 = vector.load %arg9[%c0_59, %c32] : memref<256x36xbf16, #tpu.memory_space<vmem>>, vector<256x4xbf16>
    tpu.vector_store %arg9[%c0_59, %c32], %48 {strides = array<i32>} : memref<256x36xbf16, #tpu.memory_space<vmem>>, vector<256x4xbf16>,
    %c0_60 = arith.constant 0 : index
    %c0_61 = arith.constant 0 : index
    %50 = vector.load %arg9[%c0_60, %c0_61] : memref<256x36xbf16, #tpu.memory_space<vmem>>, vector<256x36xbf16>
    %c0_62 = arith.constant 0 : index
    %c0_63 = arith.constant 0 : index
    %51 = vector.load %arg5[%c0_62, %c0_63] : memref<36x8xbf16, #tpu.memory_space<vmem>>, vector<36x8xbf16>
    %cst_64 = arith.constant dense<0.000000e+00> : vector<256x8xf32>
    %52 = tpu.matmul %50, %51, %cst_64 {dimension_numbers = #tpu.dot_dimension_numbers<[1], [0], [0], [1], [0, 0, 1, 1], [], []>} : vector<256x36xbf16>, vector<36x8xbf16>, vector<256x8xf32> -> vector<256x8xf32>
    %53 = vector.shape_cast %52 : vector<256x8xf32> to vector<16x16x8xf32>
    %54 = arith.truncf %53 : vector<16x16x8xf32> to vector<16x16x8xbf16>
    %c0_65 = arith.constant 0 : index
    %c0_66 = arith.constant 0 : index
    %c0_67 = arith.constant 0 : index
    %c0_68 = arith.constant 0 : index
    %55 = vector.load %arg6[%c0_65, %c0_66, %c0_67, %c0_68] : memref<1x16x16x8xbf16, #tpu.memory_space<vmem>>, vector<1x16x16x8xbf16>
    %56 = vector.shape_cast %55 : vector<1x16x16x8xbf16> to vector<16x16x8xbf16>
    %57 = vector.shape_cast %54 : vector<16x16x8xbf16> to vector<1x16x16x8xbf16>
    tpu.vector_store %arg6[%c0_65, %c0_66, %c0_67, %c0_68], %57 {strides = array<i32>} : memref<1x16x16x8xbf16, #tpu.memory_space<vmem>>, vector<1x16x16x8xbf16>,
    %cst_69 = arith.constant dense<0.000000e+00> : vector<8xf32>
    %58 = vector.multi_reduction <add>, %52, %cst_69 [0] : vector<256x8xf32> to vector<8xf32>
    %59 = vector.shape_cast %58 : vector<8xf32> to vector<1x8xf32>
    %60 = arith.addf %21, %59 : vector<1x8xf32>
    %61 = arith.mulf %52, %52 : vector<256x8xf32>
    %cst_70 = arith.constant dense<0.000000e+00> : vector<8xf32>
    %62 = vector.multi_reduction <add>, %61, %cst_70 [0] : vector<256x8xf32> to vector<8xf32>
    %63 = vector.shape_cast %62 : vector<8xf32> to vector<1x8xf32>
    %64 = arith.addf %22, %63 : vector<1x8xf32>
    %c0_71 = arith.constant 0 : index
    %c0_72 = arith.constant 0 : index
    %c0_73 = arith.constant 0 : index
    %65 = vector.load %arg7[%c0_71, %c0_72, %c0_73] : memref<1x2x8xf32, #tpu.memory_space<vmem>>, vector<1x1x8xf32>
    %66 = vector.shape_cast %65 : vector<1x1x8xf32> to vector<1x8xf32>
    %67 = vector.shape_cast %60 : vector<1x8xf32> to vector<1x1x8xf32>
    tpu.vector_store %arg7[%c0_71, %c0_72, %c0_73], %67 {strides = array<i32>} : memref<1x2x8xf32, #tpu.memory_space<vmem>>, vector<1x1x8xf32>,
    %c0_74 = arith.constant 0 : index
    %c1_75 = arith.constant 1 : index
    %c0_76 = arith.constant 0 : index
    %68 = vector.load %arg7[%c0_74, %c1_75, %c0_76] : memref<1x2x8xf32, #tpu.memory_space<vmem>>, vector<1x1x8xf32>
    %69 = vector.shape_cast %68 : vector<1x1x8xf32> to vector<1x8xf32>
    %70 = vector.shape_cast %64 : vector<1x8xf32> to vector<1x1x8xf32>
    tpu.vector_store %arg7[%c0_74, %c1_75, %c0_76], %70 {strides = array<i32>} : memref<1x2x8xf32, #tpu.memory_space<vmem>>, vector<1x1x8xf32>,
    return
  }
  func.func @transform_0(%arg0: i32, %arg1: i32) -> (i32, i32, i32, i32) {
    %c0_i32 = arith.constant 0 : i32
    %c0_i32_0 = arith.constant 0 : i32
    %c0_i32_1 = arith.constant 0 : i32
    %c0_i32_2 = arith.constant 0 : i32
    return %arg0, %c0_i32, %c0_i32_0, %c0_i32_1 : i32, i32, i32, i32
  }
  func.func @transform_1(%arg0: i32, %arg1: i32) -> (i32, i32) {
    %c0_i32 = arith.constant 0 : i32
    %c0_i32_0 = arith.constant 0 : i32
    %c0_i32_1 = arith.constant 0 : i32
    return %c0_i32, %c0_i32_0 : i32, i32
  }
  func.func @transform_2(%arg0: i32, %arg1: i32) -> (i32, i32) {
    %c0_i32 = arith.constant 0 : i32
    %c0_i32_0 = arith.constant 0 : i32
    %c0_i32_1 = arith.constant 0 : i32
    return %c0_i32, %c0_i32_0 : i32, i32
  }
  func.func @transform_3(%arg0: i32, %arg1: i32) -> (i32, i32) {
    %c0_i32 = arith.constant 0 : i32
    %c0_i32_0 = arith.constant 0 : i32
    return %c0_i32, %arg1 : i32, i32
  }
  func.func @transform_4(%arg0: i32, %arg1: i32) -> (i32, i32, i32, i32) {
    %c0_i32 = arith.constant 0 : i32
    %c0_i32_0 = arith.constant 0 : i32
    %c0_i32_1 = arith.constant 0 : i32
    return %arg0, %c0_i32, %c0_i32_0, %arg1 : i32, i32, i32, i32
  }
  func.func @transform_5(%arg0: i32, %arg1: i32) -> (i32, i32, i32) {
    %c0_i32 = arith.constant 0 : i32
    %c0_i32_0 = arith.constant 0 : i32
    return %arg0, %c0_i32, %arg1 : i32, i32, i32
  }
}

module attributes {stable_mosaic.version = 11 : i64} {
  func.func @_bn_relu_kernel(%arg0: i32, %arg1: i32, %arg2: memref<1x16x16x8xbf16, #tpu.memory_space<vmem>>, %arg3: memref<1x8xf32, #tpu.memory_space<vmem>>, %arg4: memref<1x8xf32, #tpu.memory_space<vmem>>, %arg5: memref<1x16x16x8xf32, #tpu.memory_space<vmem>>) attributes {dimension_semantics = [#tpu.dimension_semantics<parallel>, #tpu.dimension_semantics<parallel>], iteration_bounds = array<i64: 2, 1>, scalar_prefetch = 0 : i64, scratch_operands = 0 : i64, tpu.core_type = #tpu.core_type<tc>, window_params = [{transform_indices = @transform_0, window_bounds = array<i64: 1, 16, 16, 8>}, {pipeline_mode = #tpu.pipeline_mode<synchronous>, transform_indices = @transform_1, window_bounds = array<i64: 1, 8>}, {pipeline_mode = #tpu.pipeline_mode<synchronous>, transform_indices = @transform_2, window_bounds = array<i64: 1, 8>}, {transform_indices = @transform_3, window_bounds = array<i64: 1, 16, 16, 8>}]} {
    %c0 = arith.constant 0 : index
    %c0_0 = arith.constant 0 : index
    %c0_1 = arith.constant 0 : index
    %c0_2 = arith.constant 0 : index
    %0 = vector.load %arg2[%c0, %c0_0, %c0_1, %c0_2] : memref<1x16x16x8xbf16, #tpu.memory_space<vmem>>, vector<1x16x16x8xbf16>
    %1 = arith.extf %0 : vector<1x16x16x8xbf16> to vector<1x16x16x8xf32>
    %c0_3 = arith.constant 0 : index
    %c0_4 = arith.constant 0 : index
    %2 = vector.load %arg3[%c0_3, %c0_4] : memref<1x8xf32, #tpu.memory_space<vmem>>, vector<1x8xf32>
    %3 = vector.shape_cast %2 : vector<1x8xf32> to vector<1x1x1x8xf32>
    %4 = vector.broadcast %3 : vector<1x1x1x8xf32> to vector<1x16x16x8xf32>
    %5 = arith.mulf %1, %4 : vector<1x16x16x8xf32>
    %c0_5 = arith.constant 0 : index
    %c0_6 = arith.constant 0 : index
    %6 = vector.load %arg4[%c0_5, %c0_6] : memref<1x8xf32, #tpu.memory_space<vmem>>, vector<1x8xf32>
    %7 = vector.shape_cast %6 : vector<1x8xf32> to vector<1x1x1x8xf32>
    %8 = vector.broadcast %7 : vector<1x1x1x8xf32> to vector<1x16x16x8xf32>
    %9 = arith.addf %5, %8 : vector<1x16x16x8xf32>
    %cst = arith.constant 0.000000e+00 : f32
    %10 = vector.broadcast %cst : f32 to vector<1x16x16x8xf32>
    %11 = arith.maximumf %9, %10 : vector<1x16x16x8xf32>
    %c0_7 = arith.constant 0 : index
    %c0_8 = arith.constant 0 : index
    %c0_9 = arith.constant 0 : index
    %c0_10 = arith.constant 0 : index
    %12 = vector.load %arg5[%c0_7, %c0_8, %c0_9, %c0_10] : memref<1x16x16x8xf32, #tpu.memory_space<vmem>>, vector<1x16x16x8xf32>
    tpu.vector_store %arg5[%c0_7, %c0_8, %c0_9, %c0_10], %11 {strides = array<i32>} : memref<1x16x16x8xf32, #tpu.memory_space<vmem>>, vector<1x16x16x8xf32>,
    return
  }
  func.func @transform_0(%arg0: i32, %arg1: i32) -> (i32, i32, i32, i32) {
    %c0_i32 = arith.constant 0 : i32
    %c0_i32_0 = arith.constant 0 : i32
    %c0_i32_1 = arith.constant 0 : i32
    return %arg0, %arg1, %c0_i32, %c0_i32_0 : i32, i32, i32, i32
  }
  func.func @transform_1(%arg0: i32, %arg1: i32) -> (i32, i32) {
    %c0_i32 = arith.constant 0 : i32
    %c0_i32_0 = arith.constant 0 : i32
    %c0_i32_1 = arith.constant 0 : i32
    return %c0_i32, %c0_i32_0 : i32, i32
  }
  func.func @transform_2(%arg0: i32, %arg1: i32) -> (i32, i32) {
    %c0_i32 = arith.constant 0 : i32
    %c0_i32_0 = arith.constant 0 : i32
    %c0_i32_1 = arith.constant 0 : i32
    return %c0_i32, %c0_i32_0 : i32, i32
  }
  func.func @transform_3(%arg0: i32, %arg1: i32) -> (i32, i32, i32, i32) {
    %c0_i32 = arith.constant 0 : i32
    %c0_i32_0 = arith.constant 0 : i32
    %c0_i32_1 = arith.constant 0 : i32
    return %arg0, %arg1, %c0_i32, %c0_i32_0 : i32, i32, i32, i32
  }
}

</mosaic_0001>

<bundles_post_ra>
// kernel: up_forward.5
= control target key start
LH: loop header
LB: loop body
LE: loop exit
PB: predicated region body
PF: predicated region fallthrough
CT: control target
= control target key end

     0   :  { %s680_s12 = smov 0   ;;  %s682_s13 = smov 0   ;;  %s875_s0 = inlined_call_operand.vmem [shape: bf16[2,16,16,8], index: 0, kind: input, shape index: {}]   ;;  %s876_s1 = inlined_call_operand.vmem [shape: f32[1,8], index: 1, kind: input, shape index: {}]   ;;  %s877_s2 = inlined_call_operand.vmem [shape: f32[1,8], index: 2, kind: input, shape index: {}]   ;;  %s878_s3 = inlined_call_operand.vmem [shape: f32[2,16,16,8], index: 3, kind: output, shape index: {}]  }
   0x1   :  { %s684_s14 = smov 0  }
   0x2 LB: > { %s25_s15 = sadd.s32 1, %s654_s13  ;;  %p522_p0 = scmp.ge.s32.totalorder %s658_s14, 1  ;;  %s658_s14 = sphi %s684_s14, %s13_s14   ;;  %s654_s13 = sphi %s682_s13, %s880_s13   ;;  %s650_s12 = sphi %s680_s12, %s879_s12  }
   0x3   : > { %p27_p1 = scmp.ge.s32.totalorder %s25_s15, 2  ;;  %p159_p2 = scmp.lt.s32.totalorder %s658_s14, 3 }
   0x5   : > { %s882_s15 = smov (%p27_p1, %s25_s15), 0  ;;  %p160_p3 = pnand %p522_p0, %p159_p2 }
   0x6   : > { %p194_p4 = scmp.lt.s32.totalorder (!%p160_p3), %s650_s12, 1  ;;  %v709_v0 = vld [vmem:[%s876_s1] ss:$0 sm:$0xff] (!%p160_p3)  ;;  %vm389_vm0 = vcmask (!%p160_p3), 64512  }
   0x7   : > { %163 = sbr.rel (%p160_p3) target bundleno = 54 (0x36), region = 32  ;;  %v718_v9 = vld [vmem:[%s877_s2] ss:$0 sm:$0xff] (!%p160_p3) }
   0xe   : > { %s884_s12 = smov (!%p194_p4, %s650_s12), 1 }
   0xf   : > { %s531_s16 = sshll.u32 %s884_s12, 7  ;;  %s532_s24 = sshll.u32 %s884_s12, 8 }
  0x10   : > { %s704_s19 = scalar_lea.vmem %s875_s0, %s531_s16  ;;  %s736_s27 = scalar_lea.vmem %s878_s3, %s532_s24 }
  0x11   : > { %v534_v1 = vld [vmem:[%s704_s19] sm:$0xff]   ;;  %v597_v2 = vld [vmem:[%s704_s19 + $0x8] sm:$0xff]   ;;  %v598_v3 = vld [vmem:[%s704_s19 + $0x10] sm:$0xff]  }
  0x12   : > { %v535_v4 = vunpack.c.l.bf16 %v534_v1  ;;  %v536_v5 = vunpack.c.h.bf16 %v534_v1  ;;  %v539_v6 = vunpack.c.l.bf16 %v597_v2  ;;  %v540_v7 = vunpack.c.h.bf16 %v597_v2  ;;  %v599_v8 = vld [vmem:[%s704_s19 + $0x18] sm:$0xff]   ;;  %v600_v30 = vld [vmem:[%s704_s19 + $0x20] sm:$0xff]   ;;  %v601_v31 = vld [vmem:[%s704_s19 + $0x28] sm:$0xff]  }
  0x13   : > { %v543_v10 = vunpack.c.l.bf16 %v598_v3  ;;  %v544_v11 = vunpack.c.h.bf16 %v598_v3  ;;  %v547_v12 = vunpack.c.l.bf16 %v599_v8  ;;  %v548_v13 = vunpack.c.h.bf16 %v599_v8  ;;  %v602_v36 = vld [vmem:[%s704_s19 + $0x30] sm:$0xff]   ;;  %v603_v37 = vld [vmem:[%s704_s19 + $0x38] sm:$0xff]   ;;  %v604_v3 = vld [vmem:[%s704_s19 + $0x40] sm:$0xff]  }
  0x14   : > { %v286_v14 = vmul.f32 %v535_v4, %v709_v0  ;;  %v287_v15 = vmul.f32 %v536_v5, %v709_v0  ;;  %v288_v16 = vmul.f32 %v539_v6, %v709_v0  ;;  %v289_v17 = vmul.f32 %v540_v7, %v709_v0  ;;  %v605_v4 = vld [vmem:[%s704_s19 + $0x48] sm:$0xff]  }
  0x15   : > { %v290_v18 = vmul.f32 %v543_v10, %v709_v0  ;;  %v291_v19 = vmul.f32 %v544_v11, %v709_v0  ;;  %v292_v20 = vmul.f32 %v547_v12, %v709_v0  ;;  %v293_v21 = vmul.f32 %v548_v13, %v709_v0  ;;  %v606_v10 = vld [vmem:[%s704_s19 + $0x50] sm:$0xff]   ;;  %v607_v11 = vld [vmem:[%s704_s19 + $0x58] sm:$0xff]  }
  0x16   : > { %v325_v22 = vadd.f32 %v718_v9, %v286_v14  ;;  %v326_v23 = vadd.f32 %v718_v9, %v287_v15  ;;  %v327_v24 = vadd.f32 %v718_v9, %v288_v16  ;;  %v328_v25 = vadd.f32 %v718_v9, %v289_v17 }
  0x17   : > { %v329_v26 = vadd.f32 %v718_v9, %v290_v18  ;;  %v330_v27 = vadd.f32 %v718_v9, %v291_v19  ;;  %v331_v28 = vadd.f32 %v718_v9, %v292_v20  ;;  %v332_v29 = vadd.f32 %v718_v9, %v293_v21 }
  0x18   : > { %v357_v32 = vmax.f32 %v325_v22, 0.0  ;;  %v358_v33 = vmax.f32 %v326_v23, 0.0  ;;  %v359_v34 = vmax.f32 %v327_v24, 0.0  ;;  %v360_v35 = vmax.f32 %v328_v25, 0.0 }
  0x19   : > { %v361_v38 = vmax.f32 %v329_v26, 0.0  ;;  %v362_v39 = vmax.f32 %v330_v27, 0.0  ;;  %v363_v40 = vmax.f32 %v331_v28, 0.0  ;;  %v364_v41 = vmax.f32 %v332_v29, 0.0 }
  0x1a   : > { %390 = vst.msk [vmem:[%s736_s27] sm:$0xff] %vm389_vm0, %v357_v32  ;;  %391 = vst.msk [vmem:[%s736_s27 + $0x8] sm:$0xff] %vm389_vm0, %v358_v33  ;;  %v551_v42 = vunpack.c.l.bf16 %v600_v30  ;;  %v552_v43 = vunpack.c.h.bf16 %v600_v30  ;;  %v555_v44 = vunpack.c.l.bf16 %v601_v31  ;;  %v556_v45 = vunpack.c.h.bf16 %v601_v31 }
  0x1b   : > { %392 = vst.msk [vmem:[%s736_s27 + $0x10] sm:$0xff] %vm389_vm0, %v359_v34  ;;  %393 = vst.msk [vmem:[%s736_s27 + $0x18] sm:$0xff] %vm389_vm0, %v360_v35  ;;  %v559_v46 = vunpack.c.l.bf16 %v602_v36  ;;  %v560_v47 = vunpack.c.h.bf16 %v602_v36  ;;  %v563_v48 = vunpack.c.l.bf16 %v603_v37  ;;  %v564_v49 = vunpack.c.h.bf16 %v603_v37 }
  0x1c   : > { %394 = vst.msk [vmem:[%s736_s27 + $0x20] sm:$0xff] %vm389_vm0, %v361_v38  ;;  %395 = vst.msk [vmem:[%s736_s27 + $0x28] sm:$0xff] %vm389_vm0, %v362_v39  ;;  %v294_v50 = vmul.f32 %v551_v42, %v709_v0  ;;  %v295_v51 = vmul.f32 %v552_v43, %v709_v0  ;;  %v296_v52 = vmul.f32 %v555_v44, %v709_v0  ;;  %v567_v16 = vunpack.c.l.bf16 %v604_v3 }
  0x1d   : > { %396 = vst.msk [vmem:[%s736_s27 + $0x30] sm:$0xff] %vm389_vm0, %v363_v40  ;;  %397 = vst.msk [vmem:[%s736_s27 + $0x38] sm:$0xff] %vm389_vm0, %v364_v41  ;;  %v297_v53 = vmul.f32 %v556_v45, %v709_v0  ;;  %v298_v54 = vmul.f32 %v559_v46, %v709_v0  ;;  %v299_v55 = vmul.f32 %v560_v47, %v709_v0  ;;  %v568_v17 = vunpack.c.h.bf16 %v604_v3  ;;  %v608_v40 = vld [vmem:[%s704_s19 + $0x60] sm:$0xff]   ;;  %v609_v41 = vld [vmem:[%s704_s19 + $0x68] sm:$0xff]  }
  0x1e   : > { %v300_v56 = vmul.f32 %v563_v48, %v709_v0  ;;  %v301_v57 = vmul.f32 %v564_v49, %v709_v0  ;;  %v333_v58 = vadd.f32 %v718_v9, %v294_v50  ;;  %v334_v59 = vadd.f32 %v718_v9, %v295_v51  ;;  %v610_v46 = vld [vmem:[%s704_s19 + $0x70] sm:$0xff]   ;;  %v611_v47 = vld [vmem:[%s704_s19 + $0x78] sm:$0xff]  }
  0x1f   : > { %v335_v60 = vadd.f32 %v718_v9, %v296_v52  ;;  %v336_v61 = vadd.f32 %v718_v9, %v297_v53  ;;  %v337_v62 = vadd.f32 %v718_v9, %v298_v54  ;;  %v338_v63 = vadd.f32 %v718_v9, %v299_v55 }
  0x20   : > { %v339_v1 = vadd.f32 %v718_v9, %v300_v56  ;;  %v340_v2 = vadd.f32 %v718_v9, %v301_v57  ;;  %v365_v5 = vmax.f32 %v333_v58, 0.0  ;;  %v366_v6 = vmax.f32 %v334_v59, 0.0 }
  0x21   : > { %v367_v7 = vmax.f32 %v335_v60, 0.0  ;;  %v368_v8 = vmax.f32 %v336_v61, 0.0  ;;  %v369_v12 = vmax.f32 %v337_v62, 0.0  ;;  %v370_v13 = vmax.f32 %v338_v63, 0.0 }
  0x22   : > { %v371_v14 = vmax.f32 %v339_v1, 0.0  ;;  %v372_v15 = vmax.f32 %v340_v2, 0.0  ;;  %398 = vst.msk [vmem:[%s736_s27 + $0x40] sm:$0xff] %vm389_vm0, %v365_v5  ;;  %399 = vst.msk [vmem:[%s736_s27 + $0x48] sm:$0xff] %vm389_vm0, %v366_v6  ;;  %v571_v18 = vunpack.c.l.bf16 %v605_v4  ;;  %v572_v19 = vunpack.c.h.bf16 %v605_v4 }
  0x23   : > { %400 = vst.msk [vmem:[%s736_s27 + $0x50] sm:$0xff] %vm389_vm0, %v367_v7  ;;  %401 = vst.msk [vmem:[%s736_s27 + $0x58] sm:$0xff] %vm389_vm0, %v368_v8  ;;  %v575_v20 = vunpack.c.l.bf16 %v606_v10  ;;  %v576_v21 = vunpack.c.h.bf16 %v606_v10  ;;  %v579_v22 = vunpack.c.l.bf16 %v607_v11  ;;  %v580_v23 = vunpack.c.h.bf16 %v607_v11 }
  0x24   : > { %402 = vst.msk [vmem:[%s736_s27 + $0x60] sm:$0xff] %vm389_vm0, %v369_v12  ;;  %403 = vst.msk [vmem:[%s736_s27 + $0x68] sm:$0xff] %vm389_vm0, %v370_v13  ;;  %v302_v24 = vmul.f32 %v567_v16, %v709_v0  ;;  %v303_v25 = vmul.f32 %v568_v17, %v709_v0  ;;  %v304_v26 = vmul.f32 %v571_v18, %v709_v0  ;;  %v583_v52 = vunpack.c.l.bf16 %v608_v40 }
  0x25   : > { %404 = vst.msk [vmem:[%s736_s27 + $0x70] sm:$0xff] %vm389_vm0, %v371_v14  ;;  %405 = vst.msk [vmem:[%s736_s27 + $0x78] sm:$0xff] %vm389_vm0, %v372_v15  ;;  %v305_v27 = vmul.f32 %v572_v19, %v709_v0  ;;  %v306_v28 = vmul.f32 %v575_v20, %v709_v0  ;;  %v307_v29 = vmul.f32 %v576_v21, %v709_v0  ;;  %v584_v53 = vunpack.c.h.bf16 %v608_v40 }
  0x26   : > { %v308_v30 = vmul.f32 %v579_v22, %v709_v0  ;;  %v309_v31 = vmul.f32 %v580_v23, %v709_v0  ;;  %v341_v32 = vadd.f32 %v718_v9, %v302_v24  ;;  %v342_v33 = vadd.f32 %v718_v9, %v303_v25 }
  0x27   : > { %v343_v34 = vadd.f32 %v718_v9, %v304_v26  ;;  %v344_v35 = vadd.f32 %v718_v9, %v305_v27  ;;  %v345_v36 = vadd.f32 %v718_v9, %v306_v28  ;;  %v346_v37 = vadd.f32 %v718_v9, %v307_v29 }
  0x28   : > { %v347_v38 = vadd.f32 %v718_v9, %v308_v30  ;;  %v348_v39 = vadd.f32 %v718_v9, %v309_v31  ;;  %v373_v42 = vmax.f32 %v341_v32, 0.0  ;;  %v374_v43 = vmax.f32 %v342_v33, 0.0 }
  0x29   : > { %v375_v44 = vmax.f32 %v343_v34, 0.0  ;;  %v376_v45 = vmax.f32 %v344_v35, 0.0  ;;  %v377_v48 = vmax.f32 %v345_v36, 0.0  ;;  %v378_v49 = vmax.f32 %v346_v37, 0.0 }
  0x2a   : > { %v379_v50 = vmax.f32 %v347_v38, 0.0  ;;  %v380_v51 = vmax.f32 %v348_v39, 0.0  ;;  %406 = vst.msk [vmem:[%s736_s27 + $0x80] sm:$0xff] %vm389_vm0, %v373_v42  ;;  %407 = vst.msk [vmem:[%s736_s27 + $0x88] sm:$0xff] %vm389_vm0, %v374_v43  ;;  %v587_v54 = vunpack.c.l.bf16 %v609_v41  ;;  %v588_v55 = vunpack.c.h.bf16 %v609_v41 }
  0x2b   : > { %408 = vst.msk [vmem:[%s736_s27 + $0x90] sm:$0xff] %vm389_vm0, %v375_v44  ;;  %409 = vst.msk [vmem:[%s736_s27 + $0x98] sm:$0xff] %vm389_vm0, %v376_v45  ;;  %v591_v56 = vunpack.c.l.bf16 %v610_v46  ;;  %v592_v57 = vunpack.c.h.bf16 %v610_v46  ;;  %v595_v58 = vunpack.c.l.bf16 %v611_v47  ;;  %v596_v59 = vunpack.c.h.bf16 %v611_v47 }
  0x2c   : > { %410 = vst.msk [vmem:[%s736_s27 + $0xa0] sm:$0xff] %vm389_vm0, %v377_v48  ;;  %411 = vst.msk [vmem:[%s736_s27 + $0xa8] sm:$0xff] %vm389_vm0, %v378_v49  ;;  %v310_v60 = vmul.f32 %v583_v52, %v709_v0  ;;  %v311_v61 = vmul.f32 %v584_v53, %v709_v0  ;;  %v312_v62 = vmul.f32 %v587_v54, %v709_v0 }
  0x2d   : > { %412 = vst.msk [vmem:[%s736_s27 + $0xb0] sm:$0xff] %vm389_vm0, %v379_v50  ;;  %413 = vst.msk [vmem:[%s736_s27 + $0xb8] sm:$0xff] %vm389_vm0, %v380_v51  ;;  %v313_v63 = vmul.f32 %v588_v55, %v709_v0  ;;  %v314_v1 = vmul.f32 %v591_v56, %v709_v0  ;;  %v315_v2 = vmul.f32 %v592_v57, %v709_v0 }
  0x2e   : > { %v316_v3 = vmul.f32 %v595_v58, %v709_v0  ;;  %v317_v4 = vmul.f32 %v596_v59, %v709_v0  ;;  %v349_v5 = vadd.f32 %v718_v9, %v310_v60  ;;  %v350_v6 = vadd.f32 %v718_v9, %v311_v61 }
  0x2f   : > { %v351_v7 = vadd.f32 %v718_v9, %v312_v62  ;;  %v352_v8 = vadd.f32 %v718_v9, %v313_v63  ;;  %v353_v10 = vadd.f32 %v718_v9, %v314_v1  ;;  %v354_v11 = vadd.f32 %v718_v9, %v315_v2 }
  0x30   : > { %v355_v0 = vadd.f32 %v718_v9, %v316_v3  ;;  %v356_v12 = vadd.f32 %v718_v9, %v317_v4  ;;  %v381_v13 = vmax.f32 %v349_v5, 0.0  ;;  %v382_v14 = vmax.f32 %v350_v6, 0.0 }
  0x31   : > { %v383_v15 = vmax.f32 %v351_v7, 0.0  ;;  %v384_v16 = vmax.f32 %v352_v8, 0.0  ;;  %v385_v17 = vmax.f32 %v353_v10, 0.0  ;;  %v386_v18 = vmax.f32 %v354_v11, 0.0 }
  0x32   : > { %v387_v19 = vmax.f32 %v355_v0, 0.0  ;;  %v388_v20 = vmax.f32 %v356_v12, 0.0  ;;  %414 = vst.msk [vmem:[%s736_s27 + $0xc0] sm:$0xff] %vm389_vm0, %v381_v13  ;;  %415 = vst.msk [vmem:[%s736_s27 + $0xc8] sm:$0xff] %vm389_vm0, %v382_v14 }
  0x33   : > { %416 = vst.msk [vmem:[%s736_s27 + $0xd0] sm:$0xff] %vm389_vm0, %v383_v15  ;;  %417 = vst.msk [vmem:[%s736_s27 + $0xd8] sm:$0xff] %vm389_vm0, %v384_v16 }
  0x34   : > { %418 = vst.msk [vmem:[%s736_s27 + $0xe0] sm:$0xff] %vm389_vm0, %v385_v17  ;;  %419 = vst.msk [vmem:[%s736_s27 + $0xe8] sm:$0xff] %vm389_vm0, %v386_v18 }
  0x35   : > { %420 = vst.msk [vmem:[%s736_s27 + $0xf0] sm:$0xff] %vm389_vm0, %v387_v19  ;;  %421 = vst.msk [vmem:[%s736_s27 + $0xf8] sm:$0xff] %vm389_vm0, %v388_v20 }
  0x36 PF: > { %s13_s14 = sadd.s32 1, %s658_s14   ;;  %s879_s12 = smov %s654_s13 }
  0x37   : > { %p10_p5 = scmp.ge.s32.totalorder %s13_s14, 4   ;;  %s880_s13 = smov %s882_s15 }
  0x39   :  { %12 = sbr.rel (!%p10_p5) target bundleno = 2 (0x2), region = 62 }

// kernel: up_forward.4
= control target key start
LH: loop header
LB: loop body
LE: loop exit
PB: predicated region body
PF: predicated region fallthrough
CT: control target
= control target key end

     0   :  { %s5589_s18 = smov 0   ;;  %s5591_s19 = smov 0   ;;  %s7207_s0 = inlined_call_operand.vmem [shape: bf16[2,16,16,4], index: 0, kind: input, shape index: {}]   ;;  %s7208_s1 = inlined_call_operand.vmem [shape: f32[1,4], index: 1, kind: input, shape index: {}]   ;;  %s7209_s2 = inlined_call_operand.vmem [shape: f32[1,4], index: 2, kind: input, shape index: {}]   ;;  %s7210_s3 = inlined_call_operand.vmem [shape: bf16[36,8], index: 3, kind: input, shape index: {}]   ;;  %s7211_s4 = inlined_call_operand.vmem [shape: bf16[2,16,16,8], index: 4, kind: output, shape index: {0}]   ;;  %s7212_s5 = inlined_call_operand.vmem [shape: f32[2,2,8], index: 5, kind: output, shape index: {1}]  }
   0x1   :  { %s5593_s20 = smov 0  }
   0x2 LB: > { %s28_s21 = sadd.s32 1, %s5544_s19  ;;  %p4941_p0 = scmp.ge.s32.totalorder %s5548_s20, 1  ;;  %s5548_s20 = sphi %s5593_s20, %s16_s20   ;;  %s5544_s19 = sphi %s5591_s19, %s7244_s19   ;;  %s5540_s18 = sphi %s5589_s18, %s7243_s18  }
   0x3   : > { %p30_p1 = scmp.ge.s32.totalorder %s28_s21, 2  ;;  %p215_p2 = scmp.lt.s32.totalorder %s5548_s20, 3 }
   0x5   : > { %s7246_s21 = smov (%p30_p1, %s28_s21), 0  ;;  %p216_p3 = pnand %p4941_p0, %p215_p2 }
   0x6   : > { %vm282_vm0 = vcmask (!%p216_p3), 27648   ;;  %vm285_vm1 = vcmask (!%p216_p3), 24576   ;;  %vm292_vm2 = vsmask.f32 (!%p216_p3), 256  ;;  %v5550_v0 = vmov (!%p216_p3), 0   ;;  %p257_p4 = scmp.lt.s32.totalorder (!%p216_p3), %s5540_s18, 1 }
   0x7   : > { %219 = sbr.rel (%p216_p3) target bundleno = 792 (0x318), region = 36  ;;  %283 = vst.msk [vmem:[#allocation2] sm:$0xf] (!%p216_p3), %vm282_vm0, %v5550_v0  ;;  %284 = vst.msk [vmem:[#allocation2 + $0x4] sm:$0xf] (!%p216_p3), %vm282_vm0, %v5550_v0  ;;  %vm1900_vm5 = vcmask (!%p216_p3), 1042432  }
   0x8   : > { %286 = vst.msk [vmem:[#allocation2 + $0x8] sm:$0x1] (!%p216_p3), %vm285_vm1, %v5550_v0  ;;  %290 = vst.msk [vmem:[#allocation2 + $0xd4] sm:$0x1] (!%p216_p3), %vm285_vm1, %v5550_v0  ;;  %v300_v2 = vld [vmem:[#allocation2 + $0x18] sm:$0x1] (!%p216_p3) }
   0x9   : > { %288 = vst.msk [vmem:[#allocation2 + $0xcc] sm:$0xf] (!%p216_p3), %vm282_vm0, %v5550_v0  ;;  %289 = vst.msk [vmem:[#allocation2 + $0xd0] sm:$0xf] (!%p216_p3), %vm282_vm0, %v5550_v0  ;;  %vm348_vm4 = vsmask.f32 (!%p216_p3), 7938 }
   0xa   : > { %vm5615_vm3 = vmand (!%p216_p3), %vm285_vm1, %vm292_vm2  ;;  %vm1901_vm6 = vcmask (!%p216_p3), 1046532   ;;  %v297_v4 = vld [vmem:[#allocation2 + $0xc] sm:$0x1] (!%p216_p3)  ;;  %v303_v6 = vld [vmem:[#allocation2 + $0x24] sm:$0x1] (!%p216_p3)  ;;  %s5551_s30 = smov (!%p216_p3), 8  }
   0xb   : > { %v301_v3 = vsel (!%p216_p3), %vm5615_vm3, 0, %v300_v2  ;;  %v298_v5 = vsel (!%p216_p3), %vm5615_vm3, 0, %v297_v4  ;;  %v306_v7 = vld [vmem:[#allocation2 + $0x30] sm:$0x1] (!%p216_p3)  ;;  %vm5627_vm7 = vmand (!%p216_p3), %vm285_vm1, %vm348_vm4  ;;  %v304_v9 = vsel (!%p216_p3), %vm5615_vm3, 0, %v303_v6  ;;  %s5552_s6 = smov (!%p216_p3), 4  }
   0xc   : > { %302 = vst [vmem:[#allocation2 + $0x18] sm:$0x1] (!%p216_p3), %v301_v3  ;;  %299 = vst [vmem:[#allocation2 + $0xc] sm:$0x1] (!%p216_p3), %v298_v5  ;;  %v307_v10 = vsel (!%p216_p3), %vm5615_vm3, 0, %v306_v7  ;;  %s5553_s7 = smov (!%p216_p3), 12  }
   0xd   : > { %v353_v11 = vld [vmem:[#allocation2 + $0x14] sm:$0x1] (!%p216_p3)  ;;  %vm5636_vm8 = vmor (!%p216_p3), %vm1900_vm5, %vm1901_vm6  ;;  %v5650_v13 = vld [vmem:[%s7208_s1] ss:$0 sm:$0xff] (!%p216_p3)  ;;  %305 = vst [vmem:[#allocation2 + $0x24] sm:$0x1] (!%p216_p3), %v304_v9 }
   0xe   : > { %s7248_s18 = smov (!%p257_p4, %s5540_s18), 1  ;;  %308 = vst [vmem:[#allocation2 + $0x30] sm:$0x1] %v307_v10  ;;  %v354_v14 = vsel %vm5627_vm7, 0, %v353_v11  ;;  %v356_v15 = vld [vmem:[#allocation2 + $0x20] sm:$0x1]  ;;  %vm5702_vm13 = vmand %vm282_vm0, %vm348_vm4 }
   0xf   : > { %s5226_s22 = sshll.u32 %s7248_s18, 7  ;;  %v350_v16 = vld [vmem:[#allocation2 + $0x8] sm:$0x1]  ;;  %v1804_v17 = vld [vmem:[#allocation2] sm:$0xe]  ;;  %v357_v30 = vsel %vm5627_vm7, 0, %v356_v15 }
  0x10   : > { %s5645_s25 = scalar_lea.vmem %s7207_s0, %s5226_s22  ;;  %v1805_v18 = vld [vmem:[#allocation2 + $0x4] sm:$0xf]  ;;  %vm1304_vm9 = vsmask.f32 3328  ;;  %vm1305_vm10 = vsmask.f32 7440 }
  0x11   : > { %355 = vst [vmem:[#allocation2 + $0x14] sm:$0x1] %v354_v14  ;;  %v351_v19 = vsel %vm5627_vm7, 0, %v350_v16  ;;  %v5013_v20 = vrot.slane %v1804_v17, 9  ;;  %v1905_v21 = vrot.slane %v1805_v18, 5  ;;  %v5356_v23 = vld [vmem:[%s5645_s25 + $0x8] sm:$0xff]   ;;  %vm5692_vm12 = vmor %vm1304_vm9, %vm1305_vm10 }
  0x12   : > { %v294_v22 = vld [vmem:[#allocation2] sm:$0x1]  ;;  %352 = vst [vmem:[#allocation2 + $0x8] sm:$0x1] %v351_v19  ;;  %v1257_v25 = vld [vmem:[#allocation2 + $0x4] sm:$0xf]  ;;  %v5298_v26 = vunpack.c.l.bf16 %v5356_v23  ;;  %v5299_v27 = vunpack.c.h.bf16 %v5356_v23 }
  0x13   : > { %v295_v24 = vsel %vm5615_vm3, 0, %v294_v22  ;;  %v5293_v28 = vld [vmem:[%s5645_s25] sm:$0xff]   ;;  %v5357_v29 = vld [vmem:[%s5645_s25 + $0x10] sm:$0xff]   ;;  %v1906_v31 = vsel %vm5636_vm8, %v5013_v20, %v1905_v21  ;;  %v1907_v32 = vrot.slane %v1905_v21, 4  ;;  %v1317_v33 = vshll.u32 %v1257_v25, 16  ;;  %v5673_v40 = vld [vmem:[%s5645_s25 + $0x18] sm:$0xff]  }
  0x14   : > { %296 = vst [vmem:[#allocation2] sm:$0x1] %v295_v24  ;;  %v1321_v34 = vshrl.u32 %v1257_v25, 16  ;;  %v5668_v35 = vld [vmem:[%s7209_s2] ss:$0 sm:$0xff]  ;;  %v477_v36 = vmul.f32 %v5298_v26, %v5650_v13  ;;  %v478_v37 = vmul.f32 %v5299_v27, %v5650_v13  ;;  %v5294_v38 = vunpack.c.l.bf16 %v5293_v28  ;;  %s5554_s8 = smov 24  }
  0x15   : > { %358 = vst [vmem:[#allocation2 + $0x20] sm:$0x1] %v357_v30  ;;  %v5295_v39 = vunpack.c.h.bf16 %v5293_v28  ;;  %v5675_v41 = vrot.slane %v1317_v33, 5  ;;  %vm674_vm11 = vsmask.f32 4368  ;;  %v5302_v43 = vunpack.c.l.bf16 %v5357_v29  ;;  %s5555_s9 = smov 20  }
  0x16   : > { %v1323_v42 = vrot.slane %v1321_v34, 4  ;;  %v5303_v44 = vunpack.c.h.bf16 %v5357_v29  ;;  %v516_v45 = vadd.f32 %v5668_v35, %v477_v36  ;;  %v517_v46 = vadd.f32 %v5668_v35, %v478_v37  ;;  %v1006_v21 = vld [vmem:[#allocation2 + $0x18] sm:$0xf]  ;;  %vm5709_vm14 = vmor %vm292_vm2, %vm674_vm11  ;;  %s5556_s10 = smov 32   ;;  %s5557_s11 = smov 16  }
  0x17   : > { %v475_v47 = vmul.f32 %v5294_v38, %v5650_v13  ;;  %v476_v48 = vmul.f32 %v5295_v39, %v5650_v13  ;;  %v479_v50 = vmul.f32 %v5302_v43, %v5650_v13  ;;  %v5306_v52 = vunpack.c.l.bf16 %v5673_v40  ;;  %s5558_s12 = smov 28  }
  0x18   : > { %v1324_v49 = vor.u32 %v1323_v42, %v5675_v41  ;;  %v480_v51 = vmul.f32 %v5303_v44, %v5650_v13  ;;  %v548_v53 = vmax.f32 %v516_v45, 0.0  ;;  %v549_v54 = vmax.f32 %v517_v46, 0.0 }
  0x19   : > { %v514_v55 = vadd.f32 %v5668_v35, %v475_v47  ;;  %v515_v56 = vadd.f32 %v5668_v35, %v476_v48  ;;  %v1806_v57 = vld [vmem:[#allocation2 + $0x8] sm:$0x1]  ;;  %v518_v60 = vadd.f32 %v5668_v35, %v479_v50  ;;  %v5307_v62 = vunpack.c.h.bf16 %v5673_v40  ;;  %v999_v50 = vld [vmem:[#allocation2 + $0xc] sm:$0xf] }
  0x1a   : > { %v1258_v58 = vld [vmem:[#allocation2 + $0x8] sm:$0x1]  ;;  %v1325_v59 = vrot.slane %v1324_v49, 4  ;;  %v519_v61 = vadd.f32 %v5668_v35, %v480_v51  ;;  %v1908_v63 = vrot.slane %v1806_v57, 5  ;;  %v5230_v3 = vpack.c.bf16 %v548_v53, %v548_v53  ;;  %v1003_v57 = vld [vmem:[#allocation2 + $0x14] sm:$0x1] }
  0x1b   : > { %v1256_v0 = vld [vmem:[#allocation2] sm:$0xf]  ;;  %v1327_v2 = vshll.u32 %v1258_v58, 16  ;;  %v5231_v4 = vpack.c.bf16 %v549_v54, %v549_v54  ;;  %v546_v9 = vmax.f32 %v514_v55, 0.0  ;;  %v547_v10 = vmax.f32 %v515_v56, 0.0  ;;  %v5744_v40 = vld [vmem:[%s5645_s25 + $0x28] sm:$0xff]  }
  0x1c   : > { %v1308_v6 = vshrl.u32 %v1256_v0, 16  ;;  %v1311_v7 = vshll.u32 %v1256_v0, 16  ;;  %v1909_v11 = vsel %vm5636_vm8, %v1907_v32, %v1908_v63  ;;  %v694_v15 = vshrl.u32 %v5230_v3, 16  ;;  %v359_v58 = vld [vmem:[#allocation2 + $0x2c] sm:$0x1] }
  0x1d   : > { %v1329_v14 = vrot.slane %v1327_v2, 5  ;;  %v697_v16 = vshll.u32 %v5230_v3, 16  ;;  %v5029_v17 = vcombine.low %v1906_v31, %v1909_v11  ;;  %v702_v20 = vshrl.u32 %v5231_v4, 16  ;;  %v1010_v63 = vld [vmem:[#allocation2 + $0x20] sm:$0x1] }
  0x1e   : > { %v1310_v18 = vrot.slane %v1308_v6, 4  ;;  %v1313_v19 = vrot.slane %v1311_v7, 5  ;;  %v696_v23 = vrot.slane %v694_v15, 7  ;;  %v705_v24 = vshll.u32 %v5231_v4, 16  ;;  %v362_v6 = vld [vmem:[#allocation2 + $0x38] sm:$0x1] }
  0x1f   : > { %v1330_v22 = vsel %vm5692_vm12, %v1325_v59, %v1329_v14  ;;  %v5228_v25 = vpack.c.bf16 %v546_v9, %v546_v9  ;;  %2063 = vrot.lane.b32.xlu1 %v5029_v17, %s5551_s30  ;;  %v704_v28 = vrot.slane %v702_v20, 7  ;;  %v5229_v29 = vpack.c.bf16 %v547_v10, %v547_v10  ;;  %v5359_v14 = vld [vmem:[%s5645_s25 + $0x20] sm:$0xff]  }
  0x20   : > { %v1314_v27 = vor.u32 %v1313_v19, %v1310_v18  ;;  %v550_v30 = vmax.f32 %v518_v60, 0.0  ;;  %v699_v32 = vor.u32 %v697_v16, %v696_v23  ;;  %v700_v33 = vrot.slane %v696_v23, 4  ;;  %v1013_v16 = vld [vmem:[#allocation2 + $0x24] sm:$0xf] }
  0x21   : > { %v677_v34 = vshrl.u32 %v5228_v25, 16  ;;  %v680_v36 = vshll.u32 %v5228_v25, 16  ;;  %v707_v38 = vor.u32 %v705_v24, %v704_v28  ;;  %v709_v39 = vrot.slane %v704_v28, 4 }
  0x22   : > { %v1315_v37 = vrot.slane %v1314_v27, 4  ;;  %v685_v42 = vshrl.u32 %v5229_v29, 16  ;;  %v1007_v43 = vsel %vm5702_vm13, %v699_v32, %v1006_v21  ;;  %v688_v45 = vshll.u32 %v5229_v29, 16 }
  0x23   : > { %v679_v44 = vrot.slane %v677_v34, 7  ;;  %v551_v46 = vmax.f32 %v519_v61, 0.0  ;;  %v708_v48 = vsel %vm5709_vm14, %v700_v33, %v707_v38  ;;  %1008 = vst [vmem:[#allocation2 + $0x18] sm:$0xf] %v1007_v43  ;;  %v5232_v51 = vpack.c.bf16 %v550_v30, %v550_v30 }
  0x24   : > { %v1320_v47 = vsel %vm5692_vm12, %v1315_v37, %v5675_v41  ;;  %v687_v49 = vrot.slane %v685_v42, 7  ;;  %1009 = vst.msk [vmem:[#allocation2 + $0x1c] sm:$0xf] %vm282_vm0, %v708_v48  ;;  %v481_v4 = vmul.f32 %v5306_v52, %v5650_v13  ;;  %v482_v10 = vmul.f32 %v5307_v62, %v5650_v13 }
  0x25   : > { %v4997_v53 = vcombine.low %v1320_v47, %v1330_v22  ;;  %v682_v54 = vor.u32 %v680_v36, %v679_v44  ;;  %v683_v55 = vrot.slane %v679_v44, 4  ;;  %v5233_v56 = vpack.c.bf16 %v551_v46, %v551_v46  ;;  %v309_v22 = vld [vmem:[#allocation2 + $0x3c] sm:$0x1] }
  0x26   : > { %v690_v59 = vor.u32 %v688_v45, %v687_v49  ;;  %v692_v60 = vrot.slane %v687_v49, 4  ;;  %v711_v61 = vshrl.u32 %v5232_v51, 16  ;;  %v714_v41 = vshll.u32 %v5232_v51, 16 }
  0x27   : > { %1739 = vrot.lane.b32.xlu0 %v4997_v53, %s5552_s6  ;;  %v1000_v0 = vsel %vm5702_vm13, %v682_v54, %v999_v50  ;;  %v719_v2 = vshrl.u32 %v5233_v56, 16  ;;  %v722_v3 = vshll.u32 %v5233_v56, 16  ;;  %v520_v52 = vadd.f32 %v5668_v35, %v481_v4  ;;  %v5777_v4 = vld [vmem:[%s5645_s25 + $0x30] sm:$0xff]  }
  0x28   : > { %v691_v7 = vsel %vm5709_vm14, %v683_v55, %v690_v59  ;;  %1001 = vst [vmem:[#allocation2 + $0xc] sm:$0xf] %v1000_v0  ;;  %v713_v9 = vrot.slane %v711_v61, 7  ;;  %v1004_v11 = vsel %vm5615_vm3, %v692_v60, %v1003_v57  ;;  %v1011_v17 = vsel %vm5615_vm3, %v709_v39, %v1010_v63 }
  0x29   : > { %1002 = vst.msk [vmem:[#allocation2 + $0x10] sm:$0xf] %vm282_vm0, %v691_v7  ;;  %v5736_v15 = vrot.slane %v719_v2, 7  ;;  %1005 = vst [vmem:[#allocation2 + $0x14] sm:$0x1] %v1004_v11  ;;  %v360_v18 = vsel %vm5627_vm7, 0, %v359_v58  ;;  %v521_v20 = vadd.f32 %v5668_v35, %v482_v10  ;;  %v5310_v27 = vunpack.c.l.bf16 %v5359_v14 }
  0x2a   : > { %v716_v62 = vor.u32 %v714_v41, %v713_v9  ;;  %v717_v19 = vrot.slane %v713_v9, 4  ;;  %1012 = vst [vmem:[#allocation2 + $0x20] sm:$0x1] %v1011_v17  ;;  %361 = vst [vmem:[#allocation2 + $0x2c] sm:$0x1] %v360_v18  ;;  %v363_v21 = vsel %vm5627_vm7, 0, %v362_v6  ;;  %v5311_v32 = vunpack.c.h.bf16 %v5359_v14 }
  0x2b   : > { %v724_v23 = vor.u32 %v722_v3, %v5736_v15  ;;  %v726_v24 = vrot.slane %v5736_v15, 4  ;;  %v552_v25 = vmax.f32 %v520_v52, 0.0  ;;  %364 = vst [vmem:[#allocation2 + $0x38] sm:$0x1] %v363_v21  ;;  %v5469_v28 = vld [vmem:[#allocation2 + $0x18] sm:$0xff]   ;;  %v553_v30 = vmax.f32 %v521_v20, 0.0 }
  0x2c   : > { %v1014_v29 = vsel %vm5702_vm13, %v716_v62, %v1013_v16  ;;  %v5314_v33 = vunpack.c.l.bf16 %v5744_v40  ;;  %v3894_v37 = vld [vmem:[#allocation2 + $0x18] sm:$0xe]  ;;  %v3895_v38 = vld [vmem:[#allocation2 + $0x1c] sm:$0xf]  ;;  %v310_v39 = vsel %vm5615_vm3, 0, %v309_v22  ;;  %v483_v42 = vmul.f32 %v5310_v27, %v5650_v13  ;;  %2242 = vrot.lane.b32.xlu1 %v5469_v28, %s5553_s7 }
  0x2d   : > { %v725_v34 = vsel %vm5709_vm14, %v717_v19, %v724_v23  ;;  %1015 = vst [vmem:[#allocation2 + $0x24] sm:$0xf] %v1014_v29  ;;  %v5234_v36 = vpack.c.bf16 %v552_v25, %v552_v25  ;;  %v5235_v43 = vpack.c.bf16 %v553_v30, %v553_v30  ;;  %v5141_v44 = vrot.slane %v3894_v37, 9  ;;  %v5761_v46 = vld [vmem:[#allocation2 + $0x18] sm:$0xe] }
  0x2e   : > { %1016 = vst.msk [vmem:[#allocation2 + $0x28] sm:$0xf] %vm282_vm0, %v725_v34  ;;  %v3992_v45 = vrot.slane %v3895_v38, 5  ;;  %311 = vst [vmem:[#allocation2 + $0x3c] sm:$0x1] %v310_v39  ;;  %v484_v47 = vmul.f32 %v5311_v32, %v5650_v13  ;;  %v5765_v51 = vadd.f32 %v5668_v35, %v483_v42  ;;  %v5315_v53 = vunpack.c.h.bf16 %v5744_v40  ;;  %v5472_v55 = vld [vmem:[#allocation2 + $0x18] sm:$0xff]  }
  0x2f   : > { %v728_v48 = vshrl.u32 %v5234_v36, 16  ;;  %v731_v49 = vshll.u32 %v5234_v36, 16  ;;  %v2850_v50 = vld [vmem:[#allocation2 + $0xc] sm:$0xe]  ;;  %v736_v56 = vshrl.u32 %v5235_v43, 16  ;;  %v739_v57 = vshll.u32 %v5235_v43, 16 }
  0x30   : > { %v5470_v54 = vld [vmem:[#allocation2 + $0xc] sm:$0xff]   ;;  %v5077_v59 = vrot.slane %v2850_v50, 9  ;;  %v5770_v60 = vsel %vm5636_vm8, %v5141_v44, %v3992_v45  ;;  %v2852_v63 = vld [vmem:[#allocation2 + $0x14] sm:$0x1]  ;;  %v3994_v0 = vrot.slane %v3992_v45, 4  ;;  %v5773_v2 = vadd.f32 %v5668_v35, %v484_v47 }
  0x31   : > { %v1020_v58 = vld [vmem:[#allocation2 + $0x30] sm:$0xf]  ;;  %v730_v61 = vrot.slane %v728_v48, 7  ;;  %v485_v3 = vmul.f32 %v5314_v33, %v5650_v13  ;;  %2240 = vrot.lane.b32.xlu0 %v5470_v54, %s5553_s7  ;;  %v5780_v6 = vrot.slane %v736_v56, 7  ;;  %v2951_v9 = vrot.slane %v2852_v63, 5 }
  0x32   : > { %v2851_v41 = vld [vmem:[#allocation2 + $0x10] sm:$0xf]  ;;  %v1807_v10 = vld [vmem:[#allocation2 + $0xc] sm:$0xe]  ;;  %v5078_v11 = vrot.slane %v5761_v46, 9  ;;  %v486_v62 = vmul.f32 %v5315_v53, %v5650_v13  ;;  %v5318_v38 = vunpack.c.l.bf16 %v5777_v4  ;;  %vm1239_vm15 = vcmask 31744  }
  0x33   : > { %v2948_v7 = vrot.slane %v2851_v41, 5  ;;  %v733_v14 = vor.u32 %v731_v49, %v730_v61  ;;  %v734_v16 = vrot.slane %v730_v61, 4  ;;  %v1808_v52 = vld [vmem:[#allocation2 + $0x10] sm:$0xf]  ;;  %v1809_v17 = vld [vmem:[#allocation2 + $0x14] sm:$0x1]  ;;  %v741_v19 = vor.u32 %v739_v57, %v5780_v6 }
  0x34   : > { %v5014_v18 = vrot.slane %v1807_v10, 9  ;;  %v2854_v40 = vld [vmem:[#allocation2 + $0x1c] sm:$0xf]  ;;  %v743_v20 = vrot.slane %v5780_v6, 4  ;;  %v1912_v27 = vrot.slane %v1808_v52, 5  ;;  %v5791_v28 = vadd.f32 %v5668_v35, %v485_v3 }
  0x35   : > { %v2949_v21 = vsel %vm5636_vm8, %v5077_v59, %v2948_v7  ;;  %v2950_v22 = vrot.slane %v2948_v7, 4  ;;  %v5471_v23 = vld [vmem:[#allocation2 + $0x24] sm:$0xff]   ;;  %v1021_v25 = vsel %vm5702_vm13, %v733_v14, %v1020_v58  ;;  %v5794_v29 = vadd.f32 %v5668_v35, %v486_v62  ;;  %3284 = vrot.lane.b32.xlu0 %v5472_v55, %s5554_s8  ;;  %v3896_v36 = vld [vmem:[#allocation2 + $0x20] sm:$0x1]  ;;  %v1017_v44 = vld [vmem:[#allocation2 + $0x2c] sm:$0x1] }
  0x36   : > { %v742_v30 = vsel %vm5709_vm14, %v734_v16, %v741_v19  ;;  %1022 = vst [vmem:[#allocation2 + $0x30] sm:$0xf] %v1021_v25  ;;  %v5474_v32 = vld [vmem:[#allocation2 + $0x24] sm:$0xff]   ;;  %v1915_v34 = vrot.slane %v1809_v17, 5  ;;  %v2855_v37 = vld [vmem:[#allocation2 + $0x20] sm:$0x1]  ;;  %3286 = vrot.lane.b32.xlu1 %v5471_v23, %s5554_s8  ;;  %v5806_v39 = vsel %vm5636_vm8, %v5014_v18, %v1912_v27  ;;  %v1018_v48 = vsel %vm5615_vm3, %v726_v24, %v1017_v44 }
  0x37   : > { %v2952_v33 = vsel %vm5636_vm8, %v2950_v22, %v2951_v9  ;;  %1023 = vst.msk [vmem:[#allocation2 + $0x34] sm:$0xf] %vm282_vm0, %v742_v30  ;;  %v1914_v42 = vrot.slane %v1912_v27, 4  ;;  %v3995_v43 = vrot.slane %v3896_v36, 5  ;;  %v3897_v45 = vld [vmem:[#allocation2 + $0x24] sm:$0xe]  ;;  %v5319_v27 = vunpack.c.h.bf16 %v5777_v4 }
  0x38   : > { %v5093_v35 = vcombine.low %v2949_v21, %v2952_v33  ;;  %v2955_v46 = vrot.slane %v2854_v40, 5  ;;  %v2958_v47 = vrot.slane %v2855_v37, 5  ;;  %v3898_v49 = vld [vmem:[#allocation2 + $0x28] sm:$0xf]  ;;  %v5142_v50 = vrot.slane %v3897_v45, 9 }
  0x39   : > { %v5814_v53 = vsel %vm5636_vm8, %v1914_v42, %v1915_v34  ;;  %v3996_v54 = vsel %vm5636_vm8, %v3994_v0, %v3995_v43  ;;  %1019 = vst [vmem:[#allocation2 + $0x2c] sm:$0x1] %v1018_v48  ;;  %v3999_v55 = vrot.slane %v3898_v49, 5  ;;  %v1813_v56 = vld [vmem:[#allocation2 + $0x24] sm:$0xe]  ;;  %v554_v58 = vmax.f32 %v5765_v51, 0.0  ;;  %2244 = vrot.lane.b32.xlu0 %v5474_v32, %s5553_s7 }
  0x3a   : > { %v1814_v57 = vld [vmem:[#allocation2 + $0x28] sm:$0xf]  ;;  %v5030_v15 = vcombine.low %v5806_v39, %v5814_v53  ;;  %v5157_v24 = vcombine.low %v5770_v60, %v3996_v54  ;;  %v5825_v59 = vsel %vm5636_vm8, %v5078_v11, %v2955_v46  ;;  %v2957_v61 = vrot.slane %v2955_v46, 4  ;;  %v1810_v41 = vld [vmem:[#allocation2 + $0x18] sm:$0xe] }
  0x3b   : > { %v1811_v63 = vld [vmem:[#allocation2 + $0x1c] sm:$0xf]  ;;  %v4000_v0 = vsel %vm5636_vm8, %v5142_v50, %v3999_v55  ;;  %v4001_v3 = vrot.slane %v3999_v55, 4  ;;  %v5016_v7 = vrot.slane %v1813_v56, 9  ;;  %v1926_v51 = vrot.slane %v1814_v57, 5 }
  0x3c   : > { %v1812_v9 = vld [vmem:[#allocation2 + $0x20] sm:$0x1]  ;;  %v5831_v10 = vsel %vm5636_vm8, %v2957_v61, %v2958_v47  ;;  %v5015_v14 = vrot.slane %v1810_v41, 9  ;;  %v1919_v60 = vrot.slane %v1811_v63, 5  ;;  %v2308_v52 = vld [vmem:[#allocation2 + $0x18] sm:$0xf]  ;;  %v5844_v25 = vpack.c.bf16 %v554_v58, %v554_v58 }
  0x3d   : > { %v1922_v16 = vrot.slane %v1812_v9, 5  ;;  %v5094_v11 = vcombine.low %v5825_v59, %v5831_v10  ;;  %v5837_v17 = vsel %vm5636_vm8, %v5016_v7, %v1926_v51  ;;  %v1928_v18 = vrot.slane %v1926_v51, 4  ;;  %v2309_v40 = vld [vmem:[#allocation2 + $0x1c] sm:$0xf]  ;;  %3106 = vrot.lane.b32.xlu0 %v5093_v35, %s5555_s9  ;;  %v2310_v23 = vld [vmem:[#allocation2 + $0x20] sm:$0x1] }
  0x3e   : > { %v2378_v62 = vshrl.u32 %v2308_v52, 16  ;;  %v5473_v19 = vld [vmem:[#allocation2 + $0x30] sm:$0xff]   ;;  %v5842_v21 = vsel %vm5636_vm8, %v5015_v14, %v1919_v60  ;;  %v1921_v22 = vrot.slane %v1919_v60, 4  ;;  %v2381_v32 = vshll.u32 %v2308_v52, 16  ;;  %v3352_v36 = vld [vmem:[#allocation2 + $0x24] sm:$0xf] }
  0x3f   : > { %v2387_v33 = vshll.u32 %v2309_v40, 16  ;;  %v2391_v34 = vshrl.u32 %v2309_v40, 16  ;;  %2246 = vrot.lane.b32.xlu1 %v5473_v19, %s5553_s7  ;;  %v2397_v42 = vshll.u32 %v2310_v23, 16  ;;  %v3422_v43 = vshrl.u32 %v3352_v36, 16  ;;  %v3353_v49 = vld [vmem:[#allocation2 + $0x28] sm:$0xf] }
  0x40   : > { %v2380_v30 = vrot.slane %v2378_v62, 4  ;;  %v3899_v37 = vld [vmem:[#allocation2 + $0x2c] sm:$0x1]  ;;  %v1923_v35 = vsel %vm5636_vm8, %v1921_v22, %v1922_v16  ;;  %v5851_v44 = vmul.f32 %v5318_v38, %v5650_v13  ;;  %v2383_v48 = vrot.slane %v2381_v32, 5  ;;  %v1260_v14 = vld [vmem:[#allocation2 + $0x10] sm:$0xf] }
  0x41   : > { %v1815_v39 = vld [vmem:[#allocation2 + $0x2c] sm:$0x1]  ;;  %v4002_v45 = vrot.slane %v3899_v37, 5  ;;  %v5031_v47 = vcombine.low %v5842_v21, %v1923_v35  ;;  %4150 = vrot.lane.b32.xlu0 %v5157_v24, %s5556_s10  ;;  %v2389_v50 = vrot.slane %v2387_v33, 5  ;;  %v2393_v53 = vrot.slane %v2391_v34, 4 }
  0x42   : > { %v1929_v46 = vrot.slane %v1815_v39, 5  ;;  %v2399_v54 = vrot.slane %v2397_v42, 5  ;;  %v3354_v55 = vld [vmem:[#allocation2 + $0x2c] sm:$0x1]  ;;  %v3424_v56 = vrot.slane %v3422_v43, 4  ;;  %v2384_v38 = vor.u32 %v2383_v48, %v2380_v30 }
  0x43   : > { %v4003_v57 = vsel %vm5636_vm8, %v4001_v3, %v4002_v45  ;;  %v3425_v58 = vshll.u32 %v3352_v36, 16  ;;  %v1259_v59 = vld [vmem:[#allocation2 + $0xc] sm:$0xf]  ;;  %2065 = vrot.lane.b32.xlu1 %v5030_v15, %s5551_s30  ;;  %v2394_v24 = vor.u32 %v2393_v53, %v2389_v50  ;;  %v3431_v63 = vshll.u32 %v3353_v49, 16  ;;  %v1262_v62 = vld [vmem:[#allocation2 + $0x18] sm:$0xf] }
  0x44   : > { %v1930_v13 = vsel %vm5636_vm8, %v1928_v18, %v1929_v46  ;;  %v5158_v61 = vcombine.low %v4000_v0, %v4003_v57  ;;  %v2385_v7 = vrot.slane %v2384_v38, 4  ;;  %v3435_v9 = vshrl.u32 %v3353_v49, 16  ;;  %v1263_v36 = vld [vmem:[#allocation2 + $0x1c] sm:$0xf]  ;;  %v1264_v46 = vld [vmem:[#allocation2 + $0x20] sm:$0x1] }
  0x45   : > { %v5032_v41 = vcombine.low %v5837_v17, %v1930_v13  ;;  %v3427_v51 = vrot.slane %v3425_v58, 5  ;;  %v3441_v10 = vshll.u32 %v3354_v55, 16  ;;  %v2395_v3 = vrot.slane %v2394_v24, 4  ;;  %v1261_v17 = vld [vmem:[#allocation2 + $0x14] sm:$0x1] }
  0x46   : > { %4152 = vrot.lane.b32.xlu0 %v5158_v61, %s5556_s10  ;;  %v3433_v60 = vrot.slane %v3431_v63, 5  ;;  %v1332_v16 = vshrl.u32 %v1259_v59, 16  ;;  %v1335_v52 = vshll.u32 %v1259_v59, 16  ;;  %v2390_v18 = vsel %vm5692_vm12, %v2385_v7, %v2389_v50  ;;  %v2305_v55 = vld [vmem:[#allocation2 + $0xc] sm:$0xf] }
  0x47   : > { %v3428_v15 = vor.u32 %v3427_v51, %v3424_v56  ;;  %v3437_v0 = vrot.slane %v3435_v9, 4  ;;  %v3443_v40 = vrot.slane %v3441_v10, 5  ;;  %3108 = vrot.lane.b32.xlu1 %v5094_v11, %s5555_s9  ;;  %v2400_v19 = vsel %vm5692_vm12, %v2395_v3, %v2399_v54  ;;  %v2306_v38 = vld [vmem:[#allocation2 + $0x10] sm:$0xf]  ;;  %v2307_v51 = vld [vmem:[#allocation2 + $0x14] sm:$0x1] }
  0x48   : > { %v1334_v21 = vrot.slane %v1332_v16, 4  ;;  %v1337_v22 = vrot.slane %v1335_v52, 5  ;;  %v1341_v23 = vshll.u32 %v1260_v14, 16  ;;  %v5062_v30 = vcombine.low %v2390_v18, %v2400_v19  ;;  %v1265_v16 = vld [vmem:[#allocation2 + $0x24] sm:$0xf] }
  0x49   : > { %v3429_v32 = vrot.slane %v3428_v15, 4  ;;  %v3438_v33 = vor.u32 %v3437_v0, %v3433_v60  ;;  %v1345_v34 = vshrl.u32 %v1260_v14, 16  ;;  %v1351_v35 = vshll.u32 %v1261_v17, 16 }
  0x4a   : > { %2067 = vrot.lane.b32.xlu0 %v5031_v47, %s5551_s30  ;;  %v1338_v37 = vor.u32 %v1337_v22, %v1334_v21  ;;  %v1343_v39 = vrot.slane %v1341_v23, 5  ;;  %v1356_v42 = vshrl.u32 %v1262_v62, 16  ;;  %v1359_v48 = vshll.u32 %v1262_v62, 16 }
  0x4b   : > { %v3434_v11 = vsel %vm5692_vm12, %v3429_v32, %v3433_v60  ;;  %v3439_v43 = vrot.slane %v3438_v33, 4  ;;  %v1347_v45 = vrot.slane %v1345_v34, 4  ;;  %2069 = vrot.lane.b32.xlu1 %v5032_v41, %s5551_s30  ;;  %v1353_v50 = vrot.slane %v1351_v35, 5  ;;  %v3349_v35 = vld [vmem:[#allocation2 + $0x18] sm:$0xf] }
  0x4c   : > { %v1339_v49 = vrot.slane %v1338_v37, 4  ;;  %v1358_v53 = vrot.slane %v1356_v42, 4  ;;  %v1365_v54 = vshll.u32 %v1263_v36, 16  ;;  %v1361_v57 = vrot.slane %v1359_v48, 5 }
  0x4d   : > { %v3444_v47 = vsel %vm5692_vm12, %v3439_v43, %v3443_v40  ;;  %v1348_v56 = vor.u32 %v1347_v45, %v1343_v39  ;;  %v1369_v13 = vshrl.u32 %v1263_v36, 16  ;;  %v1375_v24 = vshll.u32 %v1264_v46, 16  ;;  %v1266_v40 = vld [vmem:[#allocation2 + $0x28] sm:$0xf]  ;;  %v1267_v36 = vld [vmem:[#allocation2 + $0x2c] sm:$0x1] }
  0x4e   : > { %v5126_v58 = vcombine.low %v3434_v11, %v3444_v47  ;;  %v1344_v59 = vsel %vm5692_vm12, %v1339_v49, %v1343_v39  ;;  %v1367_v61 = vrot.slane %v1365_v54, 5  ;;  %v1362_v41 = vor.u32 %v1361_v57, %v1358_v53  ;;  %v3350_v47 = vld [vmem:[#allocation2 + $0x1c] sm:$0xf] }
  0x4f   : > { %v1349_v63 = vrot.slane %v1348_v56, 4  ;;  %v1371_v7 = vrot.slane %v1369_v13, 4  ;;  %v2354_v9 = vshrl.u32 %v2305_v55, 16  ;;  %2787 = vrot.lane.b32.xlu1 %v5062_v30, %s5557_s11  ;;  %v1377_v10 = vrot.slane %v1375_v24, 5 }
  0x50   : > { %v2357_v14 = vshll.u32 %v2305_v55, 16  ;;  %v2363_v3 = vshll.u32 %v2306_v38, 16  ;;  %v2367_v60 = vshrl.u32 %v2306_v38, 16  ;;  %v1363_v18 = vrot.slane %v1362_v41, 4 }
  0x51   : > { %v1354_v52 = vsel %vm5692_vm12, %v1349_v63, %v1353_v50  ;;  %v1372_v15 = vor.u32 %v1371_v7, %v1367_v61  ;;  %v2356_v0 = vrot.slane %v2354_v9, 4  ;;  %v2373_v30 = vshll.u32 %v2307_v51, 16 }
  0x52   : > { %v4998_v17 = vcombine.low %v1344_v59, %v1354_v52  ;;  %v2359_v62 = vrot.slane %v2357_v14, 5  ;;  %v2365_v19 = vrot.slane %v2363_v3, 5  ;;  %v2369_v21 = vrot.slane %v2367_v60, 4 }
  0x53   : > { %v1368_v22 = vsel %vm5692_vm12, %v1363_v18, %v1367_v61  ;;  %v1373_v23 = vrot.slane %v1372_v15, 4  ;;  %v1380_v32 = vshrl.u32 %v1265_v16, 16  ;;  %3831 = vrot.lane.b32.xlu1 %v5126_v58, %s5558_s12  ;;  %v1383_v37 = vshll.u32 %v1265_v16, 16  ;;  %v3351_v58 = vld [vmem:[#allocation2 + $0x20] sm:$0x1] }
  0x54   : > { %1741 = vrot.lane.b32.xlu0 %v4998_v17, %s5552_s6  ;;  %v2360_v33 = vor.u32 %v2359_v62, %v2356_v0  ;;  %v2370_v34 = vor.u32 %v2369_v21, %v2365_v19  ;;  %v1389_v39 = vshll.u32 %v1266_v40, 16  ;;  %v2375_v11 = vrot.slane %v2373_v30, 5  ;;  %v2311_v61 = vld [vmem:[#allocation2 + $0x24] sm:$0xf]  ;;  %v2312_v16 = vld [vmem:[#allocation2 + $0x28] sm:$0xf] }
  0x55   : > { %v1378_v42 = vsel %vm5692_vm12, %v1373_v23, %v1377_v10  ;;  %v1382_v43 = vrot.slane %v1380_v32, 4  ;;  %v1393_v45 = vshrl.u32 %v1266_v40, 16  ;;  %v1385_v50 = vrot.slane %v1383_v37, 5  ;;  %v2313_v62 = vld [vmem:[#allocation2 + $0x2c] sm:$0x1] }
  0x56   : > { %v4999_v46 = vcombine.low %v1368_v22, %v1378_v42  ;;  %v2361_v48 = vrot.slane %v2360_v33, 4  ;;  %v2371_v49 = vrot.slane %v2370_v34, 4  ;;  %v1391_v53 = vrot.slane %v1389_v39, 5  ;;  %v2314_v32 = vld [vmem:[#allocation2 + $0x30] sm:$0xf] }
  0x57   : > { %v1395_v54 = vrot.slane %v1393_v45, 4  ;;  %v1399_v55 = vshll.u32 %v1267_v36, 16  ;;  %v3398_v56 = vshrl.u32 %v3349_v35, 16  ;;  %v1386_v38 = vor.u32 %v1385_v50, %v1382_v43  ;;  %v2315_v39 = vld [vmem:[#allocation2 + $0x34] sm:$0xf] }
  0x58   : > { %1743 = vrot.lane.b32.xlu1 %v4999_v46, %s5552_s6  ;;  %v2366_v57 = vsel %vm5692_vm12, %v2361_v48, %v2365_v19  ;;  %v2376_v13 = vsel %vm5692_vm12, %v2371_v49, %v2375_v11  ;;  %v3401_v59 = vshll.u32 %v3349_v35, 16  ;;  %v3407_v10 = vshll.u32 %v3350_v47, 16  ;;  %v1024_v19 = vld [vmem:[#allocation2 + $0x38] sm:$0x1]  ;;  %v2856_v45 = vld [vmem:[#allocation2 + $0x24] sm:$0xe] }
  0x59   : > { %v5061_v24 = vcombine.low %v2366_v57, %v2376_v13  ;;  %v1396_v63 = vor.u32 %v1395_v54, %v1391_v53  ;;  %v1401_v41 = vrot.slane %v1399_v55, 5  ;;  %v3400_v7 = vrot.slane %v3398_v56, 4  ;;  %v2857_v46 = vld [vmem:[#allocation2 + $0x28] sm:$0xf]  ;;  %v2858_v54 = vld [vmem:[#allocation2 + $0x2c] sm:$0x1] }
  0x5a   : > { %v1387_v51 = vrot.slane %v1386_v38, 4  ;;  %v3403_v9 = vrot.slane %v3401_v59, 5  ;;  %v3411_v14 = vshrl.u32 %v3350_v47, 16  ;;  %v3417_v60 = vshll.u32 %v3351_v58, 16  ;;  %v2859_v55 = vld [vmem:[#allocation2 + $0x30] sm:$0xe] }
  0x5b   : > { %2785 = vrot.lane.b32.xlu0 %v5061_v24, %s5557_s11  ;;  %v1397_v3 = vrot.slane %v1396_v63, 4  ;;  %v2402_v52 = vshrl.u32 %v2311_v61, 16  ;;  %v2405_v18 = vshll.u32 %v2311_v61, 16  ;;  %v3409_v40 = vrot.slane %v3407_v10, 5  ;;  %v2860_v13 = vld [vmem:[#allocation2 + $0x34] sm:$0xf] }
  0x5c   : > { %v1392_v15 = vsel %vm5692_vm12, %v1387_v51, %v1391_v53  ;;  %v3404_v0 = vor.u32 %v3403_v9, %v3400_v7  ;;  %v3413_v17 = vrot.slane %v3411_v14, 4  ;;  %v3419_v22 = vrot.slane %v3417_v60, 5 }
  0x5d   : > { %v1402_v21 = vsel %vm5692_vm12, %v1397_v3, %v1401_v41  ;;  %v2404_v23 = vrot.slane %v2402_v52, 4  ;;  %v2407_v30 = vrot.slane %v2405_v18, 5  ;;  %v2411_v37 = vshll.u32 %v2312_v16, 16 }
  0x5e   : > { %v5000_v33 = vcombine.low %v1392_v15, %v1402_v21  ;;  %v3405_v34 = vrot.slane %v3404_v0, 4  ;;  %v3414_v36 = vor.u32 %v3413_v17, %v3409_v40  ;;  %v2415_v42 = vshrl.u32 %v2312_v16, 16 }
  0x5f   : > { %v2408_v35 = vor.u32 %v2407_v30, %v2404_v23  ;;  %v2421_v11 = vshll.u32 %v2313_v62, 16  ;;  %v1025_v43 = vsel %vm5615_vm3, %v743_v20, %v1024_v19  ;;  %v2413_v50 = vrot.slane %v2411_v37, 5  ;;  %v3356_v37 = vld [vmem:[#allocation2 + $0x34] sm:$0xf] }
  0x60   : > { %1745 = vrot.lane.b32.xlu1 %v5000_v33, %s5552_s6  ;;  %v3410_v48 = vsel %vm5692_vm12, %v3405_v34, %v3409_v40  ;;  %v3415_v49 = vrot.slane %v3414_v36, 4  ;;  %1026 = vst [vmem:[#allocation2 + $0x38] sm:$0x1] %v1025_v43  ;;  %v2426_v53 = vshrl.u32 %v2314_v32, 16  ;;  %v2417_v56 = vrot.slane %v2415_v42, 4 }
  0x61   : > { %v2409_v47 = vrot.slane %v2408_v35, 4  ;;  %v2423_v57 = vrot.slane %v2421_v11, 5  ;;  %v2429_v6 = vshll.u32 %v2314_v32, 16  ;;  %v2435_v58 = vshll.u32 %v2315_v39, 16  ;;  %v3355_v36 = vld [vmem:[#allocation2 + $0x30] sm:$0xf] }
  0x62   : > { %v3420_v20 = vsel %vm5692_vm12, %v3415_v49, %v3419_v22  ;;  %v2428_v38 = vrot.slane %v2426_v53, 4  ;;  %v2439_v59 = vshrl.u32 %v2315_v39, 16  ;;  %v2418_v63 = vor.u32 %v2417_v56, %v2413_v50  ;;  %v5914_v22 = vld [vmem:[%s7208_s1] ss:$0 sm:$0xff]  ;;  %v1027_v56 = vld [vmem:[#allocation2 + $0x3c] sm:$0xf] }
  0x63   : > { %v5125_v61 = vcombine.low %v3410_v48, %v3420_v20  ;;  %v2414_v24 = vsel %vm5692_vm12, %v2409_v47, %v2413_v50  ;;  %v2431_v41 = vrot.slane %v2429_v6, 5  ;;  %v2437_v7 = vrot.slane %v2435_v58, 5  ;;  %v365_v50 = vld [vmem:[#allocation2 + $0x44] sm:$0x1]  ;;  %v3900_v58 = vld [vmem:[#allocation2 + $0x30] sm:$0xe] }
  0x64   : > { %v2441_v51 = vrot.slane %v2439_v59, 4  ;;  %v5079_v9 = vrot.slane %v2856_v45, 9  ;;  %v2962_v10 = vrot.slane %v2857_v46, 5  ;;  %v2419_v14 = vrot.slane %v2418_v63, 4  ;;  %v5475_v59 = vld [vmem:[#allocation2 + $0x30] sm:$0xff]  }
  0x65   : > { %3829 = vrot.lane.b32.xlu0 %v5125_v61, %s5558_s12  ;;  %v2432_v3 = vor.u32 %v2431_v41, %v2428_v38  ;;  %v2965_v60 = vrot.slane %v2858_v54, 5  ;;  %v5080_v16 = vrot.slane %v2859_v55, 9  ;;  %v2969_v0 = vrot.slane %v2860_v13, 5 }
  0x66   : > { %v2442_v52 = vor.u32 %v2441_v51, %v2437_v7  ;;  %v2963_v18 = vsel %vm5636_vm8, %v5079_v9, %v2962_v10  ;;  %v2964_v15 = vrot.slane %v2962_v10, 4  ;;  %v2424_v40 = vsel %vm5692_vm12, %v2419_v14, %v2423_v57 }
  0x67   : > { %v2316_v17 = vld [vmem:[#allocation2 + $0x38] sm:$0x1]  ;;  %v2433_v62 = vrot.slane %v2432_v3, 4  ;;  %v555_v21 = vmax.f32 %v5773_v2, 0.0  ;;  %v5919_v23 = vmul.f32 %v5914_v22, %v5319_v27  ;;  %v5063_v30 = vcombine.low %v2414_v24, %v2424_v40 }
  0x68   : > { %v2861_v19 = vld [vmem:[#allocation2 + $0x38] sm:$0x1]  ;;  %v2443_v32 = vrot.slane %v2442_v52, 4  ;;  %v2445_v33 = vshll.u32 %v2316_v17, 16  ;;  %v2966_v34 = vsel %vm5636_vm8, %v2964_v15, %v2965_v60  ;;  %v2970_v35 = vsel %vm5636_vm8, %v5080_v16, %v2969_v0 }
  0x69   : > { %v2438_v2 = vsel %vm5692_vm12, %v2433_v62, %v2437_v7  ;;  %v5095_v39 = vcombine.low %v2963_v18, %v2966_v34  ;;  %v2971_v42 = vrot.slane %v2969_v0, 4  ;;  %2789 = vrot.lane.b32.xlu0 %v5063_v30, %s5557_s11  ;;  %v2972_v27 = vrot.slane %v2861_v19, 5  ;;  %v3357_v57 = vld [vmem:[#allocation2 + $0x38] sm:$0x1]  ;;  %v1268_v7 = vld [vmem:[#allocation2 + $0x30] sm:$0xf] }
  0x6a   : > { %v2447_v4 = vrot.slane %v2445_v33, 5  ;;  %v5237_v11 = vpack.c.bf16 %v555_v21, %v555_v21  ;;  %v745_v43 = vshrl.u32 %v5844_v25, 16  ;;  %v748_v45 = vshll.u32 %v5844_v25, 16  ;;  %v3901_v25 = vld [vmem:[#allocation2 + $0x34] sm:$0xf] }
  0x6b   : > { %v3446_v46 = vshrl.u32 %v3355_v36, 16  ;;  %v3449_v48 = vshll.u32 %v3355_v36, 16  ;;  %v3455_v49 = vshll.u32 %v3356_v37, 16  ;;  %v2973_v54 = vsel %vm5636_vm8, %v2971_v42, %v2972_v27  ;;  %v3902_v3 = vld [vmem:[#allocation2 + $0x38] sm:$0x1] }
  0x6c   : > { %v2448_v53 = vsel %vm5692_vm12, %v2443_v32, %v2447_v4  ;;  %v747_v55 = vrot.slane %v745_v43, 7  ;;  %v753_v47 = vshrl.u32 %v5237_v11, 16  ;;  %v5096_v13 = vcombine.low %v2970_v35, %v2973_v54  ;;  %v1269_v62 = vld [vmem:[#allocation2 + $0x34] sm:$0xf]  ;;  %v1270_v32 = vld [vmem:[#allocation2 + $0x38] sm:$0x1] }
  0x6d   : > { %v5064_v6 = vcombine.low %v2438_v2, %v2448_v53  ;;  %v756_v20 = vshll.u32 %v5237_v11, 16  ;;  %v3448_v38 = vrot.slane %v3446_v46, 4  ;;  %3110 = vrot.lane.b32.xlu0 %v5095_v39, %s5555_s9  ;;  %v3451_v41 = vrot.slane %v3449_v48, 5  ;;  %v1816_v39 = vld [vmem:[#allocation2 + $0x30] sm:$0xe] }
  0x6e   : > { %v750_v61 = vor.u32 %v748_v45, %v747_v55  ;;  %v751_v24 = vrot.slane %v747_v55, 4  ;;  %v755_v63 = vrot.slane %v753_v47, 7  ;;  %v3457_v51 = vrot.slane %v3455_v49, 5  ;;  %v5949_v11 = vld [vmem:[#allocation2 + $0x34] sm:$0xf] }
  0x6f   : > { %2791 = vrot.lane.b32.xlu1 %v5064_v6, %s5557_s11  ;;  %v3459_v9 = vshrl.u32 %v3356_v37, 16  ;;  %v3465_v10 = vshll.u32 %v3357_v57, 16  ;;  %v366_v14 = vsel %vm5627_vm7, 0, %v365_v50  ;;  %v3452_v18 = vor.u32 %v3451_v41, %v3448_v38 }
  0x70   : > { %v758_v60 = vor.u32 %v756_v20, %v755_v63  ;;  %v760_v16 = vrot.slane %v755_v63, 4  ;;  %v1028_v52 = vsel %vm5702_vm13, %v750_v61, %v1027_v56  ;;  %367 = vst [vmem:[#allocation2 + $0x44] sm:$0x1] %v366_v14  ;;  %v5143_v40 = vrot.slane %v3900_v58, 9  ;;  %v5964_v61 = vld [vmem:[%s7209_s2] ss:$0 sm:$0xff] }
  0x71   : > { %1029 = vst [vmem:[#allocation2 + $0x3c] sm:$0xf] %v1028_v52  ;;  %v3461_v15 = vrot.slane %v3459_v9, 4  ;;  %v3467_v0 = vrot.slane %v3465_v10, 5  ;;  %v4006_v17 = vrot.slane %v3901_v25, 5  ;;  %3288 = vrot.lane.b32.xlu0 %v5475_v59, %s5554_s8  ;;  %v3453_v21 = vrot.slane %v3452_v18, 4 }
  0x72   : > { %v759_v19 = vsel %vm5709_vm14, %v751_v24, %v758_v60  ;;  %v4009_v30 = vrot.slane %v3902_v3, 5  ;;  %v1404_v33 = vshrl.u32 %v1268_v7, 16  ;;  %v1407_v2 = vshll.u32 %v1268_v7, 16 }
  0x73   : > { %3112 = vrot.lane.b32.xlu1 %v5096_v13, %s5555_s9  ;;  %1030 = vst.msk [vmem:[#allocation2 + $0x40] sm:$0xf] %vm282_vm0, %v759_v19  ;;  %v3462_v34 = vor.u32 %v3461_v15, %v3457_v51  ;;  %v4007_v36 = vsel %vm5636_vm8, %v5143_v40, %v4006_v17  ;;  %v4008_v37 = vrot.slane %v4006_v17, 4  ;;  %v3458_v35 = vsel %vm5692_vm12, %v3453_v21, %v3457_v51  ;;  %v5957_v13 = vld [vmem:[%s5645_s25 + $0x38] sm:$0xff]  }
  0x74   : > { %v1406_v42 = vrot.slane %v1404_v33, 4  ;;  %v1413_v4 = vshll.u32 %v1269_v62, 16  ;;  %v1417_v27 = vshrl.u32 %v1269_v62, 16  ;;  %v1409_v46 = vrot.slane %v1407_v2, 5 }
  0x75   : > { %v3463_v43 = vrot.slane %v3462_v34, 4  ;;  %v4010_v45 = vsel %vm5636_vm8, %v4008_v37, %v4009_v30  ;;  %v1423_v48 = vshll.u32 %v1270_v32, 16  ;;  %v5017_v54 = vrot.slane %v1816_v39, 9 }
  0x76   : > { %v5159_v49 = vcombine.low %v4007_v36, %v4010_v45  ;;  %v1415_v50 = vrot.slane %v1413_v4, 5  ;;  %v1419_v53 = vrot.slane %v1417_v27, 4  ;;  %v1410_v56 = vor.u32 %v1409_v46, %v1406_v42  ;;  %v5990_v36 = vld [vmem:[%s5645_s25 + $0x40] sm:$0xff]   ;;  %v1818_v45 = vld [vmem:[#allocation2 + $0x38] sm:$0x1] }
  0x77   : > { %v3468_v55 = vsel %vm5692_vm12, %v3463_v43, %v3467_v0  ;;  %v1031_v47 = vld [vmem:[#allocation2 + $0x44] sm:$0x1]  ;;  %v1425_v57 = vrot.slane %v1423_v48, 5  ;;  %v1933_v6 = vrot.slane %v5949_v11, 5  ;;  %v5968_v24 = vadd.f32 %v5964_v61, %v5851_v44 }
  0x78   : > { %v5127_v20 = vcombine.low %v3458_v35, %v3468_v55  ;;  %v1032_v38 = vsel %vm5615_vm3, %v760_v16, %v1031_v47  ;;  %v3358_v58 = vld [vmem:[#allocation2 + $0x3c] sm:$0xf]  ;;  %v1420_v25 = vor.u32 %v1419_v53, %v1415_v50  ;;  %v1411_v7 = vrot.slane %v1410_v56, 4 }
  0x79   : > { %v3903_v59 = vld [vmem:[#allocation2 + $0x3c] sm:$0xe]  ;;  %1033 = vst [vmem:[#allocation2 + $0x44] sm:$0x1] %v1032_v38  ;;  %v3470_v63 = vshrl.u32 %v3358_v58, 16  ;;  %v3473_v41 = vshll.u32 %v3358_v58, 16  ;;  %v5975_v60 = vsel %vm5636_vm8, %v5017_v54, %v1933_v6  ;;  %v5979_v44 = vadd.f32 %v5964_v61, %v5919_v23 }
  0x7a   : > { %v5144_v51 = vrot.slane %v3903_v59, 9  ;;  %v1271_v9 = vld [vmem:[#allocation2 + $0x3c] sm:$0xf]  ;;  %3833 = vrot.lane.b32.xlu0 %v5127_v20, %s5558_s12  ;;  %v3359_v14 = vld [vmem:[#allocation2 + $0x40] sm:$0xf]  ;;  %v1421_v3 = vrot.slane %v1420_v25, 4  ;;  %v5322_v16 = vunpack.c.l.bf16 %v5957_v13  ;;  %v1416_v17 = vsel %vm5692_vm12, %v1411_v7, %v1415_v50 }
  0x7b   : > { %v5476_v10 = vld [vmem:[#allocation2 + $0x3c] sm:$0xff]   ;;  %v3472_v52 = vrot.slane %v3470_v63, 4  ;;  %v3475_v18 = vrot.slane %v3473_v41, 5  ;;  %v3479_v15 = vshll.u32 %v3359_v14, 16  ;;  %v3483_v0 = vshrl.u32 %v3359_v14, 16 }
  0x7c   : > { %v3904_v40 = vld [vmem:[#allocation2 + $0x40] sm:$0xf]  ;;  %3290 = vrot.lane.b32.xlu1 %v5476_v10, %s5554_s8  ;;  %v1426_v62 = vsel %vm5692_vm12, %v1421_v3, %v1425_v57  ;;  %v1428_v23 = vshrl.u32 %v1271_v9, 16  ;;  %v1431_v35 = vshll.u32 %v1271_v9, 16  ;;  %v5323_v53 = vunpack.c.h.bf16 %v5957_v13  ;;  %v1819_v38 = vld [vmem:[#allocation2 + $0x3c] sm:$0xe] }
  0x7d   : > { %v4013_v19 = vrot.slane %v3904_v40, 5  ;;  %v1272_v21 = vld [vmem:[#allocation2 + $0x40] sm:$0xf]  ;;  %v3476_v30 = vor.u32 %v3475_v18, %v3472_v52  ;;  %v3481_v32 = vrot.slane %v3479_v15, 5  ;;  %v3485_v33 = vrot.slane %v3483_v0, 4 }
  0x7e   : > { %v5987_v34 = vcombine.low %v1416_v17, %v1426_v62  ;;  %4154 = vrot.lane.b32.xlu0 %v5159_v49, %s5556_s10  ;;  %v1430_v39 = vrot.slane %v1428_v23, 4  ;;  %v1437_v27 = vshll.u32 %v1272_v21, 16  ;;  %v1441_v43 = vshrl.u32 %v1272_v21, 16  ;;  %v1820_v41 = vld [vmem:[#allocation2 + $0x40] sm:$0xf] }
  0x7f   : > { %v4014_v37 = vsel %vm5636_vm8, %v5144_v51, %v4013_v19  ;;  %v4015_v2 = vrot.slane %v4013_v19, 4  ;;  %v3477_v42 = vrot.slane %v3476_v30, 4  ;;  %v3486_v4 = vor.u32 %v3485_v33, %v3481_v32  ;;  %v312_v15 = vld [vmem:[#allocation2 + $0x48] sm:$0x1]  ;;  %v2317_v19 = vld [vmem:[#allocation2 + $0x3c] sm:$0xf] }
  0x80   : > { %v3360_v46 = vld [vmem:[#allocation2 + $0x44] sm:$0x1]  ;;  %v5997_v54 = vmul.f32 %v5914_v22, %v5322_v16  ;;  %v5326_v49 = vunpack.c.l.bf16 %v5990_v36  ;;  %v5327_v55 = vunpack.c.h.bf16 %v5990_v36  ;;  %v1433_v58 = vrot.slane %v1431_v35, 5 }
  0x81   : > { %v3905_v48 = vld [vmem:[#allocation2 + $0x44] sm:$0x1]  ;;  %v3482_v47 = vsel %vm5692_vm12, %v3477_v42, %v3481_v32  ;;  %v3487_v56 = vrot.slane %v3486_v4, 4  ;;  %v3489_v57 = vshll.u32 %v3360_v46, 16  ;;  %v1439_v25 = vrot.slane %v1437_v27, 5 }
  0x82   : > { %v1273_v50 = vld [vmem:[#allocation2 + $0x44] sm:$0x1]  ;;  %v4016_v20 = vrot.slane %v3905_v48, 5  ;;  %v1443_v59 = vrot.slane %v1441_v43, 4  ;;  %v1935_v9 = vrot.slane %v1933_v6, 4  ;;  %v1936_v10 = vrot.slane %v1818_v45, 5 }
  0x83   : > { %v1447_v63 = vshll.u32 %v1273_v50, 16  ;;  %v3491_v7 = vrot.slane %v3489_v57, 5  ;;  %v1434_v3 = vor.u32 %v1433_v58, %v1430_v39  ;;  %v1821_v18 = vld [vmem:[#allocation2 + $0x44] sm:$0x1]  ;;  %v5018_v17 = vrot.slane %v1819_v38, 9  ;;  %v5477_v50 = vld [vmem:[#allocation2 + $0x3c] sm:$0xff]  }
  0x84   : > { %v4017_v51 = vsel %vm5636_vm8, %v4015_v2, %v4016_v20  ;;  %v1444_v16 = vor.u32 %v1443_v59, %v1439_v25  ;;  %v1937_v40 = vsel %vm5636_vm8, %v1935_v9, %v1936_v10  ;;  %v1940_v62 = vrot.slane %v1820_v41, 5  ;;  %v2318_v2 = vld [vmem:[#allocation2 + $0x40] sm:$0xf]  ;;  %v2319_v4 = vld [vmem:[#allocation2 + $0x44] sm:$0x1] }
  0x85   : > { %v5160_v14 = vcombine.low %v4014_v37, %v4017_v51  ;;  %v1449_v52 = vrot.slane %v1447_v63, 5  ;;  %v3492_v0 = vsel %vm5692_vm12, %v3487_v56, %v3491_v7  ;;  %v1435_v11 = vrot.slane %v1434_v3, 4  ;;  %v2862_v20 = vld [vmem:[#allocation2 + $0x3c] sm:$0xe]  ;;  %v2863_v59 = vld [vmem:[#allocation2 + $0x40] sm:$0xf] }
  0x86   : > { %v5128_v21 = vcombine.low %v3482_v47, %v3492_v0  ;;  %v1445_v6 = vrot.slane %v1444_v16, 4  ;;  %v5033_v23 = vcombine.low %v5975_v60, %v1937_v40  ;;  %v6015_v30 = vsel %vm5636_vm8, %v5018_v17, %v1940_v62  ;;  %v2864_v9 = vld [vmem:[#allocation2 + $0x44] sm:$0x1]  ;;  %v315_v40 = vld [vmem:[#allocation2 + $0x54] sm:$0x1] }
  0x87   : > { %4156 = vrot.lane.b32.xlu0 %v5160_v14, %s5556_s10  ;;  %v1942_v32 = vrot.slane %v1940_v62, 4  ;;  %v1943_v33 = vrot.slane %v1821_v18, 5  ;;  %v313_v37 = vsel %vm5615_vm3, 0, %v312_v15  ;;  %v1440_v39 = vsel %vm5692_vm12, %v1435_v11, %v1439_v25 }
  0x88   : > { %3835 = vrot.lane.b32.xlu1 %v5128_v21, %s5558_s12  ;;  %v1450_v35 = vsel %vm5692_vm12, %v1445_v6, %v1449_v52  ;;  %314 = vst [vmem:[#allocation2 + $0x48] sm:$0x1] %v313_v37  ;;  %v556_v60 = vmax.f32 %v5791_v28, 0.0  ;;  %v557_v42 = vmax.f32 %v5794_v29, 0.0  ;;  %v2450_v45 = vshrl.u32 %v2317_v19, 16 }
  0x89   : > { %v5002_v27 = vcombine.low %v1440_v39, %v1450_v35  ;;  %v6028_v43 = vsel %vm5636_vm8, %v1942_v32, %v1943_v33  ;;  %v2453_v46 = vshll.u32 %v2317_v19, 16  ;;  %v2459_v57 = vshll.u32 %v2318_v2, 16  ;;  %v368_v28 = vld [vmem:[#allocation2 + $0x50] sm:$0x1]  ;;  %v371_v32 = vld [vmem:[#allocation2 + $0x5c] sm:$0x1] }
  0x8a   : > { %v5034_v48 = vcombine.low %v6015_v30, %v6028_v43  ;;  %v5238_v47 = vpack.c.bf16 %v556_v60, %v556_v60  ;;  %v5239_v56 = vpack.c.bf16 %v557_v42, %v557_v42  ;;  %v2452_v29 = vrot.slane %v2450_v45, 4  ;;  %v318_v35 = vld [vmem:[#allocation2 + $0x60] sm:$0x1]  ;;  %v374_v45 = vld [vmem:[#allocation2 + $0x68] sm:$0x1] }
  0x8b   : > { %2071 = vrot.lane.b32.xlu0 %v5033_v23, %s5551_s30  ;;  %v2455_v38 = vrot.slane %v2453_v46, 5  ;;  %v2463_v58 = vshrl.u32 %v2318_v2, 16  ;;  %v2469_v25 = vshll.u32 %v2319_v4, 16  ;;  %v2461_v14 = vrot.slane %v2459_v57, 5  ;;  %v5492_v60 = vld [vmem:[%s7210_s3] sm:$0xff]  }
  0x8c   : > { %1747 = vrot.lane.b32.xlu1 %v5987_v34, %s5552_s6  ;;  %v762_v63 = vshrl.u32 %v5238_v47, 16  ;;  %v765_v41 = vshll.u32 %v5238_v47, 16  ;;  %v770_v7 = vshrl.u32 %v5239_v56, 16  ;;  %v773_v51 = vshll.u32 %v5239_v56, 16  ;;  %v5483_v57 = vld [vmem:[#allocation2] sm:$0xff]   ;;  %5390 = vmatprep.subr.bf16.mxu0 %v5492_v60 }
  0x8d   : > { %v2456_v10 = vor.u32 %v2455_v38, %v2452_v29  ;;  %v2465_v3 = vrot.slane %v2463_v58, 4  ;;  %v2471_v16 = vrot.slane %v2469_v25, 5  ;;  %v369_v15 = vsel %vm5627_vm7, 0, %v368_v28  ;;  %v5488_v28 = vld [vmem:[#allocation2 + $0xc] sm:$0xff]   ;;  %5428 = vmatprep.subr.bf16.mxu1 %v5492_v60  ;;  %5391 = vmatpush3.bf16.msra.mxu0 %v5492_v60  ;;  %1240 = vst.msk [vmem:[#allocation3] sm:$0xff] %vm1239_vm15, %v5483_v57 }
  0x8e   : > { %v764_v52 = vrot.slane %v762_v63, 7  ;;  %v772_v18 = vrot.slane %v770_v7, 7  ;;  %v5081_v0 = vrot.slane %v2862_v20, 9  ;;  %370 = vst [vmem:[#allocation2 + $0x50] sm:$0x1] %v369_v15  ;;  %v2976_v19 = vrot.slane %v2863_v59, 5  ;;  %5431 = vmatpush3.bf16.msra.mxu1 %v5492_v60 }
  0x8f   : > { %2248 = vrot.lane.b32.xlu0 %v5477_v50, %s5553_s7  ;;  %v1034_v17 = vld [vmem:[#allocation2 + $0x48] sm:$0xf]  ;;  %v2457_v34 = vrot.slane %v2456_v10, 4  ;;  %v2466_v62 = vor.u32 %v2465_v3, %v2461_v14  ;;  %v2979_v21 = vrot.slane %v2864_v9, 5  ;;  %v558_v43 = vmax.f32 %v5968_v24, 0.0  ;;  %v5491_v20 = vld [vmem:[#allocation2 + $0x18] sm:$0xff]  }
  0x90   : > { %1749 = vrot.lane.b32.xlu1 %v5002_v27, %s5552_s6  ;;  %v767_v11 = vor.u32 %v765_v41, %v764_v52  ;;  %v768_v6 = vrot.slane %v764_v52, 4  ;;  %v775_v23 = vor.u32 %v773_v51, %v772_v18  ;;  %v777_v30 = vrot.slane %v772_v18, 4  ;;  %v321_v63 = vld [vmem:[#allocation2 + $0x6c] sm:$0x1]  ;;  %1241 = vst.msk [vmem:[#allocation3 + $0x8] sm:$0xff] %vm1239_vm15, %v5488_v28  ;;  %1242 = vst.msk [vmem:[#allocation3 + $0x10] sm:$0xff] %vm1239_vm15, %v5491_v20 }
  0x91   : > { %v2462_v33 = vsel %vm5692_vm12, %v2457_v34, %v2461_v14  ;;  %v2467_v37 = vrot.slane %v2466_v62, 4  ;;  %v6043_v2 = vsel %vm5636_vm8, %v5081_v0, %v2976_v19  ;;  %v2978_v39 = vrot.slane %v2976_v19, 4  ;;  %v2064_v3 = vpop.permute.xlu1 %2063  ;;  %v6087_v18 = vld [vmem:[%s5645_s25 + $0x48] sm:$0xff]  }
  0x92   : > { %v776_v42 = vsel %vm5709_vm14, %v768_v6, %v775_v23  ;;  %v1035_v4 = vsel %vm5702_vm13, %v767_v11, %v1034_v17  ;;  %v316_v27 = vsel %vm5615_vm3, 0, %v315_v40  ;;  %v559_v47 = vmax.f32 %v5979_v44, 0.0  ;;  %v5493_v15 = vld [vmem:[#allocation2 + $0x24] sm:$0xff]  }
  0x93   : > { %1036 = vst [vmem:[#allocation2 + $0x48] sm:$0xf] %v1035_v4  ;;  %1037 = vst.msk [vmem:[#allocation2 + $0x4c] sm:$0xf] %vm282_vm0, %v776_v42  ;;  %v2472_v46 = vsel %vm5692_vm12, %v2467_v37, %v2471_v16  ;;  %v2980_v50 = vsel %vm5636_vm8, %v2978_v39, %v2979_v21  ;;  %v372_v56 = vsel %vm5627_vm7, 0, %v371_v32  ;;  %v5240_v38 = vpack.c.bf16 %v558_v43, %v558_v43  ;;  %v5494_v62 = vld [vmem:[%s7210_s3 + $0x8] sm:$0xff]  }
  0x94   : > { %317 = vst [vmem:[#allocation2 + $0x54] sm:$0x1] %v316_v27  ;;  %2073 = vrot.lane.b32.xlu1 %v5034_v48, %s5551_s30  ;;  %v5065_v24 = vcombine.low %v2462_v33, %v2472_v46  ;;  %v5097_v29 = vcombine.low %v6043_v2, %v2980_v50  ;;  %373 = vst [vmem:[#allocation2 + $0x5c] sm:$0x1] %v372_v56  ;;  %v319_v58 = vsel %vm5615_vm3, 0, %v318_v35  ;;  %v375_v48 = vsel %vm5627_vm7, 0, %v374_v45 }
  0x95   : > { %v5241_v44 = vpack.c.bf16 %v559_v47, %v559_v47  ;;  %320 = vst [vmem:[#allocation2 + $0x60] sm:$0x1] %v319_v58  ;;  %v490_v25 = vmul.f32 %v5914_v22, %v5323_v53  ;;  %v528_v59 = vadd.f32 %v5964_v61, %v5997_v54  ;;  %v1038_v41 = vld [vmem:[#allocation2 + $0x50] sm:$0x1]  ;;  %v779_v7 = vshrl.u32 %v5240_v38, 16  ;;  %1243 = vst.msk [vmem:[#allocation3 + $0x18] sm:$0xff] %vm1239_vm15, %v5493_v15 }
  0x96   : > { %2793 = vrot.lane.b32.xlu0 %v5065_v24, %s5557_s11  ;;  %v782_v51 = vshll.u32 %v5240_v38, 16  ;;  %376 = vst [vmem:[#allocation2 + $0x68] sm:$0x1] %v375_v48  ;;  %vm1787_vm1 = vcmask 64544   ;;  %v1039_v13 = vsel %vm5615_vm3, %v777_v30, %v1038_v41  ;;  %v322_v16 = vsel %vm5615_vm3, 0, %v321_v63  ;;  %5392 = vmatprep.subr.bf16.mxu0 %v5494_v62 }
  0x97   : > { %v787_v53 = vshrl.u32 %v5241_v44, 16  ;;  %v790_v9 = vshll.u32 %v5241_v44, 16  ;;  %v529_v54 = vadd.f32 %v5964_v61, %v490_v25  ;;  %1040 = vst [vmem:[#allocation2 + $0x50] sm:$0x1] %v1039_v13  ;;  %v781_v10 = vrot.slane %v779_v7, 7  ;;  %5429 = vmatprep.subr.bf16.mxu1 %v5494_v62  ;;  %5393 = vmatpush3.bf16.msra.mxu0 %v5494_v62 }
  0x98   : > { %v560_v14 = vmax.f32 %v528_v59, 0.0  ;;  %v491_v52 = vmul.f32 %v5914_v22, %v5326_v49  ;;  %323 = vst [vmem:[#allocation2 + $0x6c] sm:$0x1] %v322_v16  ;;  %v492_v34 = vmul.f32 %v5914_v22, %v5327_v55  ;;  %vm2111_vm2 = vcmask 97344   ;;  %5432 = vmatpush3.bf16.msra.mxu1 %v5494_v62 }
  0x99   : > { %v6089_v0 = vrot.slane %v787_v53, 7  ;;  %v561_v40 = vmax.f32 %v529_v54, 0.0  ;;  %v1740_v17 = vpop.permute.xlu0 %1739  ;;  %v784_v49 = vor.u32 %v782_v51, %v781_v10  ;;  %v785_v21 = vrot.slane %v781_v10, 4 }
  0x9a   : > { %v5478_v19 = vld [vmem:[#allocation2 + $0x48] sm:$0xff]   ;;  %3114 = vrot.lane.b32.xlu0 %v5097_v29, %s5555_s9  ;;  %v6098_v11 = vpack.c.bf16 %v560_v14, %v560_v14  ;;  %1788 = vst.msk [vmem:[#allocation3] sm:$0xff] %vm1787_vm1, %v1740_v17  ;;  %v6102_v6 = vadd.f32 %v5964_v61, %v491_v52  ;;  %v6109_v33 = vadd.f32 %v5964_v61, %v492_v34  ;;  %v5330_v37 = vunpack.c.l.bf16 %v6087_v18 }
  0x9b   : > { %v2320_v36 = vld [vmem:[#allocation2 + $0x48] sm:$0xf]  ;;  %v2321_v55 = vld [vmem:[#allocation2 + $0x4c] sm:$0xf]  ;;  %v792_v30 = vor.u32 %v790_v9, %v6089_v0  ;;  %v6106_v32 = vpack.c.bf16 %v561_v40, %v561_v40  ;;  %2112 = vst.msk [vmem:[#allocation3] sm:$0xff] %vm2111_vm2, %v2064_v3  ;;  %2250 = vrot.lane.b32.xlu1 %v5478_v19, %s5553_s7  ;;  %v5331_v45 = vunpack.c.h.bf16 %v6087_v18  ;;  %v794_v38 = vrot.slane %v6089_v0, 4 }
  0x9c   : > { %v2865_v23 = vld [vmem:[#allocation2 + $0x48] sm:$0xe]  ;;  %v2474_v2 = vshrl.u32 %v2320_v36, 16  ;;  %v2477_v39 = vshll.u32 %v2320_v36, 16  ;;  %v2483_v35 = vshll.u32 %v2321_v55, 16  ;;  %v2487_v60 = vshrl.u32 %v2321_v55, 16 }
  0x9d   : > { %v2866_v42 = vld [vmem:[#allocation2 + $0x4c] sm:$0xf]  ;;  %v5082_v4 = vrot.slane %v2865_v23, 9  ;;  %v793_v43 = vsel %vm5709_vm14, %v785_v21, %v792_v30  ;;  %v493_v58 = vmul.f32 %v5914_v22, %v5330_v37  ;;  %v1041_v63 = vld [vmem:[#allocation2 + $0x54] sm:$0xf]  ;;  %v6128_v54 = vmul.f32 %v5914_v22, %v5331_v45 }
  0x9e   : > { %v2983_v27 = vrot.slane %v2866_v42, 5  ;;  %v2476_v46 = vrot.slane %v2474_v2, 4  ;;  %v2479_v50 = vrot.slane %v2477_v39, 5  ;;  %v2485_v47 = vrot.slane %v2483_v35, 5  ;;  %v5479_v57 = vld [vmem:[#allocation2 + $0x48] sm:$0xff]  }
  0x9f   : > { %v2489_v56 = vrot.slane %v2487_v60, 4  ;;  %1044 = vst.msk [vmem:[#allocation2 + $0x58] sm:$0xf] %vm282_vm0, %v793_v43  ;;  %v2322_v28 = vld [vmem:[#allocation2 + $0x50] sm:$0x1]  ;;  %3292 = vrot.lane.b32.xlu0 %v5479_v57, %s5554_s8  ;;  %v1042_v7 = vsel %vm5702_vm13, %v784_v49, %v1041_v63  ;;  %vm7213_vm4 = vcmask 130144  }
  0xa0   : > { %v2867_v20 = vld [vmem:[#allocation2 + $0x50] sm:$0x1]  ;;  %v6120_v24 = vsel %vm5636_vm8, %v5082_v4, %v2983_v27  ;;  %v2985_v29 = vrot.slane %v2983_v27, 4  ;;  %v2480_v44 = vor.u32 %v2479_v50, %v2476_v46  ;;  %v2493_v59 = vshll.u32 %v2322_v28, 16  ;;  %v3361_v41 = vld [vmem:[#allocation2 + $0x48] sm:$0xf]  ;;  %v6141_v27 = vpop.permute.xlu1 %2242 }
  0xa1   : > { %v2490_v25 = vor.u32 %v2489_v56, %v2485_v47  ;;  %v2986_v48 = vrot.slane %v2867_v20, 5  ;;  %v3362_v51 = vld [vmem:[#allocation2 + $0x4c] sm:$0xf]  ;;  %v3363_v13 = vld [vmem:[#allocation2 + $0x50] sm:$0x1]  ;;  %v3494_v53 = vshrl.u32 %v3361_v41, 16 }
  0xa2   : > { %v3497_v9 = vshll.u32 %v3361_v41, 16  ;;  %v2481_v10 = vrot.slane %v2480_v44, 4  ;;  %v2495_v3 = vrot.slane %v2493_v59, 5  ;;  %1043 = vst [vmem:[#allocation2 + $0x54] sm:$0xf] %v1042_v7  ;;  %v3503_v40 = vshll.u32 %v3362_v51, 16 }
  0xa3   : > { %v2491_v14 = vrot.slane %v2490_v25, 4  ;;  %v2987_v16 = vsel %vm5636_vm8, %v2985_v29, %v2986_v48  ;;  %v1045_v52 = vld [vmem:[#allocation2 + $0x5c] sm:$0x1]  ;;  %v3496_v15 = vrot.slane %v3494_v53, 4  ;;  %v3906_v17 = vld [vmem:[#allocation2 + $0x48] sm:$0xe]  ;;  %v6137_v36 = vpop.permute.xlu0 %2240  ;;  %v6153_v59 = vadd.f32 %v5964_v61, %v493_v58 }
  0xa4   : > { %v5098_v18 = vcombine.low %v6120_v24, %v2987_v16  ;;  %v3499_v0 = vrot.slane %v3497_v9, 5  ;;  %v2486_v34 = vsel %vm5692_vm12, %v2481_v10, %v2485_v47  ;;  %v3507_v62 = vshrl.u32 %v3362_v51, 16  ;;  %v3907_v49 = vld [vmem:[#allocation2 + $0x4c] sm:$0xf]  ;;  %v3908_v21 = vld [vmem:[#allocation2 + $0x50] sm:$0x1] }
  0xa5   : > { %v2496_v22 = vsel %vm5692_vm12, %v2491_v14, %v2495_v3  ;;  %v3513_v19 = vshll.u32 %v3363_v13, 16  ;;  %v3505_v30 = vrot.slane %v3503_v40, 5  ;;  %v1046_v37 = vsel %vm5615_vm3, %v794_v38, %v1045_v52  ;;  %v1274_v4 = vld [vmem:[#allocation2 + $0x48] sm:$0xf]  ;;  %v1275_v28 = vld [vmem:[#allocation2 + $0x4c] sm:$0xf] }
  0xa6   : > { %v5066_v55 = vcombine.low %v2486_v34, %v2496_v22  ;;  %v3500_v23 = vor.u32 %v3499_v0, %v3496_v15  ;;  %v3365_v2 = vld [vmem:[#allocation2 + $0x58] sm:$0xf]  ;;  %v3509_v39 = vrot.slane %v3507_v62, 4  ;;  %1047 = vst [vmem:[#allocation2 + $0x5c] sm:$0x1] %v1046_v37  ;;  %v5145_v45 = vrot.slane %v3906_v17, 9 }
  0xa7   : > { %v3515_v35 = vrot.slane %v3513_v19, 5  ;;  %v3527_v60 = vshll.u32 %v3365_v2, 16  ;;  %v3531_v42 = vshrl.u32 %v3365_v2, 16  ;;  %v4020_v46 = vrot.slane %v3907_v49, 5  ;;  %v6146_v24 = vpop.permute.xlu0 %3284  ;;  %v1276_v51 = vld [vmem:[#allocation2 + $0x50] sm:$0x1] }
  0xa8   : > { %2795 = vrot.lane.b32.xlu1 %v5066_v55, %s5557_s11  ;;  %v3501_v43 = vrot.slane %v3500_v23, 4  ;;  %v4023_v50 = vrot.slane %v3908_v21, 5  ;;  %v3510_v47 = vor.u32 %v3509_v39, %v3505_v30  ;;  %v1452_v20 = vshrl.u32 %v1274_v4, 16  ;;  %v3910_v0 = vld [vmem:[#allocation2 + $0x58] sm:$0xf]  ;;  %v6161_v40 = vpop.permute.xlu1 %3286  ;;  %2289 = vst.msk [vmem:[#allocation3] sm:$0xff] %vm7213_vm4, %v6137_v36 }
  0xa9   : > { %v6144_v56 = vrot.slane %v3527_v60, 5  ;;  %v3533_v57 = vrot.slane %v3531_v42, 4  ;;  %v3364_v38 = vld [vmem:[#allocation2 + $0x54] sm:$0xf]  ;;  %v4021_v44 = vsel %vm5636_vm8, %v5145_v45, %v4020_v46  ;;  %v4022_v25 = vrot.slane %v4020_v46, 4 }
  0xaa   : > { %v3506_v29 = vsel %vm5692_vm12, %v3501_v43, %v3505_v30  ;;  %v3511_v48 = vrot.slane %v3510_v47, 4  ;;  %v3518_v63 = vshrl.u32 %v3364_v38, 16  ;;  %v3521_v41 = vshll.u32 %v3364_v38, 16  ;;  %v5480_v13 = vld [vmem:[#allocation2 + $0x54] sm:$0xff]   ;;  %v1822_v38 = vld [vmem:[#allocation2 + $0x48] sm:$0xe] }
  0xab   : > { %v3534_v7 = vor.u32 %v3533_v57, %v6144_v56  ;;  %v4024_v53 = vsel %vm5636_vm8, %v4022_v25, %v4023_v50  ;;  %v1454_v9 = vrot.slane %v1452_v20, 4  ;;  %v1455_v10 = vshll.u32 %v1274_v4, 16  ;;  %v3909_v3 = vld [vmem:[#allocation2 + $0x54] sm:$0xe]  ;;  %v6163_v17 = vpop.permute.xlu0 %2244  ;;  %v1278_v42 = vld [vmem:[#allocation2 + $0x58] sm:$0xf] }
  0xac   : > { %3116 = vrot.lane.b32.xlu1 %v5098_v18, %s5555_s9  ;;  %v1461_v14 = vshll.u32 %v1275_v28, 16  ;;  %v3516_v58 = vsel %vm5692_vm12, %v3511_v48, %v3515_v35  ;;  %v3520_v16 = vrot.slane %v3518_v63, 4  ;;  %v3523_v52 = vrot.slane %v3521_v41, 5  ;;  %v1277_v37 = vld [vmem:[#allocation2 + $0x54] sm:$0xf] }
  0xad   : > { %v3535_v15 = vrot.slane %v3534_v7, 4  ;;  %v5129_v18 = vcombine.low %v3506_v29, %v3516_v58  ;;  %v3366_v34 = vld [vmem:[#allocation2 + $0x5c] sm:$0x1]  ;;  %v5161_v22 = vcombine.low %v4021_v44, %v4024_v53  ;;  %v1457_v62 = vrot.slane %v1455_v10, 5  ;;  %v1823_v41 = vld [vmem:[#allocation2 + $0x4c] sm:$0xf] }
  0xae   : > { %v1463_v19 = vrot.slane %v1461_v14, 5  ;;  %v3911_v49 = vld [vmem:[#allocation2 + $0x5c] sm:$0x1]  ;;  %v3524_v21 = vor.u32 %v3523_v52, %v3520_v16  ;;  %v3537_v55 = vshll.u32 %v3366_v34, 16  ;;  %v1465_v23 = vshrl.u32 %v1275_v28, 16 }
  0xaf   : > { %v1471_v30 = vshll.u32 %v1276_v51, 16  ;;  %3837 = vrot.lane.b32.xlu0 %v5129_v18, %s5558_s12  ;;  %v1458_v2 = vor.u32 %v1457_v62, %v1454_v9  ;;  %v5146_v39 = vrot.slane %v3909_v3, 9  ;;  %v4027_v35 = vrot.slane %v3910_v0, 5  ;;  %v1279_v50 = vld [vmem:[#allocation2 + $0x5c] sm:$0x1]  ;;  %v6167_v47 = vpop.permute.xlu0 %3106 }
  0xb0   : > { %3294 = vrot.lane.b32.xlu1 %v5480_v13, %s5554_s8  ;;  %v4030_v60 = vrot.slane %v3911_v49, 5  ;;  %v3525_v4 = vrot.slane %v3524_v21, 4  ;;  %v3539_v43 = vrot.slane %v3537_v55, 5  ;;  %v1467_v45 = vrot.slane %v1465_v23, 4  ;;  %v1824_v7 = vld [vmem:[#allocation2 + $0x50] sm:$0x1] }
  0xb1   : > { %v1473_v46 = vrot.slane %v1471_v30, 5  ;;  %v1459_v57 = vrot.slane %v1458_v2, 4  ;;  %v4028_v28 = vsel %vm5636_vm8, %v5146_v39, %v4027_v35  ;;  %v4029_v20 = vrot.slane %v4027_v35, 4  ;;  %v6176_v51 = vpop.permute.xlu1 %2246  ;;  %v1826_v14 = vld [vmem:[#allocation2 + $0x58] sm:$0xf] }
  0xb2   : > { %v1476_v29 = vshrl.u32 %v1277_v37, 16  ;;  %v3530_v44 = vsel %vm5692_vm12, %v3525_v4, %v6144_v56  ;;  %v3540_v25 = vsel %vm5692_vm12, %v3535_v15, %v3539_v43  ;;  %v1468_v48 = vor.u32 %v1467_v45, %v1463_v19  ;;  %v1825_v56 = vld [vmem:[#allocation2 + $0x54] sm:$0xe]  ;;  %v1827_v55 = vld [vmem:[#allocation2 + $0x5c] sm:$0x1] }
  0xb3   : > { %v1479_v63 = vshll.u32 %v1277_v37, 16  ;;  %v5130_v13 = vcombine.low %v3530_v44, %v3540_v25  ;;  %4158 = vrot.lane.b32.xlu0 %v5161_v22, %s5556_s10  ;;  %v1464_v53 = vsel %vm5692_vm12, %v1459_v57, %v1463_v19  ;;  %v4031_v9 = vsel %vm5636_vm8, %v4029_v20, %v4030_v60  ;;  %v6183_v15 = vpop.permute.xlu0 %4150  ;;  %v2323_v57 = vld [vmem:[#allocation2 + $0x54] sm:$0xf]  ;;  %v1048_v44 = vld [vmem:[#allocation2 + $0x60] sm:$0xf] }
  0xb4   : > { %v1478_v10 = vrot.slane %v1476_v29, 4  ;;  %v1469_v3 = vrot.slane %v1468_v48, 4  ;;  %v5162_v58 = vcombine.low %v4028_v28, %v4031_v9  ;;  %v1485_v52 = vshll.u32 %v1278_v42, 16 }
  0xb5   : > { %v1481_v16 = vrot.slane %v1479_v63, 5  ;;  %3839 = vrot.lane.b32.xlu1 %v5130_v13, %s5558_s12  ;;  %v1489_v0 = vshrl.u32 %v1278_v42, 16  ;;  %v1495_v18 = vshll.u32 %v1279_v50, 16  ;;  %v5019_v34 = vrot.slane %v1822_v38, 9  ;;  %v6188_v23 = vpop.permute.xlu1 %2065  ;;  %v5498_v63 = vld [vmem:[#allocation2 + $0x30] sm:$0xff]  }
  0xb6   : > { %v1947_v22 = vrot.slane %v1823_v41, 5  ;;  %v1474_v62 = vsel %vm5692_vm12, %v1469_v3, %v1473_v46  ;;  %v1487_v49 = vrot.slane %v1485_v52, 5  ;;  %v1950_v21 = vrot.slane %v1824_v7, 5  ;;  %1244 = vst.msk [vmem:[#allocation3 + $0x20] sm:$0xff] %vm1239_vm15, %v5498_v63  ;;  %v5481_v52 = vld [vmem:[#allocation2 + $0x54] sm:$0xff]  }
  0xb7   : > { %v1482_v19 = vor.u32 %v1481_v16, %v1478_v10  ;;  %v5003_v30 = vcombine.low %v1464_v53, %v1474_v62  ;;  %4160 = vrot.lane.b32.xlu0 %v5162_v58, %s5556_s10  ;;  %v1491_v37 = vrot.slane %v1489_v0, 4  ;;  %v1497_v2 = vrot.slane %v1495_v18, 5  ;;  %v2324_v53 = vld [vmem:[#allocation2 + $0x58] sm:$0xf] }
  0xb8   : > { %v1948_v39 = vsel %vm5636_vm8, %v5019_v34, %v1947_v22  ;;  %v1949_v60 = vrot.slane %v1947_v22, 4  ;;  %v5020_v42 = vrot.slane %v1825_v56, 9  ;;  %v1954_v4 = vrot.slane %v1826_v14, 5  ;;  %v6206_v48 = vpop.permute.xlu0 %4152  ;;  %v2325_v56 = vld [vmem:[#allocation2 + $0x5c] sm:$0x1] }
  0xb9   : > { %v1483_v35 = vrot.slane %v1482_v19, 4  ;;  %1751 = vrot.lane.b32.xlu1 %v5003_v30, %s5552_s6  ;;  %v1492_v43 = vor.u32 %v1491_v37, %v1487_v49  ;;  %v1957_v45 = vrot.slane %v1827_v55, 5  ;;  %v796_v46 = vshrl.u32 %v6098_v11, 16  ;;  %v6204_v25 = vpop.permute.xlu1 %3108  ;;  %v1052_v34 = vld [vmem:[#allocation2 + $0x68] sm:$0x1]  ;;  %v5499_v37 = vld [vmem:[#allocation2 + $0x3c] sm:$0xff]  }
  0xba   : > { %v799_v50 = vshll.u32 %v6098_v11, 16  ;;  %v1951_v20 = vsel %vm5636_vm8, %v1949_v60, %v1950_v21  ;;  %v6202_v29 = vsel %vm5636_vm8, %v5020_v42, %v1954_v4  ;;  %v1956_v38 = vrot.slane %v1954_v4, 4  ;;  %v2868_v22 = vld [vmem:[#allocation2 + $0x54] sm:$0xe]  ;;  %v2869_v62 = vld [vmem:[#allocation2 + $0x58] sm:$0xf] }
  0xbb   : > { %v1488_v28 = vsel %vm5692_vm12, %v1483_v35, %v1487_v49  ;;  %v1493_v41 = vrot.slane %v1492_v43, 4  ;;  %v5035_v11 = vcombine.low %v1948_v39, %v1951_v20  ;;  %v798_v7 = vrot.slane %v796_v46, 7  ;;  %v2870_v55 = vld [vmem:[#allocation2 + $0x5c] sm:$0x1]  ;;  %v377_v42 = vld [vmem:[#allocation2 + $0x74] sm:$0x1] }
  0xbc   : > { %v804_v13 = vshrl.u32 %v6106_v32, 16  ;;  %v1958_v9 = vsel %vm5636_vm8, %v1956_v38, %v1957_v45  ;;  %v807_v10 = vshll.u32 %v6106_v32, 16  ;;  %v2498_v14 = vshrl.u32 %v2323_v57, 16  ;;  %1245 = vst.msk [vmem:[#allocation3 + $0x28] sm:$0xff] %vm1239_vm15, %v5499_v37 }
  0xbd   : > { %v2501_v3 = vshll.u32 %v2323_v57, 16  ;;  %v1498_v58 = vsel %vm5692_vm12, %v1493_v41, %v1497_v2  ;;  %2075 = vrot.lane.b32.xlu0 %v5035_v11, %s5551_s30  ;;  %v5036_v16 = vcombine.low %v6202_v29, %v1958_v9  ;;  %v801_v0 = vor.u32 %v799_v50, %v798_v7  ;;  %v6217_v30 = vpop.permute.xlu1 %2069  ;;  %v6222_v50 = vpop.permute.xlu0 %2067  ;;  %v324_v11 = vld [vmem:[#allocation2 + $0x78] sm:$0x1] }
  0xbe   : > { %v802_v18 = vrot.slane %v798_v7, 4  ;;  %v5004_v19 = vcombine.low %v1488_v28, %v1498_v58  ;;  %v806_v32 = vrot.slane %v804_v13, 7  ;;  %v2500_v49 = vrot.slane %v2498_v14, 4  ;;  %v5365_v58 = vld [vmem:[%s5645_s25 + $0x50] sm:$0xff]  }
  0xbf   : > { %v2503_v21 = vrot.slane %v2501_v3, 5  ;;  %v1049_v2 = vsel %vm5702_vm13, %v801_v0, %v1048_v44  ;;  %v2507_v39 = vshll.u32 %v2324_v53, 16  ;;  %v2511_v35 = vshrl.u32 %v2324_v53, 16 }
  0xc0   : > { %v2517_v60 = vshll.u32 %v2325_v56, 16  ;;  %1753 = vrot.lane.b32.xlu1 %v5004_v19, %s5552_s6  ;;  %v809_v4 = vor.u32 %v807_v10, %v806_v32  ;;  %v811_v43 = vrot.slane %v806_v32, 4  ;;  %1050 = vst [vmem:[#allocation2 + $0x60] sm:$0xf] %v1049_v2  ;;  %v5083_v46 = vrot.slane %v2868_v22, 9 }
  0xc1   : > { %v2504_v45 = vor.u32 %v2503_v21, %v2500_v49  ;;  %2252 = vrot.lane.b32.xlu0 %v5481_v52, %s5553_s7  ;;  %v2509_v57 = vrot.slane %v2507_v39, 5  ;;  %v2513_v28 = vrot.slane %v2511_v35, 4  ;;  %v2990_v29 = vrot.slane %v2869_v62, 5  ;;  %v6230_v7 = vpop.permute.xlu1 %2787  ;;  %v6246_v52 = vld [vmem:[%s5645_s25 + $0x58] sm:$0xff]  }
  0xc2   : > { %v2519_v20 = vrot.slane %v2517_v60, 5  ;;  %v810_v38 = vsel %vm5709_vm14, %v802_v18, %v809_v4  ;;  %v1053_v63 = vsel %vm5615_vm3, %v811_v43, %v1052_v34  ;;  %v2993_v41 = vrot.slane %v2870_v55, 5 }
  0xc3   : > { %v2505_v44 = vrot.slane %v2504_v45, 4  ;;  %1051 = vst.msk [vmem:[#allocation2 + $0x64] sm:$0xf] %vm282_vm0, %v810_v38  ;;  %v2514_v13 = vor.u32 %v2513_v28, %v2509_v57  ;;  %1054 = vst [vmem:[#allocation2 + $0x68] sm:$0x1] %v1053_v63  ;;  %v6235_v53 = vsel %vm5636_vm8, %v5083_v46, %v2990_v29  ;;  %v2992_v9 = vrot.slane %v2990_v29, 4 }
  0xc4   : > { %v562_v10 = vmax.f32 %v6102_v6, 0.0  ;;  %2077 = vrot.lane.b32.xlu1 %v5036_v16, %s5551_s30  ;;  %v563_v14 = vmax.f32 %v6109_v33, 0.0  ;;  %v378_v3 = vsel %vm5627_vm7, 0, %v377_v42  ;;  %v325_v6 = vsel %vm5615_vm3, 0, %v324_v11 }
  0xc5   : > { %v2510_v56 = vsel %vm5692_vm12, %v2505_v44, %v2509_v57  ;;  %v2515_v0 = vrot.slane %v2514_v13, 4  ;;  %v2994_v18 = vsel %vm5636_vm8, %v2992_v9, %v2993_v41  ;;  %379 = vst [vmem:[#allocation2 + $0x74] sm:$0x1] %v378_v3  ;;  %326 = vst [vmem:[#allocation2 + $0x78] sm:$0x1] %v325_v6  ;;  %v6261_v22 = vadd.f32 %v5964_v61, %v6128_v54  ;;  %v6264_v19 = vpop.permute.xlu1 %3831 }
  0xc6   : > { %v6250_v34 = vpack.c.bf16 %v562_v10, %v562_v10  ;;  %v5099_v33 = vcombine.low %v6235_v53, %v2994_v18  ;;  %v6257_v16 = vpack.c.bf16 %v563_v14, %v563_v14  ;;  %v564_v62 = vmax.f32 %v6153_v59, 0.0  ;;  %v1742_v32 = vpop.permute.xlu0 %1741  ;;  %v1055_v41 = vld [vmem:[#allocation2 + $0x6c] sm:$0xf]  ;;  %v6294_v14 = vld [vmem:[%s7209_s2] ss:$0 sm:$0xff] }
  0xc7   : > { %v2520_v36 = vsel %vm5692_vm12, %v2515_v0, %v2519_v20  ;;  %v2326_v49 = vld [vmem:[#allocation2 + $0x60] sm:$0xf]  ;;  %1789 = vst.msk [vmem:[#allocation3 + $0x8] sm:$0xff] %vm1787_vm1, %v1742_v32  ;;  %v5334_v55 = vunpack.c.l.bf16 %v5365_v58  ;;  %v5335_v37 = vunpack.c.h.bf16 %v5365_v58  ;;  %v5338_v2 = vunpack.c.l.bf16 %v6246_v52 }
  0xc8   : > { %v2871_v21 = vld [vmem:[#allocation2 + $0x60] sm:$0xe]  ;;  %v5067_v39 = vcombine.low %v2510_v56, %v2520_v36  ;;  %v2522_v35 = vshrl.u32 %v2326_v49, 16  ;;  %v2525_v61 = vshll.u32 %v2326_v49, 16  ;;  %2113 = vst.msk [vmem:[#allocation3 + $0x8] sm:$0xff] %vm2111_vm2, %v6188_v23  ;;  %v813_v59 = vshrl.u32 %v6250_v34, 16 }
  0xc9   : > { %v5084_v54 = vrot.slane %v2871_v21, 9  ;;  %v816_v60 = vshll.u32 %v6250_v34, 16  ;;  %v821_v42 = vshrl.u32 %v6257_v16, 16  ;;  %v824_v4 = vshll.u32 %v6257_v16, 16  ;;  %2290 = vst.msk [vmem:[#allocation3 + $0x8] sm:$0xff] %vm7213_vm4, %v6141_v27 }
  0xca   : > { %v5482_v43 = vld [vmem:[#allocation2 + $0x60] sm:$0xff]   ;;  %2797 = vrot.lane.b32.xlu0 %v5067_v39, %s5557_s11  ;;  %v2524_v46 = vrot.slane %v2522_v35, 4  ;;  %v6279_v57 = vpack.c.bf16 %v564_v62, %v564_v62  ;;  %v1744_v29 = vpop.permute.xlu1 %1743  ;;  %v2328_v38 = vld [vmem:[#allocation2 + $0x68] sm:$0x1]  ;;  %v2527_v44 = vrot.slane %v2525_v61, 5  ;;  %v5339_v13 = vunpack.c.h.bf16 %v6246_v52 }
  0xcb   : > { %v2327_v45 = vld [vmem:[#allocation2 + $0x64] sm:$0xf]  ;;  %v6284_v23 = vld [vmem:[%s7208_s1] ss:$0 sm:$0xff]  ;;  %1790 = vst.msk [vmem:[#allocation3 + $0x10] sm:$0xff] %vm1787_vm1, %v1744_v29  ;;  %2254 = vrot.lane.b32.xlu1 %v5482_v43, %s5553_s7  ;;  %v2541_v53 = vshll.u32 %v2328_v38, 16 }
  0xcc   : > { %v495_v28 = vmul.f32 %v6284_v23, %v5334_v55  ;;  %v496_v20 = vmul.f32 %v6284_v23, %v5335_v37  ;;  %v2531_v27 = vshll.u32 %v2327_v45, 16  ;;  %v2535_v63 = vshrl.u32 %v2327_v45, 16  ;;  %v3367_v11 = vld [vmem:[#allocation2 + $0x60] sm:$0xf]  ;;  %v2872_v9 = vld [vmem:[#allocation2 + $0x64] sm:$0xf] }
  0xcd   : > { %v2873_v10 = vld [vmem:[#allocation2 + $0x68] sm:$0x1]  ;;  %v815_v56 = vrot.slane %v813_v59, 7  ;;  %2114 = vst.msk [vmem:[#allocation3 + $0x10] sm:$0xff] %vm2111_vm2, %v6222_v50  ;;  %v2528_v0 = vor.u32 %v2527_v44, %v2524_v46  ;;  %v2997_v6 = vrot.slane %v2872_v9, 5  ;;  %v2543_v16 = vrot.slane %v2541_v53, 5 }
  0xce   : > { %v6297_v3 = vadd.f32 %v6294_v14, %v495_v28  ;;  %v6300_v58 = vadd.f32 %v6294_v14, %v496_v20  ;;  %v2533_v18 = vrot.slane %v2531_v27, 5  ;;  %v2537_v34 = vrot.slane %v2535_v63, 4  ;;  %2291 = vst.msk [vmem:[#allocation3 + $0x10] sm:$0xff] %vm7213_vm4, %v6163_v17  ;;  %3118 = vrot.lane.b32.xlu0 %v5099_v33, %s5555_s9  ;;  %v5484_v32 = vld [vmem:[#allocation2 + $0x60] sm:$0xff]   ;;  %v3369_v59 = vld [vmem:[#allocation2 + $0x68] sm:$0x1] }
  0xcf   : > { %v3000_v62 = vrot.slane %v2873_v10, 5  ;;  %v818_v36 = vor.u32 %v816_v60, %v815_v56  ;;  %v819_v49 = vrot.slane %v815_v56, 4  ;;  %v3368_v21 = vld [vmem:[#allocation2 + $0x64] sm:$0xf]  ;;  %v2529_v55 = vrot.slane %v2528_v0, 4 }
  0xd0   : > { %v2538_v37 = vor.u32 %v2537_v34, %v2533_v18  ;;  %v2998_v50 = vsel %vm5636_vm8, %v5084_v54, %v2997_v6  ;;  %v2999_v39 = vrot.slane %v2997_v6, 4  ;;  %v823_v35 = vrot.slane %v821_v42, 7  ;;  %v1059_v28 = vld [vmem:[#allocation2 + $0x74] sm:$0x1]  ;;  %v3912_v20 = vld [vmem:[#allocation2 + $0x60] sm:$0xe]  ;;  %v6315_v54 = vpop.permute.xlu0 %2785 }
  0xd1   : > { %v1056_v61 = vsel %vm5702_vm13, %v818_v36, %v1055_v41  ;;  %v3542_v17 = vshrl.u32 %v3367_v11, 16  ;;  %v3545_v43 = vshll.u32 %v3367_v11, 16  ;;  %v2534_v33 = vsel %vm5692_vm12, %v2529_v55, %v2533_v18  ;;  %v3913_v27 = vld [vmem:[#allocation2 + $0x64] sm:$0xf]  ;;  %v3914_v63 = vld [vmem:[#allocation2 + $0x68] sm:$0x1] }
  0xd2   : > { %v2539_v45 = vrot.slane %v2538_v37, 4  ;;  %v3001_v60 = vsel %vm5636_vm8, %v2999_v39, %v3000_v62  ;;  %1057 = vst [vmem:[#allocation2 + $0x6c] sm:$0xf] %v1056_v61  ;;  %v3551_v46 = vshll.u32 %v3368_v21, 16  ;;  %3296 = vrot.lane.b32.xlu0 %v5484_v32, %s5554_s8  ;;  %v826_v29 = vor.u32 %v824_v4, %v823_v35  ;;  %v1746_v41 = vpop.permute.xlu1 %1745  ;;  %v1280_v56 = vld [vmem:[#allocation2 + $0x60] sm:$0xf] }
  0xd3   : > { %v5100_v42 = vcombine.low %v2998_v50, %v3001_v60  ;;  %v828_v38 = vrot.slane %v823_v35, 4  ;;  %v3544_v44 = vrot.slane %v3542_v17, 4  ;;  %v3547_v53 = vrot.slane %v3545_v43, 5  ;;  %1791 = vst.msk [vmem:[#allocation3 + $0x18] sm:$0xff] %vm1787_vm1, %v1746_v41  ;;  %v1281_v35 = vld [vmem:[#allocation2 + $0x64] sm:$0xf] }
  0xd4   : > { %v2544_v11 = vsel %vm5692_vm12, %v2539_v45, %v2543_v16  ;;  %v3553_v9 = vrot.slane %v3551_v46, 5  ;;  %v3555_v10 = vshrl.u32 %v3368_v21, 16  ;;  %v827_v18 = vsel %vm5709_vm14, %v819_v49, %v826_v29  ;;  %2115 = vst.msk [vmem:[#allocation3 + $0x18] sm:$0xff] %vm2111_vm2, %v6217_v30  ;;  %v1282_v29 = vld [vmem:[#allocation2 + $0x68] sm:$0x1] }
  0xd5   : > { %v5068_v0 = vcombine.low %v2534_v33, %v2544_v11  ;;  %v3561_v34 = vshll.u32 %v3369_v59, 16  ;;  %v1060_v4 = vsel %vm5615_vm3, %v828_v38, %v1059_v28  ;;  %1058 = vst.msk [vmem:[#allocation2 + $0x70] sm:$0xf] %vm282_vm0, %v827_v18  ;;  %v3548_v6 = vor.u32 %v3547_v53, %v3544_v44 }
  0xd6   : > { %v3557_v16 = vrot.slane %v3555_v10, 4  ;;  %1061 = vst [vmem:[#allocation2 + $0x74] sm:$0x1] %v1060_v4  ;;  %v5147_v62 = vrot.slane %v3912_v20, 9  ;;  %v4034_v32 = vrot.slane %v3913_v27, 5  ;;  %2292 = vst.msk [vmem:[#allocation3 + $0x18] sm:$0xff] %vm7213_vm4, %v6176_v51  ;;  %v497_v51 = vmul.f32 %v6284_v23, %v5338_v2 }
  0xd7   : > { %2799 = vrot.lane.b32.xlu1 %v5068_v0, %s5557_s11  ;;  %v3563_v36 = vrot.slane %v3561_v34, 5  ;;  %v4037_v49 = vrot.slane %v3914_v63, 5  ;;  %v1500_v21 = vshrl.u32 %v1280_v56, 16  ;;  %v1503_v55 = vshll.u32 %v1280_v56, 16  ;;  %v6333_v61 = vpop.permute.xlu0 %3829 }
  0xd8   : > { %v3549_v37 = vrot.slane %v3548_v6, 4  ;;  %v3558_v50 = vor.u32 %v3557_v16, %v3553_v9  ;;  %v4035_v30 = vsel %vm5636_vm8, %v5147_v62, %v4034_v32  ;;  %v4036_v39 = vrot.slane %v4034_v32, 4 }
  0xd9   : > { %v3370_v59 = vld [vmem:[#allocation2 + $0x6c] sm:$0xf]  ;;  %v1502_v17 = vrot.slane %v1500_v21, 4  ;;  %v1505_v43 = vrot.slane %v1503_v55, 5  ;;  %v498_v33 = vmul.f32 %v6284_v23, %v5339_v13  ;;  %v1509_v44 = vshll.u32 %v1281_v35, 16 }
  0xda   : > { %v3554_v45 = vsel %vm5692_vm12, %v3549_v37, %v3553_v9  ;;  %v3559_v60 = vrot.slane %v3558_v50, 4  ;;  %v3566_v46 = vshrl.u32 %v3370_v59, 16  ;;  %v3569_v28 = vshll.u32 %v3370_v59, 16  ;;  %v3915_v41 = vld [vmem:[#allocation2 + $0x6c] sm:$0xe] }
  0xdb   : > { %3120 = vrot.lane.b32.xlu1 %v5100_v42, %s5555_s9  ;;  %v4038_v20 = vsel %vm5636_vm8, %v4036_v39, %v4037_v49  ;;  %v1506_v38 = vor.u32 %v1505_v43, %v1502_v17  ;;  %v1513_v27 = vshrl.u32 %v1281_v35, 16  ;;  %v1283_v56 = vld [vmem:[#allocation2 + $0x6c] sm:$0xf]  ;;  %v6348_v42 = vpop.permute.xlu0 %2789  ;;  %v6351_v0 = vadd.f32 %v6294_v14, %v497_v51 }
  0xdc   : > { %v3564_v52 = vsel %vm5692_vm12, %v3559_v60, %v3563_v36  ;;  %v3568_v2 = vrot.slane %v3566_v46, 4  ;;  %v3571_v13 = vrot.slane %v3569_v28, 5  ;;  %v5163_v63 = vcombine.low %v4035_v30, %v4038_v20  ;;  %v5485_v11 = vld [vmem:[#allocation2 + $0x6c] sm:$0xff]  }
  0xdd   : > { %v5131_v53 = vcombine.low %v3554_v45, %v3564_v52  ;;  %v3371_v9 = vld [vmem:[#allocation2 + $0x70] sm:$0xf]  ;;  %v1507_v10 = vrot.slane %v1506_v38, 4  ;;  %v6354_v18 = vadd.f32 %v6294_v14, %v498_v33  ;;  %v3372_v34 = vld [vmem:[#allocation2 + $0x74] sm:$0x1]  ;;  %v1511_v62 = vrot.slane %v1509_v44, 5 }
  0xde   : > { %v3572_v4 = vor.u32 %v3571_v13, %v3568_v2  ;;  %v3575_v6 = vshll.u32 %v3371_v9, 16  ;;  %v3579_v16 = vshrl.u32 %v3371_v9, 16  ;;  %v3585_v32 = vshll.u32 %v3372_v34, 16  ;;  %v3916_v21 = vld [vmem:[#allocation2 + $0x70] sm:$0xf] }
  0xdf   : > { %3298 = vrot.lane.b32.xlu1 %v5485_v11, %s5554_s8  ;;  %3841 = vrot.lane.b32.xlu0 %v5131_v53, %s5558_s12  ;;  %v1515_v36 = vrot.slane %v1513_v27, 4  ;;  %v1519_v49 = vshll.u32 %v1282_v29, 16  ;;  %v5148_v55 = vrot.slane %v3915_v41, 9  ;;  %v1512_v39 = vsel %vm5692_vm12, %v1507_v10, %v1511_v62  ;;  %v3917_v35 = vld [vmem:[#allocation2 + $0x74] sm:$0x1]  ;;  %v6360_v45 = vpop.permute.xlu0 %3110 }
  0xe0   : > { %v3573_v37 = vrot.slane %v3572_v4, 4  ;;  %v3577_v50 = vrot.slane %v3575_v6, 5  ;;  %v3581_v30 = vrot.slane %v3579_v16, 4  ;;  %v3587_v59 = vrot.slane %v3585_v32, 5  ;;  %v1284_v33 = vld [vmem:[#allocation2 + $0x70] sm:$0xf] }
  0xe1   : > { %v1516_v17 = vor.u32 %v1515_v36, %v1511_v62  ;;  %v1521_v43 = vrot.slane %v1519_v49, 5  ;;  %v4041_v51 = vrot.slane %v3916_v21, 5  ;;  %v4044_v28 = vrot.slane %v3917_v35, 5  ;;  %v1285_v20 = vld [vmem:[#allocation2 + $0x74] sm:$0x1] }
  0xe2   : > { %v3578_v60 = vsel %vm5692_vm12, %v3573_v37, %v3577_v50  ;;  %v3582_v46 = vor.u32 %v3581_v30, %v3577_v50  ;;  %v1524_v29 = vshrl.u32 %v1283_v56, 16  ;;  %v1527_v52 = vshll.u32 %v1283_v56, 16  ;;  %v1828_v2 = vld [vmem:[#allocation2 + $0x60] sm:$0xe]  ;;  %v1829_v13 = vld [vmem:[#allocation2 + $0x64] sm:$0xf] }
  0xe3   : > { %4162 = vrot.lane.b32.xlu0 %v5163_v63, %s5556_s10  ;;  %v1517_v38 = vrot.slane %v1516_v17, 4  ;;  %v4042_v44 = vsel %vm5636_vm8, %v5148_v55, %v4041_v51  ;;  %v4043_v27 = vrot.slane %v4041_v51, 4  ;;  %v1533_v53 = vshll.u32 %v1284_v33, 16  ;;  %v1830_v6 = vld [vmem:[#allocation2 + $0x68] sm:$0x1]  ;;  %v6373_v35 = vpop.permute.xlu0 %3288 }
  0xe4   : > { %v3583_v41 = vrot.slane %v3582_v46, 4  ;;  %v1526_v11 = vrot.slane %v1524_v29, 4  ;;  %v1537_v9 = vshrl.u32 %v1284_v33, 16  ;;  %v1529_v4 = vrot.slane %v1527_v52, 5  ;;  %v1831_v16 = vld [vmem:[#allocation2 + $0x6c] sm:$0xe] }
  0xe5   : > { %v1522_v10 = vsel %vm5692_vm12, %v1517_v38, %v1521_v43  ;;  %v4045_v34 = vsel %vm5636_vm8, %v4043_v27, %v4044_v28  ;;  %v1543_v63 = vshll.u32 %v1285_v20, 16  ;;  %v1535_v36 = vrot.slane %v1533_v53, 5  ;;  %v1832_v49 = vld [vmem:[#allocation2 + $0x70] sm:$0xf]  ;;  %v1833_v21 = vld [vmem:[#allocation2 + $0x74] sm:$0x1]  ;;  %v6376_v28 = vpop.permute.xlu1 %2791 }
  0xe6   : > { %v3588_v62 = vsel %vm5692_vm12, %v3583_v41, %v3587_v59  ;;  %v5005_v56 = vcombine.low %v1512_v39, %v1522_v10  ;;  %v5164_v32 = vcombine.low %v4042_v44, %v4045_v34  ;;  %v1530_v37 = vor.u32 %v1529_v4, %v1526_v11  ;;  %v2329_v46 = vld [vmem:[#allocation2 + $0x6c] sm:$0xf] }
  0xe7   : > { %v5132_v55 = vcombine.low %v3578_v60, %v3588_v62  ;;  %v1539_v50 = vrot.slane %v1537_v9, 4  ;;  %v1545_v30 = vrot.slane %v1543_v63, 5  ;;  %v5021_v17 = vrot.slane %v1828_v2, 9  ;;  %v5504_v29 = vld [vmem:[#allocation2 + $0x48] sm:$0xff]   ;;  %v2331_v62 = vld [vmem:[#allocation2 + $0x74] sm:$0x1] }
  0xe8   : > { %4164 = vrot.lane.b32.xlu0 %v5164_v32, %s5556_s10  ;;  %v1961_v43 = vrot.slane %v1829_v13, 5  ;;  %v1964_v51 = vrot.slane %v1830_v6, 5  ;;  %v5022_v33 = vrot.slane %v1831_v16, 9  ;;  %v1531_v39 = vrot.slane %v1530_v37, 4  ;;  %1246 = vst.msk [vmem:[#allocation3 + $0x30] sm:$0xff] %vm1239_vm15, %v5504_v29  ;;  %v5486_v37 = vld [vmem:[#allocation2 + $0x6c] sm:$0xff]  }
  0xe9   : > { %3843 = vrot.lane.b32.xlu1 %v5132_v55, %s5558_s12  ;;  %v1540_v59 = vor.u32 %v1539_v50, %v1535_v36  ;;  %v1968_v20 = vrot.slane %v1832_v49, 5  ;;  %v1971_v60 = vrot.slane %v1833_v21, 5  ;;  %v565_v27 = vmax.f32 %v6261_v22, 0.0  ;;  %v1062_v22 = vld [vmem:[#allocation2 + $0x78] sm:$0xf] }
  0xea   : > { %v1962_v38 = vsel %vm5636_vm8, %v5021_v17, %v1961_v43  ;;  %v1963_v44 = vrot.slane %v1961_v43, 4  ;;  %v830_v52 = vshrl.u32 %v6279_v57, 16  ;;  %v1536_v2 = vsel %vm5692_vm12, %v1531_v39, %v1535_v36  ;;  %v2330_v16 = vld [vmem:[#allocation2 + $0x70] sm:$0xf]  ;;  %v5505_v49 = vld [vmem:[#allocation2 + $0x54] sm:$0xff]   ;;  %v3113_v43 = vpop.permute.xlu1 %3112 }
  0xeb   : > { %v1541_v13 = vrot.slane %v1540_v59, 4  ;;  %v1969_v41 = vsel %vm5636_vm8, %v5022_v33, %v1968_v20  ;;  %v1970_v11 = vrot.slane %v1968_v20, 4  ;;  %v5247_v9 = vpack.c.bf16 %v565_v27, %v565_v27  ;;  %v380_v17 = vld [vmem:[#allocation2 + $0x80] sm:$0x1]  ;;  %v2875_v59 = vld [vmem:[#allocation2 + $0x70] sm:$0xf] }
  0xec   : > { %v1965_v53 = vsel %vm5636_vm8, %v1963_v44, %v1964_v51  ;;  %v832_v10 = vrot.slane %v830_v52, 7  ;;  %v833_v34 = vshll.u32 %v6279_v57, 16  ;;  %v2546_v32 = vshrl.u32 %v2329_v46, 16  ;;  %v6396_v36 = vpop.permute.xlu0 %3833  ;;  %1247 = vst.msk [vmem:[#allocation3 + $0x38] sm:$0xff] %vm1239_vm15, %v5505_v49  ;;  %v2876_v44 = vld [vmem:[#allocation2 + $0x74] sm:$0x1] }
  0xed   : > { %1755 = vrot.lane.b32.xlu1 %v5005_v56, %s5552_s6  ;;  %v1546_v4 = vsel %vm5692_vm12, %v1541_v13, %v1545_v30  ;;  %v5037_v63 = vcombine.low %v1962_v38, %v1965_v53  ;;  %v1972_v6 = vsel %vm5636_vm8, %v1970_v11, %v1971_v60  ;;  %v2874_v56 = vld [vmem:[#allocation2 + $0x6c] sm:$0xe]  ;;  %v838_v30 = vshrl.u32 %v5247_v9, 16 }
  0xee   : > { %v5006_v21 = vcombine.low %v1536_v2, %v1546_v4  ;;  %v5038_v55 = vcombine.low %v1969_v41, %v1972_v6  ;;  %v835_v57 = vor.u32 %v833_v34, %v832_v10  ;;  %v836_v50 = vrot.slane %v832_v10, 4 }
  0xef   : > { %2079 = vrot.lane.b32.xlu0 %v5037_v63, %s5551_s30  ;;  %v841_v51 = vshll.u32 %v5247_v9, 16  ;;  %v2548_v33 = vrot.slane %v2546_v32, 4  ;;  %v2549_v39 = vshll.u32 %v2329_v46, 16  ;;  %v2555_v60 = vshll.u32 %v2330_v16, 16  ;;  %v3291_v32 = vpop.permute.xlu1 %3290 }
  0xf0   : > { %v1063_v20 = vsel %vm5702_vm13, %v835_v57, %v1062_v22  ;;  %v2559_v29 = vshrl.u32 %v2330_v16, 16  ;;  %v2565_v38 = vshll.u32 %v2331_v62, 16  ;;  %v6403_v27 = vrot.slane %v838_v30, 7  ;;  %v4155_v4 = vpop.permute.xlu0 %4154  ;;  %v327_v62 = vld [vmem:[#allocation2 + $0x84] sm:$0x1] }
  0xf1   : > { %1757 = vrot.lane.b32.xlu1 %v5006_v21, %s5552_s6  ;;  %1064 = vst [vmem:[#allocation2 + $0x78] sm:$0xf] %v1063_v20  ;;  %v2551_v52 = vrot.slane %v2549_v39, 5  ;;  %v381_v2 = vsel %vm5627_vm7, 0, %v380_v17  ;;  %v5085_v46 = vrot.slane %v2874_v56, 9  ;;  %v2557_v13 = vrot.slane %v2555_v60, 5 }
  0xf2   : > { %v2561_v41 = vrot.slane %v2559_v29, 4  ;;  %v2567_v11 = vrot.slane %v2565_v38, 5  ;;  %382 = vst [vmem:[#allocation2 + $0x80] sm:$0x1] %v381_v2  ;;  %v3004_v53 = vrot.slane %v2875_v59, 5  ;;  %v843_v9 = vor.u32 %v841_v51, %v6403_v27 }
  0xf3   : > { %2256 = vrot.lane.b32.xlu0 %v5486_v37, %s5553_s7  ;;  %v845_v10 = vrot.slane %v6403_v27, 4  ;;  %v2552_v34 = vor.u32 %v2551_v52, %v2548_v33  ;;  %v3007_v22 = vrot.slane %v2876_v44, 5  ;;  %vm2833_vm5 = vcmask 162944   ;;  %v6426_v37 = vld [vmem:[%s5645_s25 + $0x60] sm:$0xff]  }
  0xf4   : > { %v2562_v63 = vor.u32 %v2561_v41, %v2557_v13  ;;  %v6412_v6 = vsel %vm5636_vm8, %v5085_v46, %v3004_v53  ;;  %v3006_v16 = vrot.slane %v3004_v53, 4  ;;  %v844_v49 = vsel %vm5709_vm14, %v836_v50, %v843_v9  ;;  %2835 = vst.msk [vmem:[#allocation3 + $0x8] sm:$0xff] %vm2833_vm5, %v6230_v7  ;;  %2834 = vst.msk [vmem:[#allocation3] sm:$0xff] %vm2833_vm5, %v6315_v54 }
  0xf5   : > { %2081 = vrot.lane.b32.xlu1 %v5038_v55, %s5551_s30  ;;  %v2553_v21 = vrot.slane %v2552_v34, 4  ;;  %vm3154_vm6 = vcmask 195744   ;;  %vm3332_vm9 = vcmask 228544   ;;  %2836 = vst.msk [vmem:[#allocation3 + $0x10] sm:$0xff] %vm2833_vm5, %v6348_v42  ;;  %2837 = vst.msk [vmem:[#allocation3 + $0x18] sm:$0xff] %vm2833_vm5, %v6376_v28  ;;  %v6429_v55 = vld [vmem:[%s5645_s25 + $0x68] sm:$0xff]  }
  0xf6   : > { %1065 = vst.msk [vmem:[#allocation2 + $0x7c] sm:$0xf] %vm282_vm0, %v844_v49  ;;  %v2563_v57 = vrot.slane %v2562_v63, 4  ;;  %v6434_v50 = vsel %vm5636_vm8, %v3006_v16, %v3007_v22  ;;  %vm3877_vm10 = vcmask 261344   ;;  %vm7214_vm11 = vcmask 294144  }
  0xf7   : > { %3156 = vst.msk [vmem:[#allocation3 + $0x8] sm:$0xff] %vm3154_vm6, %v6204_v25  ;;  %3155 = vst.msk [vmem:[#allocation3] sm:$0xff] %vm3154_vm6, %v6167_v47  ;;  %v2558_v7 = vsel %vm5692_vm12, %v2553_v21, %v2557_v13  ;;  %v5101_v54 = vcombine.low %v6412_v6, %v6434_v50  ;;  %v328_v25 = vsel %vm5615_vm3, 0, %v327_v62  ;;  %v566_v42 = vmax.f32 %v6297_v3, 0.0  ;;  %v383_v47 = vld [vmem:[#allocation2 + $0x8c] sm:$0x1] }
  0xf8   : > { %3157 = vst.msk [vmem:[#allocation3 + $0x10] sm:$0xff] %vm3154_vm6, %v6360_v45  ;;  %3158 = vst.msk [vmem:[#allocation3 + $0x18] sm:$0xff] %vm3154_vm6, %v3113_v43  ;;  %v2568_v45 = vsel %vm5692_vm12, %v2563_v57, %v2567_v11  ;;  %v2332_v28 = vld [vmem:[#allocation2 + $0x78] sm:$0xf]  ;;  %v5346_v3 = vunpack.c.l.bf16 %v6429_v55  ;;  %v384_v59 = vsel %vm5627_vm7, 0, %v383_v47 }
  0xf9   : > { %3334 = vst.msk [vmem:[#allocation3 + $0x8] sm:$0xff] %vm3332_vm9, %v6161_v40  ;;  %3333 = vst.msk [vmem:[#allocation3] sm:$0xff] %vm3332_vm9, %v6146_v24  ;;  %v6459_v17 = vld [vmem:[#allocation2 + $0x78] sm:$0xe]  ;;  %v5342_v24 = vunpack.c.l.bf16 %v6426_v37  ;;  %v5343_v40 = vunpack.c.h.bf16 %v6426_v37  ;;  %v1066_v56 = vld [vmem:[#allocation2 + $0x80] sm:$0x1]  ;;  %v5248_v33 = vpack.c.bf16 %v566_v42, %v566_v42 }
  0xfa   : > { %3335 = vst.msk [vmem:[#allocation3 + $0x10] sm:$0xff] %vm3332_vm9, %v6373_v35  ;;  %3336 = vst.msk [vmem:[#allocation3 + $0x18] sm:$0xff] %vm3332_vm9, %v3291_v32  ;;  %v5069_v35 = vcombine.low %v2558_v7, %v2568_v45  ;;  %v2570_v43 = vshrl.u32 %v2332_v28, 16  ;;  %v2573_v30 = vshll.u32 %v2332_v28, 16  ;;  %v5086_v51 = vrot.slane %v6459_v17, 9  ;;  %v3836_v38 = vpop.permute.xlu1 %3835 }
  0xfb   : > { %3879 = vst.msk [vmem:[#allocation3 + $0x8] sm:$0xff] %vm3877_vm10, %v6264_v19  ;;  %329 = vst [vmem:[#allocation2 + $0x84] sm:$0x1] %v328_v25  ;;  %v4157_v19 = vpop.permute.xlu0 %4156  ;;  %v3373_v39 = vld [vmem:[#allocation2 + $0x78] sm:$0xf]  ;;  %v847_v27 = vshrl.u32 %v5248_v33, 16  ;;  %v6488_v11 = vmul.f32 %v6284_v23, %v5342_v24  ;;  %v6491_v53 = vmul.f32 %v6284_v23, %v5343_v40  ;;  %v6495_v63 = vmul.f32 %v6284_v23, %v5346_v3 }
  0xfc   : > { %3878 = vst.msk [vmem:[#allocation3] sm:$0xff] %vm3877_vm10, %v6333_v61  ;;  %3880 = vst.msk [vmem:[#allocation3 + $0x10] sm:$0xff] %vm3877_vm10, %v6396_v36  ;;  %v1067_v61 = vsel %vm5615_vm3, %v845_v10, %v1066_v56  ;;  %v567_v36 = vmax.f32 %v6300_v58, 0.0  ;;  %2801 = vrot.lane.b32.xlu0 %v5069_v35, %s5557_s11  ;;  %v2575_v20 = vrot.slane %v2573_v30, 5  ;;  %v3590_v60 = vshrl.u32 %v3373_v39, 16 }
  0xfd   : > { %4200 = vst.msk [vmem:[#allocation3 + $0x8] sm:$0xff] %vm7214_vm11, %v6206_v48  ;;  %4199 = vst.msk [vmem:[#allocation3] sm:$0xff] %vm7214_vm11, %v6183_v15  ;;  %v2572_v48 = vrot.slane %v2570_v43, 4  ;;  %v3593_v15 = vshll.u32 %v3373_v39, 16  ;;  %v6482_v29 = vld [vmem:[#allocation2 + $0x78] sm:$0xe] }
  0xfe   : > { %4201 = vst.msk [vmem:[#allocation3 + $0x10] sm:$0xff] %vm7214_vm11, %v4155_v4  ;;  %1068 = vst [vmem:[#allocation2 + $0x80] sm:$0x1] %v1067_v61  ;;  %v5249_v44 = vpack.c.bf16 %v567_v36, %v567_v36  ;;  %v850_v52 = vshll.u32 %v5248_v33, 16  ;;  %v5149_v58 = vrot.slane %v6482_v29, 9  ;;  %v5487_v2 = vld [vmem:[#allocation2 + $0x78] sm:$0xff]   ;;  %v5347_v4 = vunpack.c.h.bf16 %v6429_v55  ;;  %v1748_v21 = vpop.permute.xlu1 %1747 }
  0xff   : > { %385 = vst [vmem:[#allocation2 + $0x8c] sm:$0x1] %v384_v59  ;;  %3881 = vst.msk [vmem:[#allocation3 + $0x18] sm:$0xff] %vm3877_vm10, %v3836_v38  ;;  %v2333_v46 = vld [vmem:[#allocation2 + $0x7c] sm:$0xf]  ;;  %v2576_v13 = vor.u32 %v2575_v20, %v2572_v48  ;;  %v3592_v41 = vrot.slane %v3590_v60, 4  ;;  %v2072_v9 = vpop.permute.xlu0 %2071  ;;  %2258 = vrot.lane.b32.xlu1 %v5487_v2, %s5553_s7  ;;  %v6560_v55 = vadd.f32 %v6294_v14, %v6495_v63 }
 0x100   : > { %4202 = vst.msk [vmem:[#allocation3 + $0x18] sm:$0xff] %vm7214_vm11, %v4157_v19  ;;  %v2579_v10 = vshll.u32 %v2333_v46, 16  ;;  %v2583_v34 = vshrl.u32 %v2333_v46, 16  ;;  %v2878_v22 = vld [vmem:[#allocation2 + $0x7c] sm:$0xf]  ;;  %3122 = vrot.lane.b32.xlu0 %v5101_v54, %s5555_s9  ;;  %v849_v32 = vrot.slane %v847_v27, 7 }
 0x101   : > { %v2577_v6 = vrot.slane %v2576_v13, 4  ;;  %v3011_v16 = vrot.slane %v2878_v22, 5  ;;  %v5489_v62 = vld [vmem:[#allocation2 + $0x78] sm:$0xff]   ;;  %v855_v49 = vshrl.u32 %v5249_v44, 16  ;;  %v858_v50 = vshll.u32 %v5249_v44, 16  ;;  %1792 = vst.msk [vmem:[#allocation3 + $0x20] sm:$0xff] %vm1787_vm1, %v1748_v21 }
 0x102   : > { %v2581_v37 = vrot.slane %v2579_v10, 5  ;;  %v2585_v57 = vrot.slane %v2583_v34, 4  ;;  %v1069_v7 = vld [vmem:[#allocation2 + $0x84] sm:$0xf]  ;;  %v3595_v25 = vrot.slane %v3593_v15, 5  ;;  %v852_v45 = vor.u32 %v850_v52, %v849_v32  ;;  %2116 = vst.msk [vmem:[#allocation3 + $0x20] sm:$0xff] %vm2111_vm2, %v2072_v9  ;;  %v1750_v59 = vpop.permute.xlu1 %1749 }
 0x103   : > { %v6502_v42 = vsel %vm5636_vm8, %v5086_v51, %v3011_v16  ;;  %v3013_v47 = vrot.slane %v3011_v16, 4  ;;  %v853_v28 = vrot.slane %v849_v32, 4  ;;  %v3374_v54 = vld [vmem:[#allocation2 + $0x7c] sm:$0xf]  ;;  %v2249_v17 = vpop.permute.xlu0 %2248  ;;  %v857_v56 = vrot.slane %v855_v49, 7  ;;  %1793 = vst.msk [vmem:[#allocation3 + $0x28] sm:$0xff] %vm1787_vm1, %v1750_v59 }
 0x104   : > { %v2582_v40 = vsel %vm5692_vm12, %v2577_v6, %v2581_v37  ;;  %v2586_v3 = vor.u32 %v2585_v57, %v2581_v37  ;;  %v3596_v43 = vor.u32 %v3595_v25, %v3592_v41  ;;  %v3919_v30 = vld [vmem:[#allocation2 + $0x7c] sm:$0xf]  ;;  %2293 = vst.msk [vmem:[#allocation3 + $0x20] sm:$0xff] %vm7213_vm4, %v2249_v17  ;;  %3300 = vrot.lane.b32.xlu0 %v5489_v62, %s5554_s8  ;;  %v3599_v33 = vshll.u32 %v3374_v54, 16  ;;  %v1286_v39 = vld [vmem:[#allocation2 + $0x78] sm:$0xf] }
 0x105   : > { %v2334_v24 = vld [vmem:[#allocation2 + $0x80] sm:$0x1]  ;;  %v1070_v61 = vsel %vm5702_vm13, %v852_v45, %v1069_v7  ;;  %v860_v20 = vor.u32 %v858_v50, %v857_v56  ;;  %v862_v60 = vrot.slane %v857_v56, 4  ;;  %v3603_v2 = vshrl.u32 %v3374_v54, 16  ;;  %v1287_v62 = vld [vmem:[#allocation2 + $0x7c] sm:$0xf] }
 0x106   : > { %v2879_v35 = vld [vmem:[#allocation2 + $0x80] sm:$0x1]  ;;  %v2589_v51 = vshll.u32 %v2334_v24, 16  ;;  %v2587_v48 = vrot.slane %v2586_v3, 4  ;;  %1071 = vst [vmem:[#allocation2 + $0x84] sm:$0xf] %v1070_v61  ;;  %v2074_v49 = vpop.permute.xlu1 %2073 }
 0x107   : > { %v3014_v19 = vrot.slane %v2879_v35, 5  ;;  %v3375_v36 = vld [vmem:[#allocation2 + $0x80] sm:$0x1]  ;;  %v3597_v15 = vrot.slane %v3596_v43, 4  ;;  %v1073_v38 = vld [vmem:[#allocation2 + $0x8c] sm:$0x1]  ;;  %v861_v41 = vsel %vm5709_vm14, %v853_v28, %v860_v20 }
 0x108   : > { %v2591_v44 = vrot.slane %v2589_v51, 5  ;;  %v3601_v52 = vrot.slane %v3599_v33, 5  ;;  %v3920_v46 = vld [vmem:[#allocation2 + $0x80] sm:$0x1]  ;;  %v3609_v9 = vshll.u32 %v3375_v36, 16  ;;  %v1074_v10 = vsel %vm5615_vm3, %v862_v60, %v1073_v38  ;;  %2117 = vst.msk [vmem:[#allocation3 + $0x28] sm:$0xff] %vm2111_vm2, %v2074_v49  ;;  %v2794_v45 = vpop.permute.xlu0 %2793 }
 0x109   : > { %v3015_v27 = vsel %vm5636_vm8, %v3013_v47, %v3014_v19  ;;  %1072 = vst.msk [vmem:[#allocation2 + $0x88] sm:$0xf] %vm282_vm0, %v861_v41  ;;  %v3605_v6 = vrot.slane %v3603_v2, 4  ;;  %1075 = vst [vmem:[#allocation2 + $0x8c] sm:$0x1] %v1074_v10  ;;  %v4048_v16 = vrot.slane %v3919_v30, 5 }
 0x10a   : > { %v5102_v13 = vcombine.low %v6502_v42, %v3015_v27  ;;  %v2592_v34 = vsel %vm5692_vm12, %v2587_v48, %v2591_v44  ;;  %v3602_v22 = vsel %vm5692_vm12, %v3597_v15, %v3601_v52  ;;  %v1288_v32 = vld [vmem:[#allocation2 + $0x80] sm:$0x1]  ;;  %v3611_v37 = vrot.slane %v3609_v9, 5  ;;  %2838 = vst.msk [vmem:[#allocation3 + $0x20] sm:$0xff] %vm2833_vm5, %v2794_v45 }
 0x10b   : > { %v5070_v21 = vcombine.low %v2582_v40, %v2592_v34  ;;  %v4051_v57 = vrot.slane %v3920_v46, 5  ;;  %v1548_v50 = vshrl.u32 %v1286_v39, 16  ;;  %v3606_v7 = vor.u32 %v3605_v6, %v3601_v52  ;;  %v5495_v15 = vld [vmem:[%s7210_s3 + $0x10] ss:$0 sps:$4 sm:$0x33]  }
 0x10c   : > { %v6529_v25 = vsel %vm5636_vm8, %v5149_v58, %v4048_v16  ;;  %v4050_v42 = vrot.slane %v4048_v16, 4  ;;  %v1551_v47 = vshll.u32 %v1286_v39, 16  ;;  %v1557_v54 = vshll.u32 %v1287_v62, 16  ;;  %v3115_v59 = vpop.permute.xlu0 %3114 }
 0x10d   : > { %2803 = vrot.lane.b32.xlu1 %v5070_v21, %s5557_s11  ;;  %v1550_v28 = vrot.slane %v1548_v50, 4  ;;  %v1561_v17 = vshrl.u32 %v1287_v62, 16  ;;  %v1567_v24 = vshll.u32 %v1288_v32, 16  ;;  %v3607_v40 = vrot.slane %v3606_v7, 4  ;;  %v3376_v3 = vld [vmem:[#allocation2 + $0x84] sm:$0xf]  ;;  %v2251_v9 = vpop.permute.xlu1 %2250 }
 0x10e   : > { %v4052_v29 = vsel %vm5636_vm8, %v4050_v42, %v4051_v57  ;;  %v1553_v35 = vrot.slane %v1551_v47, 5  ;;  %v6537_v58 = vadd.f32 %v6294_v14, %v6488_v11  ;;  %v3614_v56 = vshrl.u32 %v3376_v3, 16  ;;  %v3921_v39 = vld [vmem:[#allocation2 + $0x84] sm:$0xe]  ;;  %3159 = vst.msk [vmem:[#allocation3 + $0x20] sm:$0xff] %vm3154_vm6, %v3115_v59 }
 0x10f   : > { %v3617_v43 = vshll.u32 %v3376_v3, 16  ;;  %v5165_v30 = vcombine.low %v6529_v25, %v4052_v29  ;;  %v1559_v51 = vrot.slane %v1557_v54, 5  ;;  %v3612_v19 = vsel %vm5692_vm12, %v3607_v40, %v3611_v37  ;;  %v1289_v38 = vld [vmem:[#allocation2 + $0x84] sm:$0xf]  ;;  %2294 = vst.msk [vmem:[#allocation3 + $0x28] sm:$0xff] %vm7213_vm4, %v2251_v9 }
 0x110   : > { %v1554_v61 = vor.u32 %v1553_v35, %v1550_v28  ;;  %v1563_v36 = vrot.slane %v1561_v17, 4  ;;  %v1569_v33 = vrot.slane %v1567_v24, 5  ;;  %v5490_v48 = vld [vmem:[#allocation2 + $0x84] sm:$0xff]   ;;  %v5133_v20 = vcombine.low %v3602_v22, %v3612_v19  ;;  %v3378_v52 = vld [vmem:[#allocation2 + $0x8c] sm:$0x1] }
 0x111   : > { %3124 = vrot.lane.b32.xlu1 %v5102_v13, %s5555_s9  ;;  %v3377_v60 = vld [vmem:[#allocation2 + $0x88] sm:$0xf]  ;;  %v3616_v11 = vrot.slane %v3614_v56, 4  ;;  %v6548_v44 = vadd.f32 %v6294_v14, %v6491_v53  ;;  %v6554_v27 = vmul.f32 %v6284_v23, %v5347_v4  ;;  %v3619_v2 = vrot.slane %v3617_v43, 5  ;;  %v3923_v53 = vld [vmem:[#allocation2 + $0x8c] sm:$0x1]  ;;  %v3293_v14 = vpop.permute.xlu0 %3292 }
 0x112   : > { %v3623_v46 = vshll.u32 %v3377_v60, 16  ;;  %v3627_v13 = vshrl.u32 %v3377_v60, 16  ;;  %v1555_v41 = vrot.slane %v1554_v61, 4  ;;  %3845 = vrot.lane.b32.xlu0 %v5133_v20, %s5558_s12  ;;  %v3633_v10 = vshll.u32 %v3378_v52, 16  ;;  %v3922_v22 = vld [vmem:[#allocation2 + $0x88] sm:$0xf] }
 0x113   : > { %v1564_v34 = vor.u32 %v1563_v36, %v1559_v51  ;;  %v5150_v6 = vrot.slane %v3921_v39, 9  ;;  %v3620_v23 = vor.u32 %v3619_v2, %v3616_v11  ;;  %v4055_v21 = vrot.slane %v3922_v22, 5  ;;  %v1290_v57 = vld [vmem:[#allocation2 + $0x88] sm:$0xf]  ;;  %v1291_v25 = vld [vmem:[#allocation2 + $0x8c] sm:$0x1] }
 0x114   : > { %v3625_v4 = vrot.slane %v3623_v46, 5  ;;  %v3629_v16 = vrot.slane %v3627_v13, 4  ;;  %v1560_v62 = vsel %vm5692_vm12, %v1555_v41, %v1559_v51  ;;  %v3635_v32 = vrot.slane %v3633_v10, 5  ;;  %3337 = vst.msk [vmem:[#allocation3 + $0x20] sm:$0xff] %vm3332_vm9, %v3293_v14  ;;  %v1834_v3 = vld [vmem:[#allocation2 + $0x78] sm:$0xe] }
 0x115   : > { %3302 = vrot.lane.b32.xlu1 %v5490_v48, %s5554_s8  ;;  %v1565_v49 = vrot.slane %v1564_v34, 4  ;;  %v4058_v37 = vrot.slane %v3923_v53, 5  ;;  %v3621_v50 = vrot.slane %v3620_v23, 4  ;;  %vm4300_vm4 = vcmask 1041408   ;;  %v1835_v29 = vld [vmem:[#allocation2 + $0x7c] sm:$0xf] }
 0x116   : > { %v3630_v7 = vor.u32 %v3629_v16, %v3625_v4  ;;  %v1572_v42 = vshrl.u32 %v1289_v38, 16  ;;  %4166 = vrot.lane.b32.xlu0 %v5165_v30, %s5556_s10  ;;  %v4056_v47 = vsel %vm5636_vm8, %v5150_v6, %v4055_v21  ;;  %v4057_v45 = vrot.slane %v4055_v21, 4  ;;  %5434 = vmatprep.subr.msk.bf16.mxu0 %vm4300_vm4, %v5495_v15  ;;  %v1836_v51 = vld [vmem:[#allocation2 + $0x80] sm:$0x1]  ;;  %v4215_v39 = vld [vmem:[#allocation3] sm:$0xff]  ;;  %v4217_v53 = vld [vmem:[#allocation3 + $0x10] sm:$0xff] }
 0x117   : > { %v1570_v63 = vsel %vm5692_vm12, %v1565_v49, %v1569_v33  ;;  %v1575_v28 = vshll.u32 %v1289_v38, 16  ;;  %v3626_v54 = vsel %vm5692_vm12, %v3621_v50, %v3625_v4  ;;  %5435 = vmatprep.subr.msk.bf16.mxu1 %vm4300_vm4, %v5495_v15  ;;  %v1581_v43 = vshll.u32 %v1290_v57, 16  ;;  %v1837_v59 = vld [vmem:[#allocation2 + $0x84] sm:$0xe]  ;;  %v330_v48 = vld [vmem:[#allocation2 + $0x90] sm:$0x1] }
 0x118   : > { %v3631_v17 = vrot.slane %v3630_v7, 4  ;;  %v5007_v24 = vcombine.low %v1560_v62, %v1570_v63  ;;  %v1574_v40 = vrot.slane %v1572_v42, 4  ;;  %v4059_v35 = vsel %vm5636_vm8, %v4057_v45, %v4058_v37  ;;  %v1838_v52 = vld [vmem:[#allocation2 + $0x88] sm:$0xf]  ;;  %v1839_v2 = vld [vmem:[#allocation2 + $0x8c] sm:$0x1] }
 0x119   : > { %v1577_v56 = vrot.slane %v1575_v28, 5  ;;  %v1585_v30 = vshrl.u32 %v1290_v57, 16  ;;  %v5166_v61 = vcombine.low %v4056_v47, %v4059_v35  ;;  %v1591_v36 = vshll.u32 %v1291_v25, 16  ;;  %v2335_v10 = vld [vmem:[#allocation2 + $0x84] sm:$0xf] }
 0x11a   : > { %v3636_v19 = vsel %vm5692_vm12, %v3631_v17, %v3635_v32  ;;  %v4302_v33 = vsel %vm4300_vm4, %v5495_v15, 0  ;;  %v1583_v11 = vrot.slane %v1581_v43, 5  ;;  %v5023_v13 = vrot.slane %v1834_v3, 9  ;;  %v2796_v6 = vpop.permute.xlu1 %2795  ;;  %v4216_v32 = vld [vmem:[#allocation3 + $0x8] sm:$0xff]  ;;  %v2336_v45 = vld [vmem:[#allocation2 + $0x88] sm:$0xf] }
 0x11b   : > { %v5134_v20 = vcombine.low %v3626_v54, %v3636_v19  ;;  %v1578_v60 = vor.u32 %v1577_v56, %v1574_v40  ;;  %v1587_v38 = vrot.slane %v1585_v30, 4  ;;  %5395 = vmatpush3.bf16.msra.mxu0 %v4302_v33  ;;  %5433 = vmatpush3.bf16.msra.mxu1 %v4302_v33  ;;  %v1593_v46 = vrot.slane %v1591_v36, 5  ;;  %2839 = vst.msk [vmem:[#allocation3 + $0x28] sm:$0xff] %vm2833_vm5, %v2796_v6  ;;  %v5510_v50 = vld [vmem:[#allocation2 + $0x60] sm:$0xff]   ;;  %v386_v56 = vld [vmem:[#allocation2 + $0x98] sm:$0x1] }
 0x11c   : > { %4168 = vrot.lane.b32.xlu0 %v5166_v61, %s5556_s10  ;;  %v1975_v41 = vrot.slane %v1835_v29, 5  ;;  %v1978_v9 = vrot.slane %v1836_v51, 5  ;;  %vm4251_vm4 = vcmask 293888   ;;  %v5024_v22 = vrot.slane %v1837_v59, 9  ;;  %1248 = vst.msk [vmem:[#allocation3 + $0x40] sm:$0xff] %vm1239_vm15, %v5510_v50  ;;  %v5496_v3 = vld [vmem:[#allocation2 + $0x84] sm:$0xff]  }
 0x11d   : > { %3847 = vrot.lane.b32.xlu1 %v5134_v20, %s5558_s12  ;;  %v1579_v15 = vrot.slane %v1578_v60, 4  ;;  %v1588_v34 = vor.u32 %v1587_v38, %v1583_v11  ;;  %5396 = vmatprep.mubr.msk.bf16.mxu0 %vm4251_vm4, %v4215_v39  ;;  %v1982_v16 = vrot.slane %v1838_v52, 5  ;;  %v1985_v62 = vrot.slane %v1839_v2, 5  ;;  %v2337_v29 = vld [vmem:[#allocation2 + $0x8c] sm:$0x1]  ;;  %v4218_v20 = vld [vmem:[#allocation3 + $0x18] sm:$0xff] }
 0x11e   : > { %v1976_v23 = vsel %vm5636_vm8, %v5023_v13, %v1975_v41  ;;  %v1977_v4 = vrot.slane %v1975_v41, 4  ;;  %5397 = vmatmul.mubr.msk.bf16.vlgmr.msra.gmra.mrb[0].mxu0 %vm4251_vm4, %v4216_v32  ;;  %v331_v37 = vsel %vm5615_vm3, 0, %v330_v48  ;;  %v568_v57 = vmax.f32 %v6351_v0, 0.0  ;;  %v3117_v54 = vpop.permute.xlu1 %3116  ;;  %v2880_v19 = vld [vmem:[#allocation2 + $0x84] sm:$0xe]  ;;  %v5511_v61 = vld [vmem:[#allocation2 + $0x6c] sm:$0xff]  }
 0x11f   : > { %v1584_v49 = vsel %vm5692_vm12, %v1579_v15, %v1583_v11  ;;  %v1589_v21 = vrot.slane %v1588_v34, 4  ;;  %v6596_v25 = vsel %vm5636_vm8, %v5024_v22, %v1982_v16  ;;  %v1984_v42 = vrot.slane %v1982_v16, 4  ;;  %332 = vst [vmem:[#allocation2 + $0x90] sm:$0x1] %v331_v37  ;;  %5400 = vmatprep.mubr.msk.bf16.mxu0 %vm4251_vm4, %v4217_v53  ;;  %3160 = vst.msk [vmem:[#allocation3 + $0x28] sm:$0xff] %vm3154_vm6, %v3117_v54 }
 0x120   : > { %v1979_v7 = vsel %vm5636_vm8, %v1977_v4, %v1978_v9  ;;  %v569_v14 = vmax.f32 %v6354_v18, 0.0  ;;  %v5250_v47 = vpack.c.bf16 %v568_v57, %v568_v57  ;;  %v2594_v28 = vshrl.u32 %v2335_v10, 16  ;;  %v333_v48 = vld [vmem:[#allocation2 + $0x9c] sm:$0x1]  ;;  %v2881_v2 = vld [vmem:[#allocation2 + $0x88] sm:$0xf] }
 0x121   : > { %1759 = vrot.lane.b32.xlu1 %v5007_v24, %s5552_s6  ;;  %v1594_v63 = vsel %vm5692_vm12, %v1589_v21, %v1593_v46  ;;  %v5039_v0 = vcombine.low %v1976_v23, %v1979_v7  ;;  %v1986_v40 = vsel %vm5636_vm8, %v1984_v42, %v1985_v62  ;;  %v2597_v35 = vshll.u32 %v2335_v10, 16  ;;  %v3838_v13 = vpop.permute.xlu0 %3837  ;;  %1249 = vst.msk [vmem:[#allocation3 + $0x48] sm:$0xff] %vm1239_vm15, %v5511_v61  ;;  %v2882_v15 = vld [vmem:[#allocation2 + $0x8c] sm:$0x1]  ;;  %v389_v21 = vld [vmem:[#allocation2 + $0xa4] sm:$0x1] }
 0x122   : > { %v5008_v17 = vcombine.low %v1584_v49, %v1594_v63  ;;  %v5251_v18 = vpack.c.bf16 %v569_v14, %v569_v14  ;;  %v5040_v24 = vcombine.low %v6596_v25, %v1986_v40  ;;  %v864_v43 = vshrl.u32 %v5250_v47, 16  ;;  %v3295_v46 = vpop.permute.xlu1 %3294  ;;  %3882 = vst.msk [vmem:[#allocation3 + $0x20] sm:$0xff] %vm3877_vm10, %v3838_v13  ;;  %v336_v25 = vld [vmem:[#allocation2 + $0xa8] sm:$0x1] }
 0x123   : > { %2083 = vrot.lane.b32.xlu0 %v5039_v0, %s5551_s30  ;;  %v867_v30 = vshll.u32 %v5250_v47, 16  ;;  %v2596_v51 = vrot.slane %v2594_v28, 4  ;;  %v2599_v39 = vrot.slane %v2597_v35, 5  ;;  %v2603_v59 = vshll.u32 %v2336_v45, 16  ;;  %3338 = vst.msk [vmem:[#allocation3 + $0x28] sm:$0xff] %vm3332_vm9, %v3295_v46  ;;  %v6669_v46 = vld [vmem:[%s5645_s25 + $0x70] sm:$0xff]  }
 0x124   : > { %v872_v36 = vshrl.u32 %v5251_v18, 16  ;;  %v875_v33 = vshll.u32 %v5251_v18, 16  ;;  %v866_v60 = vrot.slane %v864_v43, 7  ;;  %v2607_v11 = vshrl.u32 %v2336_v45, 16 }
 0x125   : > { %1761 = vrot.lane.b32.xlu1 %v5008_v17, %s5552_s6  ;;  %v2613_v38 = vshll.u32 %v2337_v29, 16  ;;  %v387_v52 = vsel %vm5627_vm7, 0, %v386_v56  ;;  %v2600_v9 = vor.u32 %v2599_v39, %v2596_v51  ;;  %v2605_v10 = vrot.slane %v2603_v59, 5  ;;  %v4159_v42 = vpop.permute.xlu0 %4158  ;;  %v6641_v29 = vld [vmem:[%s7209_s2] ss:$0 sm:$0xff] }
 0x126   : > { %v874_v41 = vrot.slane %v872_v36, 7  ;;  %388 = vst [vmem:[#allocation2 + $0x98] sm:$0x1] %v387_v52  ;;  %v5087_v34 = vrot.slane %v2880_v19, 9  ;;  %v869_v22 = vor.u32 %v867_v30, %v866_v60  ;;  %v870_v53 = vrot.slane %v866_v60, 4  ;;  %5401 = vmatmul.mubr.msk.bf16.gmra.mrb[4].mxu0 %vm4251_vm4, %v4218_v20  ;;  %4203 = vst.msk [vmem:[#allocation3 + $0x20] sm:$0xff] %vm7214_vm11, %v4159_v42 }
 0x127   : > { %2260 = vrot.lane.b32.xlu0 %v5496_v3, %s5553_s7  ;;  %v1076_v6 = vld [vmem:[#allocation2 + $0x90] sm:$0xf]  ;;  %v2609_v23 = vrot.slane %v2607_v11, 4  ;;  %v2615_v4 = vrot.slane %v2613_v38, 5  ;;  %v2601_v32 = vrot.slane %v2600_v9, 4  ;;  %v3018_v49 = vrot.slane %v2881_v2, 5  ;;  %v3840_v40 = vpop.permute.xlu1 %3839 }
 0x128   : > { %v877_v16 = vor.u32 %v875_v33, %v874_v41  ;;  %v879_v62 = vrot.slane %v874_v41, 4  ;;  %v1077_v37 = vsel %vm5702_vm13, %v869_v22, %v1076_v6  ;;  %v3021_v50 = vrot.slane %v2882_v15, 5  ;;  %3883 = vst.msk [vmem:[#allocation3 + $0x28] sm:$0xff] %vm3877_vm10, %v3840_v40  ;;  %v392_v30 = vld [vmem:[#allocation2 + $0xb0] sm:$0x1]  ;;  %v5514_v20 = vld [vmem:[#allocation2 + $0x78] sm:$0xff]  }
 0x129   : > { %2085 = vrot.lane.b32.xlu1 %v5040_v24, %s5551_s30  ;;  %v2610_v57 = vor.u32 %v2609_v23, %v2605_v10  ;;  %v334_v7 = vsel %vm5615_vm3, 0, %v333_v48  ;;  %1078 = vst [vmem:[#allocation2 + $0x90] sm:$0xf] %v1077_v37  ;;  %v2606_v63 = vsel %vm5692_vm12, %v2601_v32, %v2605_v10  ;;  %v3019_v0 = vsel %vm5636_vm8, %v5087_v34, %v3018_v49  ;;  %v4161_v51 = vpop.permute.xlu0 %4160  ;;  %v5515_v60 = vld [vmem:[#allocation2 + $0x84] sm:$0xff]  }
 0x12a   : > { %v878_v14 = vsel %vm5709_vm14, %v870_v53, %v877_v16  ;;  %v3020_v47 = vrot.slane %v3018_v49, 4  ;;  %335 = vst [vmem:[#allocation2 + $0x9c] sm:$0x1] %v334_v7  ;;  %v570_v28 = vmax.f32 %v6537_v58, 0.0  ;;  %v571_v54 = vmax.f32 %v6548_v44, 0.0  ;;  %4204 = vst.msk [vmem:[#allocation3 + $0x28] sm:$0xff] %vm7214_vm11, %v4161_v51 }
 0x12b   : > { %1079 = vst.msk [vmem:[#allocation2 + $0x94] sm:$0xf] %vm282_vm0, %v878_v14  ;;  %v2611_v45 = vrot.slane %v2610_v57, 4  ;;  %v390_v17 = vsel %vm5627_vm7, 0, %v389_v21  ;;  %v337_v18 = vsel %vm5615_vm3, 0, %v336_v25  ;;  %v541_v58 = vadd.f32 %v6641_v29, %v6554_v27  ;;  %v1752_v48 = vpop.permute.xlu1 %1751 }
 0x12c   : > { %v3022_v3 = vsel %vm5636_vm8, %v3020_v47, %v3021_v50  ;;  %391 = vst [vmem:[#allocation2 + $0xa4] sm:$0x1] %v390_v17  ;;  %v572_v44 = vmax.f32 %v6560_v55, 0.0  ;;  %v6649_v24 = vpack.c.bf16 %v570_v28, %v570_v28  ;;  %v6651_v43 = vpack.c.bf16 %v571_v54, %v571_v54  ;;  %338 = vst [vmem:[#allocation2 + $0xa8] sm:$0x1] %v337_v18 }
 0x12d   : > { %v2616_v35 = vsel %vm5692_vm12, %v2611_v45, %v2615_v4  ;;  %v1080_v56 = vld [vmem:[#allocation2 + $0x98] sm:$0x1]  ;;  %v5103_v27 = vcombine.low %v3019_v0, %v3022_v3  ;;  %v573_v59 = vmax.f32 %v541_v58, 0.0  ;;  %v393_v2 = vsel %vm5627_vm7, 0, %v392_v30  ;;  %1794 = vst.msk [vmem:[#allocation3 + $0x30] sm:$0xff] %vm1787_vm1, %v1752_v48 }
 0x12e   : > { %v5071_v19 = vcombine.low %v2606_v63, %v2616_v35  ;;  %v1081_v61 = vsel %vm5615_vm3, %v879_v62, %v1080_v56  ;;  %v6655_v36 = vpack.c.bf16 %v572_v44, %v572_v44  ;;  %v881_v55 = vshrl.u32 %v6649_v24, 16  ;;  %394 = vst [vmem:[#allocation2 + $0xb0] sm:$0x1] %v393_v2  ;;  %1250 = vst.msk [vmem:[#allocation3 + $0x50] sm:$0xff] %vm1239_vm15, %v5514_v20  ;;  %v4219_v25 = vld [vmem:[#allocation3 + $0x20] sm:$0xff] }
 0x12f   : > { %1082 = vst [vmem:[#allocation2 + $0x98] sm:$0x1] %v1081_v61  ;;  %v884_v33 = vshll.u32 %v6649_v24, 16  ;;  %v889_v39 = vshrl.u32 %v6651_v43, 16  ;;  %v892_v11 = vshll.u32 %v6651_v43, 16  ;;  %1251 = vst.msk [vmem:[#allocation3 + $0x58] sm:$0xff] %vm1239_vm15, %v5515_v60  ;;  %v2076_v4 = vpop.permute.xlu0 %2075  ;;  %v6675_v32 = vpack.c.bf16 %v573_v59, %v573_v59  ;;  %5404 = vmatprep.mubr.msk.bf16.mxu0 %vm4251_vm4, %v4219_v25 }
 0x130   : > { %2805 = vrot.lane.b32.xlu0 %v5071_v19, %s5557_s11  ;;  %v898_v38 = vshrl.u32 %v6655_v36, 16  ;;  %v901_v52 = vshll.u32 %v6655_v36, 16  ;;  %v2338_v13 = vld [vmem:[#allocation2 + $0x90] sm:$0xf]  ;;  %v5350_v49 = vunpack.c.l.bf16 %v6669_v46  ;;  %2118 = vst.msk [vmem:[#allocation3 + $0x30] sm:$0xff] %vm2111_vm2, %v2076_v4  ;;  %v883_v7 = vrot.slane %v881_v55, 7 }
 0x131   : > { %v2883_v41 = vld [vmem:[#allocation2 + $0x90] sm:$0xe]  ;;  %v2618_v15 = vshrl.u32 %v2338_v13, 16  ;;  %v2621_v34 = vshll.u32 %v2338_v13, 16  ;;  %v891_v47 = vrot.slane %v889_v39, 7  ;;  %v5351_v28 = vunpack.c.h.bf16 %v6669_v46  ;;  %v4220_v59 = vld [vmem:[#allocation3 + $0x28] sm:$0xff] }
 0x132   : > { %v5497_v9 = vld [vmem:[#allocation2 + $0x90] sm:$0xff]   ;;  %v5088_v23 = vrot.slane %v2883_v41, 9  ;;  %v1754_v45 = vpop.permute.xlu1 %1753  ;;  %v1083_v18 = vld [vmem:[#allocation2 + $0x9c] sm:$0xf]  ;;  %v886_v35 = vor.u32 %v884_v33, %v883_v7  ;;  %v887_v56 = vrot.slane %v883_v7, 4  ;;  %vm7227_vm11 = vcmask 130144   ;;  %5405 = vmatmul.mubr.msk.bf16.gmra.mrb[8].mxu0 %vm4251_vm4, %v4220_v59 }
 0x133   : > { %v2339_v10 = vld [vmem:[#allocation2 + $0x94] sm:$0xf]  ;;  %2262 = vrot.lane.b32.xlu1 %v5497_v9, %s5553_s7  ;;  %v2620_v16 = vrot.slane %v2618_v15, 4  ;;  %v2623_v21 = vrot.slane %v2621_v34, 5  ;;  %v3379_v58 = vld [vmem:[#allocation2 + $0x90] sm:$0xf]  ;;  %v2253_v44 = vpop.permute.xlu0 %2252  ;;  %v894_v24 = vor.u32 %v892_v11, %v891_v47 }
 0x134   : > { %v2627_v22 = vshll.u32 %v2339_v10, 16  ;;  %v2631_v53 = vshrl.u32 %v2339_v10, 16  ;;  %v2884_v6 = vld [vmem:[#allocation2 + $0x94] sm:$0xf]  ;;  %3126 = vrot.lane.b32.xlu0 %v5103_v27, %s5555_s9  ;;  %1795 = vst.msk [vmem:[#allocation3 + $0x38] sm:$0xff] %vm1787_vm1, %v1754_v45  ;;  %v896_v43 = vrot.slane %v891_v47, 4  ;;  %v1084_v20 = vsel %vm5702_vm13, %v886_v35, %v1083_v18 }
 0x135   : > { %v3025_v62 = vrot.slane %v2884_v6, 5  ;;  %v5500_v50 = vld [vmem:[#allocation2 + $0x90] sm:$0xff]   ;;  %v2624_v54 = vor.u32 %v2623_v21, %v2620_v16  ;;  %2295 = vst.msk [vmem:[#allocation3 + $0x30] sm:$0xff] %vm7227_vm11, %v2253_v44  ;;  %v1087_v39 = vld [vmem:[#allocation2 + $0xa4] sm:$0x1]  ;;  %v895_v33 = vsel %vm5709_vm14, %v887_v56, %v894_v24  ;;  %v3638_v60 = vshrl.u32 %v3379_v58, 16 }
 0x136   : > { %v2629_v37 = vrot.slane %v2627_v22, 5  ;;  %v2633_v57 = vrot.slane %v2631_v53, 4  ;;  %v2340_v42 = vld [vmem:[#allocation2 + $0x98] sm:$0x1]  ;;  %v3380_v30 = vld [vmem:[#allocation2 + $0x94] sm:$0xf]  ;;  %v2078_v13 = vpop.permute.xlu1 %2077 }
 0x137   : > { %v2885_v14 = vld [vmem:[#allocation2 + $0x98] sm:$0x1]  ;;  %v6681_v63 = vsel %vm5636_vm8, %v5088_v23, %v3025_v62  ;;  %v3027_v0 = vrot.slane %v3025_v62, 4  ;;  %v2637_v40 = vshll.u32 %v2340_v42, 16  ;;  %v2625_v19 = vrot.slane %v2624_v54, 4  ;;  %2119 = vst.msk [vmem:[#allocation3 + $0x38] sm:$0xff] %vm2111_vm2, %v2078_v13 }
 0x138   : > { %v2634_v17 = vor.u32 %v2633_v57, %v2629_v37  ;;  %v3028_v3 = vrot.slane %v2885_v14, 5  ;;  %3304 = vrot.lane.b32.xlu0 %v5500_v50, %s5554_s8  ;;  %v3381_v51 = vld [vmem:[#allocation2 + $0x98] sm:$0x1]  ;;  %v3924_v11 = vld [vmem:[#allocation2 + $0x90] sm:$0xe]  ;;  %v3641_v10 = vshll.u32 %v3379_v58, 16 }
 0x139   : > { %v2639_v27 = vrot.slane %v2637_v40, 5  ;;  %v3925_v2 = vld [vmem:[#allocation2 + $0x94] sm:$0xf]  ;;  %v2630_v41 = vsel %vm5692_vm12, %v2625_v19, %v2629_v37  ;;  %1085 = vst [vmem:[#allocation2 + $0x9c] sm:$0xf] %v1084_v20  ;;  %v3647_v15 = vshll.u32 %v3380_v30, 16  ;;  %v1088_v37 = vsel %vm5615_vm3, %v896_v43, %v1087_v39 }
 0x13a   : > { %v2635_v61 = vrot.slane %v2634_v17, 4  ;;  %v3029_v55 = vsel %vm5636_vm8, %v3027_v0, %v3028_v3  ;;  %1086 = vst.msk [vmem:[#allocation2 + $0xa0] sm:$0xf] %vm282_vm0, %v895_v33  ;;  %v3926_v34 = vld [vmem:[#allocation2 + $0x98] sm:$0x1]  ;;  %v3640_v6 = vrot.slane %v3638_v60, 4 }
 0x13b   : > { %v5104_v48 = vcombine.low %v6681_v63, %v3029_v55  ;;  %v1292_v22 = vld [vmem:[#allocation2 + $0x90] sm:$0xf]  ;;  %v3651_v23 = vshrl.u32 %v3380_v30, 16  ;;  %v3657_v4 = vshll.u32 %v3381_v51, 16  ;;  %v1293_v16 = vld [vmem:[#allocation2 + $0x94] sm:$0xf] }
 0x13c   : > { %v2640_v9 = vsel %vm5692_vm12, %v2635_v61, %v2639_v27  ;;  %v3643_v62 = vrot.slane %v3641_v10, 5  ;;  %v3649_v21 = vrot.slane %v3647_v15, 5  ;;  %v5151_v57 = vrot.slane %v3924_v11, 9  ;;  %1089 = vst [vmem:[#allocation2 + $0xa4] sm:$0x1] %v1088_v37  ;;  %v2798_v3 = vpop.permute.xlu0 %2797  ;;  %v5516_v13 = vld [vmem:[#allocation2 + $0x90] sm:$0xff]  }
 0x13d   : > { %v5072_v53 = vcombine.low %v2630_v41, %v2640_v9  ;;  %v3653_v50 = vrot.slane %v3651_v23, 4  ;;  %v3659_v7 = vrot.slane %v3657_v4, 5  ;;  %v4062_v25 = vrot.slane %v3925_v2, 5  ;;  %2840 = vst.msk [vmem:[#allocation3 + $0x30] sm:$0xff] %vm2833_vm5, %v2798_v3  ;;  %v1294_v30 = vld [vmem:[#allocation2 + $0x98] sm:$0x1]  ;;  %v2255_v27 = vpop.permute.xlu1 %2254 }
 0x13e   : > { %v4065_v42 = vrot.slane %v3926_v34, 5  ;;  %v3644_v14 = vor.u32 %v3643_v62, %v3640_v6  ;;  %v1596_v63 = vshrl.u32 %v1292_v22, 16  ;;  %v1599_v0 = vshll.u32 %v1292_v22, 16  ;;  %v6718_v51 = vld [vmem:[%s7208_s1] ss:$0 sm:$0xff]  ;;  %2296 = vst.msk [vmem:[#allocation3 + $0x38] sm:$0xff] %vm7227_vm11, %v2255_v27 }
 0x13f   : > { %2807 = vrot.lane.b32.xlu1 %v5072_v53, %s5557_s11  ;;  %v1605_v47 = vshll.u32 %v1293_v16, 16  ;;  %v3654_v45 = vor.u32 %v3653_v50, %v3649_v21  ;;  %v6707_v54 = vsel %vm5636_vm8, %v5151_v57, %v4062_v25  ;;  %v4064_v17 = vrot.slane %v4062_v25, 4  ;;  %1252 = vst.msk [vmem:[#allocation3 + $0x60] sm:$0xff] %vm1239_vm15, %v5516_v13  ;;  %v1840_v3 = vld [vmem:[#allocation2 + $0x90] sm:$0xe] }
 0x140   : > { %v1609_v40 = vshrl.u32 %v1293_v16, 16  ;;  %v3645_v18 = vrot.slane %v3644_v14, 4  ;;  %v1598_v58 = vrot.slane %v1596_v63, 4  ;;  %v1601_v44 = vrot.slane %v1599_v0, 5  ;;  %v3382_v39 = vld [vmem:[#allocation2 + $0x9c] sm:$0xf]  ;;  %v3119_v2 = vpop.permute.xlu0 %3118 }
 0x141   : > { %v6709_v35 = vrot.slane %v1605_v47, 5  ;;  %v5501_v56 = vld [vmem:[#allocation2 + $0x9c] sm:$0xff]   ;;  %v3655_v24 = vrot.slane %v3654_v45, 4  ;;  %v4066_v43 = vsel %vm5636_vm8, %v4064_v17, %v4065_v42  ;;  %v6723_v19 = vmul.f32 %v6718_v51, %v5350_v49  ;;  %3161 = vst.msk [vmem:[#allocation3 + $0x30] sm:$0xff] %vm3154_vm6, %v3119_v2 }
 0x142   : > { %v6728_v61 = vmul.f32 %v6718_v51, %v5351_v28  ;;  %v3650_v55 = vsel %vm5692_vm12, %v3645_v18, %v3649_v21  ;;  %v3383_v59 = vld [vmem:[#allocation2 + $0xa0] sm:$0xf]  ;;  %v1602_v33 = vor.u32 %v1601_v44, %v1598_v58  ;;  %v1611_v20 = vrot.slane %v1609_v40, 4  ;;  %v3927_v28 = vld [vmem:[#allocation2 + $0x9c] sm:$0xe] }
 0x143   : > { %3128 = vrot.lane.b32.xlu1 %v5104_v48, %s5555_s9  ;;  %v5167_v48 = vcombine.low %v6707_v54, %v4066_v43  ;;  %v3660_v49 = vsel %vm5692_vm12, %v3655_v24, %v3659_v7  ;;  %v3662_v60 = vshrl.u32 %v3382_v39, 16  ;;  %v3665_v46 = vshll.u32 %v3382_v39, 16  ;;  %v3384_v9 = vld [vmem:[#allocation2 + $0xa4] sm:$0x1]  ;;  %v3928_v22 = vld [vmem:[#allocation2 + $0xa0] sm:$0xf] }
 0x144   : > { %v3671_v11 = vshll.u32 %v3383_v59, 16  ;;  %v5135_v41 = vcombine.low %v3650_v55, %v3660_v49  ;;  %v3675_v10 = vshrl.u32 %v3383_v59, 16  ;;  %v1603_v15 = vrot.slane %v1602_v33, 4  ;;  %v3929_v16 = vld [vmem:[#allocation2 + $0xa4] sm:$0x1]  ;;  %v5517_v7 = vld [vmem:[#allocation2 + $0x9c] sm:$0xff]   ;;  %v3297_v47 = vpop.permute.xlu0 %3296 }
 0x145   : > { %v1612_v34 = vor.u32 %v1611_v20, %v6709_v35  ;;  %v3664_v53 = vrot.slane %v3662_v60, 4  ;;  %v3667_v6 = vrot.slane %v3665_v46, 5  ;;  %v3681_v4 = vshll.u32 %v3384_v9, 16  ;;  %v1295_v50 = vld [vmem:[#allocation2 + $0x9c] sm:$0xf]  ;;  %3339 = vst.msk [vmem:[#allocation3 + $0x30] sm:$0xff] %vm3332_vm9, %v3297_v47 }
 0x146   : > { %v3673_v23 = vrot.slane %v3671_v11, 5  ;;  %3849 = vrot.lane.b32.xlu0 %v5135_v41, %s5558_s12  ;;  %v3677_v62 = vrot.slane %v3675_v10, 4  ;;  %v1608_v21 = vsel %vm5692_vm12, %v1603_v15, %v6709_v35  ;;  %v1615_v57 = vshll.u32 %v1294_v30, 16  ;;  %v1296_v0 = vld [vmem:[#allocation2 + $0xa0] sm:$0xf]  ;;  %1253 = vst.msk [vmem:[#allocation3 + $0x68] sm:$0xff] %vm1239_vm15, %v5517_v7 }
 0x147   : > { %3306 = vrot.lane.b32.xlu1 %v5501_v56, %s5554_s8  ;;  %v1613_v37 = vrot.slane %v1612_v34, 4  ;;  %v3668_v25 = vor.u32 %v3667_v6, %v3664_v53  ;;  %v3683_v42 = vrot.slane %v3681_v4, 5  ;;  %v5152_v14 = vrot.slane %v3927_v28, 9  ;;  %v1297_v35 = vld [vmem:[#allocation2 + $0xa4] sm:$0x1] }
 0x148   : > { %v4069_v63 = vrot.slane %v3928_v22, 5  ;;  %v3678_v45 = vor.u32 %v3677_v62, %v3673_v23  ;;  %v1617_v54 = vrot.slane %v1615_v57, 5  ;;  %v4072_v17 = vrot.slane %v3929_v16, 5  ;;  %v1841_v24 = vld [vmem:[#allocation2 + $0x94] sm:$0xf] }
 0x149   : > { %v1620_v40 = vshrl.u32 %v1295_v50, 16  ;;  %v3669_v18 = vrot.slane %v3668_v25, 4  ;;  %v1623_v56 = vshll.u32 %v1295_v50, 16  ;;  %v1842_v43 = vld [vmem:[#allocation2 + $0x98] sm:$0x1]  ;;  %v1629_v39 = vshll.u32 %v1296_v0, 16  ;;  %v2800_v11 = vpop.permute.xlu1 %2799 }
 0x14a   : > { %v4070_v58 = vsel %vm5636_vm8, %v5152_v14, %v4069_v63  ;;  %v4071_v44 = vrot.slane %v4069_v63, 4  ;;  %v3679_v30 = vrot.slane %v3678_v45, 4  ;;  %4170 = vrot.lane.b32.xlu0 %v5167_v48, %s5556_s10  ;;  %v1618_v27 = vsel %vm5692_vm12, %v1613_v37, %v1617_v54  ;;  %v1843_v59 = vld [vmem:[#allocation2 + $0x9c] sm:$0xe]  ;;  %v1844_v46 = vld [vmem:[#allocation2 + $0xa0] sm:$0xf] }
 0x14b   : > { %v1622_v55 = vrot.slane %v1620_v40, 4  ;;  %v3674_v33 = vsel %vm5692_vm12, %v3669_v18, %v3673_v23  ;;  %v5009_v20 = vcombine.low %v1608_v21, %v1618_v27  ;;  %v1625_v60 = vrot.slane %v1623_v56, 5  ;;  %v1845_v41 = vld [vmem:[#allocation2 + $0xa4] sm:$0x1]  ;;  %2841 = vst.msk [vmem:[#allocation3 + $0x38] sm:$0xff] %vm2833_vm5, %v2800_v11 }
 0x14c   : > { %v4073_v49 = vsel %vm5636_vm8, %v4071_v44, %v4072_v17  ;;  %v3684_v28 = vsel %vm5692_vm12, %v3679_v30, %v3683_v42  ;;  %v1631_v2 = vrot.slane %v1629_v39, 5  ;;  %v1633_v13 = vshrl.u32 %v1296_v0, 16  ;;  %v1090_v37 = vld [vmem:[#allocation2 + $0xa8] sm:$0xf]  ;;  %v2341_v14 = vld [vmem:[#allocation2 + $0x9c] sm:$0xf] }
 0x14d   : > { %v5168_v48 = vcombine.low %v4070_v58, %v4073_v49  ;;  %v5136_v9 = vcombine.low %v3674_v33, %v3684_v28  ;;  %v1626_v10 = vor.u32 %v1625_v60, %v1622_v55  ;;  %v1639_v15 = vshll.u32 %v1297_v35, 16  ;;  %v3121_v57 = vpop.permute.xlu1 %3120  ;;  %v1094_v27 = vld [vmem:[#allocation2 + $0xb0] sm:$0x1]  ;;  %v339_v55 = vld [vmem:[#allocation2 + $0xb4] sm:$0x1]  ;;  %v5502_v39 = vld [vmem:[#allocation2 + $0x9c] sm:$0xff]  }
 0x14e   : > { %v5025_v34 = vrot.slane %v1840_v3, 9  ;;  %v1635_v22 = vrot.slane %v1633_v13, 4  ;;  %v1989_v53 = vrot.slane %v1841_v24, 5  ;;  %v1992_v6 = vrot.slane %v1842_v43, 5  ;;  %3162 = vst.msk [vmem:[#allocation3 + $0x38] sm:$0xff] %vm3154_vm6, %v3121_v57 }
 0x14f   : > { %4172 = vrot.lane.b32.xlu0 %v5168_v48, %s5556_s10  ;;  %v5026_v23 = vrot.slane %v1843_v59, 9  ;;  %3851 = vrot.lane.b32.xlu1 %v5136_v9, %s5558_s12  ;;  %v1627_v4 = vrot.slane %v1626_v10, 4  ;;  %v1641_v16 = vrot.slane %v1639_v15, 5  ;;  %v1996_v62 = vrot.slane %v1844_v46, 5  ;;  %v2342_v3 = vld [vmem:[#allocation2 + $0xa0] sm:$0xf] }
 0x150   : > { %v1999_v21 = vrot.slane %v1845_v41, 5  ;;  %v1636_v50 = vor.u32 %v1635_v22, %v1631_v2  ;;  %v1990_v7 = vsel %vm5636_vm8, %v5025_v34, %v1989_v53  ;;  %v1991_v25 = vrot.slane %v1989_v53, 4  ;;  %v2887_v49 = vld [vmem:[#allocation2 + $0xa0] sm:$0xf]  ;;  %v2886_v48 = vld [vmem:[#allocation2 + $0x9c] sm:$0xe] }
 0x151   : > { %v900_v42 = vrot.slane %v898_v38, 7  ;;  %v1632_v63 = vsel %vm5692_vm12, %v1627_v4, %v1631_v2  ;;  %v1998_v0 = vrot.slane %v1996_v62, 4  ;;  %v906_v47 = vshrl.u32 %v6675_v32, 16  ;;  %v3299_v56 = vpop.permute.xlu1 %3298  ;;  %v3842_v24 = vpop.permute.xlu0 %3841  ;;  %v2888_v10 = vld [vmem:[#allocation2 + $0xa4] sm:$0x1] }
 0x152   : > { %v6770_v45 = vadd.f32 %v6641_v29, %v6723_v19  ;;  %v1637_v54 = vrot.slane %v1636_v50, 4  ;;  %v1993_v17 = vsel %vm5636_vm8, %v1991_v25, %v1992_v6  ;;  %v1997_v38 = vsel %vm5636_vm8, %v5026_v23, %v1996_v62  ;;  %v2343_v19 = vld [vmem:[#allocation2 + $0xa4] sm:$0x1]  ;;  %3340 = vst.msk [vmem:[#allocation3 + $0x38] sm:$0xff] %vm3332_vm9, %v3299_v56  ;;  %v395_v15 = vld [vmem:[#allocation2 + $0xbc] sm:$0x1] }
 0x153   : > { %v903_v40 = vor.u32 %v901_v52, %v900_v42  ;;  %1763 = vrot.lane.b32.xlu1 %v5009_v20, %s5552_s6  ;;  %v5041_v18 = vcombine.low %v1990_v7, %v1993_v17  ;;  %v904_v58 = vrot.slane %v900_v42, 4  ;;  %v908_v44 = vrot.slane %v906_v47, 7  ;;  %3884 = vst.msk [vmem:[#allocation3 + $0x30] sm:$0xff] %vm3877_vm10, %v3842_v24  ;;  %v342_v4 = vld [vmem:[#allocation2 + $0xc0] sm:$0x1] }
 0x154   : > { %v909_v35 = vshll.u32 %v6675_v32, 16  ;;  %v1642_v43 = vsel %vm5692_vm12, %v1637_v54, %v1641_v16  ;;  %v2000_v30 = vsel %vm5636_vm8, %v1998_v0, %v1999_v21  ;;  %v2642_v52 = vshrl.u32 %v2341_v14, 16  ;;  %v6808_v0 = vld [vmem:[%s5645_s25 + $0x78] sm:$0xff]  }
 0x155   : > { %v1091_v36 = vsel %vm5702_vm13, %v903_v40, %v1090_v37  ;;  %v5010_v32 = vcombine.low %v1632_v63, %v1642_v43  ;;  %2087 = vrot.lane.b32.xlu0 %v5041_v18, %s5551_s30  ;;  %v913_v33 = vrot.slane %v908_v44, 4  ;;  %v2645_v20 = vshll.u32 %v2341_v14, 16  ;;  %v4163_v34 = vpop.permute.xlu0 %4162 }
 0x156   : > { %v911_v59 = vor.u32 %v909_v35, %v908_v44  ;;  %1092 = vst [vmem:[#allocation2 + $0xa8] sm:$0xf] %v1091_v36  ;;  %v2644_v60 = vrot.slane %v2642_v52, 4  ;;  %v2651_v46 = vshll.u32 %v2342_v3, 16  ;;  %v2655_v11 = vshrl.u32 %v2342_v3, 16 }
 0x157   : > { %v2661_v28 = vshll.u32 %v2343_v19, 16  ;;  %1765 = vrot.lane.b32.xlu1 %v5010_v32, %s5552_s6  ;;  %v5042_v2 = vcombine.low %v1997_v38, %v2000_v30  ;;  %v2647_v41 = vrot.slane %v2645_v20, 5  ;;  %v1095_v9 = vsel %vm5615_vm3, %v913_v33, %v1094_v27 }
 0x158   : > { %v912_v13 = vsel %vm5709_vm14, %v904_v58, %v911_v59  ;;  %v2653_v22 = vrot.slane %v2651_v46, 5  ;;  %v2657_v53 = vrot.slane %v2655_v11, 4  ;;  %1096 = vst [vmem:[#allocation2 + $0xb0] sm:$0x1] %v1095_v9  ;;  %v3032_v6 = vrot.slane %v2887_v49, 5 }
 0x159   : > { %1093 = vst.msk [vmem:[#allocation2 + $0xac] sm:$0xf] %vm282_vm0, %v912_v13  ;;  %v543_v23 = vadd.f32 %v6641_v29, %v6728_v61  ;;  %vm7228_vm11 = vcmask 294144   ;;  %2264 = vrot.lane.b32.xlu0 %v5502_v39, %s5553_s7  ;;  %v2648_v16 = vor.u32 %v2647_v41, %v2644_v60  ;;  %v5089_v62 = vrot.slane %v2886_v48, 9 }
 0x15a   : > { %4205 = vst.msk [vmem:[#allocation3 + $0x30] sm:$0xff] %vm7228_vm11, %v4163_v34  ;;  %v340_v21 = vsel %vm5615_vm3, 0, %v339_v55  ;;  %v574_v37 = vmax.f32 %v6770_v45, 0.0  ;;  %v2658_v57 = vor.u32 %v2657_v53, %v2653_v22  ;;  %v2663_v50 = vrot.slane %v2661_v28, 5  ;;  %v4165_v17 = vpop.permute.xlu0 %4164 }
 0x15b   : > { %v3034_v7 = vrot.slane %v3032_v6, 4  ;;  %v3035_v25 = vrot.slane %v2888_v10, 5  ;;  %341 = vst [vmem:[#allocation2 + $0xb4] sm:$0x1] %v340_v21  ;;  %2089 = vrot.lane.b32.xlu1 %v5042_v2, %s5551_s30  ;;  %v2649_v61 = vrot.slane %v2648_v16, 4  ;;  %v396_v14 = vsel %vm5627_vm7, 0, %v395_v15  ;;  %v3844_v44 = vpop.permute.xlu1 %3843 }
 0x15c   : > { %v5256_v42 = vpack.c.bf16 %v574_v37, %v574_v37  ;;  %v343_v63 = vsel %vm5615_vm3, 0, %v342_v4  ;;  %v2659_v47 = vrot.slane %v2658_v57, 4  ;;  %v575_v45 = vmax.f32 %v543_v23, 0.0  ;;  %397 = vst [vmem:[#allocation2 + $0xbc] sm:$0x1] %v396_v14  ;;  %3885 = vst.msk [vmem:[#allocation3 + $0x38] sm:$0xff] %vm3877_vm10, %v3844_v44 }
 0x15d   : > { %v2344_v54 = vld [vmem:[#allocation2 + $0xa8] sm:$0xf]  ;;  %344 = vst [vmem:[#allocation2 + $0xc0] sm:$0x1] %v343_v63  ;;  %v2654_v38 = vsel %vm5692_vm12, %v2649_v61, %v2653_v22  ;;  %v3033_v18 = vsel %vm5636_vm8, %v5089_v62, %v3032_v6  ;;  %v3036_v19 = vsel %vm5636_vm8, %v3034_v7, %v3035_v25  ;;  %v5354_v27 = vunpack.c.l.bf16 %v6808_v0  ;;  %4206 = vst.msk [vmem:[#allocation3 + $0x38] sm:$0xff] %vm7228_vm11, %v4165_v17 }
 0x15e   : > { %v2666_v40 = vshrl.u32 %v2344_v54, 16  ;;  %v2669_v3 = vshll.u32 %v2344_v54, 16  ;;  %v2889_v58 = vld [vmem:[#allocation2 + $0xa8] sm:$0xe]  ;;  %v2664_v35 = vsel %vm5692_vm12, %v2659_v47, %v2663_v50  ;;  %v915_v56 = vshrl.u32 %v5256_v42, 16 }
 0x15f   : > { %v918_v24 = vshll.u32 %v5256_v42, 16  ;;  %v5073_v30 = vcombine.low %v2654_v38, %v2664_v35  ;;  %v5355_v55 = vunpack.c.h.bf16 %v6808_v0  ;;  %v2346_v32 = vld [vmem:[#allocation2 + $0xb0] sm:$0x1]  ;;  %v5090_v20 = vrot.slane %v2889_v58, 9  ;;  %v3385_v49 = vld [vmem:[#allocation2 + $0xa8] sm:$0xf]  ;;  %v1756_v13 = vpop.permute.xlu1 %1755 }
 0x160   : > { %v5503_v43 = vld [vmem:[#allocation2 + $0xa8] sm:$0xff]   ;;  %v2668_v52 = vrot.slane %v2666_v40, 4  ;;  %v2671_v39 = vrot.slane %v2669_v3, 5  ;;  %v2685_v60 = vshll.u32 %v2346_v32, 16  ;;  %v5105_v46 = vcombine.low %v3033_v18, %v3036_v19  ;;  %v2891_v28 = vld [vmem:[#allocation2 + $0xb0] sm:$0x1] }
 0x161   : > { %v2345_v36 = vld [vmem:[#allocation2 + $0xac] sm:$0xf]  ;;  %2266 = vrot.lane.b32.xlu1 %v5503_v43, %s5553_s7  ;;  %2809 = vrot.lane.b32.xlu0 %v5073_v30, %s5557_s11  ;;  %v5257_v48 = vpack.c.bf16 %v575_v45, %v575_v45  ;;  %v6824_v2 = vrot.slane %v915_v56, 7  ;;  %1796 = vst.msk [vmem:[#allocation3 + $0x40] sm:$0xff] %vm1787_vm1, %v1756_v13  ;;  %v3042_v53 = vrot.slane %v2891_v28, 5  ;;  %v2080_v16 = vpop.permute.xlu0 %2079  ;;  %v3686_v63 = vshrl.u32 %v3385_v49, 16 }
 0x162   : > { %v2675_v59 = vshll.u32 %v2345_v36, 16  ;;  %v2679_v33 = vshrl.u32 %v2345_v36, 16  ;;  %v2890_v11 = vld [vmem:[#allocation2 + $0xac] sm:$0xf]  ;;  %v2672_v41 = vor.u32 %v2671_v39, %v2668_v52  ;;  %v2687_v22 = vrot.slane %v2685_v60, 5  ;;  %2120 = vst.msk [vmem:[#allocation3 + $0x40] sm:$0xff] %vm2111_vm2, %v2080_v16 }
 0x163   : > { %v3039_v15 = vrot.slane %v2890_v11, 5  ;;  %v4221_v34 = vld [vmem:[#allocation3 + $0x30] sm:$0xff]  ;;  %v920_v6 = vor.u32 %v918_v24, %v6824_v2  ;;  %v921_v23 = vrot.slane %v6824_v2, 4  ;;  %v1097_v4 = vld [vmem:[#allocation2 + $0xb4] sm:$0xf]  ;;  %v923_v25 = vshrl.u32 %v5257_v48, 16  ;;  %v1758_v47 = vpop.permute.xlu1 %1757 }
 0x164   : > { %v2677_v9 = vrot.slane %v2675_v59, 5  ;;  %v2681_v10 = vrot.slane %v2679_v33, 4  ;;  %5408 = vmatprep.mubr.msk.bf16.mxu0 %vm4251_vm4, %v4221_v34  ;;  %v2673_v62 = vrot.slane %v2672_v41, 4  ;;  %v3386_v50 = vld [vmem:[#allocation2 + $0xac] sm:$0xf]  ;;  %v926_v61 = vshll.u32 %v5257_v48, 16 }
 0x165   : > { %v6832_v37 = vsel %vm5636_vm8, %v5090_v20, %v3039_v15  ;;  %v3041_v57 = vrot.slane %v3039_v15, 4  ;;  %3130 = vrot.lane.b32.xlu0 %v5105_v46, %s5555_s9  ;;  %v5506_v7 = vld [vmem:[#allocation2 + $0xa8] sm:$0xff]   ;;  %v1098_v42 = vsel %vm5702_vm13, %v920_v6, %v1097_v4  ;;  %v3387_v14 = vld [vmem:[#allocation2 + $0xb0] sm:$0x1]  ;;  %v3689_v38 = vshll.u32 %v3385_v49, 16  ;;  %1797 = vst.msk [vmem:[#allocation3 + $0x48] sm:$0xff] %vm1787_vm1, %v1758_v47  ;;  %v2257_v56 = vpop.permute.xlu0 %2256 }
 0x166   : > { %v2682_v21 = vor.u32 %v2681_v10, %v2677_v9  ;;  %v2678_v54 = vsel %vm5692_vm12, %v2673_v62, %v2677_v9  ;;  %1099 = vst [vmem:[#allocation2 + $0xb4] sm:$0xf] %v1098_v42  ;;  %v1101_v40 = vld [vmem:[#allocation2 + $0xbc] sm:$0x1]  ;;  %v3930_v3 = vld [vmem:[#allocation2 + $0xa8] sm:$0xe]  ;;  %v505_v62 = vmul.f32 %v6718_v51, %v5354_v27 }
 0x167   : > { %v3043_v17 = vsel %vm5636_vm8, %v3041_v57, %v3042_v53  ;;  %v925_v58 = vrot.slane %v923_v25, 7  ;;  %v3688_v44 = vrot.slane %v3686_v63, 4  ;;  %v3695_v35 = vshll.u32 %v3386_v50, 16  ;;  %v3931_v19 = vld [vmem:[#allocation2 + $0xac] sm:$0xf]  ;;  %v4222_v24 = vld [vmem:[#allocation3 + $0x38] sm:$0xff]  ;;  %v2082_v60 = vpop.permute.xlu1 %2081 }
 0x168   : > { %v2683_v45 = vrot.slane %v2682_v21, 4  ;;  %v5106_v18 = vcombine.low %v6832_v37, %v3043_v17  ;;  %v3691_v30 = vrot.slane %v3689_v38, 5  ;;  %v3699_v36 = vshrl.u32 %v3386_v50, 16  ;;  %v3932_v32 = vld [vmem:[#allocation2 + $0xb0] sm:$0x1]  ;;  %5409 = vmatmul.mubr.msk.bf16.gmra.mrb[12].mxu0 %vm4251_vm4, %v4222_v24  ;;  %2121 = vst.msk [vmem:[#allocation3 + $0x48] sm:$0xff] %vm2111_vm2, %v2082_v60 }
 0x169   : > { %v3705_v52 = vshll.u32 %v3387_v14, 16  ;;  %vm7229_vm11 = vcmask 130144   ;;  %3308 = vrot.lane.b32.xlu0 %v5506_v7, %s5554_s8  ;;  %v928_v59 = vor.u32 %v926_v61, %v925_v58  ;;  %v930_v33 = vrot.slane %v925_v58, 4  ;;  %v1298_v49 = vld [vmem:[#allocation2 + $0xa8] sm:$0xf] }
 0x16a   : > { %v2688_v43 = vsel %vm5692_vm12, %v2683_v45, %v2687_v22  ;;  %2297 = vst.msk [vmem:[#allocation3 + $0x40] sm:$0xff] %vm7229_vm11, %v2257_v56  ;;  %v3697_v20 = vrot.slane %v3695_v35, 5  ;;  %v3692_v46 = vor.u32 %v3691_v30, %v3688_v44  ;;  %v3701_v11 = vrot.slane %v3699_v36, 4  ;;  %v1299_v2 = vld [vmem:[#allocation2 + $0xac] sm:$0xf] }
 0x16b   : > { %v5074_v39 = vcombine.low %v2678_v54, %v2688_v43  ;;  %v3707_v28 = vrot.slane %v3705_v52, 5  ;;  %v5153_v48 = vrot.slane %v3930_v3, 9  ;;  %v929_v13 = vsel %vm5709_vm14, %v921_v23, %v928_v59  ;;  %v1300_v7 = vld [vmem:[#allocation2 + $0xb0] sm:$0x1]  ;;  %v5518_v35 = vld [vmem:[#allocation2 + $0xa8] sm:$0xff]  }
 0x16c   : > { %v1102_v41 = vsel %vm5615_vm3, %v930_v33, %v1101_v40  ;;  %v4076_v9 = vrot.slane %v3931_v19, 5  ;;  %v4079_v10 = vrot.slane %v3932_v32, 5  ;;  %1100 = vst.msk [vmem:[#allocation2 + $0xb8] sm:$0xf] %vm282_vm0, %v929_v13  ;;  %v3693_v15 = vrot.slane %v3692_v46, 4 }
 0x16d   : > { %2811 = vrot.lane.b32.xlu1 %v5074_v39, %s5557_s11  ;;  %v3702_v34 = vor.u32 %v3701_v11, %v3697_v20  ;;  %1103 = vst [vmem:[#allocation2 + $0xbc] sm:$0x1] %v1102_v41  ;;  %v1644_v22 = vshrl.u32 %v1298_v49, 16  ;;  %v1647_v53 = vshll.u32 %v1298_v49, 16  ;;  %v3388_v6 = vld [vmem:[#allocation2 + $0xb4] sm:$0xf]  ;;  %v506_v23 = vmul.f32 %v6718_v51, %v5355_v55 }
 0x16e   : > { %v4078_v4 = vrot.slane %v4076_v9, 4  ;;  %v1653_v16 = vshll.u32 %v1299_v2, 16  ;;  %v3698_v21 = vsel %vm5692_vm12, %v3693_v15, %v3697_v20  ;;  %v3710_v57 = vshrl.u32 %v3388_v6, 16  ;;  %v3933_v0 = vld [vmem:[#allocation2 + $0xb4] sm:$0xe]  ;;  %v2802_v51 = vpop.permute.xlu0 %2801  ;;  %1254 = vst.msk [vmem:[#allocation3 + $0x70] sm:$0xff] %vm1239_vm15, %v5518_v35 }
 0x16f   : > { %v3703_v37 = vrot.slane %v3702_v34, 4  ;;  %v3713_v50 = vshll.u32 %v3388_v6, 16  ;;  %v4077_v25 = vsel %vm5636_vm8, %v5153_v48, %v4076_v9  ;;  %v1646_v27 = vrot.slane %v1644_v22, 4  ;;  %v1301_v14 = vld [vmem:[#allocation2 + $0xb4] sm:$0xf]  ;;  %2842 = vst.msk [vmem:[#allocation3 + $0x40] sm:$0xff] %vm2833_vm5, %v2802_v51 }
 0x170   : > { %v4080_v61 = vsel %vm5636_vm8, %v4078_v4, %v4079_v10  ;;  %v1649_v42 = vrot.slane %v1647_v53, 5  ;;  %v3712_v63 = vrot.slane %v3710_v57, 4  ;;  %v6871_v54 = vrot.slane %v1653_v16, 5  ;;  %v1846_v10 = vld [vmem:[#allocation2 + $0xa8] sm:$0xe] }
 0x171   : > { %3132 = vrot.lane.b32.xlu1 %v5106_v18, %s5555_s9  ;;  %v3708_v55 = vsel %vm5692_vm12, %v3703_v37, %v3707_v28  ;;  %v3715_v47 = vrot.slane %v3713_v50, 5  ;;  %v1657_v38 = vshrl.u32 %v1299_v2, 16  ;;  %v1663_v40 = vshll.u32 %v1300_v7, 16  ;;  %v2259_v30 = vpop.permute.xlu1 %2258  ;;  %v1848_v37 = vld [vmem:[#allocation2 + $0xb0] sm:$0x1] }
 0x172   : > { %v5137_v45 = vcombine.low %v3698_v21, %v3708_v55  ;;  %v1650_v17 = vor.u32 %v1649_v42, %v1646_v27  ;;  %v5154_v18 = vrot.slane %v3933_v0, 9  ;;  %v1668_v58 = vshrl.u32 %v1301_v14, 16  ;;  %v3123_v36 = vpop.permute.xlu0 %3122  ;;  %2298 = vst.msk [vmem:[#allocation3 + $0x48] sm:$0xff] %vm7229_vm11, %v2259_v30  ;;  %v1847_v21 = vld [vmem:[#allocation2 + $0xac] sm:$0xf] }
 0x173   : > { %v3716_v3 = vor.u32 %v3715_v47, %v3712_v63  ;;  %v1671_v44 = vshll.u32 %v1301_v14, 16  ;;  %v5507_v19 = vld [vmem:[#allocation2 + $0xb4] sm:$0xff]   ;;  %v5169_v24 = vcombine.low %v4077_v25, %v4080_v61  ;;  %v1659_v33 = vrot.slane %v1657_v38, 4  ;;  %3163 = vst.msk [vmem:[#allocation3 + $0x40] sm:$0xff] %vm3154_vm6, %v3123_v36 }
 0x174   : > { %3853 = vrot.lane.b32.xlu0 %v5137_v45, %s5558_s12  ;;  %v3389_v56 = vld [vmem:[#allocation2 + $0xb8] sm:$0xf]  ;;  %v1651_v43 = vrot.slane %v1650_v17, 4  ;;  %v3390_v52 = vld [vmem:[#allocation2 + $0xbc] sm:$0x1]  ;;  %v1665_v49 = vrot.slane %v1663_v40, 5  ;;  %v6880_v11 = vadd.f32 %v6641_v29, %v505_v62  ;;  %v6883_v28 = vadd.f32 %v6641_v29, %v506_v23 }
 0x175   : > { %v3717_v32 = vrot.slane %v3716_v3, 4  ;;  %v3719_v39 = vshll.u32 %v3389_v56, 16  ;;  %v3723_v59 = vshrl.u32 %v3389_v56, 16  ;;  %3310 = vrot.lane.b32.xlu1 %v5507_v19, %s5554_s8  ;;  %v3729_v20 = vshll.u32 %v3390_v52, 16  ;;  %v3934_v60 = vld [vmem:[#allocation2 + $0xb8] sm:$0xf] }
 0x176   : > { %v3935_v46 = vld [vmem:[#allocation2 + $0xbc] sm:$0x1]  ;;  %v1660_v13 = vor.u32 %v1659_v33, %v6871_v54  ;;  %v4083_v41 = vrot.slane %v3934_v60, 5  ;;  %v1302_v9 = vld [vmem:[#allocation2 + $0xb8] sm:$0xf]  ;;  %v1656_v15 = vsel %vm5692_vm12, %v1651_v43, %v6871_v54  ;;  %v1670_v53 = vrot.slane %v1668_v58, 4  ;;  %v3301_v4 = vpop.permute.xlu0 %3300 }
 0x177   : > { %v3721_v48 = vrot.slane %v3719_v39, 5  ;;  %v3725_v2 = vrot.slane %v3723_v59, 4  ;;  %v4086_v34 = vrot.slane %v3935_v46, 5  ;;  %v1303_v22 = vld [vmem:[#allocation2 + $0xbc] sm:$0x1]  ;;  %v1673_v6 = vrot.slane %v1671_v44, 5 }
 0x178   : > { %4174 = vrot.lane.b32.xlu0 %v5169_v24, %s5556_s10  ;;  %v3731_v16 = vrot.slane %v3729_v20, 5  ;;  %v1661_v62 = vrot.slane %v1660_v13, 4  ;;  %v4084_v23 = vsel %vm5636_vm8, %v5154_v18, %v4083_v41  ;;  %3341 = vst.msk [vmem:[#allocation3 + $0x40] sm:$0xff] %vm3332_vm9, %v3301_v4  ;;  %v5519_v57 = vld [vmem:[#allocation2 + $0xb4] sm:$0xff]   ;;  %v4085_v50 = vrot.slane %v4083_v41, 4 }
 0x179   : > { %v3726_v29 = vor.u32 %v3725_v2, %v3721_v48  ;;  %v1674_v7 = vor.u32 %v1673_v6, %v1670_v53  ;;  %v1677_v25 = vshll.u32 %v1302_v9, 16  ;;  %v1681_v61 = vshrl.u32 %v1302_v9, 16  ;;  %v1849_v51 = vld [vmem:[#allocation2 + $0xb4] sm:$0xe]  ;;  %v1850_v55 = vld [vmem:[#allocation2 + $0xb8] sm:$0xf] }
 0x17a   : > { %v3722_v27 = vsel %vm5692_vm12, %v3717_v32, %v3721_v48  ;;  %v1666_v0 = vsel %vm5692_vm12, %v1661_v62, %v1665_v49  ;;  %v1687_v14 = vshll.u32 %v1303_v22, 16  ;;  %1255 = vst.msk [vmem:[#allocation3 + $0x78] sm:$0xff] %vm1239_vm15, %v5519_v57  ;;  %v4087_v63 = vsel %vm5636_vm8, %v4085_v50, %v4086_v34  ;;  %v1851_v17 = vld [vmem:[#allocation2 + $0xbc] sm:$0x1]  ;;  %v2347_v58 = vld [vmem:[#allocation2 + $0xb4] sm:$0xf] }
 0x17b   : > { %v3727_v42 = vrot.slane %v3726_v29, 4  ;;  %v1675_v47 = vrot.slane %v1674_v7, 4  ;;  %v1679_v54 = vrot.slane %v1677_v25, 5  ;;  %v5027_v45 = vrot.slane %v1846_v10, 9  ;;  %v2348_v41 = vld [vmem:[#allocation2 + $0xb8] sm:$0xf] }
 0x17c   : > { %v5170_v40 = vcombine.low %v4084_v23, %v4087_v63  ;;  %v1683_v3 = vrot.slane %v1681_v61, 4  ;;  %v1689_v18 = vrot.slane %v1687_v14, 5  ;;  %v5011_v35 = vcombine.low %v1656_v15, %v1666_v0  ;;  %v2349_v15 = vld [vmem:[#allocation2 + $0xbc] sm:$0x1]  ;;  %v398_v22 = vld [vmem:[#allocation2 + $0xc8] sm:$0x1] }
 0x17d   : > { %v3732_v38 = vsel %vm5692_vm12, %v3727_v42, %v3731_v16  ;;  %v2003_v19 = vrot.slane %v1847_v21, 5  ;;  %v2006_v56 = vrot.slane %v1848_v37, 5  ;;  %v5028_v43 = vrot.slane %v1849_v51, 9  ;;  %v2892_v62 = vld [vmem:[#allocation2 + $0xb4] sm:$0xe] }
 0x17e   : > { %v5138_v44 = vcombine.low %v3722_v27, %v3732_v38  ;;  %4176 = vrot.lane.b32.xlu0 %v5170_v40, %s5556_s10  ;;  %v1684_v24 = vor.u32 %v1683_v3, %v1679_v54  ;;  %v2010_v30 = vrot.slane %v1850_v55, 5  ;;  %v2013_v36 = vrot.slane %v1851_v17, 5  ;;  %v5508_v23 = vld [vmem:[#allocation2 + $0xb4] sm:$0xff]   ;;  %v345_v7 = vld [vmem:[#allocation2 + $0xcc] sm:$0x1] }
 0x17f   : > { %v2804_v52 = vpop.permute.xlu1 %2803  ;;  %v2004_v32 = vsel %vm5636_vm8, %v5027_v45, %v2003_v19  ;;  %v2005_v39 = vrot.slane %v2003_v19, 4  ;;  %v576_v59 = vmax.f32 %v6880_v11, 0.0  ;;  %v577_v33 = vmax.f32 %v6883_v28, 0.0  ;;  %v2893_v14 = vld [vmem:[#allocation2 + $0xb8] sm:$0xf] }
 0x180   : > { %3855 = vrot.lane.b32.xlu1 %v5138_v44, %s5558_s12  ;;  %2843 = vst.msk [vmem:[#allocation3 + $0x48] sm:$0xff] %vm2833_vm5, %v2804_v52  ;;  %v1680_v20 = vsel %vm5692_vm12, %v1675_v47, %v1679_v54  ;;  %v1685_v49 = vrot.slane %v1684_v24, 4  ;;  %v2012_v60 = vrot.slane %v2010_v30, 4  ;;  %v2690_v46 = vshrl.u32 %v2347_v58, 16  ;;  %v1104_v63 = vld [vmem:[#allocation2 + $0xc0] sm:$0xf] }
 0x181   : > { %v2007_v48 = vsel %vm5636_vm8, %v2005_v39, %v2006_v56  ;;  %v5258_v2 = vpack.c.bf16 %v576_v59, %v576_v59  ;;  %v5259_v13 = vpack.c.bf16 %v577_v33, %v577_v33  ;;  %v2693_v9 = vshll.u32 %v2347_v58, 16  ;;  %v2894_v45 = vld [vmem:[#allocation2 + $0xbc] sm:$0x1]  ;;  %v401_v56 = vld [vmem:[#allocation2 + $0xd4] sm:$0x1] }
 0x182   : > { %v1690_v11 = vsel %vm5692_vm12, %v1685_v49, %v1689_v18  ;;  %v5043_v10 = vcombine.low %v2004_v32, %v2007_v48  ;;  %v2011_v28 = vsel %vm5636_vm8, %v5028_v43, %v2010_v30  ;;  %v2692_v34 = vrot.slane %v2690_v46, 4  ;;  %v3395_v32 = vld [vmem:[#allocation2 + $0xd0] sm:$0xf] }
 0x183   : > { %v3125_v53 = vpop.permute.xlu1 %3124  ;;  %v5012_v6 = vcombine.low %v1680_v20, %v1690_v11  ;;  %v2014_v4 = vsel %vm5636_vm8, %v2012_v60, %v2013_v36  ;;  %v932_v29 = vshrl.u32 %v5258_v2, 16  ;;  %v935_v16 = vshll.u32 %v5258_v2, 16 }
 0x184   : > { %1767 = vrot.lane.b32.xlu1 %v5011_v35, %s5552_s6  ;;  %3164 = vst.msk [vmem:[#allocation3 + $0x48] sm:$0xff] %vm3154_vm6, %v3125_v53  ;;  %2091 = vrot.lane.b32.xlu0 %v5043_v10, %s5551_s30  ;;  %v940_v21 = vshrl.u32 %v5259_v13, 16  ;;  %v943_v37 = vshll.u32 %v5259_v13, 16  ;;  %v2695_v57 = vrot.slane %v2693_v9, 5  ;;  %v2699_v50 = vshll.u32 %v2348_v41, 16  ;;  %v3846_v25 = vpop.permute.xlu0 %3845 }
 0x185   : > { %v934_v61 = vrot.slane %v932_v29, 7  ;;  %v2703_v27 = vshrl.u32 %v2348_v41, 16  ;;  %v2709_v42 = vshll.u32 %v2349_v15, 16  ;;  %v399_v0 = vsel %vm5627_vm7, 0, %v398_v22  ;;  %3886 = vst.msk [vmem:[#allocation3 + $0x40] sm:$0xff] %vm3877_vm10, %v3846_v25 }
 0x186   : > { %v5044_v51 = vcombine.low %v2011_v28, %v2014_v4  ;;  %v942_v55 = vrot.slane %v940_v21, 7  ;;  %v2696_v47 = vor.u32 %v2695_v57, %v2692_v34  ;;  %v2701_v54 = vrot.slane %v2699_v50, 5  ;;  %400 = vst [vmem:[#allocation2 + $0xc8] sm:$0x1] %v399_v0 }
 0x187   : > { %v3303_v17 = vpop.permute.xlu1 %3302  ;;  %v937_v38 = vor.u32 %v935_v16, %v934_v61  ;;  %v938_v40 = vrot.slane %v934_v61, 4  ;;  %v2705_v3 = vrot.slane %v2703_v27, 4  ;;  %v5091_v18 = vrot.slane %v2892_v62, 9 }
 0x188   : > { %1769 = vrot.lane.b32.xlu1 %v5012_v6, %s5552_s6  ;;  %3342 = vst.msk [vmem:[#allocation3 + $0x48] sm:$0xff] %vm3332_vm9, %v3303_v17  ;;  %2268 = vrot.lane.b32.xlu0 %v5508_v23, %s5553_s7  ;;  %v945_v58 = vor.u32 %v943_v37, %v942_v55  ;;  %v2697_v44 = vrot.slane %v2696_v47, 4  ;;  %v2711_v35 = vrot.slane %v2709_v42, 5  ;;  %v3046_v19 = vrot.slane %v2893_v14, 5  ;;  %v4167_v24 = vpop.permute.xlu0 %4166  ;;  %v6956_v6 = vld [vmem:[#allocation2 + $0xd0] sm:$0xf]  ;;  %s7042_s6 = scalar_lea.vmem %s7211_s4, %s5226_s22 }
 0x189   : > { %v1105_v43 = vsel %vm5702_vm13, %v937_v38, %v1104_v63  ;;  %v2706_v30 = vor.u32 %v2705_v3, %v2701_v54  ;;  %v3049_v36 = vrot.slane %v2894_v45, 5  ;;  %v346_v52 = vsel %vm5615_vm3, 0, %v345_v7  ;;  %s4946_s22 = sshll.u32 %s7248_s18, 1 }
 0x18a   : > { %vm7230_vm15 = vcmask 294144   ;;  %v946_v39 = vsel %vm5709_vm14, %v938_v40, %v945_v58  ;;  %v947_v59 = vrot.slane %v942_v55, 4  ;;  %1106 = vst [vmem:[#allocation2 + $0xc0] sm:$0xf] %v1105_v43  ;;  %v3048_v33 = vrot.slane %v3046_v19, 4 }
 0x18b   : > { %4207 = vst.msk [vmem:[#allocation3 + $0x40] sm:$0xff] %vm7230_vm15, %v4167_v24  ;;  %347 = vst [vmem:[#allocation2 + $0xcc] sm:$0x1] %v346_v52  ;;  %v2702_v26 = vsel %vm5692_vm12, %v2697_v44, %v2701_v54  ;;  %v2707_v20 = vrot.slane %v2706_v30, 4  ;;  %v402_v49 = vsel %vm5627_vm7, 0, %v401_v56  ;;  %v3767_v60 = vshll.u32 %v3395_v32, 16 }
 0x18c   : > { %2093 = vrot.lane.b32.xlu1 %v5044_v51, %s5551_s30  ;;  %1107 = vst.msk [vmem:[#allocation2 + $0xc4] sm:$0xf] %vm282_vm0, %v946_v39  ;;  %403 = vst [vmem:[#allocation2 + $0xd4] sm:$0x1] %v402_v49  ;;  %v3771_v46 = vshrl.u32 %v3395_v32, 16  ;;  %v3047_v2 = vsel %vm5636_vm8, %v5091_v18, %v3046_v19  ;;  %v3050_v13 = vsel %vm5636_vm8, %v3048_v33, %v3049_v36  ;;  %v4097_v54 = vrot.slane %v6956_v6, 5 }
 0x18d   : > { %v2712_v31 = vsel %vm5692_vm12, %v2707_v20, %v2711_v35  ;;  %v1108_v48 = vld [vmem:[#allocation2 + $0xc8] sm:$0x1]  ;;  %v5107_v10 = vcombine.low %v3047_v2, %v3050_v13  ;;  %v6951_v28 = vrot.slane %v3767_v60, 5  ;;  %vm7231_vm0 = vmmov %vm7230_vm15  ;;  %vm4593_vm15 = vcmask 60416  }
 0x18e   : > { %v4169_v41 = vpop.permute.xlu0 %4168  ;;  %v5075_v9 = vcombine.low %v2702_v26, %v2712_v31  ;;  %v1109_v11 = vsel %vm5615_vm3, %v947_v59, %v1108_v48  ;;  %v6953_v15 = vrot.slane %v3771_v46, 4  ;;  %vm7232_vm3 = vmmov %vm7229_vm11 }
 0x18f   : > { %v3848_v8 = vpop.permute.xlu1 %3847  ;;  %1110 = vst [vmem:[#allocation2 + $0xc8] sm:$0x1] %v1109_v11  ;;  %vm7233_vm7 = vmmov %vm7232_vm3 }
 0x190   : > { %3887 = vst.msk [vmem:[#allocation3 + $0x48] sm:$0xff] %vm3877_vm10, %v3848_v8  ;;  %2813 = vrot.lane.b32.xlu0 %v5075_v9, %s5557_s11  ;;  %v3774_v47 = vor.u32 %v6953_v15, %v6951_v28  ;;  %vm7236_vm13 = vmmov %vm7232_vm3 }
 0x191   : > { %4208 = vst.msk [vmem:[#allocation3 + $0x48] sm:$0xff] %vm7231_vm0, %v4169_v41  ;;  %v2350_v22 = vld [vmem:[#allocation2 + $0xc0] sm:$0xf]  ;;  %vm7237_vm14 = vmmov %vm7232_vm3 }
 0x192   : > { %v4223_v34 = vld [vmem:[#allocation3 + $0x40] sm:$0xff]  ;;  %v2895_v53 = vld [vmem:[#allocation2 + $0xc0] sm:$0xe]  ;;  %v2714_v29 = vshrl.u32 %v2350_v22, 16  ;;  %v2717_v62 = vshll.u32 %v2350_v22, 16  ;;  %vm7238_vm11 = vmmov %vm7231_vm0 }
 0x193   : > { %5412 = vmatprep.mubr.msk.bf16.mxu1 %vm4251_vm4, %v4223_v34  ;;  %v5509_v1 = vld [vmem:[#allocation2 + $0xc0] sm:$0xff]   ;;  %v1760_v16 = vpop.permute.xlu1 %1759  ;;  %v5092_v57 = vrot.slane %v2895_v53, 9  ;;  %v3394_v39 = vld [vmem:[#allocation2 + $0xcc] sm:$0xf]  ;;  %v3396_v60 = vld [vmem:[#allocation2 + $0xd4] sm:$0x1] }
 0x194   : > { %v2351_v4 = vld [vmem:[#allocation2 + $0xc4] sm:$0xf]  ;;  %1798 = vst.msk [vmem:[#allocation3 + $0x50] sm:$0xff] %vm1787_vm1, %v1760_v16  ;;  %2270 = vrot.lane.b32.xlu1 %v5509_v1, %s5553_s7  ;;  %v2716_v50 = vrot.slane %v2714_v29, 4  ;;  %3134 = vrot.lane.b32.xlu0 %v5107_v10, %s5555_s9  ;;  %v2719_v61 = vrot.slane %v2717_v62, 5  ;;  %v3758_v8 = vshrl.u32 %v3394_v39, 16 }
 0x195   : > { %v2723_v23 = vshll.u32 %v2351_v4, 16  ;;  %v2727_v21 = vshrl.u32 %v2351_v4, 16  ;;  %v2896_v37 = vld [vmem:[#allocation2 + $0xc4] sm:$0xf]  ;;  %v2084_v25 = vpop.permute.xlu0 %2083  ;;  %v3391_v18 = vld [vmem:[#allocation2 + $0xc0] sm:$0xf] }
 0x196   : > { %v3053_v7 = vrot.slane %v2896_v37, 5  ;;  %v5512_v0 = vld [vmem:[#allocation2 + $0xc0] sm:$0xff]   ;;  %2122 = vst.msk [vmem:[#allocation3 + $0x50] sm:$0xff] %vm2111_vm2, %v2084_v25  ;;  %v2352_v14 = vld [vmem:[#allocation2 + $0xc8] sm:$0x1]  ;;  %v2720_v17 = vor.u32 %v2719_v61, %v2716_v50  ;;  %v3734_v35 = vshrl.u32 %v3391_v18, 16 }
 0x197   : > { %v2725_v27 = vrot.slane %v2723_v23, 5  ;;  %v2729_v42 = vrot.slane %v2727_v21, 4  ;;  %v2897_v51 = vld [vmem:[#allocation2 + $0xc8] sm:$0x1]  ;;  %v1762_v45 = vpop.permute.xlu1 %1761  ;;  %v2733_v40 = vshll.u32 %v2352_v14, 16  ;;  %v3737_v19 = vshll.u32 %v3391_v18, 16 }
 0x198   : > { %v6965_v55 = vsel %vm5636_vm8, %v5092_v57, %v3053_v7  ;;  %v3055_v63 = vrot.slane %v3053_v7, 4  ;;  %v3056_v3 = vrot.slane %v2897_v51, 5  ;;  %v3392_v58 = vld [vmem:[#allocation2 + $0xc4] sm:$0xf]  ;;  %1799 = vst.msk [vmem:[#allocation3 + $0x58] sm:$0xff] %vm1787_vm1, %v1762_v45  ;;  %3312 = vrot.lane.b32.xlu0 %v5512_v0, %s5554_s8  ;;  %v2721_v30 = vrot.slane %v2720_v17, 4 }
 0x199   : > { %v2730_v38 = vor.u32 %v2729_v42, %v2725_v27  ;;  %v3393_v44 = vld [vmem:[#allocation2 + $0xc8] sm:$0x1]  ;;  %v3743_v56 = vshll.u32 %v3392_v58, 16  ;;  %v3747_v24 = vshrl.u32 %v3392_v58, 16  ;;  %v2261_v43 = vpop.permute.xlu0 %2260  ;;  %v2735_v52 = vrot.slane %v2733_v40, 5  ;;  %v4224_v59 = vld [vmem:[#allocation3 + $0x48] sm:$0xff] }
 0x19a   : > { %v3057_v32 = vsel %vm5636_vm8, %v3055_v63, %v3056_v3  ;;  %2299 = vst.msk [vmem:[#allocation3 + $0x50] sm:$0xff] %vm7232_vm3, %v2261_v43  ;;  %v3736_v26 = vrot.slane %v3734_v35, 4  ;;  %v3739_v20 = vrot.slane %v3737_v19, 5  ;;  %5413 = vmatmul.mubr.msk.bf16.vlgmr.msra.gmra.mrb[0].mxu1 %vm4251_vm4, %v4224_v59  ;;  %v2726_v31 = vsel %vm5692_vm12, %v2721_v30, %v2725_v27  ;;  %v3936_v41 = vld [vmem:[#allocation2 + $0xc0] sm:$0xe] }
 0x19b   : > { %v2731_v36 = vrot.slane %v2730_v38, 4  ;;  %v5108_v33 = vcombine.low %v6965_v55, %v3057_v32  ;;  %v3745_v49 = vrot.slane %v3743_v56, 5  ;;  %v2086_v46 = vpop.permute.xlu1 %2085  ;;  %v3749_v2 = vrot.slane %v3747_v24, 4  ;;  %v3937_v15 = vld [vmem:[#allocation2 + $0xc4] sm:$0xf]  ;;  %v5513_v55 = vld [vmem:[#allocation2 + $0xcc] sm:$0xff]  }
 0x19c   : > { %v3753_v13 = vshll.u32 %v3393_v44, 16  ;;  %2123 = vst.msk [vmem:[#allocation3 + $0x58] sm:$0xff] %vm2111_vm2, %v2086_v46  ;;  %v3740_v11 = vor.u32 %v3739_v20, %v3736_v26  ;;  %v3761_v10 = vshll.u32 %v3394_v39, 16  ;;  %v3938_v34 = vld [vmem:[#allocation2 + $0xc8] sm:$0x1]  ;;  %v3775_v1 = vrot.slane %v3774_v47, 4 }
 0x19d   : > { %v2736_v48 = vsel %vm5692_vm12, %v2731_v36, %v2735_v52  ;;  %v3750_v22 = vor.u32 %v3749_v2, %v3745_v49  ;;  %v3777_v4 = vshll.u32 %v3396_v60, 16  ;;  %v3760_v16 = vrot.slane %v3758_v8, 4  ;;  %v3939_v7 = vld [vmem:[#allocation2 + $0xcc] sm:$0xe]  ;;  %v3941_v27 = vld [vmem:[#allocation2 + $0xd4] sm:$0x1] }
 0x19e   : > { %v5076_v9 = vcombine.low %v2726_v31, %v2736_v48  ;;  %v3755_v53 = vrot.slane %v3753_v13, 5  ;;  %v3741_v29 = vrot.slane %v3740_v11, 4  ;;  %v3763_v62 = vrot.slane %v3761_v10, 5 }
 0x19f   : > { %v5155_v23 = vrot.slane %v3936_v41, 9  ;;  %v3751_v21 = vrot.slane %v3750_v22, 4  ;;  %v3779_v37 = vrot.slane %v3777_v4, 5  ;;  %v4090_v57 = vrot.slane %v3937_v15, 5 }
 0x1a0   : > { %2815 = vrot.lane.b32.xlu1 %v5076_v9, %s5557_s11  ;;  %v4093_v50 = vrot.slane %v3938_v34, 5  ;;  %v3746_v25 = vsel %vm5692_vm12, %v3741_v29, %v3745_v49  ;;  %v3764_v61 = vor.u32 %v3763_v62, %v3760_v16  ;;  %v5156_v45 = vrot.slane %v3939_v7, 9 }
 0x1a1   : > { %v3756_v42 = vsel %vm5692_vm12, %v3751_v21, %v3755_v53  ;;  %v4091_v0 = vsel %vm5636_vm8, %v5155_v23, %v4090_v57  ;;  %v4092_v14 = vrot.slane %v4090_v57, 4  ;;  %v3780_v17 = vsel %vm5692_vm12, %v3775_v1, %v3779_v37 }
 0x1a2   : > { %v2806_v51 = vpop.permute.xlu0 %2805  ;;  %v5139_v63 = vcombine.low %v3746_v25, %v3756_v42  ;;  %v3765_v47 = vrot.slane %v3764_v61, 4  ;;  %v4099_v40 = vrot.slane %v4097_v54, 4  ;;  %v4100_v3 = vrot.slane %v3941_v27, 5 }
 0x1a3   : > { %2844 = vst.msk [vmem:[#allocation3 + $0x50] sm:$0xff] %vm2833_vm5, %v2806_v51  ;;  %v4094_v38 = vsel %vm5636_vm8, %v4092_v14, %v4093_v50  ;;  %v4098_v56 = vsel %vm5636_vm8, %v5156_v45, %v4097_v54 }
 0x1a4   : > { %3136 = vrot.lane.b32.xlu1 %v5108_v33, %s5555_s9  ;;  %3857 = vrot.lane.b32.xlu0 %v5139_v63, %s5558_s12  ;;  %v3770_v18 = vsel %vm5692_vm12, %v3765_v47, %v6951_v28  ;;  %v5171_v58 = vcombine.low %v4091_v0, %v4094_v38  ;;  %v4101_v24 = vsel %vm5636_vm8, %v4099_v40, %v4100_v3  ;;  %vm7234_vm8 = vmmov %vm7231_vm0  ;;  %s280_s9 = scalar_lea.vmem %s7212_s5, %s4946_s22 }
 0x1a5   : > { %v2263_v44 = vpop.permute.xlu1 %2262  ;;  %v5140_v19 = vcombine.low %v3770_v18, %v3780_v17  ;;  %v5172_v28 = vcombine.low %v4098_v56, %v4101_v24  ;;  %vm7235_vm12 = vmmov %vm7231_vm0  ;;  %vm4626_vm0 = vcmask 64512  }
 0x1a6   : > { %v3127_v35 = vpop.permute.xlu0 %3126  ;;  %2300 = vst.msk [vmem:[#allocation3 + $0x58] sm:$0xff] %vm7233_vm7, %v2263_v44  ;;  %vm7239_vm3 = vmmov %vm7234_vm8 }
 0x1a7   : > { %3165 = vst.msk [vmem:[#allocation3 + $0x50] sm:$0xff] %vm3154_vm6, %v3127_v35 }
 0x1a8   : > { %3314 = vrot.lane.b32.xlu1 %v5513_v55, %s5554_s8  ;;  %4178 = vrot.lane.b32.xlu0 %v5171_v58, %s5556_s10 }
 0x1aa   : > { %v3305_v5 = vpop.permute.xlu0 %3304 }
 0x1ab   : > { %3343 = vst.msk [vmem:[#allocation3 + $0x50] sm:$0xff] %vm3332_vm9, %v3305_v5 }
 0x1ac   : > { %3859 = vrot.lane.b32.xlu1 %v5140_v19, %s5558_s12 }
 0x1b0   : > { %4180 = vrot.lane.b32.xlu1 %v5172_v28, %s5556_s10 }
 0x1b1   : > { %v2808_v43 = vpop.permute.xlu1 %2807 }
 0x1b2   : > { %2845 = vst.msk [vmem:[#allocation3 + $0x58] sm:$0xff] %vm2833_vm5, %v2808_v43 }
 0x1b5   : > { %v3129_v6 = vpop.permute.xlu1 %3128 }
 0x1b6   : > { %3166 = vst.msk [vmem:[#allocation3 + $0x58] sm:$0xff] %vm3154_vm6, %v3129_v6 }
 0x1b8   : > { %v3850_v12 = vpop.permute.xlu0 %3849 }
 0x1b9   : > { %v3307_v54 = vpop.permute.xlu1 %3306  ;;  %3888 = vst.msk [vmem:[#allocation3 + $0x50] sm:$0xff] %vm3877_vm10, %v3850_v12 }
 0x1ba   : > { %3344 = vst.msk [vmem:[#allocation3 + $0x58] sm:$0xff] %vm3332_vm9, %v3307_v54 }
 0x1bc   : > { %v4171_v30 = vpop.permute.xlu0 %4170 }
 0x1bd   : > { %4209 = vst.msk [vmem:[#allocation3 + $0x50] sm:$0xff] %vm7234_vm8, %v4171_v30 }
 0x1c1   : > { %v4173_v36 = vpop.permute.xlu0 %4172  ;;  %v3852_v52 = vpop.permute.xlu1 %3851 }
 0x1c2   : > { %3889 = vst.msk [vmem:[#allocation3 + $0x58] sm:$0xff] %vm3877_vm10, %v3852_v52 }
 0x1c3   : > { %4210 = vst.msk [vmem:[#allocation3 + $0x58] sm:$0xff] %vm7235_vm12, %v4173_v36 }
 0x1c4   : > { %v4225_v32 = vld [vmem:[#allocation3 + $0x50] sm:$0xff] }
 0x1c5   : > { %v1764_v39 = vpop.permute.xlu1 %1763  ;;  %5416 = vmatprep.mubr.msk.bf16.mxu1 %vm4251_vm4, %v4225_v32 }
 0x1c6   : > { %1800 = vst.msk [vmem:[#allocation3 + $0x60] sm:$0xff] %vm1787_vm1, %v1764_v39 }
 0x1c7   : > { %v2088_v59 = vpop.permute.xlu0 %2087 }
 0x1c8   : > { %2124 = vst.msk [vmem:[#allocation3 + $0x60] sm:$0xff] %vm2111_vm2, %v2088_v59 }
 0x1c9   : > { %v1766_v33 = vpop.permute.xlu1 %1765 }
 0x1ca   : > { %1801 = vst.msk [vmem:[#allocation3 + $0x68] sm:$0xff] %vm1787_vm1, %v1766_v33  ;;  %v4226_v26 = vld [vmem:[#allocation3 + $0x58] sm:$0xff] }
 0x1cb   : > { %v2265_v20 = vpop.permute.xlu0 %2264  ;;  %5417 = vmatmul.mubr.msk.bf16.gmra.mrb[4].mxu1 %vm4251_vm4, %v4226_v26 }
 0x1cc   : > { %2301 = vst.msk [vmem:[#allocation3 + $0x60] sm:$0xff] %vm7236_vm13, %v2265_v20 }
 0x1cd   : > { %v2090_v49 = vpop.permute.xlu1 %2089 }
 0x1ce   : > { %2125 = vst.msk [vmem:[#allocation3 + $0x68] sm:$0xff] %vm2111_vm2, %v2090_v49 }
 0x1d3   : > { %v2267_v60 = vpop.permute.xlu1 %2266  ;;  %v2810_v46 = vpop.permute.xlu0 %2809 }
 0x1d4   : > { %2302 = vst.msk [vmem:[#allocation3 + $0x68] sm:$0xff] %vm7237_vm14, %v2267_v60 }
 0x1d5   : > { %2846 = vst.msk [vmem:[#allocation3 + $0x60] sm:$0xff] %vm2833_vm5, %v2810_v46 }
 0x1d7   : > { %v3131_v31 = vpop.permute.xlu0 %3130 }
 0x1d8   : > { %3167 = vst.msk [vmem:[#allocation3 + $0x60] sm:$0xff] %vm3154_vm6, %v3131_v31 }
 0x1db   : > { %v3309_v48 = vpop.permute.xlu0 %3308 }
 0x1dc   : > { %3345 = vst.msk [vmem:[#allocation3 + $0x60] sm:$0xff] %vm3332_vm9, %v3309_v48 }
 0x1df   : > { %v2812_v2 = vpop.permute.xlu1 %2811 }
 0x1e0   : > { %2847 = vst.msk [vmem:[#allocation3 + $0x68] sm:$0xff] %vm2833_vm5, %v2812_v2 }
 0x1e3   : > { %v3133_v13 = vpop.permute.xlu1 %3132 }
 0x1e4   : > { %3168 = vst.msk [vmem:[#allocation3 + $0x68] sm:$0xff] %vm3154_vm6, %v3133_v13 }
 0x1e6   : > { %v3854_v41 = vpop.permute.xlu0 %3853 }
 0x1e7   : > { %3890 = vst.msk [vmem:[#allocation3 + $0x60] sm:$0xff] %vm3877_vm10, %v3854_v41  ;;  %v3311_v9 = vpop.permute.xlu1 %3310 }
 0x1e8   : > { %3346 = vst.msk [vmem:[#allocation3 + $0x68] sm:$0xff] %vm3332_vm9, %v3311_v9 }
 0x1ea   : > { %v4175_v11 = vpop.permute.xlu0 %4174 }
 0x1eb   : > { %4211 = vst.msk [vmem:[#allocation3 + $0x60] sm:$0xff] %vm7238_vm11, %v4175_v11 }
 0x1f0   : > { %v4177_v8 = vpop.permute.xlu0 %4176 }
 0x1f1   : > { %v5398_v34 = vpop.f32.mrb[0].mxu0 }
 0x1f2   : > { %v3856_v10 = vpop.permute.xlu1 %3855  ;;  %v4227_v15 = vld [vmem:[#allocation3 + $0x60] sm:$0xff]  ;;  %v5262_v22 = vpack.c.bf16 %v5398_v34, %v5398_v34  ;;  %v4338_v53 = vpop.f32.mrb[1].mxu0  ;;  %v4699_v16 = vmul.f32 %v5398_v34, %v5398_v34  ;;  %v4630_v42 = vsel %vm4626_vm0, %v5398_v34, 0.0 }
 0x1f3   : > { %3891 = vst.msk [vmem:[#allocation3 + $0x68] sm:$0xff] %vm3877_vm10, %v3856_v10  ;;  %5420 = vmatprep.mubr.msk.bf16.mxu1 %vm4251_vm4, %v4227_v15  ;;  %v5260_v1 = vpack.c.bf16 %v4338_v53, %v4338_v53  ;;  %v4697_v4 = vmul.f32 %v4338_v53, %v4338_v53  ;;  %v5399_v29 = vpop.f32.mrb[2].mxu0  ;;  %v4627_v37 = vsel %vm4626_vm0, %v4338_v53, 0.0 }
 0x1f4   : > { %4212 = vst.msk [vmem:[#allocation3 + $0x68] sm:$0xff] %vm7239_vm3, %v4177_v8  ;;  %v5263_v62 = vpack.c.bf16 %v5399_v29, %v5399_v29  ;;  %v4341_v23 = vpop.f32.mrb[3].mxu0  ;;  %v4700_v61 = vmul.f32 %v5399_v29, %v5399_v29  ;;  %v4732_v47 = vsel %vm4626_vm0, %v4699_v16, 0.0  ;;  %v4632_v40 = vsel %vm4626_vm0, %v5399_v29, 0.0 }
 0x1f5   : > { %4596 = vst.msk [vmem:[%s7042_s6 + $0x8] sm:$0xf] %vm4593_vm15, %v5262_v22  ;;  %4594 = vst.msk [vmem:[%s7042_s6] sm:$0xf] %vm4593_vm15, %v5260_v1  ;;  %v5261_v57 = vpack.c.bf16 %v4341_v23, %v4341_v23  ;;  %v4628_v50 = vsel %vm4626_vm0, %v4341_v23, 0.0  ;;  %v4698_v7 = vmul.f32 %v4341_v23, %v4341_v23  ;;  %v4729_v0 = vsel %vm4626_vm0, %v4697_v4, 0.0 }
 0x1f6   : > { %v1768_v21 = vpop.permute.xlu1 %1767  ;;  %v2092_v25 = vpop.permute.xlu0 %2091  ;;  %4597 = vst.msk [vmem:[%s7042_s6 + $0xc] sm:$0xf] %vm4593_vm15, %v5263_v62  ;;  %v4629_v27 = vadd.f32 %v4628_v50, %v4627_v37  ;;  %v4734_v3 = vsel %vm4626_vm0, %v4700_v61, 0.0 }
 0x1f7   : > { %1802 = vst.msk [vmem:[#allocation3 + $0x70] sm:$0xff] %vm1787_vm1, %v1768_v21  ;;  %v4730_v14 = vsel %vm4626_vm0, %v4698_v7, 0.0 }
 0x1f8   : > { %2126 = vst.msk [vmem:[#allocation3 + $0x70] sm:$0xff] %vm2111_vm2, %v2092_v25  ;;  %v4631_v51 = vadd.f32 %v4630_v42, %v4629_v27  ;;  %v4731_v55 = vadd.f32 %v4730_v14, %v4729_v0 }
 0x1f9   : > { %4595 = vst.msk [vmem:[%s7042_s6 + $0x4] sm:$0xf] %vm4593_vm15, %v5261_v57  ;;  %v5402_v45 = vpop.f32.mrb[4].mxu0 }
 0x1fa   : > { %v1770_v63 = vpop.permute.xlu1 %1769  ;;  %v2269_v17 = vpop.permute.xlu0 %2268  ;;  %v4733_v18 = vadd.f32 %v4732_v47, %v4731_v55  ;;  %v5266_v58 = vpack.c.bf16 %v5402_v45, %v5402_v45  ;;  %v4633_v19 = vadd.f32 %v4632_v40, %v4631_v51  ;;  %v4703_v52 = vmul.f32 %v5402_v45, %v5402_v45 }
 0x1fb   : > { %1803 = vst.msk [vmem:[#allocation3 + $0x78] sm:$0xff] %vm1787_vm1, %v1770_v63  ;;  %v4228_v38 = vld [vmem:[#allocation3 + $0x68] sm:$0xff]  ;;  %v4354_v44 = vpop.f32.mrb[5].mxu0  ;;  %v4638_v26 = vsel %vm4626_vm0, %v5402_v45, 0.0  ;;  %vm7240_vm1 = vmmov %vm7233_vm7 }
 0x1fc   : > { %2303 = vst.msk [vmem:[#allocation3 + $0x70] sm:$0xff] %vm7233_vm7, %v2269_v17  ;;  %5421 = vmatmul.mubr.msk.bf16.gmra.mrb[8].mxu1 %vm4251_vm4, %v4228_v38  ;;  %v5264_v35 = vpack.c.bf16 %v4354_v44, %v4354_v44  ;;  %v4634_v56 = vsel %vm4626_vm0, %v4354_v44, 0.0  ;;  %v4701_v24 = vmul.f32 %v4354_v44, %v4354_v44  ;;  %v5403_v5 = vpop.f32.mrb[6].mxu0  ;;  %v4735_v28 = vadd.f32 %v4734_v3, %v4733_v18 }
 0x1fd   : > { %4600 = vst.msk [vmem:[%s7042_s6 + $0x18] sm:$0xf] %vm4593_vm15, %v5266_v58  ;;  %v5267_v43 = vpack.c.bf16 %v5403_v5, %v5403_v5  ;;  %v4357_v6 = vpop.f32.mrb[7].mxu0  ;;  %v4635_v12 = vadd.f32 %v4634_v56, %v4633_v19  ;;  %v4704_v20 = vmul.f32 %v5403_v5, %v5403_v5  ;;  %v4740_v48 = vsel %vm4626_vm0, %v4703_v52, 0.0 }
 0x1fe   : > { %v2094_v54 = vpop.permute.xlu1 %2093  ;;  %4598 = vst.msk [vmem:[%s7042_s6 + $0x10] sm:$0xf] %vm4593_vm15, %v5264_v35  ;;  %v4736_v30 = vsel %vm4626_vm0, %v4701_v24, 0.0  ;;  %v5265_v36 = vpack.c.bf16 %v4357_v6, %v4357_v6  ;;  %v4636_v39 = vsel %vm4626_vm0, %v4357_v6, 0.0  ;;  %v4702_v59 = vmul.f32 %v4357_v6, %v4357_v6 }
 0x1ff   : > { %2127 = vst.msk [vmem:[#allocation3 + $0x78] sm:$0xff] %vm2111_vm2, %v2094_v54  ;;  %v4737_v32 = vadd.f32 %v4736_v30, %v4735_v28  ;;  %v4637_v33 = vadd.f32 %v4636_v39, %v4635_v12  ;;  %v4640_v2 = vsel %vm4626_vm0, %v5403_v5, 0.0  ;;  %v4742_v9 = vsel %vm4626_vm0, %v4704_v20, 0.0  ;;  %vm7241_vm2 = vmmov %vm7239_vm3 }
 0x200   : > { %4601 = vst.msk [vmem:[%s7042_s6 + $0x1c] sm:$0xf] %vm4593_vm15, %v5267_v43  ;;  %4599 = vst.msk [vmem:[%s7042_s6 + $0x14] sm:$0xf] %vm4593_vm15, %v5265_v36  ;;  %v4738_v49 = vsel %vm4626_vm0, %v4702_v59, 0.0 }
 0x201   : > { %v4639_v60 = vadd.f32 %v4638_v26, %v4637_v33  ;;  %v4739_v46 = vadd.f32 %v4738_v49, %v4737_v32 }
 0x202   : > { %v2814_v31 = vpop.permute.xlu0 %2813 }
 0x203   : > { %2848 = vst.msk [vmem:[#allocation3 + $0x70] sm:$0xff] %vm2833_vm5, %v2814_v31  ;;  %v4741_v13 = vadd.f32 %v4740_v48, %v4739_v46  ;;  %v4641_v41 = vadd.f32 %v4640_v2, %v4639_v60 }
 0x205   : > { %v4743_v11 = vadd.f32 %v4742_v9, %v4741_v13  ;;  %v5406_v34 = vpop.f32.mrb[8].mxu0 }
 0x206   : > { %v2271_v8 = vpop.permute.xlu1 %2270  ;;  %v3135_v10 = vpop.permute.xlu0 %3134  ;;  %v5270_v22 = vpack.c.bf16 %v5406_v34, %v5406_v34  ;;  %v4707_v25 = vmul.f32 %v5406_v34, %v5406_v34  ;;  %v4646_v0 = vsel %vm4626_vm0, %v5406_v34, 0.0 }
 0x207   : > { %2304 = vst.msk [vmem:[#allocation3 + $0x78] sm:$0xff] %vm7240_vm1, %v2271_v8  ;;  %v4370_v53 = vpop.f32.mrb[9].mxu0 }
 0x208   : > { %3169 = vst.msk [vmem:[#allocation3 + $0x70] sm:$0xff] %vm3154_vm6, %v3135_v10  ;;  %v5268_v1 = vpack.c.bf16 %v4370_v53, %v4370_v53  ;;  %v4642_v4 = vsel %vm4626_vm0, %v4370_v53, 0.0  ;;  %v4705_v29 = vmul.f32 %v4370_v53, %v4370_v53  ;;  %v5407_v16 = vpop.f32.mrb[10].mxu0  ;;  %v4748_v17 = vsel %vm4626_vm0, %v4707_v25, 0.0 }
 0x209   : > { %4604 = vst.msk [vmem:[%s7042_s6 + $0x28] sm:$0xf] %vm4593_vm15, %v5270_v22  ;;  %v4643_v62 = vadd.f32 %v4642_v4, %v4641_v41  ;;  %v5271_v23 = vpack.c.bf16 %v5407_v16, %v5407_v16  ;;  %v4373_v21 = vpop.f32.mrb[11].mxu0  ;;  %v4708_v14 = vmul.f32 %v5407_v16, %v5407_v16  ;;  %v4648_v47 = vsel %vm4626_vm0, %v5407_v16, 0.0 }
 0x20a   : > { %v3313_v15 = vpop.permute.xlu0 %3312  ;;  %4602 = vst.msk [vmem:[%s7042_s6 + $0x20] sm:$0xf] %vm4593_vm15, %v5268_v1  ;;  %v4744_v57 = vsel %vm4626_vm0, %v4705_v29, 0.0  ;;  %v5269_v50 = vpack.c.bf16 %v4373_v21, %v4373_v21  ;;  %v4644_v7 = vsel %vm4626_vm0, %v4373_v21, 0.0  ;;  %v4706_v42 = vmul.f32 %v4373_v21, %v4373_v21 }
 0x20b   : > { %3347 = vst.msk [vmem:[#allocation3 + $0x70] sm:$0xff] %vm3332_vm9, %v3313_v15  ;;  %v4745_v61 = vadd.f32 %v4744_v57, %v4743_v11  ;;  %v4645_v27 = vadd.f32 %v4644_v7, %v4643_v62  ;;  %v4750_v18 = vsel %vm4626_vm0, %v4708_v14, 0.0 }
 0x20c   : > { %4605 = vst.msk [vmem:[%s7042_s6 + $0x2c] sm:$0xf] %vm4593_vm15, %v5271_v23  ;;  %4603 = vst.msk [vmem:[%s7042_s6 + $0x24] sm:$0xf] %vm4593_vm15, %v5269_v50  ;;  %v4746_v55 = vsel %vm4626_vm0, %v4706_v42, 0.0 }
 0x20d   : > { %v4647_v51 = vadd.f32 %v4646_v0, %v4645_v27  ;;  %v4747_v45 = vadd.f32 %v4746_v55, %v4745_v61 }
 0x20f   : > { %v4649_v38 = vadd.f32 %v4648_v47, %v4647_v51  ;;  %v4749_v3 = vadd.f32 %v4748_v17, %v4747_v45 }
 0x211   : > { %v4751_v44 = vadd.f32 %v4750_v18, %v4749_v3 }
 0x212   : > { %v2816_v37 = vpop.permute.xlu1 %2815 }
 0x213   : > { %2849 = vst.msk [vmem:[#allocation3 + $0x78] sm:$0xff] %vm2833_vm5, %v2816_v37  ;;  %vm7242_vm5 = vmmov %vm7241_vm2 }
 0x216   : > { %v3137_v63 = vpop.permute.xlu1 %3136  ;;  %v3858_v40 = vpop.permute.xlu0 %3857 }
 0x217   : > { %3170 = vst.msk [vmem:[#allocation3 + $0x78] sm:$0xff] %vm3154_vm6, %v3137_v63  ;;  %vm4799_vm6 = vcmask 57344  }
 0x218   : > { %3892 = vst.msk [vmem:[#allocation3 + $0x70] sm:$0xff] %vm3877_vm10, %v3858_v40 }
 0x21a   : > { %v3315_v58 = vpop.permute.xlu1 %3314  ;;  %v4179_v35 = vpop.permute.xlu0 %4178 }
 0x21b   : > { %3348 = vst.msk [vmem:[#allocation3 + $0x78] sm:$0xff] %vm3332_vm9, %v3315_v58 }
 0x21c   : > { %4213 = vst.msk [vmem:[#allocation3 + $0x70] sm:$0xff] %vm7241_vm2, %v4179_v35 }
 0x21e   : > { %v3860_v19 = vpop.permute.xlu1 %3859 }
 0x21f   : > { %3893 = vst.msk [vmem:[#allocation3 + $0x78] sm:$0xff] %vm3877_vm10, %v3860_v19 }
 0x222   : > { %v4181_v56 = vpop.permute.xlu1 %4180 }
 0x223   : > { %4214 = vst.msk [vmem:[#allocation3 + $0x78] sm:$0xff] %vm7242_vm5, %v4181_v56  ;;  %v4229_v24 = vld [vmem:[#allocation3 + $0x70] sm:$0xff] }
 0x224   : > { %5424 = vmatprep.mubr.msk.bf16.mxu1 %vm4251_vm4, %v4229_v24 }
 0x22a   : > { %v4230_v5 = vld [vmem:[#allocation3 + $0x78] sm:$0xff] }
 0x22b   : > { %5425 = vmatmul.mubr.msk.bf16.gmra.mrb[12].mxu1 %vm4251_vm4, %v4230_v5 }
 0x23b   : > { %v5410_v28 = vpop.f32.mrb[12].mxu0 }
 0x23c   : > { %v5274_v43 = vpack.c.bf16 %v5410_v28, %v5410_v28  ;;  %v4386_v6 = vpop.f32.mrb[13].mxu0  ;;  %v4711_v20 = vmul.f32 %v5410_v28, %v5410_v28  ;;  %v4654_v31 = vsel %vm4626_vm0, %v5410_v28, 0.0 }
 0x23d   : > { %v5272_v54 = vpack.c.bf16 %v4386_v6, %v4386_v6  ;;  %v4650_v12 = vsel %vm4626_vm0, %v4386_v6, 0.0  ;;  %v4709_v30 = vmul.f32 %v4386_v6, %v4386_v6  ;;  %v5411_v36 = vpop.f32.mrb[14].mxu0 }
 0x23e   : > { %4608 = vst.msk [vmem:[%s7042_s6 + $0x38] sm:$0xf] %vm4593_vm15, %v5274_v43  ;;  %v4651_v52 = vadd.f32 %v4650_v12, %v4649_v38  ;;  %v5275_v32 = vpack.c.bf16 %v5411_v36, %v5411_v36  ;;  %v4389_v39 = vpop.f32.mrb[15].mxu0  ;;  %v4712_v48 = vmul.f32 %v5411_v36, %v5411_v36  ;;  %v4656_v41 = vsel %vm4626_vm0, %v5411_v36, 0.0 }
 0x23f   : > { %4606 = vst.msk [vmem:[%s7042_s6 + $0x30] sm:$0xf] %vm4593_vm15, %v5272_v54  ;;  %v4752_v59 = vsel %vm4626_vm0, %v4709_v30, 0.0  ;;  %v5273_v33 = vpack.c.bf16 %v4389_v39, %v4389_v39  ;;  %v4652_v26 = vsel %vm4626_vm0, %v4389_v39, 0.0  ;;  %v4710_v46 = vmul.f32 %v4389_v39, %v4389_v39 }
 0x240   : > { %v4753_v49 = vadd.f32 %v4752_v59, %v4751_v44  ;;  %4609 = vst.msk [vmem:[%s7042_s6 + $0x3c] sm:$0xf] %vm4593_vm15, %v5275_v32  ;;  %v4653_v60 = vadd.f32 %v4652_v26, %v4651_v52  ;;  %v4756_v11 = vsel %vm4626_vm0, %v4711_v20, 0.0  ;;  %v4758_v15 = vsel %vm4626_vm0, %v4712_v48, 0.0 }
 0x241   : > { %4607 = vst.msk [vmem:[%s7042_s6 + $0x34] sm:$0xf] %vm4593_vm15, %v5273_v33  ;;  %v4754_v13 = vsel %vm4626_vm0, %v4710_v46, 0.0 }
 0x242   : > { %v4655_v2 = vadd.f32 %v4654_v31, %v4653_v60  ;;  %v4755_v9 = vadd.f32 %v4754_v13, %v4753_v49 }
 0x244   : > { %v4657_v8 = vadd.f32 %v4656_v41, %v4655_v2  ;;  %v4757_v10 = vadd.f32 %v4756_v11, %v4755_v9 }
 0x246   : > { %v4759_v34 = vadd.f32 %v4758_v15, %v4757_v10 }
 0x26d   : > { %v5414_v22 = vpop.f32.mrb[0].mxu1 }
 0x26e   : > { %v5278_v53 = vpack.c.bf16 %v5414_v22, %v5414_v22  ;;  %v4402_v1 = vpop.f32.mrb[1].mxu1  ;;  %v4715_v25 = vmul.f32 %v5414_v22, %v5414_v22  ;;  %v4662_v0 = vsel %vm4626_vm0, %v5414_v22, 0.0 }
 0x26f   : > { %v5276_v4 = vpack.c.bf16 %v4402_v1, %v4402_v1  ;;  %v4658_v29 = vsel %vm4626_vm0, %v4402_v1, 0.0  ;;  %v4713_v16 = vmul.f32 %v4402_v1, %v4402_v1  ;;  %v5415_v62 = vpop.f32.mrb[2].mxu1 }
 0x270   : > { %4612 = vst.msk [vmem:[%s7042_s6 + $0x48] sm:$0xf] %vm4593_vm15, %v5278_v53  ;;  %v4659_v23 = vadd.f32 %v4658_v29, %v4657_v8  ;;  %v5279_v21 = vpack.c.bf16 %v5415_v62, %v5415_v62  ;;  %v4405_v37 = vpop.f32.mrb[3].mxu1  ;;  %v4716_v14 = vmul.f32 %v5415_v62, %v5415_v62  ;;  %v4664_v63 = vsel %vm4626_vm0, %v5415_v62, 0.0 }
 0x271   : > { %4610 = vst.msk [vmem:[%s7042_s6 + $0x40] sm:$0xf] %vm4593_vm15, %v5276_v4  ;;  %v4760_v57 = vsel %vm4626_vm0, %v4713_v16, 0.0  ;;  %v5277_v50 = vpack.c.bf16 %v4405_v37, %v4405_v37  ;;  %v4660_v7 = vsel %vm4626_vm0, %v4405_v37, 0.0  ;;  %v4714_v42 = vmul.f32 %v4405_v37, %v4405_v37 }
 0x272   : > { %v4761_v61 = vadd.f32 %v4760_v57, %v4759_v34  ;;  %4613 = vst.msk [vmem:[%s7042_s6 + $0x4c] sm:$0xf] %vm4593_vm15, %v5279_v21  ;;  %v4661_v27 = vadd.f32 %v4660_v7, %v4659_v23  ;;  %v4764_v45 = vsel %vm4626_vm0, %v4715_v25, 0.0  ;;  %v4766_v40 = vsel %vm4626_vm0, %v4716_v14, 0.0 }
 0x273   : > { %4611 = vst.msk [vmem:[%s7042_s6 + $0x44] sm:$0xf] %vm4593_vm15, %v5277_v50  ;;  %v4762_v55 = vsel %vm4626_vm0, %v4714_v42, 0.0 }
 0x274   : > { %v4663_v51 = vadd.f32 %v4662_v0, %v4661_v27  ;;  %v4763_v47 = vadd.f32 %v4762_v55, %v4761_v61 }
 0x276   : > { %v4665_v17 = vadd.f32 %v4664_v63, %v4663_v51  ;;  %v4765_v38 = vadd.f32 %v4764_v45, %v4763_v47 }
 0x278   : > { %v4767_v3 = vadd.f32 %v4766_v40, %v4765_v38 }
 0x29e   : > { %v5418_v18 = vpop.f32.mrb[4].mxu1 }
 0x29f   : > { %v5282_v58 = vpack.c.bf16 %v5418_v18, %v5418_v18  ;;  %v4418_v44 = vpop.f32.mrb[5].mxu1  ;;  %v4719_v30 = vmul.f32 %v5418_v18, %v5418_v18  ;;  %v4670_v39 = vsel %vm4626_vm0, %v5418_v18, 0.0 }
 0x2a0   : > { %v5280_v35 = vpack.c.bf16 %v4418_v44, %v4418_v44  ;;  %v4666_v19 = vsel %vm4626_vm0, %v4418_v44, 0.0  ;;  %v4717_v56 = vmul.f32 %v4418_v44, %v4418_v44  ;;  %v5419_v24 = vpop.f32.mrb[6].mxu1 }
 0x2a1   : > { %4616 = vst.msk [vmem:[%s7042_s6 + $0x58] sm:$0xf] %vm4593_vm15, %v5282_v58  ;;  %v4667_v5 = vadd.f32 %v4666_v19, %v4665_v17  ;;  %v5283_v28 = vpack.c.bf16 %v5419_v24, %v5419_v24  ;;  %v4421_v43 = vpop.f32.mrb[7].mxu1  ;;  %v4720_v59 = vmul.f32 %v5419_v24, %v5419_v24  ;;  %v4672_v20 = vsel %vm4626_vm0, %v5419_v24, 0.0 }
 0x2a2   : > { %4614 = vst.msk [vmem:[%s7042_s6 + $0x50] sm:$0xf] %vm4593_vm15, %v5280_v35  ;;  %v4768_v6 = vsel %vm4626_vm0, %v4717_v56, 0.0  ;;  %v5281_v54 = vpack.c.bf16 %v4421_v43, %v4421_v43  ;;  %v4668_v12 = vsel %vm4626_vm0, %v4421_v43, 0.0  ;;  %v4718_v32 = vmul.f32 %v4421_v43, %v4421_v43 }
 0x2a3   : > { %v4769_v36 = vadd.f32 %v4768_v6, %v4767_v3  ;;  %4617 = vst.msk [vmem:[%s7042_s6 + $0x5c] sm:$0xf] %vm4593_vm15, %v5283_v28  ;;  %v4669_v52 = vadd.f32 %v4668_v12, %v4667_v5  ;;  %v4772_v60 = vsel %vm4626_vm0, %v4719_v30, 0.0  ;;  %v4774_v48 = vsel %vm4626_vm0, %v4720_v59, 0.0 }
 0x2a4   : > { %4615 = vst.msk [vmem:[%s7042_s6 + $0x54] sm:$0xf] %vm4593_vm15, %v5281_v54  ;;  %v4770_v26 = vsel %vm4626_vm0, %v4718_v32, 0.0 }
 0x2a5   : > { %v4671_v33 = vadd.f32 %v4670_v39, %v4669_v52  ;;  %v4771_v49 = vadd.f32 %v4770_v26, %v4769_v36 }
 0x2a7   : > { %v4673_v46 = vadd.f32 %v4672_v20, %v4671_v33  ;;  %v4773_v31 = vadd.f32 %v4772_v60, %v4771_v49 }
 0x2a9   : > { %v4775_v2 = vadd.f32 %v4774_v48, %v4773_v31 }
 0x2cf   : > { %v5422_v13 = vpop.f32.mrb[8].mxu1 }
 0x2d0   : > { %v5286_v41 = vpack.c.bf16 %v5422_v13, %v5422_v13  ;;  %v4434_v9 = vpop.f32.mrb[9].mxu1  ;;  %v4723_v16 = vmul.f32 %v5422_v13, %v5422_v13  ;;  %v4678_v37 = vsel %vm4626_vm0, %v5422_v13, 0.0 }
 0x2d1   : > { %v5284_v11 = vpack.c.bf16 %v4434_v9, %v4434_v9  ;;  %v4674_v8 = vsel %vm4626_vm0, %v4434_v9, 0.0  ;;  %v4721_v10 = vmul.f32 %v4434_v9, %v4434_v9  ;;  %v5423_v15 = vpop.f32.mrb[10].mxu1 }
 0x2d2   : > { %4620 = vst.msk [vmem:[%s7042_s6 + $0x68] sm:$0xf] %vm4593_vm15, %v5286_v41  ;;  %v4675_v34 = vadd.f32 %v4674_v8, %v4673_v46  ;;  %v5287_v22 = vpack.c.bf16 %v5423_v15, %v5423_v15  ;;  %v4437_v53 = vpop.f32.mrb[11].mxu1  ;;  %v4724_v57 = vmul.f32 %v5423_v15, %v5423_v15  ;;  %v4680_v25 = vsel %vm4626_vm0, %v5423_v15, 0.0 }
 0x2d3   : > { %4618 = vst.msk [vmem:[%s7042_s6 + $0x60] sm:$0xf] %vm4593_vm15, %v5284_v11  ;;  %v4776_v1 = vsel %vm4626_vm0, %v4721_v10, 0.0  ;;  %v5285_v4 = vpack.c.bf16 %v4437_v53, %v4437_v53  ;;  %v4676_v29 = vsel %vm4626_vm0, %v4437_v53, 0.0  ;;  %v4722_v21 = vmul.f32 %v4437_v53, %v4437_v53 }
 0x2d4   : > { %v4777_v62 = vadd.f32 %v4776_v1, %v4775_v2  ;;  %4621 = vst.msk [vmem:[%s7042_s6 + $0x6c] sm:$0xf] %vm4593_vm15, %v5287_v22  ;;  %v4677_v23 = vadd.f32 %v4676_v29, %v4675_v34  ;;  %v4780_v27 = vsel %vm4626_vm0, %v4723_v16, 0.0  ;;  %v4782_v14 = vsel %vm4626_vm0, %v4724_v57, 0.0 }
 0x2d5   : > { %4619 = vst.msk [vmem:[%s7042_s6 + $0x64] sm:$0xf] %vm4593_vm15, %v5285_v4  ;;  %v4778_v7 = vsel %vm4626_vm0, %v4722_v21, 0.0 }
 0x2d6   : > { %v4679_v50 = vadd.f32 %v4678_v37, %v4677_v23  ;;  %v4779_v61 = vadd.f32 %v4778_v7, %v4777_v62 }
 0x2d8   : > { %v4681_v42 = vadd.f32 %v4680_v25, %v4679_v50  ;;  %v4781_v0 = vadd.f32 %v4780_v27, %v4779_v61 }
 0x2da   : > { %v4783_v51 = vadd.f32 %v4782_v14, %v4781_v0 }
 0x2fe   : > { %v5426_v55 = vpop.f32.mrb[12].mxu1 }
 0x2ff   : > { %v5290_v63 = vpack.c.bf16 %v5426_v55, %v5426_v55  ;;  %v4450_v47 = vpop.f32.mrb[13].mxu1  ;;  %v4727_v56 = vmul.f32 %v5426_v55, %v5426_v55  ;;  %v4686_v43 = vsel %vm4626_vm0, %v5426_v55, 0.0 }
 0x300   : > { %v5288_v45 = vpack.c.bf16 %v4450_v47, %v4450_v47  ;;  %v4682_v17 = vsel %vm4626_vm0, %v4450_v47, 0.0  ;;  %v4725_v38 = vmul.f32 %v4450_v47, %v4450_v47  ;;  %v5427_v40 = vpop.f32.mrb[14].mxu1 }
 0x301   : > { %4624 = vst.msk [vmem:[%s7042_s6 + $0x78] sm:$0xf] %vm4593_vm15, %v5290_v63  ;;  %v4683_v3 = vadd.f32 %v4682_v17, %v4681_v42  ;;  %v5291_v18 = vpack.c.bf16 %v5427_v40, %v5427_v40  ;;  %v4453_v58 = vpop.f32.mrb[15].mxu1  ;;  %v4728_v6 = vmul.f32 %v5427_v40, %v5427_v40  ;;  %v4688_v30 = vsel %vm4626_vm0, %v5427_v40, 0.0 }
 0x302   : > { %4622 = vst.msk [vmem:[%s7042_s6 + $0x70] sm:$0xf] %vm4593_vm15, %v5288_v45  ;;  %v4784_v44 = vsel %vm4626_vm0, %v4725_v38, 0.0  ;;  %v5289_v35 = vpack.c.bf16 %v4453_v58, %v4453_v58  ;;  %v4684_v19 = vsel %vm4626_vm0, %v4453_v58, 0.0  ;;  %v4726_v28 = vmul.f32 %v4453_v58, %v4453_v58 }
 0x303   : > { %v4785_v24 = vadd.f32 %v4784_v44, %v4783_v51  ;;  %4625 = vst.msk [vmem:[%s7042_s6 + $0x7c] sm:$0xf] %vm4593_vm15, %v5291_v18  ;;  %v4685_v5 = vadd.f32 %v4684_v19, %v4683_v3  ;;  %v4788_v52 = vsel %vm4626_vm0, %v4727_v56, 0.0  ;;  %v4790_v59 = vsel %vm4626_vm0, %v4728_v6, 0.0 }
 0x304   : > { %4623 = vst.msk [vmem:[%s7042_s6 + $0x74] sm:$0xf] %vm4593_vm15, %v5289_v35  ;;  %v4786_v12 = vsel %vm4626_vm0, %v4726_v28, 0.0 }
 0x305   : > { %v4687_v54 = vadd.f32 %v4686_v43, %v4685_v5  ;;  %v4787_v36 = vadd.f32 %v4786_v12, %v4785_v24 }
 0x307   : > { %v4689_v32 = vadd.f32 %v4688_v30, %v4687_v54  ;;  %v4789_v39 = vadd.f32 %v4788_v52, %v4787_v36 }
 0x309   : > { %v4690_v33 = vrot.slane %v4689_v32, 4  ;;  %v4791_v26 = vadd.f32 %v4790_v59, %v4789_v39 }
 0x30b   : > { %v4691_v20 = vadd.f32 %v4690_v33, %v4689_v32  ;;  %v4792_v49 = vrot.slane %v4791_v26, 4 }
 0x30d   : > { %v4692_v60 = vrot.slane %v4691_v20, 2  ;;  %v4793_v46 = vadd.f32 %v4792_v49, %v4791_v26 }
 0x30f   : > { %v4693_v31 = vadd.f32 %v4692_v60, %v4691_v20  ;;  %v4794_v48 = vrot.slane %v4793_v46, 2 }
 0x311   : > { %v4694_v2 = vrot.slane %v4693_v31, 1  ;;  %v4795_v13 = vadd.f32 %v4794_v48, %v4793_v46 }
 0x313   : > { %v4695_v41 = vadd.f32 %v4694_v2, %v4693_v31  ;;  %v4796_v9 = vrot.slane %v4795_v13, 1 }
 0x315   : > { %4800 = vst.msk [vmem:[%s280_s9] sm:$0x1] %vm4799_vm6, %v4695_v41  ;;  %v4797_v11 = vadd.f32 %v4796_v9, %v4795_v13 }
 0x317   : > { %4801 = vst.msk [vmem:[%s280_s9 + $0x1] sm:$0x1] %vm4799_vm6, %v4797_v11 }
 0x318 PF: > { %s16_s20 = sadd.s32 1, %s5548_s20   ;;  %s7243_s18 = smov %s5544_s19 }
 0x319   : > { %p13_p5 = scmp.ge.s32.totalorder %s16_s20, 4   ;;  %s7244_s19 = smov %s7246_s21 }
 0x31b   :  { %15 = sbr.rel (!%p13_p5) target bundleno = 2 (0x2), region = 84 }

// kernel: up_forward.3
= control target key start
LH: loop header
LB: loop body
LE: loop exit
PB: predicated region body
PF: predicated region fallthrough
CT: control target
= control target key end

     0   :  { %s6402_s18 = smov 0   ;;  %s6404_s19 = smov 0   ;;  %s8246_s0 = inlined_call_operand.vmem [shape: bf16[2,16,16,4], index: 0, kind: input, shape index: {}]   ;;  %s8247_s1 = inlined_call_operand.vmem [shape: f32[2,8,8,4], index: 1, kind: input, shape index: {}]   ;;  %s8248_s2 = inlined_call_operand.vmem [shape: f32[256,64], index: 2, kind: input, shape index: {}]   ;;  %s8249_s3 = inlined_call_operand.vmem [shape: bf16[72,4], index: 3, kind: input, shape index: {}]   ;;  %s8250_s4 = inlined_call_operand.vmem [shape: bf16[2,16,16,4], index: 4, kind: output, shape index: {0}]   ;;  %s8251_s5 = inlined_call_operand.vmem [shape: f32[2,2,4], index: 5, kind: output, shape index: {1}]  }
   0x1   :  { %s6406_s20 = smov 0  }
   0x2 LB: > { %s28_s21 = sadd.s32 1, %s6356_s19  ;;  %p5680_p0 = scmp.ge.s32.totalorder %s6360_s20, 1  ;;  %s6360_s20 = sphi %s6406_s20, %s16_s20   ;;  %s6356_s19 = sphi %s6404_s19, %s8267_s19   ;;  %s6352_s18 = sphi %s6402_s18, %s8266_s18  }
   0x3   : > { %p30_p1 = scmp.ge.s32.totalorder %s28_s21, 2  ;;  %p225_p2 = scmp.lt.s32.totalorder %s6360_s20, 3 }
   0x5   : > { %s8269_s21 = smov (%p30_p1, %s28_s21), 0  ;;  %p226_p3 = pnand %p5680_p0, %p225_p2 }
   0x6   : > { %p272_p4 = scmp.lt.s32.totalorder (!%p226_p3), %s6352_s18, 1  ;;  %v840_v0 = vld [vmem:[%s8248_s2] sm:$0xff] (!%p226_p3)  ;;  %vm872_vm0 = vcmask (!%p226_p3), 523264   ;;  %vm302_vm1 = vcmask (!%p226_p3), 60416   ;;  %vm305_vm2 = vcmask (!%p226_p3), 57344   ;;  %v6362_v1 = vmov (!%p226_p3), 0  }
   0x7   : > { %229 = sbr.rel (%p226_p3) target bundleno = 1042 (0x412), region = 36  ;;  %6143 = vmatprep.mubr.msk.f32.mxu0 (!%p226_p3), %vm872_vm0, %v840_v0  ;;  %303 = vst.msk [vmem:[#allocation2] sm:$0xf] (!%p226_p3), %vm302_vm1, %v6362_v1  ;;  %304 = vst.msk [vmem:[#allocation2 + $0x4] sm:$0xf] (!%p226_p3), %vm302_vm1, %v6362_v1  ;;  %vm2612_vm3 = vcmask (!%p226_p3), 1042432  }
   0x8   : > { %306 = vst.msk [vmem:[#allocation2 + $0x8] sm:$0x1] (!%p226_p3), %vm305_vm2, %v6362_v1  ;;  %309 = vst.msk [vmem:[#allocation2 + $0x14] sm:$0x1] (!%p226_p3), %vm305_vm2, %v6362_v1  ;;  %vm2613_vm4 = vcmask (!%p226_p3), 1046532   ;;  %s6363_s28 = smov (!%p226_p3), 16  }
   0x9   : > { %307 = vst.msk [vmem:[#allocation2 + $0xc] sm:$0xf] (!%p226_p3), %vm302_vm1, %v6362_v1  ;;  %308 = vst.msk [vmem:[#allocation2 + $0x10] sm:$0xf] (!%p226_p3), %vm302_vm1, %v6362_v1  ;;  %v841_v25 = vld [vmem:[%s8248_s2 + $0x8] sm:$0xff] (!%p226_p3)  ;;  %v842_v26 = vld [vmem:[%s8248_s2 + $0x10] sm:$0xff] (!%p226_p3) }
   0xa   : > { %310 = vst.msk [vmem:[#allocation2 + $0x18] sm:$0xf] (!%p226_p3), %vm302_vm1, %v6362_v1  ;;  %311 = vst.msk [vmem:[#allocation2 + $0x1c] sm:$0xf] (!%p226_p3), %vm302_vm1, %v6362_v1  ;;  %v843_v27 = vld [vmem:[%s8248_s2 + $0x18] sm:$0xff] (!%p226_p3)  ;;  %v844_v28 = vld [vmem:[%s8248_s2 + $0x20] sm:$0xff] (!%p226_p3) }
   0xb   : > { %312 = vst.msk [vmem:[#allocation2 + $0x20] sm:$0x1] (!%p226_p3), %vm305_vm2, %v6362_v1  ;;  %315 = vst.msk [vmem:[#allocation2 + $0x2c] sm:$0x1] (!%p226_p3), %vm305_vm2, %v6362_v1  ;;  %v845_v29 = vld [vmem:[%s8248_s2 + $0x28] sm:$0xff] (!%p226_p3)  ;;  %v846_v30 = vld [vmem:[%s8248_s2 + $0x30] sm:$0xff] (!%p226_p3) }
   0xc   : > { %313 = vst.msk [vmem:[#allocation2 + $0x24] sm:$0xf] (!%p226_p3), %vm302_vm1, %v6362_v1  ;;  %314 = vst.msk [vmem:[#allocation2 + $0x28] sm:$0xf] (!%p226_p3), %vm302_vm1, %v6362_v1  ;;  %v847_v31 = vld [vmem:[%s8248_s2 + $0x38] sm:$0xff] (!%p226_p3)  ;;  %v848_v32 = vld [vmem:[%s8248_s2 + $0x40] sm:$0xff] (!%p226_p3) }
   0xd   : > { %316 = vst.msk [vmem:[#allocation2 + $0x30] sm:$0xf] (!%p226_p3), %vm302_vm1, %v6362_v1  ;;  %317 = vst.msk [vmem:[#allocation2 + $0x34] sm:$0xf] (!%p226_p3), %vm302_vm1, %v6362_v1  ;;  %v849_v33 = vld [vmem:[%s8248_s2 + $0x48] sm:$0xff] (!%p226_p3)  ;;  %v850_v34 = vld [vmem:[%s8248_s2 + $0x50] sm:$0xff] (!%p226_p3) }
   0xe   : > { %s8271_s18 = smov (!%p272_p4, %s6352_s18), 1  ;;  %318 = vst.msk [vmem:[#allocation2 + $0x38] sm:$0x1] %vm305_vm2, %v6362_v1  ;;  %321 = vst.msk [vmem:[#allocation2 + $0x44] sm:$0x1] %vm305_vm2, %v6362_v1  ;;  %v851_v35 = vld [vmem:[%s8248_s2 + $0x58] sm:$0xff] }
   0xf   : > { %319 = vst.msk [vmem:[#allocation2 + $0x3c] sm:$0xf] %vm302_vm1, %v6362_v1  ;;  %320 = vst.msk [vmem:[#allocation2 + $0x40] sm:$0xf] %vm302_vm1, %v6362_v1  ;;  %s6000_s24 = sshll.u32 %s8271_s18, 6  ;;  %v852_v36 = vld [vmem:[%s8248_s2 + $0x60] sm:$0xff] }
  0x10   : > { %322 = vst.msk [vmem:[#allocation2 + $0x48] sm:$0xf] %vm302_vm1, %v6362_v1  ;;  %323 = vst.msk [vmem:[#allocation2 + $0x4c] sm:$0xf] %vm302_vm1, %v6362_v1  ;;  %s281_s27 = scalar_lea.vmem %s8247_s1, %s6000_s24  ;;  %v2516_v13 = vld [vmem:[#allocation2] sm:$0xe] }
  0x11   : > { %324 = vst.msk [vmem:[#allocation2 + $0x50] sm:$0x1] %vm305_vm2, %v6362_v1  ;;  %327 = vst.msk [vmem:[#allocation2 + $0x5c] sm:$0x1] %vm305_vm2, %v6362_v1  ;;  %v832_v2 = vld [vmem:[%s281_s27] sm:$0xff]  ;;  %v833_v3 = vld [vmem:[%s281_s27 + $0x8] sm:$0xff] }
  0x12   : > { %325 = vst.msk [vmem:[#allocation2 + $0x54] sm:$0xf] %vm302_vm1, %v6362_v1  ;;  %326 = vst.msk [vmem:[#allocation2 + $0x58] sm:$0xf] %vm302_vm1, %v6362_v1  ;;  %v834_v4 = vld [vmem:[%s281_s27 + $0x10] sm:$0xff]  ;;  %v6233_v5 = vpack.c.bf16 %v833_v3, %v832_v2  ;;  %v835_v6 = vld [vmem:[%s281_s27 + $0x18] sm:$0xff] }
  0x13   : > { %328 = vst.msk [vmem:[#allocation2 + $0x60] sm:$0xf] %vm302_vm1, %v6362_v1  ;;  %329 = vst.msk [vmem:[#allocation2 + $0x64] sm:$0xf] %vm302_vm1, %v6362_v1  ;;  %v6237_v7 = vpack.c.bf16 %v835_v6, %v834_v4  ;;  %v836_v8 = vld [vmem:[%s281_s27 + $0x20] sm:$0xff]  ;;  %v837_v9 = vld [vmem:[%s281_s27 + $0x28] sm:$0xff] }
  0x14   : > { %330 = vst.msk [vmem:[#allocation2 + $0x68] sm:$0x1] %vm305_vm2, %v6362_v1  ;;  %333 = vst.msk [vmem:[#allocation2 + $0x74] sm:$0x1] %vm305_vm2, %v6362_v1  ;;  %6234 = vmatprep.subr.bf16.mxu0 %v6233_v5  ;;  %v6241_v10 = vpack.c.bf16 %v837_v9, %v836_v8  ;;  %v838_v11 = vld [vmem:[%s281_s27 + $0x30] sm:$0xff]  ;;  %v839_v12 = vld [vmem:[%s281_s27 + $0x38] sm:$0xff] }
  0x15   : > { %331 = vst.msk [vmem:[#allocation2 + $0x6c] sm:$0xf] %vm302_vm1, %v6362_v1  ;;  %332 = vst.msk [vmem:[#allocation2 + $0x70] sm:$0xf] %vm302_vm1, %v6362_v1  ;;  %6236 = vmatpush3.bf16.msra.mxu0 %v6233_v5  ;;  %v2517_v14 = vld [vmem:[#allocation2 + $0x4] sm:$0xf]  ;;  %v6245_v19 = vpack.c.bf16 %v839_v12, %v838_v11 }
  0x16   : > { %334 = vst.msk [vmem:[#allocation2 + $0x78] sm:$0xf] %vm302_vm1, %v6362_v1  ;;  %335 = vst.msk [vmem:[#allocation2 + $0x7c] sm:$0xf] %vm302_vm1, %v6362_v1  ;;  %6238 = vmatprep.subr.bf16.mxu0 %v6237_v7  ;;  %v2518_v15 = vld [vmem:[#allocation2 + $0x8] sm:$0x1] }
  0x17   : > { %336 = vst.msk [vmem:[#allocation2 + $0x80] sm:$0x1] %vm305_vm2, %v6362_v1  ;;  %339 = vst.msk [vmem:[#allocation2 + $0x8c] sm:$0x1] %vm305_vm2, %v6362_v1  ;;  %v5784_v17 = vrot.slane %v2516_v13, 9  ;;  %v2617_v18 = vrot.slane %v2517_v14, 5 }
  0x18   : > { %337 = vst.msk [vmem:[#allocation2 + $0x84] sm:$0xf] %vm302_vm1, %v6362_v1  ;;  %338 = vst.msk [vmem:[#allocation2 + $0x88] sm:$0xf] %vm302_vm1, %v6362_v1  ;;  %v2620_v20 = vrot.slane %v2518_v15, 5  ;;  %v853_v37 = vld [vmem:[%s8248_s2 + $0x68] sm:$0xff] }
  0x19   : > { %340 = vst.msk [vmem:[#allocation2 + $0x90] sm:$0xf] %vm302_vm1, %v6362_v1  ;;  %341 = vst.msk [vmem:[#allocation2 + $0x94] sm:$0xf] %vm302_vm1, %v6362_v1  ;;  %6240 = vmatpush3.bf16.msra.mxu0 %v6237_v7  ;;  %v2619_v22 = vrot.slane %v2617_v18, 4  ;;  %v854_v38 = vld [vmem:[%s8248_s2 + $0x70] sm:$0xff] }
  0x1a   : > { %342 = vst.msk [vmem:[#allocation2 + $0x98] sm:$0x1] %vm305_vm2, %v6362_v1  ;;  %345 = vst.msk [vmem:[#allocation2 + $0xa4] sm:$0x1] %vm305_vm2, %v6362_v1  ;;  %6242 = vmatprep.subr.bf16.mxu0 %v6241_v10  ;;  %v855_v39 = vld [vmem:[%s8248_s2 + $0x78] sm:$0xff]  ;;  %v856_v40 = vld [vmem:[%s8248_s2 + $0x80] sm:$0xff] }
  0x1b   : > { %343 = vst.msk [vmem:[#allocation2 + $0x9c] sm:$0xf] %vm302_vm1, %v6362_v1  ;;  %344 = vst.msk [vmem:[#allocation2 + $0xa0] sm:$0xf] %vm302_vm1, %v6362_v1  ;;  %v857_v41 = vld [vmem:[%s8248_s2 + $0x88] sm:$0xff]  ;;  %v858_v42 = vld [vmem:[%s8248_s2 + $0x90] sm:$0xff] }
  0x1c   : > { %346 = vst.msk [vmem:[#allocation2 + $0xa8] sm:$0xf] %vm302_vm1, %v6362_v1  ;;  %347 = vst.msk [vmem:[#allocation2 + $0xac] sm:$0xf] %vm302_vm1, %v6362_v1  ;;  %v859_v43 = vld [vmem:[%s8248_s2 + $0x98] sm:$0xff]  ;;  %v860_v44 = vld [vmem:[%s8248_s2 + $0xa0] sm:$0xff] }
  0x1d   : > { %348 = vst.msk [vmem:[#allocation2 + $0xb0] sm:$0x1] %vm305_vm2, %v6362_v1  ;;  %351 = vst.msk [vmem:[#allocation2 + $0xbc] sm:$0x1] %vm305_vm2, %v6362_v1  ;;  %6244 = vmatpush3.bf16.msra.mxu0 %v6241_v10  ;;  %v861_v45 = vld [vmem:[%s8248_s2 + $0xa8] sm:$0xff]  ;;  %v862_v46 = vld [vmem:[%s8248_s2 + $0xb0] sm:$0xff] }
  0x1e   : > { %349 = vst.msk [vmem:[#allocation2 + $0xb4] sm:$0xf] %vm302_vm1, %v6362_v1  ;;  %350 = vst.msk [vmem:[#allocation2 + $0xb8] sm:$0xf] %vm302_vm1, %v6362_v1  ;;  %6246 = vmatprep.subr.bf16.mxu0 %v6245_v19  ;;  %v863_v47 = vld [vmem:[%s8248_s2 + $0xb8] sm:$0xff]  ;;  %v864_v48 = vld [vmem:[%s8248_s2 + $0xc0] sm:$0xff] }
  0x1f   : > { %352 = vst.msk [vmem:[#allocation2 + $0xc0] sm:$0xf] %vm302_vm1, %v6362_v1  ;;  %353 = vst.msk [vmem:[#allocation2 + $0xc4] sm:$0xf] %vm302_vm1, %v6362_v1  ;;  %v865_v49 = vld [vmem:[%s8248_s2 + $0xc8] sm:$0xff]  ;;  %v866_v50 = vld [vmem:[%s8248_s2 + $0xd0] sm:$0xff] }
  0x20   : > { %354 = vst.msk [vmem:[#allocation2 + $0xc8] sm:$0x1] %vm305_vm2, %v6362_v1  ;;  %357 = vst.msk [vmem:[#allocation2 + $0xd4] sm:$0x1] %vm305_vm2, %v6362_v1  ;;  %v867_v51 = vld [vmem:[%s8248_s2 + $0xd8] sm:$0xff]  ;;  %v868_v52 = vld [vmem:[%s8248_s2 + $0xe0] sm:$0xff] }
  0x21   : > { %355 = vst.msk [vmem:[#allocation2 + $0xcc] sm:$0xf] %vm302_vm1, %v6362_v1  ;;  %356 = vst.msk [vmem:[#allocation2 + $0xd0] sm:$0xf] %vm302_vm1, %v6362_v1  ;;  %6248 = vmatpush3.bf16.msra.mxu0 %v6245_v19  ;;  %v869_v53 = vld [vmem:[%s8248_s2 + $0xe8] sm:$0xff]  ;;  %v870_v54 = vld [vmem:[%s8248_s2 + $0xf0] sm:$0xff] }
  0x22   : > { %vm6484_vm5 = vmor %vm2612_vm3, %vm2613_vm4  ;;  %v871_v55 = vld [vmem:[%s8248_s2 + $0xf8] sm:$0xff]  ;;  %v1968_v56 = vld [vmem:[#allocation2] sm:$0xf]  ;;  %vm2016_vm6 = vsmask.f32 3328  ;;  %s6364_s6 = smov 48  }
  0x23   : > { %v2618_v21 = vsel %vm6484_vm5, %v5784_v17, %v2617_v18  ;;  %v2621_v23 = vsel %vm6484_vm5, %v2619_v22, %v2620_v20  ;;  %v1969_v57 = vld [vmem:[#allocation2 + $0x4] sm:$0xf]  ;;  %v2020_v58 = vshrl.u32 %v1968_v56, 16  ;;  %v2023_v59 = vshll.u32 %v1968_v56, 16  ;;  %v1970_v2 = vld [vmem:[#allocation2 + $0x8] sm:$0x1] }
  0x24   : > { %v5800_v24 = vcombine.low %v2618_v21, %v2621_v23  ;;  %6144 = vmatmul.mubr.msk.f32.vlgmr.msra.gmra.mrb[0].mxu0 %vm872_vm0, %v841_v25  ;;  %v2029_v60 = vshll.u32 %v1969_v57, 16  ;;  %v2033_v61 = vshrl.u32 %v1969_v57, 16  ;;  %v2039_v7 = vshll.u32 %v1970_v2, 16  ;;  %s6365_s7 = smov 8   ;;  %s6366_s8 = smov 56  }
  0x25   : > { %6146 = vmatprep.mubr.msk.f32.mxu0 %vm872_vm0, %v842_v26  ;;  %v2022_v62 = vrot.slane %v2020_v58, 4  ;;  %v2025_v63 = vrot.slane %v2023_v59, 5  ;;  %vm2017_vm7 = vsmask.f32 7440  ;;  %vm1951_vm9 = vcmask 64512   ;;  %s5999_s9 = sshll.u32 %s8271_s18, 7 }
  0x26   : > { %2775 = vrot.lane.b32.xlu0 %v5800_v24, %s6363_s28  ;;  %v2031_v0 = vrot.slane %v2029_v60, 5  ;;  %v2035_v1 = vrot.slane %v2033_v61, 4  ;;  %vm6617_vm8 = vmor %vm2016_vm6, %vm2017_vm7  ;;  %v2041_v15 = vrot.slane %v2039_v7, 5  ;;  %s6639_s12 = scalar_lea.vmem %s8246_s0, %s5999_s9  ;;  %vm722_vm10 = vcmask 24576   ;;  %s6367_s13 = smov 4  }
  0x27   : > { %v2026_v5 = vor.u32 %v2025_v63, %v2022_v62  ;;  %v4108_v17 = vld [vmem:[#allocation2 + $0xd4] sm:$0x1]  ;;  %vm390_vm11 = vsmask.f32 256  ;;  %vm2499_vm13 = vcmask 130112   ;;  %vm714_vm14 = vcmask 27648  }
  0x28   : > { %6147 = vmatmul.mubr.msk.f32.gmra.mrb[2].mxu0 %vm872_vm0, %v843_v27  ;;  %v4106_v3 = vld [vmem:[#allocation2 + $0xcc] sm:$0xf]  ;;  %v4107_v4 = vld [vmem:[#allocation2 + $0xd0] sm:$0xf]  ;;  %v2036_v6 = vor.u32 %v2035_v1, %v2031_v0  ;;  %v4489_v23 = vshll.u32 %v4108_v17, 16  ;;  %vm6647_vm12 = vmand %vm722_vm10, %vm390_vm11  ;;  %vm2823_vm3 = vcmask 195712  }
  0x29   : > { %6149 = vmatprep.mubr.msk.f32.mxu0 %vm872_vm0, %v844_v28  ;;  %v4470_v8 = vshrl.u32 %v4106_v3, 16  ;;  %v4473_v9 = vshll.u32 %v4106_v3, 16  ;;  %v4479_v10 = vshll.u32 %v4107_v4, 16  ;;  %v4483_v11 = vshrl.u32 %v4107_v4, 16  ;;  %v6284_v24 = vld [vmem:[#allocation2 + $0xcc] sm:$0xff]   ;;  %s6368_s14 = smov 24  }
  0x2a   : > { %v2027_v12 = vrot.slane %v2026_v5, 4  ;;  %v2037_v13 = vrot.slane %v2036_v6, 4  ;;  %4026 = vrot.lane.b32.xlu1 %v6284_v24, %s6364_s6  ;;  %vm715_vm15 = vsmask.f32 7938  ;;  %v362_v59 = vld [vmem:[%s6639_s12 + $0x10] sm:$0xf] }
  0x2b   : > { %v4472_v18 = vrot.slane %v4470_v8, 4  ;;  %v4475_v19 = vrot.slane %v4473_v9, 5  ;;  %v4481_v20 = vrot.slane %v4479_v10, 5  ;;  %v4485_v22 = vrot.slane %v4483_v11, 4  ;;  %v727_v63 = vld [vmem:[#allocation2 + $0x18] sm:$0xf] }
  0x2c   : > { %6150 = vmatmul.mubr.msk.f32.gmra.mrb[4].mxu0 %vm872_vm0, %v845_v29  ;;  %v2032_v21 = vsel %vm6617_vm8, %v2027_v12, %v2031_v0  ;;  %v2042_v25 = vsel %vm6617_vm8, %v2037_v13, %v2041_v15  ;;  %v4491_v29 = vrot.slane %v4489_v23, 5  ;;  %v428_v60 = vshrl.u32 %v362_v59, 16  ;;  %v731_v5 = vld [vmem:[#allocation2 + $0x20] sm:$0x1]  ;;  %v734_v8 = vld [vmem:[#allocation2 + $0x24] sm:$0xf] }
  0x2d   : > { %6152 = vmatprep.mubr.msk.f32.mxu0 %vm872_vm0, %v846_v30  ;;  %v4476_v26 = vor.u32 %v4475_v19, %v4472_v18  ;;  %v5768_v27 = vcombine.low %v2032_v21, %v2042_v25  ;;  %v4486_v28 = vor.u32 %v4485_v22, %v4481_v20  ;;  %v431_v1 = vshll.u32 %v362_v59, 16  ;;  %v363_v12 = vld [vmem:[%s6639_s12 + $0x14] sm:$0xf]  ;;  %s6369_s15 = smov 40   ;;  %s6370_s16 = smov 32  }
  0x2e   : > { %v6668_v0 = vrot.slane %v428_v60, 7  ;;  %vm391_vm1 = vsmask.f32 4368  ;;  %v436_v15 = vshrl.u32 %v363_v12, 16  ;;  %vm1713_vm4 = vcmask 57376   ;;  %s6371_s17 = smov 64  }
  0x2f   : > { %v4477_v30 = vrot.slane %v4476_v26, 4  ;;  %2451 = vrot.lane.b32.xlu0 %v5768_v27, %s6365_s7  ;;  %vm6679_vm2 = vmor %vm390_vm11, %vm391_vm1  ;;  %v738_v27 = vld [vmem:[#allocation2 + $0x2c] sm:$0x1]  ;;  %vm1706_vm6 = vcmask 60448  }
  0x30   : > { %6153 = vmatmul.mubr.msk.f32.gmra.mrb[6].mxu0 %vm872_vm0, %v847_v31  ;;  %v4487_v31 = vrot.slane %v4486_v28, 4  ;;  %v433_v6 = vor.u32 %v431_v1, %v6668_v0  ;;  %v438_v19 = vrot.slane %v436_v15, 7  ;;  %vm7068_vm7 = vmand %vm1713_vm4, %vm390_vm11  ;;  %vm3000_vm11 = vcmask 261312  }
  0x31   : > { %6155 = vmatprep.mubr.msk.f32.mxu0 %vm872_vm0, %v848_v32  ;;  %v4482_v32 = vsel %vm6617_vm8, %v4477_v30, %v4481_v20  ;;  %vm7074_vm1 = vmand %vm1706_vm6, %vm715_vm15  ;;  %vm4979_vm4 = vcmask 588800  }
  0x32   : > { %v443_v23 = vrot.slane %v438_v19, 4 }
  0x34   : > { %6156 = vmatmul.mubr.msk.f32.gmra.mrb[8].mxu0 %vm872_vm0, %v849_v33  ;;  %v4492_v33 = vsel %vm6617_vm8, %v4487_v31, %v4491_v29  ;;  %v439_v31 = vshll.u32 %v363_v12, 16 }
  0x35   : > { %6158 = vmatprep.mubr.msk.f32.mxu0 %vm872_vm0, %v850_v34  ;;  %v5911_v34 = vcombine.low %v4482_v32, %v4492_v33  ;;  %v739_v32 = vsel %vm6647_vm12, %v443_v23, %v738_v27 }
  0x36   : > { %740 = vst [vmem:[#allocation2 + $0x2c] sm:$0x1] %v739_v32 }
  0x37   : > { %4571 = vrot.lane.b32.xlu1 %v5911_v34, %s6366_s8 }
  0x38   : > { %6159 = vmatmul.mubr.msk.f32.gmra.mrb[10].mxu0 %vm872_vm0, %v851_v35  ;;  %v6285_v35 = vld [vmem:[#allocation2] sm:$0xff]  }
  0x39   : > { %6161 = vmatprep.mubr.msk.f32.mxu0 %vm872_vm0, %v852_v36  ;;  %1952 = vst.msk [vmem:[#allocation3] sm:$0xff] %vm1951_vm9, %v6285_v35  ;;  %v359_v36 = vld [vmem:[%s6639_s12 + $0x4] sm:$0xf] }
  0x3a   : > { %v405_v4 = vshll.u32 %v359_v36, 16 }
  0x3c   : > { %6162 = vmatmul.mubr.msk.f32.gmra.mrb[12].mxu0 %vm872_vm0, %v853_v37  ;;  %v402_v37 = vshrl.u32 %v359_v36, 16 }
  0x3d   : > { %6164 = vmatprep.mubr.msk.f32.mxu0 %vm872_vm0, %v854_v38  ;;  %v358_v38 = vld [vmem:[%s6639_s12] sm:$0xf] }
  0x40   : > { %6165 = vmatmul.mubr.msk.f32.gmra.mrb[14].mxu0 %vm872_vm0, %v855_v39 }
  0x41   : > { %6167 = vmatprep.mubr.msk.f32.mxu0 %vm872_vm0, %v856_v40  ;;  %v394_v40 = vshrl.u32 %v358_v38, 16 }
  0x44   : > { %6168 = vmatmul.mubr.msk.f32.gmra.mrb[16].mxu0 %vm872_vm0, %v857_v41  ;;  %v404_v41 = vrot.slane %v402_v37, 7 }
  0x45   : > { %6170 = vmatprep.mubr.msk.f32.mxu0 %vm872_vm0, %v858_v42 }
  0x46   : > { %v407_v10 = vor.u32 %v405_v4, %v404_v41 }
  0x48   : > { %6171 = vmatmul.mubr.msk.f32.gmra.mrb[18].mxu0 %vm872_vm0, %v859_v43  ;;  %v724_v43 = vld [vmem:[#allocation2 + $0x14] sm:$0x1] }
  0x49   : > { %6173 = vmatprep.mubr.msk.f32.mxu0 %vm872_vm0, %v860_v44  ;;  %v396_v44 = vrot.slane %v394_v40, 7 }
  0x4b   : > { %v400_v9 = vrot.slane %v396_v44, 4 }
  0x4c   : > { %6174 = vmatmul.mubr.msk.f32.gmra.mrb[20].mxu0 %vm872_vm0, %v861_v45  ;;  %v397_v45 = vshll.u32 %v358_v38, 16 }
  0x4d   : > { %6176 = vmatprep.mubr.msk.f32.mxu0 %vm872_vm0, %v862_v46  ;;  %v409_v46 = vrot.slane %v404_v41, 4  ;;  %v408_v17 = vsel %vm6679_vm2, %v400_v9, %v407_v10  ;;  %v434_v41 = vrot.slane %v6668_v0, 4  ;;  %v364_v0 = vld [vmem:[%s6639_s12 + $0x18] sm:$0xf] }
  0x4e   : > { %721 = vst.msk [vmem:[#allocation2 + $0x10] sm:$0xf] %vm714_vm14, %v408_v17  ;;  %v445_v15 = vshrl.u32 %v364_v0, 16 }
  0x50   : > { %6177 = vmatmul.mubr.msk.f32.gmra.mrb[22].mxu0 %vm872_vm0, %v863_v47  ;;  %v399_v47 = vor.u32 %v397_v45, %v396_v44 }
  0x51   : > { %6179 = vmatprep.mubr.msk.f32.mxu0 %vm872_vm0, %v864_v48  ;;  %v725_v48 = vsel %vm6647_vm12, %v409_v46, %v724_v43  ;;  %v441_v43 = vor.u32 %v439_v31, %v438_v19 }
  0x52   : > { %726 = vst [vmem:[#allocation2 + $0x14] sm:$0x1] %v725_v48  ;;  %v6691_v48 = vld [vmem:[%s6639_s12 + $0x1c] sm:$0xf] }
  0x53   : > { %v442_v59 = vsel %vm6679_vm2, %v434_v41, %v441_v43 }
  0x54   : > { %6180 = vmatmul.mubr.msk.f32.gmra.mrb[24].mxu0 %vm872_vm0, %v865_v49  ;;  %737 = vst.msk [vmem:[#allocation2 + $0x28] sm:$0xf] %vm714_vm14, %v442_v59 }
  0x55   : > { %6182 = vmatprep.mubr.msk.f32.mxu0 %vm872_vm0, %v866_v50  ;;  %v717_v50 = vld [vmem:[#allocation2 + $0xc] sm:$0xf] }
  0x58   : > { %6183 = vmatmul.mubr.msk.f32.gmra.mrb[26].mxu0 %vm872_vm0, %v867_v51  ;;  %v360_v51 = vld [vmem:[%s6639_s12 + $0x8] sm:$0xf] }
  0x59   : > { %6185 = vmatprep.mubr.msk.f32.mxu0 %vm872_vm0, %v868_v52  ;;  %v414_v57 = vshll.u32 %v360_v51, 16 }
  0x5c   : > { %6186 = vmatmul.mubr.msk.f32.gmra.mrb[28].mxu0 %vm872_vm0, %v869_v53 }
  0x5d   : > { %6188 = vmatprep.mubr.msk.f32.mxu0 %vm872_vm0, %v870_v54  ;;  %v411_v54 = vshrl.u32 %v360_v51, 16 }
  0x5f   : > { %v6664_v56 = vrot.slane %v411_v54, 7 }
  0x60   : > { %6189 = vmatmul.mubr.msk.f32.gmra.mrb[30].mxu0 %vm872_vm0, %v871_v55  ;;  %vm6655_vm0 = vmand %vm714_vm14, %vm715_vm15  ;;  %v361_v55 = vld [vmem:[%s6639_s12 + $0xc] sm:$0xf]  ;;  %vm3866_vm15 = vcmask 392512  }
  0x61   : > { %v718_v53 = vsel %vm6655_vm0, %v399_v47, %v717_v50  ;;  %v419_v58 = vshrl.u32 %v361_v55, 16  ;;  %v416_v61 = vor.u32 %v414_v57, %v6664_v56  ;;  %v735_v11 = vsel %vm6655_vm0, %v433_v6, %v734_v8 }
  0x62   : > { %719 = vst [vmem:[#allocation2 + $0xc] sm:$0xf] %v718_v53  ;;  %736 = vst [vmem:[#allocation2 + $0x24] sm:$0xf] %v735_v11  ;;  %v422_v26 = vshll.u32 %v361_v55, 16  ;;  %v417_v36 = vrot.slane %v6664_v56, 4 }
  0x63   : > { %v421_v62 = vrot.slane %v419_v58, 7  ;;  %v728_v2 = vsel %vm6655_vm0, %v416_v61, %v727_v63  ;;  %v453_v63 = vshrl.u32 %v6691_v48, 16 }
  0x64   : > { %729 = vst [vmem:[#allocation2 + $0x18] sm:$0xf] %v728_v2 }
  0x65   : > { %v426_v3 = vrot.slane %v421_v62, 4  ;;  %v424_v37 = vor.u32 %v422_v26, %v421_v62  ;;  %v6707_v12 = vrot.slane %v453_v63, 7 }
  0x67   : > { %v732_v7 = vsel %vm6647_vm12, %v426_v3, %v731_v5  ;;  %v425_v58 = vsel %vm6679_vm2, %v417_v36, %v424_v37  ;;  %v460_v32 = vrot.slane %v6707_v12, 4 }
  0x68   : > { %733 = vst [vmem:[#allocation2 + $0x20] sm:$0x1] %v732_v7  ;;  %730 = vst.msk [vmem:[#allocation2 + $0x1c] sm:$0xf] %vm714_vm14, %v425_v58 }
  0x98   : > { %v6643_v39 = vpop.permute.xlu0 %2775 }
  0xa1   : > { %v2452_v52 = vpop.permute.xlu0 %2451 }
  0xa2   : > { %2500 = vst.msk [vmem:[#allocation3] sm:$0xff] %vm2499_vm13, %v2452_v52 }
  0xa3   : > { %2824 = vst.msk [vmem:[#allocation3] sm:$0xff] %vm2823_vm3, %v6643_v39 }
  0xf7   : > { %v6145_v18 = vpop.f32.mrb[0].mxu0 }
  0xf8   : > { %v6003_v20 = vpack.c.bf16 %v6145_v18, %v6145_v18  ;;  %v1035_v21 = vpop.f32.mrb[1].mxu0 }
  0xf9   : > { %v6002_v22 = vpack.c.bf16 %v1035_v21, %v1035_v21 }
  0xfa   : > { %v1299_v24 = vshrl.u32 %v6003_v20, 16  ;;  %v1302_v25 = vshll.u32 %v6003_v20, 16 }
  0xfb   : > { %v1291_v28 = vshrl.u32 %v6002_v22, 16  ;;  %v1294_v29 = vshll.u32 %v6002_v22, 16  ;;  %v6148_v30 = vpop.f32.mrb[2].mxu0 }
  0xfc   : > { %v1301_v33 = vrot.slane %v1299_v24, 7  ;;  %v6005_v34 = vpack.c.bf16 %v6148_v30, %v6148_v30  ;;  %v1045_v35 = vpop.f32.mrb[3].mxu0 }
  0xfd   : > { %v1293_v38 = vrot.slane %v1291_v28, 7  ;;  %v6004_v40 = vpack.c.bf16 %v1045_v35, %v1045_v35  ;;  %v448_v28 = vshll.u32 %v364_v0, 16 }
  0xfe   : > { %v1304_v44 = vor.u32 %v1302_v25, %v1301_v33  ;;  %v1316_v45 = vshrl.u32 %v6005_v34, 16  ;;  %v1319_v46 = vshll.u32 %v6005_v34, 16  ;;  %v1306_v47 = vrot.slane %v1301_v33, 4 }
  0xff   : > { %v1297_v50 = vrot.slane %v1293_v38, 4  ;;  %v1308_v51 = vshrl.u32 %v6004_v40, 16  ;;  %v1311_v52 = vshll.u32 %v6004_v40, 16  ;;  %v6151_v53 = vpop.f32.mrb[4].mxu0  ;;  %v1296_v54 = vor.u32 %v1294_v29, %v1293_v38  ;;  %v745_v38 = vld [vmem:[#allocation2 + $0x38] sm:$0x1] }
 0x100   : > { %v1318_v55 = vrot.slane %v1316_v45, 7  ;;  %1566 = vrot.lane.b32.xlu1 %v1306_v47, %s6367_s13  ;;  %v6007_v56 = vpack.c.bf16 %v6151_v53, %v6151_v53  ;;  %v1055_v57 = vpop.f32.mrb[5].mxu0  ;;  %v6717_v33 = vrot.slane %v445_v15, 7 }
 0x101   : > { %v1310_v60 = vrot.slane %v1308_v51, 7  ;;  %1562 = vrot.lane.b32.xlu0 %v1296_v54, %s6367_s13  ;;  %v6006_v61 = vpack.c.bf16 %v1055_v57, %v1055_v57  ;;  %v1305_v62 = vsel %vm6679_vm2, %v1297_v50, %v1304_v44  ;;  %v456_v51 = vshll.u32 %v6691_v48, 16 }
 0x102   : > { %v1321_v1 = vor.u32 %v1319_v46, %v1318_v55  ;;  %v1333_v2 = vshrl.u32 %v6007_v56, 16  ;;  %v1336_v3 = vshll.u32 %v6007_v56, 16  ;;  %v1323_v18 = vrot.slane %v1318_v55, 4 }
 0x103   : > { %v1314_v4 = vrot.slane %v1310_v60, 4  ;;  %v1325_v5 = vshrl.u32 %v6006_v61, 16  ;;  %v1328_v6 = vshll.u32 %v6006_v61, 16  ;;  %v1313_v7 = vor.u32 %v1311_v52, %v1310_v60  ;;  %v6154_v8 = vpop.f32.mrb[6].mxu0  ;;  %v741_v60 = vld [vmem:[#allocation2 + $0x30] sm:$0xf] }
 0x104   : > { %v6705_v9 = vrot.slane %v1333_v2, 7  ;;  %v6009_v10 = vpack.c.bf16 %v6154_v8, %v6154_v8  ;;  %v1065_v11 = vpop.f32.mrb[7].mxu0  ;;  %v746_v55 = vsel %vm6647_vm12, %v460_v32, %v745_v38  ;;  %v450_v56 = vor.u32 %v448_v28, %v6717_v33  ;;  %v367_v38 = vld [vmem:[%s6639_s12 + $0x24] sm:$0xf] }
 0x105   : > { %v1327_v17 = vrot.slane %v1325_v5, 7  ;;  %1564 = vrot.lane.b32.xlu0 %v1305_v62, %s6367_s13  ;;  %1568 = vrot.lane.b32.xlu1 %v1313_v7, %s6367_s13  ;;  %v1322_v19 = vsel %vm6679_vm2, %v1314_v4, %v1321_v1  ;;  %v6008_v20 = vpack.c.bf16 %v1065_v11, %v1065_v11  ;;  %747 = vst [vmem:[#allocation2 + $0x38] sm:$0x1] %v746_v55  ;;  %v366_v1 = vld [vmem:[%s6639_s12 + $0x20] sm:$0xf] }
 0x106   : > { %v1338_v21 = vor.u32 %v1336_v3, %v6705_v9  ;;  %v1350_v22 = vshrl.u32 %v6009_v10, 16  ;;  %v1353_v23 = vshll.u32 %v6009_v10, 16  ;;  %v1340_v41 = vrot.slane %v6705_v9, 4 }
 0x107   : > { %v1331_v24 = vrot.slane %v1327_v17, 4  ;;  %v1330_v25 = vor.u32 %v1328_v6, %v1327_v17  ;;  %v1342_v26 = vshrl.u32 %v6008_v20, 16  ;;  %v6157_v27 = vpop.f32.mrb[8].mxu0  ;;  %v1345_v36 = vshll.u32 %v6008_v20, 16 }
 0x108   : > { %v6714_v29 = vrot.slane %v1350_v22, 7  ;;  %v6011_v30 = vpack.c.bf16 %v6157_v27, %v6157_v27  ;;  %v1075_v31 = vpop.f32.mrb[9].mxu0  ;;  %v451_v6 = vrot.slane %v6717_v33, 4  ;;  %v742_v10 = vsel %vm6655_vm0, %v450_v56, %v741_v60  ;;  %v748_v56 = vld [vmem:[#allocation2 + $0x3c] sm:$0xf] }
 0x109   : > { %1572 = vrot.lane.b32.xlu0 %v1323_v18, %s6367_s13  ;;  %1574 = vrot.lane.b32.xlu1 %v1330_v25, %s6367_s13  ;;  %v1339_v34 = vsel %vm6679_vm2, %v1331_v24, %v1338_v21  ;;  %v1344_v35 = vrot.slane %v1342_v26, 7  ;;  %v6010_v37 = vpack.c.bf16 %v1075_v31, %v1075_v31  ;;  %v458_v11 = vor.u32 %v456_v51, %v6707_v12 }
 0x10a   : > { %v1355_v40 = vor.u32 %v1353_v23, %v6714_v29  ;;  %v1367_v43 = vshrl.u32 %v6011_v30, 16  ;;  %v1370_v44 = vshll.u32 %v6011_v30, 16  ;;  %v1357_v61 = vrot.slane %v6714_v29, 4  ;;  %743 = vst [vmem:[#allocation2 + $0x30] sm:$0xf] %v742_v10 }
 0x10b   : > { %v1348_v45 = vrot.slane %v1344_v35, 4  ;;  %v1359_v46 = vshrl.u32 %v6010_v37, 16  ;;  %v1362_v47 = vshll.u32 %v6010_v37, 16  ;;  %v6160_v50 = vpop.f32.mrb[10].mxu0  ;;  %v1347_v57 = vor.u32 %v1345_v36, %v1344_v35 }
 0x10c   : > { %v6726_v52 = vrot.slane %v1367_v43, 7  ;;  %v6013_v53 = vpack.c.bf16 %v6160_v50, %v6160_v50  ;;  %v1085_v54 = vpop.f32.mrb[11].mxu0  ;;  %v459_v29 = vsel %vm6679_vm2, %v451_v6, %v458_v11 }
 0x10d   : > { %1570 = vrot.lane.b32.xlu0 %v1322_v19, %s6367_s13  ;;  %1576 = vrot.lane.b32.xlu1 %v1339_v34, %s6367_s13  ;;  %v1356_v58 = vsel %vm6679_vm2, %v1348_v45, %v1355_v40  ;;  %v1361_v59 = vrot.slane %v1359_v46, 7  ;;  %v6012_v48 = vpack.c.bf16 %v1085_v54, %v1085_v54  ;;  %v462_v19 = vshrl.u32 %v366_v1, 16  ;;  %744 = vst.msk [vmem:[#allocation2 + $0x34] sm:$0xf] %vm714_vm14, %v459_v29 }
 0x10e   : > { %v1372_v62 = vor.u32 %v1370_v44, %v6726_v52  ;;  %v1384_v63 = vshrl.u32 %v6013_v53, 16  ;;  %v1387_v0 = vshll.u32 %v6013_v53, 16  ;;  %v465_v34 = vshll.u32 %v366_v1, 16 }
 0x10f   : > { %v1365_v2 = vrot.slane %v1361_v59, 4  ;;  %v1364_v3 = vor.u32 %v1362_v47, %v1361_v59  ;;  %v1376_v4 = vshrl.u32 %v6012_v48, 16  ;;  %v6163_v5 = vpop.f32.mrb[12].mxu0  ;;  %v1379_v23 = vshll.u32 %v6012_v48, 16 }
 0x110   : > { %v6739_v7 = vrot.slane %v1384_v63, 7  ;;  %v6015_v8 = vpack.c.bf16 %v6163_v5, %v6163_v5  ;;  %v1095_v9 = vpop.f32.mrb[13].mxu0  ;;  %v6753_v30 = vrot.slane %v462_v19, 7  ;;  %v1374_v40 = vrot.slane %v6726_v52, 4 }
 0x111   : > { %1578 = vrot.lane.b32.xlu0 %v1340_v41, %s6367_s13  ;;  %1580 = vrot.lane.b32.xlu1 %v1347_v57, %s6367_s13  ;;  %v1373_v15 = vsel %vm6679_vm2, %v1365_v2, %v1372_v62  ;;  %v1378_v17 = vrot.slane %v1376_v4, 7  ;;  %v6014_v18 = vpack.c.bf16 %v1095_v9, %v1095_v9  ;;  %v470_v57 = vshrl.u32 %v367_v38, 16 }
 0x112   : > { %v1389_v20 = vor.u32 %v1387_v0, %v6739_v7  ;;  %v1401_v21 = vshrl.u32 %v6015_v8, 16  ;;  %v1404_v22 = vshll.u32 %v6015_v8, 16  ;;  %v467_v53 = vor.u32 %v465_v34, %v6753_v30 }
 0x113   : > { %v1382_v24 = vrot.slane %v1378_v17, 4  ;;  %v1393_v25 = vshrl.u32 %v6014_v18, 16  ;;  %v6166_v26 = vpop.f32.mrb[14].mxu0  ;;  %v1396_v41 = vshll.u32 %v6014_v18, 16  ;;  %v1381_v46 = vor.u32 %v1379_v23, %v1378_v17 }
 0x114   : > { %v6749_v12 = vrot.slane %v1401_v21, 7  ;;  %v6017_v27 = vpack.c.bf16 %v6166_v26, %v6166_v26  ;;  %v1105_v28 = vpop.f32.mrb[15].mxu0  ;;  %v749_v4 = vsel %vm6655_vm0, %v467_v53, %v748_v56  ;;  %v472_v5 = vrot.slane %v470_v57, 7 }
 0x115   : > { %1584 = vrot.lane.b32.xlu0 %v1357_v61, %s6367_s13  ;;  %1586 = vrot.lane.b32.xlu1 %v1364_v3, %s6367_s13  ;;  %v1395_v31 = vrot.slane %v1393_v25, 7  ;;  %v6759_v32 = vsel %vm6679_vm2, %v1382_v24, %v1389_v20  ;;  %v6761_v33 = vpack.c.bf16 %v1105_v28, %v1105_v28  ;;  %v1391_v61 = vrot.slane %v6739_v7, 4  ;;  %750 = vst [vmem:[#allocation2 + $0x3c] sm:$0xf] %v749_v4 }
 0x116   : > { %v1406_v35 = vor.u32 %v1404_v22, %v6749_v12  ;;  %v1418_v36 = vshrl.u32 %v6017_v27, 16  ;;  %v1421_v37 = vshll.u32 %v6017_v27, 16  ;;  %v473_v9 = vshll.u32 %v367_v38, 16 }
 0x117   : > { %v1399_v43 = vrot.slane %v1395_v31, 4  ;;  %v1410_v44 = vshrl.u32 %v6761_v33, 16  ;;  %v6169_v45 = vpop.f32.mrb[16].mxu0  ;;  %v1398_v63 = vor.u32 %v1396_v41, %v1395_v31  ;;  %v1413_v17 = vshll.u32 %v6761_v33, 16 }
 0x118   : > { %v6768_v47 = vrot.slane %v1418_v36, 7  ;;  %v6019_v50 = vpack.c.bf16 %v6169_v45, %v6169_v45  ;;  %v1115_v51 = vpop.f32.mrb[17].mxu0  ;;  %v468_v21 = vrot.slane %v6753_v30, 4  ;;  %v475_v25 = vor.u32 %v473_v9, %v472_v5  ;;  %v752_v30 = vld [vmem:[#allocation2 + $0x44] sm:$0x1] }
 0x119   : > { %1582 = vrot.lane.b32.xlu0 %v1356_v58, %s6367_s13  ;;  %1588 = vrot.lane.b32.xlu1 %v1373_v15, %s6367_s13  ;;  %v1412_v54 = vrot.slane %v1410_v44, 7  ;;  %v6773_v55 = vpack.c.bf16 %v1115_v51, %v1115_v51  ;;  %v1407_v52 = vsel %vm6679_vm2, %v1399_v43, %v1406_v35  ;;  %v477_v26 = vrot.slane %v472_v5, 4  ;;  %v6819_v43 = vld [vmem:[%s6639_s12 + $0x2c] sm:$0xf] }
 0x11a   : > { %v1423_v59 = vor.u32 %v1421_v37, %v6768_v47  ;;  %v1435_v48 = vshrl.u32 %v6019_v50, 16  ;;  %v1438_v60 = vshll.u32 %v6019_v50, 16  ;;  %v1408_v31 = vrot.slane %v6749_v12, 4 }
 0x11b   : > { %v1416_v62 = vrot.slane %v1412_v54, 4  ;;  %v1427_v58 = vshrl.u32 %v6773_v55, 16  ;;  %v6172_v0 = vpop.f32.mrb[18].mxu0  ;;  %v1430_v36 = vshll.u32 %v6773_v55, 16  ;;  %v1415_v37 = vor.u32 %v1413_v17, %v1412_v54 }
 0x11c   : > { %v6780_v1 = vrot.slane %v1435_v48, 7  ;;  %v6021_v2 = vpack.c.bf16 %v6172_v0, %v6172_v0  ;;  %v1125_v3 = vpop.f32.mrb[19].mxu0  ;;  %v753_v39 = vsel %vm6647_vm12, %v477_v26, %v752_v30  ;;  %v487_v54 = vshrl.u32 %v6819_v43, 16 }
 0x11d   : > { %1590 = vrot.lane.b32.xlu0 %v1374_v40, %s6367_s13  ;;  %1592 = vrot.lane.b32.xlu1 %v1381_v46, %s6367_s13  ;;  %v6786_v6 = vrot.slane %v1427_v58, 7  ;;  %v6788_v7 = vpack.c.bf16 %v1125_v3, %v1125_v3  ;;  %v6792_v8 = vsel %vm6679_vm2, %v1416_v62, %v1423_v59  ;;  %v476_v46 = vsel %vm6679_vm2, %v468_v21, %v475_v25 }
 0x11e   : > { %v1440_v10 = vor.u32 %v1438_v60, %v6780_v1  ;;  %v1452_v11 = vshrl.u32 %v6021_v2, 16  ;;  %v1455_v15 = vshll.u32 %v6021_v2, 16  ;;  %751 = vst.msk [vmem:[#allocation2 + $0x40] sm:$0xf] %vm714_vm14, %v476_v46  ;;  %754 = vst [vmem:[#allocation2 + $0x44] sm:$0x1] %v753_v39 }
 0x11f   : > { %v1433_v18 = vrot.slane %v6786_v6, 4  ;;  %v1444_v19 = vshrl.u32 %v6788_v7, 16  ;;  %v6175_v20 = vpop.f32.mrb[20].mxu0  ;;  %v368_v60 = vld [vmem:[%s6639_s12 + $0x28] sm:$0xf]  ;;  %v6847_v58 = vrot.slane %v487_v54, 7  ;;  %v1432_v2 = vor.u32 %v1430_v36, %v6786_v6 }
 0x120   : > { %v6799_v22 = vrot.slane %v1452_v11, 7  ;;  %v6023_v23 = vpack.c.bf16 %v6175_v20, %v6175_v20  ;;  %v1135_v24 = vpop.f32.mrb[21].mxu0  ;;  %v479_v0 = vshrl.u32 %v368_v60, 16 }
 0x121   : > { %1596 = vrot.lane.b32.xlu0 %v1391_v61, %s6367_s13  ;;  %1598 = vrot.lane.b32.xlu1 %v1398_v63, %s6367_s13  ;;  %v6803_v27 = vrot.slane %v1444_v19, 7  ;;  %v6805_v28 = vpack.c.bf16 %v1135_v24, %v1135_v24  ;;  %v6809_v29 = vsel %vm6679_vm2, %v1433_v18, %v1440_v10  ;;  %v482_v18 = vshll.u32 %v368_v60, 16 }
 0x122   : > { %v1457_v33 = vor.u32 %v1455_v15, %v6799_v22  ;;  %v1469_v34 = vshrl.u32 %v6023_v23, 16  ;;  %v1472_v35 = vshll.u32 %v6023_v23, 16  ;;  %v494_v21 = vrot.slane %v6847_v58, 4 }
 0x123   : > { %v1450_v38 = vrot.slane %v6803_v27, 4  ;;  %v1461_v40 = vshrl.u32 %v6805_v28, 16  ;;  %v6178_v41 = vpop.f32.mrb[22].mxu0  ;;  %v6866_v23 = vrot.slane %v479_v0, 7  ;;  %v1447_v24 = vshll.u32 %v6788_v7, 16 }
 0x124   : > { %v6821_v44 = vrot.slane %v1469_v34, 7  ;;  %v6025_v12 = vpack.c.bf16 %v6178_v41, %v6178_v41  ;;  %v1145_v45 = vpop.f32.mrb[23].mxu0  ;;  %v490_v41 = vshll.u32 %v6819_v43, 16 }
 0x125   : > { %1594 = vrot.lane.b32.xlu0 %v6759_v32, %s6367_s13  ;;  %1600 = vrot.lane.b32.xlu1 %v1407_v52, %s6367_s13  ;;  %v6830_v50 = vrot.slane %v1461_v40, 7  ;;  %v6832_v51 = vpack.c.bf16 %v1145_v45, %v1145_v45  ;;  %v6836_v53 = vsel %vm6679_vm2, %v1450_v38, %v1457_v33  ;;  %v1425_v32 = vrot.slane %v6768_v47, 4 }
 0x126   : > { %v1474_v55 = vor.u32 %v1472_v35, %v6821_v44  ;;  %v1486_v56 = vshrl.u32 %v6025_v12, 16  ;;  %v1489_v57 = vshll.u32 %v6025_v12, 16  ;;  %v1442_v33 = vrot.slane %v6780_v1, 4 }
 0x127   : > { %v1467_v52 = vrot.slane %v6830_v50, 4  ;;  %v1478_v59 = vshrl.u32 %v6832_v51, 16  ;;  %v6181_v48 = vpop.f32.mrb[24].mxu0  ;;  %v484_v39 = vor.u32 %v482_v18, %v6866_v23 }
 0x128   : > { %v6845_v61 = vrot.slane %v1486_v56, 7  ;;  %v6027_v62 = vpack.c.bf16 %v6181_v48, %v6181_v48  ;;  %v1155_v63 = vpop.f32.mrb[25].mxu0  ;;  %v755_v56 = vld [vmem:[#allocation2 + $0x48] sm:$0xf] }
 0x129   : > { %1602 = vrot.lane.b32.xlu0 %v1408_v31, %s6367_s13  ;;  %1604 = vrot.lane.b32.xlu1 %v1415_v37, %s6367_s13  ;;  %v6852_v47 = vrot.slane %v1478_v59, 7  ;;  %v6854_v3 = vpack.c.bf16 %v1155_v63, %v1155_v63  ;;  %v6858_v4 = vsel %vm6679_vm2, %v1467_v52, %v1474_v55  ;;  %v759_v31 = vld [vmem:[#allocation2 + $0x50] sm:$0x1]  ;;  %v1464_v37 = vshll.u32 %v6805_v28, 16 }
 0x12a   : > { %v1491_v5 = vor.u32 %v1489_v57, %v6845_v61  ;;  %v1503_v9 = vshrl.u32 %v6027_v62, 16  ;;  %v1506_v10 = vshll.u32 %v6027_v62, 16  ;;  %v760_v1 = vsel %vm6647_vm12, %v494_v21, %v759_v31  ;;  %v370_v59 = vld [vmem:[%s6639_s12 + $0x30] sm:$0xf] }
 0x12b   : > { %v1484_v11 = vrot.slane %v6852_v47, 4  ;;  %v1495_v15 = vshrl.u32 %v6854_v3, 16  ;;  %v6184_v17 = vpop.f32.mrb[26].mxu0  ;;  %v1449_v28 = vor.u32 %v1447_v24, %v6803_v27  ;;  %761 = vst [vmem:[#allocation2 + $0x50] sm:$0x1] %v760_v1  ;;  %v1459_v57 = vrot.slane %v6799_v22, 4 }
 0x12c   : > { %v6863_v19 = vrot.slane %v1503_v9, 7  ;;  %v6029_v6 = vpack.c.bf16 %v6184_v17, %v6184_v17  ;;  %v1165_v20 = vpop.f32.mrb[27].mxu0  ;;  %v485_v62 = vrot.slane %v6866_v23, 4  ;;  %v756_v22 = vsel %vm6655_vm0, %v484_v39, %v755_v56  ;;  %v372_v56 = vld [vmem:[%s6639_s12 + $0x38] sm:$0xf] }
 0x12d   : > { %1608 = vrot.lane.b32.xlu0 %v1425_v32, %s6367_s13  ;;  %1610 = vrot.lane.b32.xlu1 %v1432_v2, %s6367_s13  ;;  %v6871_v25 = vrot.slane %v1495_v15, 7  ;;  %v6873_v26 = vpack.c.bf16 %v1165_v20, %v1165_v20  ;;  %v6877_v30 = vsel %vm6679_vm2, %v1484_v11, %v1491_v5  ;;  %v492_v5 = vor.u32 %v490_v41, %v6847_v58 }
 0x12e   : > { %v1508_v34 = vor.u32 %v1506_v10, %v6863_v19  ;;  %v1520_v35 = vshrl.u32 %v6029_v6, 16  ;;  %v1523_v36 = vshll.u32 %v6029_v6, 16  ;;  %757 = vst [vmem:[#allocation2 + $0x48] sm:$0xf] %v756_v22  ;;  %v496_v11 = vshrl.u32 %v370_v59, 16 }
 0x12f   : > { %v1501_v7 = vrot.slane %v6871_v25, 4  ;;  %v1512_v38 = vshrl.u32 %v6873_v26, 16  ;;  %v6187_v40 = vpop.f32.mrb[28].mxu0  ;;  %v1481_v15 = vshll.u32 %v6832_v51, 16  ;;  %v371_v6 = vld [vmem:[%s6639_s12 + $0x34] sm:$0xf]  ;;  %v493_v31 = vsel %vm6679_vm2, %v485_v62, %v492_v5 }
 0x130   : > { %v6885_v12 = vrot.slane %v1520_v35, 7  ;;  %v6031_v45 = vpack.c.bf16 %v6187_v40, %v6187_v40  ;;  %v1175_v46 = vpop.f32.mrb[29].mxu0  ;;  %v1476_v20 = vrot.slane %v6821_v44, 4  ;;  %758 = vst.msk [vmem:[#allocation2 + $0x4c] sm:$0xf] %vm714_vm14, %v493_v31 }
 0x131   : > { %1606 = vrot.lane.b32.xlu0 %v6792_v8, %s6367_s13  ;;  %1612 = vrot.lane.b32.xlu1 %v6809_v29, %s6367_s13  ;;  %v6895_v54 = vrot.slane %v1512_v38, 7  ;;  %v6897_v43 = vpack.c.bf16 %v1175_v46, %v1175_v46  ;;  %v6901_v55 = vsel %vm6679_vm2, %v1501_v7, %v1508_v34  ;;  %v1466_v29 = vor.u32 %v1464_v37, %v6830_v50  ;;  %v762_v35 = vld [vmem:[#allocation2 + $0x54] sm:$0xf]  ;;  %v769_v5 = vld [vmem:[#allocation2 + $0x60] sm:$0xf] }
 0x132   : > { %v1525_v32 = vor.u32 %v1523_v36, %v6885_v12  ;;  %v1537_v8 = vshrl.u32 %v6031_v45, 16  ;;  %v1540_v52 = vshll.u32 %v6031_v45, 16  ;;  %v499_v34 = vshll.u32 %v370_v59, 16  ;;  %v373_v45 = vld [vmem:[%s6639_s12 + $0x3c] sm:$0xf] }
 0x133   : > { %v1518_v27 = vrot.slane %v6895_v54, 4  ;;  %v1529_v48 = vshrl.u32 %v6897_v43, 16  ;;  %v6190_v60 = vpop.f32.mrb[30].mxu0  ;;  %v504_v36 = vshrl.u32 %v371_v6, 16  ;;  %v507_v37 = vshll.u32 %v371_v6, 16 }
 0x134   : > { %v6910_v63 = vrot.slane %v1537_v8, 7  ;;  %v6033_v0 = vpack.c.bf16 %v6190_v60, %v6190_v60  ;;  %v1185_v2 = vpop.f32.mrb[31].mxu0  ;;  %v1498_v7 = vshll.u32 %v6854_v3, 16  ;;  %v1483_v38 = vor.u32 %v1481_v15, %v6852_v47  ;;  %v773_v60 = vld [vmem:[#allocation2 + $0x68] sm:$0x1] }
 0x135   : > { %1614 = vrot.lane.b32.xlu0 %v1442_v33, %s6367_s13  ;;  %1616 = vrot.lane.b32.xlu1 %v1449_v28, %s6367_s13  ;;  %v6917_v50 = vrot.slane %v1529_v48, 7  ;;  %v6921_v9 = vsel %vm6679_vm2, %v1518_v27, %v1525_v32  ;;  %v6923_v10 = vpack.c.bf16 %v1185_v2, %v1185_v2  ;;  %v498_v33 = vrot.slane %v496_v11, 7  ;;  %v766_v32 = vld [vmem:[#allocation2 + $0x5c] sm:$0x1]  ;;  %v374_v48 = vld [vmem:[%s6639_s12 + $0x40] sm:$0xf] }
 0x136   : > { %v1542_v17 = vor.u32 %v1540_v52, %v6910_v63  ;;  %v1554_v18 = vshrl.u32 %v6033_v0, 16  ;;  %v1557_v58 = vshll.u32 %v6033_v0, 16  ;;  %v506_v1 = vrot.slane %v504_v36, 7  ;;  %v375_v6 = vld [vmem:[%s6639_s12 + $0x44] sm:$0xf] }
 0x137   : > { %v1535_v21 = vrot.slane %v6917_v50, 4  ;;  %v1546_v23 = vshrl.u32 %v6923_v10, 16  ;;  %v501_v41 = vor.u32 %v499_v34, %v498_v33  ;;  %v502_v39 = vrot.slane %v498_v33, 4  ;;  %v776_v31 = vld [vmem:[#allocation2 + $0x6c] sm:$0xf] }
 0x138   : > { %v6931_v24 = vrot.slane %v1554_v18, 7  ;;  %v521_v28 = vshrl.u32 %v373_v45, 16  ;;  %v513_v8 = vshrl.u32 %v372_v56, 16  ;;  %v516_v52 = vshll.u32 %v372_v56, 16 }
 0x139   : > { %1620 = vrot.lane.b32.xlu0 %v1459_v57, %s6367_s13  ;;  %1622 = vrot.lane.b32.xlu1 %v1466_v29, %s6367_s13  ;;  %v6937_v51 = vrot.slane %v1546_v23, 7  ;;  %v6941_v44 = vsel %vm6679_vm2, %v1535_v21, %v1542_v17  ;;  %v763_v57 = vsel %vm6655_vm0, %v501_v41, %v762_v35  ;;  %v524_v3 = vshll.u32 %v373_v45, 16 }
 0x13a   : > { %v1559_v40 = vor.u32 %v1557_v58, %v6931_v24  ;;  %764 = vst [vmem:[#allocation2 + $0x54] sm:$0xf] %v763_v57  ;;  %v511_v59 = vrot.slane %v506_v1, 4  ;;  %v509_v29 = vor.u32 %v507_v37, %v506_v1  ;;  %v523_v27 = vrot.slane %v521_v28, 7  ;;  %v376_v1 = vld [vmem:[%s6639_s12 + $0x48] sm:$0xf] }
 0x13b   : > { %v1552_v46 = vrot.slane %v6937_v51, 4  ;;  %v515_v62 = vrot.slane %v513_v8, 7  ;;  %v530_v0 = vshrl.u32 %v374_v48, 16  ;;  %v533_v2 = vshll.u32 %v374_v48, 16 }
 0x13c   : > { %v528_v22 = vrot.slane %v523_v27, 4  ;;  %v526_v11 = vor.u32 %v524_v3, %v523_v27  ;;  %v1493_v15 = vrot.slane %v6845_v61, 4  ;;  %v1500_v21 = vor.u32 %v1498_v7, %v6871_v25  ;;  %v780_v7 = vld [vmem:[#allocation2 + $0x74] sm:$0x1]  ;;  %v783_v27 = vld [vmem:[#allocation2 + $0x78] sm:$0xf] }
 0x13d   : > { %1618 = vrot.lane.b32.xlu0 %v6836_v53, %s6367_s13  ;;  %1624 = vrot.lane.b32.xlu1 %v6858_v4, %s6367_s13  ;;  %v6958_v47 = vsel %vm6679_vm2, %v1552_v46, %v1559_v40  ;;  %v767_v53 = vsel %vm6647_vm12, %v511_v59, %v766_v32  ;;  %v510_v4 = vsel %vm6679_vm2, %v502_v39, %v509_v29  ;;  %v519_v18 = vrot.slane %v515_v62, 4 }
 0x13e   : > { %768 = vst [vmem:[#allocation2 + $0x5c] sm:$0x1] %v767_v53  ;;  %765 = vst.msk [vmem:[#allocation2 + $0x58] sm:$0xf] %vm714_vm14, %v510_v4  ;;  %v518_v17 = vor.u32 %v516_v52, %v515_v62  ;;  %v532_v58 = vrot.slane %v530_v0, 7  ;;  %v774_v23 = vsel %vm6647_vm12, %v528_v22, %v773_v60  ;;  %v538_v33 = vshrl.u32 %v375_v6, 16 }
 0x13f   : > { %v541_v61 = vshll.u32 %v375_v6, 16  ;;  %775 = vst [vmem:[#allocation2 + $0x68] sm:$0x1] %v774_v23  ;;  %v527_v35 = vsel %vm6679_vm2, %v519_v18, %v526_v11  ;;  %v1515_v40 = vshll.u32 %v6873_v26, 16  ;;  %v547_v39 = vshrl.u32 %v376_v1, 16 }
 0x140   : > { %v770_v34 = vsel %vm6655_vm0, %v518_v17, %v769_v5  ;;  %772 = vst.msk [vmem:[#allocation2 + $0x64] sm:$0xf] %vm714_vm14, %v527_v35  ;;  %v540_v36 = vrot.slane %v538_v33, 7  ;;  %v536_v25 = vrot.slane %v532_v58, 4  ;;  %v550_v28 = vshll.u32 %v376_v1, 16 }
 0x141   : > { %1626 = vrot.lane.b32.xlu0 %v1476_v20, %s6367_s13  ;;  %1628 = vrot.lane.b32.xlu1 %v1483_v38, %s6367_s13  ;;  %v535_v20 = vor.u32 %v533_v2, %v532_v58  ;;  %771 = vst [vmem:[#allocation2 + $0x60] sm:$0xf] %v770_v34  ;;  %v377_v38 = vld [vmem:[%s6639_s12 + $0x4c] sm:$0xf]  ;;  %v787_v26 = vld [vmem:[#allocation2 + $0x80] sm:$0x1]  ;;  %v1517_v59 = vor.u32 %v1515_v40, %v6895_v54 }
 0x142   : > { %v545_v41 = vrot.slane %v540_v36, 4  ;;  %v543_v45 = vor.u32 %v541_v61, %v540_v36  ;;  %v555_v46 = vshrl.u32 %v377_v38, 16  ;;  %v549_v8 = vrot.slane %v547_v39, 7  ;;  %v379_v5 = vld [vmem:[%s6639_s12 + $0x54] sm:$0xf] }
 0x143   : > { %v777_v37 = vsel %vm6655_vm0, %v535_v20, %v776_v31  ;;  %v1532_v52 = vshll.u32 %v6897_v43, 16  ;;  %v1510_v3 = vrot.slane %v6863_v19, 4  ;;  %v558_v62 = vshll.u32 %v377_v38, 16  ;;  %v794_v23 = vld [vmem:[#allocation2 + $0x8c] sm:$0x1] }
 0x144   : > { %778 = vst [vmem:[#allocation2 + $0x6c] sm:$0xf] %v777_v37  ;;  %v781_v56 = vsel %vm6647_vm12, %v545_v41, %v780_v7  ;;  %v544_v57 = vsel %vm6679_vm2, %v536_v25, %v543_v45  ;;  %v557_v32 = vrot.slane %v555_v46, 7  ;;  %v552_v48 = vor.u32 %v550_v28, %v549_v8  ;;  %v381_v31 = vld [vmem:[%s6639_s12 + $0x5c] sm:$0xf] }
 0x145   : > { %1632 = vrot.lane.b32.xlu0 %v1493_v15, %s6367_s13  ;;  %1634 = vrot.lane.b32.xlu1 %v1500_v21, %s6367_s13  ;;  %782 = vst [vmem:[#allocation2 + $0x74] sm:$0x1] %v781_v56  ;;  %779 = vst.msk [vmem:[#allocation2 + $0x70] sm:$0xf] %vm714_vm14, %v544_v57  ;;  %v553_v43 = vrot.slane %v549_v8, 4  ;;  %v1527_v19 = vrot.slane %v6885_v12, 4  ;;  %v1534_v54 = vor.u32 %v1532_v52, %v6917_v50 }
 0x146   : > { %v562_v29 = vrot.slane %v557_v32, 4  ;;  %v560_v0 = vor.u32 %v558_v62, %v557_v32  ;;  %v790_v12 = vld [vmem:[#allocation2 + $0x84] sm:$0xf]  ;;  %v572_v11 = vshrl.u32 %v379_v5, 16  ;;  %v575_v50 = vshll.u32 %v379_v5, 16 }
 0x147   : > { %v1549_v58 = vshll.u32 %v6923_v10, 16  ;;  %v1544_v6 = vrot.slane %v6910_v63, 4  ;;  %v1561_v33 = vrot.slane %v6931_v24, 4  ;;  %v589_v10 = vshrl.u32 %v381_v31, 16  ;;  %v380_v35 = vld [vmem:[%s6639_s12 + $0x58] sm:$0xf] }
 0x148   : > { %v788_v60 = vsel %vm6647_vm12, %v562_v29, %v787_v26  ;;  %v561_v4 = vsel %vm6679_vm2, %v553_v43, %v560_v0  ;;  %v574_v17 = vrot.slane %v572_v11, 7  ;;  %v581_v63 = vshrl.u32 %v380_v35, 16  ;;  %v382_v7 = vld [vmem:[%s6639_s12 + $0x60] sm:$0xf]  ;;  %v797_v41 = vld [vmem:[#allocation2 + $0x90] sm:$0xf] }
 0x149   : > { %1630 = vrot.lane.b32.xlu0 %v6877_v30, %s6367_s13  ;;  %1636 = vrot.lane.b32.xlu1 %v6901_v55, %s6367_s13  ;;  %789 = vst [vmem:[#allocation2 + $0x80] sm:$0x1] %v788_v60  ;;  %v784_v30 = vsel %vm6655_vm0, %v552_v48, %v783_v27  ;;  %v378_v55 = vld [vmem:[%s6639_s12 + $0x50] sm:$0xf]  ;;  %786 = vst.msk [vmem:[#allocation2 + $0x7c] sm:$0xf] %vm714_vm14, %v561_v4  ;;  %v1551_v38 = vor.u32 %v1549_v58, %v6937_v51 }
 0x14a   : > { %785 = vst [vmem:[#allocation2 + $0x78] sm:$0xf] %v784_v30  ;;  %v564_v2 = vshrl.u32 %v378_v55, 16  ;;  %v567_v53 = vshll.u32 %v378_v55, 16  ;;  %v579_v61 = vrot.slane %v574_v17, 4  ;;  %v577_v34 = vor.u32 %v575_v50, %v574_v17 }
 0x14b   : > { %v584_v20 = vshll.u32 %v380_v35, 16  ;;  %v583_v24 = vrot.slane %v581_v63, 7  ;;  %v592_v37 = vshll.u32 %v381_v31, 16  ;;  %v598_v45 = vshrl.u32 %v382_v7, 16  ;;  %v804_v26 = vld [vmem:[#allocation2 + $0x9c] sm:$0xf] }
 0x14c   : > { %v566_v22 = vrot.slane %v564_v2, 7  ;;  %v795_v36 = vsel %vm6647_vm12, %v579_v61, %v794_v23  ;;  %v601_v46 = vshll.u32 %v382_v7, 16  ;;  %v808_v60 = vld [vmem:[#allocation2 + $0xa4] sm:$0x1]  ;;  %v385_v30 = vld [vmem:[%s6639_s12 + $0x6c] sm:$0xf] }
 0x14d   : > { %1638 = vrot.lane.b32.xlu0 %v1510_v3, %s6367_s13  ;;  %1640 = vrot.lane.b32.xlu1 %v1517_v59, %s6367_s13  ;;  %796 = vst [vmem:[#allocation2 + $0x8c] sm:$0x1] %v795_v36  ;;  %v586_v1 = vor.u32 %v584_v20, %v583_v24  ;;  %v587_v39 = vrot.slane %v583_v24, 4  ;;  %v600_v57 = vrot.slane %v598_v45, 7  ;;  %v383_v3 = vld [vmem:[%s6639_s12 + $0x64] sm:$0xf] }
 0x14e   : > { %v569_v15 = vor.u32 %v567_v53, %v566_v22  ;;  %v570_v18 = vrot.slane %v566_v22, 4  ;;  %v606_v59 = vshrl.u32 %v383_v3, 16  ;;  %v609_v29 = vshll.u32 %v383_v3, 16  ;;  %v815_v4 = vld [vmem:[#allocation2 + $0xb0] sm:$0x1] }
 0x14f   : > { %v798_v51 = vsel %vm6655_vm0, %v586_v1, %v797_v41  ;;  %v603_v8 = vor.u32 %v601_v46, %v600_v57  ;;  %v604_v48 = vrot.slane %v600_v57, 4  ;;  %v626_v5 = vshll.u32 %v385_v30, 16  ;;  %v386_v50 = vld [vmem:[%s6639_s12 + $0x70] sm:$0xf]  ;;  %v818_v35 = vld [vmem:[#allocation2 + $0xb4] sm:$0xf] }
 0x150   : > { %v791_v21 = vsel %vm6655_vm0, %v569_v15, %v790_v12  ;;  %v578_v25 = vsel %vm6679_vm2, %v570_v18, %v577_v34  ;;  %799 = vst [vmem:[#allocation2 + $0x90] sm:$0xf] %v798_v51  ;;  %v608_v27 = vrot.slane %v606_v59, 7  ;;  %v811_v15 = vld [vmem:[#allocation2 + $0xa8] sm:$0xf]  ;;  %v632_v18 = vshrl.u32 %v386_v50, 16 }
 0x151   : > { %1644 = vrot.lane.b32.xlu0 %v1527_v19, %s6367_s13  ;;  %1646 = vrot.lane.b32.xlu1 %v1534_v54, %s6367_s13  ;;  %792 = vst [vmem:[#allocation2 + $0x84] sm:$0xf] %v791_v21  ;;  %793 = vst.msk [vmem:[#allocation2 + $0x88] sm:$0xf] %vm714_vm14, %v578_v25  ;;  %v805_v52 = vsel %vm6655_vm0, %v603_v8, %v804_v26  ;;  %v384_v19 = vld [vmem:[%s6639_s12 + $0x68] sm:$0xf]  ;;  %v7047_v54 = vpop.permute.xlu1 %4026 }
 0x152   : > { %806 = vst [vmem:[#allocation2 + $0x9c] sm:$0xf] %v805_v52  ;;  %v613_v43 = vrot.slane %v608_v27, 4  ;;  %v611_v62 = vor.u32 %v609_v29, %v608_v27  ;;  %v615_v53 = vshrl.u32 %v384_v19, 16  ;;  %v618_v22 = vshll.u32 %v384_v19, 16 }
 0x153   : > { %v635_v58 = vshll.u32 %v386_v50, 16  ;;  %v634_v31 = vrot.slane %v632_v18, 7  ;;  %v1708_v41 = vld [vmem:[#allocation2 + $0xc] sm:$0xf]  ;;  %v1718_v26 = vld [vmem:[#allocation2 + $0x18] sm:$0xf] }
 0x154   : > { %v809_v55 = vsel %vm6647_vm12, %v613_v43, %v808_v60  ;;  %v612_v0 = vsel %vm6679_vm2, %v604_v48, %v611_v62  ;;  %v617_v11 = vrot.slane %v615_v53, 7  ;;  %v829_v59 = vld [vmem:[#allocation2 + $0xc8] sm:$0x1]  ;;  %v388_v29 = vld [vmem:[%s6639_s12 + $0x78] sm:$0xf] }
 0x155   : > { %1642 = vrot.lane.b32.xlu0 %v6921_v9, %s6367_s13  ;;  %1648 = vrot.lane.b32.xlu1 %v6941_v44, %s6367_s13  ;;  %v591_v9 = vrot.slane %v589_v10, 7  ;;  %v801_v44 = vld [vmem:[#allocation2 + $0x98] sm:$0x1]  ;;  %810 = vst [vmem:[#allocation2 + $0xa4] sm:$0x1] %v809_v55  ;;  %v7058_v61 = vpop.permute.xlu1 %4571  ;;  %v637_v36 = vor.u32 %v635_v58, %v634_v31  ;;  %v638_v25 = vrot.slane %v634_v31, 4 }
 0x156   : > { %807 = vst.msk [vmem:[#allocation2 + $0xa0] sm:$0xf] %vm714_vm14, %v612_v0  ;;  %v620_v21 = vor.u32 %v618_v22, %v617_v11  ;;  %v621_v23 = vrot.slane %v617_v11, 4  ;;  %v649_v60 = vshrl.u32 %v388_v29, 16  ;;  %v1725_v43 = vld [vmem:[#allocation2 + $0x24] sm:$0xf] }
 0x157   : > { %v596_v40 = vrot.slane %v591_v9, 4  ;;  %v594_v28 = vor.u32 %v592_v37, %v591_v9  ;;  %v1715_v37 = vld [vmem:[#allocation2 + $0x14] sm:$0x1]  ;;  %v652_v62 = vshll.u32 %v388_v29, 16  ;;  %v825_v11 = vld [vmem:[#allocation2 + $0xc0] sm:$0xf] }
 0x158   : > { %v812_v34 = vsel %vm6655_vm0, %v620_v21, %v811_v15  ;;  %v7097_v19 = vrot.slane %v649_v60, 7 }
 0x159   : > { %1650 = vrot.lane.b32.xlu0 %v1544_v6, %s6367_s13  ;;  %1656 = vrot.lane.b32.xlu1 %v1561_v33, %s6367_s13  ;;  %v802_v56 = vsel %vm6647_vm12, %v596_v40, %v801_v44  ;;  %v595_v32 = vsel %vm6679_vm2, %v587_v39, %v594_v28  ;;  %v387_v33 = vld [vmem:[%s6639_s12 + $0x74] sm:$0xf]  ;;  %813 = vst [vmem:[#allocation2 + $0xa8] sm:$0xf] %v812_v34  ;;  %v822_v28 = vld [vmem:[#allocation2 + $0xbc] sm:$0x1] }
 0x15a   : > { %803 = vst [vmem:[#allocation2 + $0x98] sm:$0x1] %v802_v56  ;;  %800 = vst.msk [vmem:[#allocation2 + $0x94] sm:$0xf] %vm714_vm14, %v595_v32  ;;  %v640_v63 = vshrl.u32 %v387_v33, 16  ;;  %v643_v20 = vshll.u32 %v387_v33, 16  ;;  %v819_v44 = vsel %vm6655_vm0, %v637_v36, %v818_v35  ;;  %v654_v18 = vor.u32 %v652_v62, %v7097_v19 }
 0x15b   : > { %820 = vst [vmem:[#allocation2 + $0xb4] sm:$0xf] %v819_v44  ;;  %v389_v56 = vld [vmem:[%s6639_s12 + $0x7c] sm:$0xf]  ;;  %v1729_v35 = vld [vmem:[#allocation2 + $0x2c] sm:$0x1] }
 0x15c   : > { %v642_v9 = vrot.slane %v640_v63, 7  ;;  %v657_v32 = vshrl.u32 %v389_v56, 16  ;;  %v1732_v63 = vld [vmem:[#allocation2 + $0x30] sm:$0xf]  ;;  %v655_v49 = vrot.slane %v7097_v19, 4 }
 0x15d   : > { %1652 = vrot.lane.b32.xlu1 %v1551_v38, %s6367_s13  ;;  %1654 = vrot.lane.b32.xlu0 %v6958_v47, %s6367_s13  ;;  %v623_v47 = vshrl.u32 %v385_v30, 16  ;;  %v1722_v30 = vld [vmem:[#allocation2 + $0x20] sm:$0x1]  ;;  %v1736_v56 = vld [vmem:[#allocation2 + $0x38] sm:$0x1] }
 0x15e   : > { %v645_v7 = vor.u32 %v643_v20, %v642_v9  ;;  %v647_v38 = vrot.slane %v642_v9, 4  ;;  %v7088_v8 = vrot.slane %v657_v32, 7 }
 0x15f   : > { %v625_v2 = vrot.slane %v623_v47, 7 }
 0x160   : > { %v646_v46 = vsel %vm6679_vm2, %v638_v25, %v645_v7  ;;  %v823_v51 = vsel %vm6647_vm12, %v647_v38, %v822_v28  ;;  %v664_v48 = vrot.slane %v7088_v8, 4  ;;  %v826_v25 = vsel %vm6655_vm0, %v654_v18, %v825_v11 }
 0x161   : > { %v630_v12 = vrot.slane %v625_v2, 4  ;;  %v628_v17 = vor.u32 %v626_v5, %v625_v2  ;;  %821 = vst.msk [vmem:[#allocation2 + $0xb8] sm:$0xf] %vm714_vm14, %v646_v46  ;;  %824 = vst [vmem:[#allocation2 + $0xbc] sm:$0x1] %v823_v51  ;;  %vm4589_vm0 = vcmask 523712  }
 0x162   : > { %v830_v47 = vsel %vm6647_vm12, %v664_v48, %v829_v59  ;;  %827 = vst [vmem:[#allocation2 + $0xc0] sm:$0xf] %v826_v25  ;;  %v1739_v51 = vld [vmem:[#allocation2 + $0x3c] sm:$0xf] }
 0x163   : > { %v816_v6 = vsel %vm6647_vm12, %v630_v12, %v815_v4  ;;  %v629_v10 = vsel %vm6679_vm2, %v621_v23, %v628_v17  ;;  %831 = vst [vmem:[#allocation2 + $0xc8] sm:$0x1] %v830_v47  ;;  %vm3545_vm12 = vcmask 326912  }
 0x164   : > { %817 = vst [vmem:[#allocation2 + $0xb0] sm:$0x1] %v816_v6  ;;  %814 = vst.msk [vmem:[#allocation2 + $0xac] sm:$0xf] %vm714_vm14, %v629_v10 }
 0x172   : > { %v1567_v45 = vpop.permute.xlu1 %1566 }
 0x173   : > { %v1716_v1 = vsel %vm7068_vm7, %v1567_v45, %v1715_v37  ;;  %v1563_v39 = vpop.permute.xlu0 %1562 }
 0x174   : > { %1717 = vst [vmem:[#allocation2 + $0x14] sm:$0x1] %v1716_v1  ;;  %v1709_v57 = vsel %vm7074_vm1, %v1563_v39, %v1708_v41 }
 0x175   : > { %1710 = vst [vmem:[#allocation2 + $0xc] sm:$0xf] %v1709_v57 }
 0x177   : > { %v1565_v52 = vpop.permute.xlu0 %1564  ;;  %v1569_v3 = vpop.permute.xlu1 %1568 }
 0x178   : > { %1712 = vst.msk [vmem:[#allocation2 + $0x10] sm:$0xf] %vm1706_vm6, %v1565_v52  ;;  %v1719_v27 = vsel %vm7074_vm1, %v1569_v3, %v1718_v26 }
 0x179   : > { %1720 = vst [vmem:[#allocation2 + $0x18] sm:$0xf] %v1719_v27 }
 0x17b   : > { %v1573_v55 = vpop.permute.xlu0 %1572  ;;  %v1575_v0 = vpop.permute.xlu1 %1574  ;;  %v3564_v2 = vld [vmem:[#allocation2 + $0x14] sm:$0x1] }
 0x17c   : > { %v7099_v53 = vld [vmem:[#allocation2 + $0x14] sm:$0x1]  ;;  %v1723_v22 = vsel %vm7068_vm7, %v1573_v55, %v1722_v30  ;;  %v1726_v5 = vsel %vm7074_vm1, %v1575_v0, %v1725_v43  ;;  %v3562_v12 = vld [vmem:[#allocation2 + $0xc] sm:$0xe]  ;;  %v3663_v42 = vrot.slane %v3564_v2, 5 }
 0x17d   : > { %v3019_v4 = vld [vmem:[#allocation2 + $0x14] sm:$0x1]  ;;  %1724 = vst [vmem:[#allocation2 + $0x20] sm:$0x1] %v1723_v22  ;;  %1727 = vst [vmem:[#allocation2 + $0x24] sm:$0xf] %v1726_v5 }
 0x17e   : > { %v7105_v50 = vld [vmem:[#allocation2 + $0xc] sm:$0xe]  ;;  %v2627_v15 = vrot.slane %v7099_v53, 5  ;;  %v5848_v58 = vrot.slane %v3562_v12, 9  ;;  %v3085_v23 = vshll.u32 %v3019_v4, 16 }
 0x17f   : > { %v3017_v17 = vld [vmem:[#allocation2 + $0xc] sm:$0xf]  ;;  %v1571_v33 = vpop.permute.xlu0 %1570  ;;  %v1577_v34 = vpop.permute.xlu1 %1576  ;;  %v3563_v20 = vld [vmem:[#allocation2 + $0x10] sm:$0xf]  ;;  %v5785_v36 = vrot.slane %v7105_v50, 9 }
 0x180   : > { %v3066_v6 = vshrl.u32 %v3017_v17, 16  ;;  %v3069_v21 = vshll.u32 %v3017_v17, 16  ;;  %v1971_v31 = vld [vmem:[#allocation2 + $0xc] sm:$0xf]  ;;  %1721 = vst.msk [vmem:[#allocation2 + $0x1c] sm:$0xf] %vm1706_vm6, %v1571_v33 }
 0x181   : > { %v6286_v10 = vld [vmem:[#allocation2 + $0xc] sm:$0xff]   ;;  %1728 = vst.msk [vmem:[#allocation2 + $0x28] sm:$0xf] %vm1706_vm6, %v1577_v34  ;;  %v3660_v9 = vrot.slane %v3563_v20, 5  ;;  %v2044_v41 = vshrl.u32 %v1971_v31, 16  ;;  %v7116_v52 = vrot.slane %v3085_v23, 5 }
 0x182   : > { %v3068_v44 = vrot.slane %v3066_v6, 4  ;;  %2952 = vrot.lane.b32.xlu0 %v6286_v10, %s6368_s14  ;;  %v2520_v37 = vld [vmem:[#allocation2 + $0x10] sm:$0xf]  ;;  %v3071_v38 = vrot.slane %v3069_v21, 5  ;;  %v2047_v59 = vshll.u32 %v1971_v31, 16 }
 0x183   : > { %v3018_v7 = vld [vmem:[#allocation2 + $0x10] sm:$0xf]  ;;  %v3662_v45 = vrot.slane %v3660_v9, 4  ;;  %v2624_v46 = vrot.slane %v2520_v37, 5  ;;  %v1579_v28 = vpop.permute.xlu0 %1578  ;;  %v1581_v57 = vpop.permute.xlu1 %1580  ;;  %v7124_v48 = vsel %vm6484_vm5, %v5848_v58, %v3660_v9  ;;  %v1973_v30 = vld [vmem:[#allocation2 + $0x14] sm:$0x1] }
 0x184   : > { %v3075_v1 = vshll.u32 %v3018_v7, 16  ;;  %v6305_v39 = vld [vmem:[#allocation2 + $0xc] sm:$0xff]   ;;  %v3072_v32 = vor.u32 %v3071_v38, %v3068_v44  ;;  %v3079_v26 = vshrl.u32 %v3018_v7, 16  ;;  %v1730_v29 = vsel %vm7068_vm7, %v1579_v28, %v1729_v35  ;;  %v4606_v0 = vld [vmem:[#allocation2 + $0x18] sm:$0xe] }
 0x185   : > { %v1972_v3 = vld [vmem:[#allocation2 + $0x10] sm:$0xf]  ;;  %v1733_v27 = vsel %vm7074_vm1, %v1581_v57, %v1732_v63  ;;  %v7128_v60 = vsel %vm6484_vm5, %v3662_v45, %v3663_v42  ;;  %1953 = vst.msk [vmem:[#allocation3 + $0x8] sm:$0xff] %vm1951_vm9, %v6305_v39  ;;  %1731 = vst [vmem:[#allocation2 + $0x2c] sm:$0x1] %v1730_v29  ;;  %v2626_v43 = vrot.slane %v2624_v46, 4  ;;  %v2625_v18 = vsel %vm6484_vm5, %v5785_v36, %v2624_v46 }
 0x186   : > { %1734 = vst [vmem:[#allocation2 + $0x30] sm:$0xf] %v1733_v27  ;;  %v3073_v62 = vrot.slane %v3072_v32, 4  ;;  %v3077_v47 = vrot.slane %v3075_v1, 5  ;;  %v2046_v55 = vrot.slane %v2044_v41, 4  ;;  %v3081_v4 = vrot.slane %v3079_v26, 4 }
 0x187   : > { %v7131_v2 = vld [vmem:[#allocation2 + $0x20] sm:$0x1]  ;;  %v2049_v22 = vrot.slane %v2047_v59, 5  ;;  %v2053_v5 = vshll.u32 %v1972_v3, 16  ;;  %v2057_v12 = vshrl.u32 %v1972_v3, 16  ;;  %v1585_v50 = vpop.permute.xlu0 %1584  ;;  %v6287_v42 = vld [vmem:[#allocation2 + $0x18] sm:$0xff]   ;;  %v5864_v17 = vcombine.low %v7124_v48, %v7128_v60  ;;  %v1587_v58 = vpop.permute.xlu1 %1586 }
 0x188   : > { %v3565_v11 = vld [vmem:[#allocation2 + $0x18] sm:$0xe]  ;;  %v2063_v6 = vshll.u32 %v1973_v30, 16  ;;  %v1737_v21 = vsel %vm7068_vm7, %v1585_v50, %v1736_v56  ;;  %v2628_v31 = vsel %vm6484_vm5, %v2626_v43, %v2627_v15  ;;  %v1740_v33 = vsel %vm7074_vm1, %v1587_v58, %v1739_v51  ;;  %2954 = vrot.lane.b32.xlu1 %v6287_v42, %s6368_s14  ;;  %v4607_v25 = vld [vmem:[#allocation2 + $0x1c] sm:$0xf]  ;;  %v6290_v48 = vld [vmem:[#allocation2 + $0x24] sm:$0xff]  }
 0x189   : > { %v6288_v23 = vld [vmem:[#allocation2 + $0x18] sm:$0xff]   ;;  %v3082_v34 = vor.u32 %v3081_v4, %v3077_v47  ;;  %1738 = vst [vmem:[#allocation2 + $0x38] sm:$0x1] %v1737_v21  ;;  %1741 = vst [vmem:[#allocation2 + $0x3c] sm:$0xf] %v1740_v33  ;;  %v2050_v10 = vor.u32 %v2049_v22, %v2046_v55  ;;  %v2055_v35 = vrot.slane %v2053_v5, 5  ;;  %v5801_v37 = vcombine.low %v2625_v18, %v2628_v31 }
 0x18a   : > { %v2059_v63 = vrot.slane %v2057_v12, 4  ;;  %v2065_v20 = vrot.slane %v2063_v6, 5  ;;  %3996 = vrot.lane.b32.xlu0 %v6288_v23, %s6364_s6  ;;  %v5912_v53 = vrot.slane %v4606_v0, 9  ;;  %v4707_v9 = vrot.slane %v7131_v2, 5  ;;  %v3566_v46 = vld [vmem:[#allocation2 + $0x1c] sm:$0xf] }
 0x18b   : > { %v3083_v36 = vrot.slane %v3082_v34, 4  ;;  %v5849_v15 = vrot.slane %v3565_v11, 9  ;;  %v1583_v44 = vpop.permute.xlu0 %1582  ;;  %v2051_v7 = vrot.slane %v2050_v10, 4  ;;  %v1589_v41 = vpop.permute.xlu1 %1588  ;;  %v4704_v45 = vrot.slane %v4607_v25, 5  ;;  %v3567_v1 = vld [vmem:[#allocation2 + $0x20] sm:$0x1] }
 0x18c   : > { %v2060_v38 = vor.u32 %v2059_v63, %v2055_v35  ;;  %v1743_v39 = vld [vmem:[#allocation2 + $0x44] sm:$0x1]  ;;  %1735 = vst.msk [vmem:[#allocation2 + $0x34] sm:$0xf] %vm1706_vm6, %v1583_v44  ;;  %v3078_v28 = vsel %vm6617_vm8, %v3073_v62, %v3077_v47  ;;  %1742 = vst.msk [vmem:[#allocation2 + $0x40] sm:$0xf] %vm1706_vm6, %v1589_v41  ;;  %2777 = vrot.lane.b32.xlu1 %v5801_v37, %s6363_s28 }
 0x18d   : > { %v3088_v56 = vsel %vm6617_vm8, %v3083_v36, %v7116_v52  ;;  %v3667_v57 = vrot.slane %v3566_v46, 5  ;;  %v3670_v51 = vrot.slane %v3567_v1, 5  ;;  %v2522_v32 = vld [vmem:[#allocation2 + $0x18] sm:$0xe]  ;;  %v2523_v26 = vld [vmem:[#allocation2 + $0x1c] sm:$0xf]  ;;  %v2056_v60 = vsel %vm6617_vm8, %v2051_v7, %v2055_v35 }
 0x18e   : > { %v5832_v3 = vcombine.low %v3078_v28, %v3088_v56  ;;  %v2061_v59 = vrot.slane %v2060_v38, 4  ;;  %v2524_v29 = vld [vmem:[#allocation2 + $0x20] sm:$0x1]  ;;  %v6308_v27 = vld [vmem:[#allocation2 + $0x18] sm:$0xff]   ;;  %3818 = vrot.lane.b32.xlu0 %v5864_v17, %s6369_s15  ;;  %v7161_v52 = vsel %vm6484_vm5, %v5912_v53, %v4704_v45  ;;  %v4706_v30 = vrot.slane %v4704_v45, 4  ;;  %v6289_v12 = vld [vmem:[#allocation2 + $0x24] sm:$0xff]  }
 0x18f   : > { %v3669_v43 = vrot.slane %v3667_v57, 4  ;;  %v7167_v47 = vsel %vm6484_vm5, %v5849_v15, %v3667_v57  ;;  %v1591_v55 = vpop.permute.xlu0 %1590  ;;  %v5786_v0 = vrot.slane %v2522_v32, 9  ;;  %v2631_v2 = vrot.slane %v2523_v26, 5  ;;  %v3020_v4 = vld [vmem:[#allocation2 + $0x18] sm:$0xf]  ;;  %v1593_v5 = vpop.permute.xlu1 %1592  ;;  %1954 = vst.msk [vmem:[#allocation3 + $0x10] sm:$0xff] %vm1951_vm9, %v6308_v27 }
 0x190   : > { %v2066_v62 = vsel %vm6617_vm8, %v2061_v59, %v2065_v20  ;;  %v3021_v22 = vld [vmem:[#allocation2 + $0x1c] sm:$0xf]  ;;  %v7172_v11 = vsel %vm6484_vm5, %v4706_v30, %v4707_v9  ;;  %v1744_v42 = vsel %vm7068_vm7, %v1591_v55, %v1743_v39  ;;  %v2634_v17 = vrot.slane %v2524_v29, 5  ;;  %v3022_v18 = vld [vmem:[#allocation2 + $0x20] sm:$0x1]  ;;  %3998 = vrot.lane.b32.xlu1 %v6290_v48, %s6364_s6 }
 0x191   : > { %v3671_v50 = vsel %vm6484_vm5, %v3669_v43, %v3670_v51  ;;  %v1750_v58 = vld [vmem:[#allocation2 + $0x50] sm:$0x1]  ;;  %v1746_v6 = vld [vmem:[#allocation2 + $0x48] sm:$0xf]  ;;  %v5769_v21 = vcombine.low %v2056_v60, %v2066_v62  ;;  %v5928_v23 = vcombine.low %v7161_v52, %v7172_v11  ;;  %1745 = vst [vmem:[#allocation2 + $0x44] sm:$0x1] %v1744_v42  ;;  %v7185_v53 = vsel %vm6484_vm5, %v5786_v0, %v2631_v2 }
 0x192   : > { %v5865_v31 = vcombine.low %v7167_v47, %v3671_v50  ;;  %v2633_v33 = vrot.slane %v2631_v2, 4  ;;  %v4061_v34 = vld [vmem:[#allocation2 + $0x18] sm:$0xf]  ;;  %v4062_v10 = vld [vmem:[#allocation2 + $0x1c] sm:$0xf]  ;;  %2956 = vrot.lane.b32.xlu0 %v6289_v12, %s6368_s14  ;;  %v3090_v35 = vshrl.u32 %v3020_v4, 16  ;;  %v1747_v37 = vsel %vm7074_vm1, %v1593_v5, %v1746_v6 }
 0x193   : > { %v3093_v63 = vshll.u32 %v3020_v4, 16  ;;  %v3099_v20 = vshll.u32 %v3021_v22, 16  ;;  %v3103_v36 = vshrl.u32 %v3021_v22, 16  ;;  %v4063_v25 = vld [vmem:[#allocation2 + $0x20] sm:$0x1]  ;;  %v3109_v15 = vshll.u32 %v3022_v18, 16  ;;  %v1597_v44 = vpop.permute.xlu0 %1596  ;;  %v7193_v7 = vpop.permute.xlu1 %1598 }
 0x194   : > { %v7189_v9 = vsel %vm6484_vm5, %v2633_v33, %v2634_v17  ;;  %v3092_v41 = vrot.slane %v3090_v35, 4  ;;  %v1974_v1 = vld [vmem:[#allocation2 + $0x18] sm:$0xf]  ;;  %1748 = vst [vmem:[#allocation2 + $0x48] sm:$0xf] %v1747_v37  ;;  %2453 = vrot.lane.b32.xlu1 %v5769_v21, %s6365_s7  ;;  %v1751_v56 = vsel %vm7068_vm7, %v1597_v44, %v1750_v58  ;;  %v4110_v57 = vshrl.u32 %v4061_v34, 16 }
 0x195   : > { %v5802_v38 = vcombine.low %v7185_v53, %v7189_v9  ;;  %v3095_v45 = vrot.slane %v3093_v63, 5  ;;  %v3101_v46 = vrot.slane %v3099_v20, 5  ;;  %v3105_v39 = vrot.slane %v3103_v36, 4  ;;  %1752 = vst [vmem:[#allocation2 + $0x50] sm:$0x1] %v1751_v56  ;;  %v6315_v47 = vld [vmem:[#allocation2 + $0x24] sm:$0xff]  }
 0x196   : > { %v3111_v28 = vrot.slane %v3109_v15, 5  ;;  %3497 = vrot.lane.b32.xlu0 %v5832_v3, %s6370_s16  ;;  %v4113_v32 = vshll.u32 %v4061_v34, 16  ;;  %v4119_v26 = vshll.u32 %v4062_v10, 16  ;;  %v4123_v59 = vshrl.u32 %v4062_v10, 16  ;;  %v1975_v29 = vld [vmem:[#allocation2 + $0x1c] sm:$0xf] }
 0x197   : > { %v3096_v51 = vor.u32 %v3095_v45, %v3092_v41  ;;  %v3106_v27 = vor.u32 %v3105_v39, %v3101_v46  ;;  %v4112_v48 = vrot.slane %v4110_v57, 4  ;;  %v4129_v60 = vshll.u32 %v4063_v25, 16  ;;  %v1976_v52 = vld [vmem:[#allocation2 + $0x20] sm:$0x1]  ;;  %v1595_v43 = vpop.permute.xlu0 %1594  ;;  %v1601_v62 = vpop.permute.xlu1 %1600  ;;  %v4609_v3 = vld [vmem:[#allocation2 + $0x24] sm:$0xe] }
 0x198   : > { %v2068_v30 = vshrl.u32 %v1974_v1, 16  ;;  %v4115_v0 = vrot.slane %v4113_v32, 5  ;;  %v4121_v2 = vrot.slane %v4119_v26, 5  ;;  %v4125_v4 = vrot.slane %v4123_v59, 4  ;;  %1749 = vst.msk [vmem:[#allocation2 + $0x4c] sm:$0xf] %vm1706_vm6, %v1595_v43  ;;  %3820 = vrot.lane.b32.xlu1 %v5865_v31, %s6369_s15 }
 0x199   : > { %v3097_v55 = vrot.slane %v3096_v51, 4  ;;  %1756 = vst.msk [vmem:[#allocation2 + $0x58] sm:$0xf] %vm1706_vm6, %v1601_v62  ;;  %v3107_v22 = vrot.slane %v3106_v27, 4  ;;  %v4131_v5 = vrot.slane %v4129_v60, 5  ;;  %v2071_v11 = vshll.u32 %v1974_v1, 16 }
 0x19a   : > { %v2070_v12 = vrot.slane %v2068_v30, 4  ;;  %v4610_v50 = vld [vmem:[#allocation2 + $0x28] sm:$0xf]  ;;  %1955 = vst.msk [vmem:[#allocation3 + $0x18] sm:$0xff] %vm1951_vm9, %v6315_v47  ;;  %4862 = vrot.lane.b32.xlu0 %v5928_v23, %s6371_s17  ;;  %v4116_v17 = vor.u32 %v4115_v0, %v4112_v48  ;;  %v4126_v18 = vor.u32 %v4125_v4, %v4121_v2  ;;  %v2077_v58 = vshll.u32 %v1975_v29, 16  ;;  %v6291_v33 = vld [vmem:[#allocation2 + $0x30] sm:$0xff]  }
 0x19b   : > { %v3102_v42 = vsel %vm6617_vm8, %v3097_v55, %v3101_v46  ;;  %v4611_v6 = vld [vmem:[#allocation2 + $0x2c] sm:$0x1]  ;;  %v2525_v21 = vld [vmem:[#allocation2 + $0x24] sm:$0xe]  ;;  %v3112_v31 = vsel %vm6617_vm8, %v3107_v22, %v3111_v28  ;;  %v2073_v34 = vrot.slane %v2071_v11, 5  ;;  %v2081_v10 = vshrl.u32 %v1975_v29, 16  ;;  %v7210_v36 = vpop.permute.xlu0 %1602  ;;  %v7212_v23 = vpop.permute.xlu1 %1604 }
 0x19c   : > { %v2087_v35 = vshll.u32 %v1976_v52, 16  ;;  %v2526_v63 = vld [vmem:[#allocation2 + $0x28] sm:$0xf]  ;;  %v2527_v20 = vld [vmem:[#allocation2 + $0x2c] sm:$0x1]  ;;  %v5833_v25 = vcombine.low %v3102_v42, %v3112_v31  ;;  %v4117_v15 = vrot.slane %v4116_v17, 4  ;;  %2958 = vrot.lane.b32.xlu1 %v6291_v33, %s6368_s14 }
 0x19d   : > { %v4127_v44 = vrot.slane %v4126_v18, 4  ;;  %v2079_v37 = vrot.slane %v2077_v58, 5  ;;  %v3568_v41 = vld [vmem:[#allocation2 + $0x24] sm:$0xe]  ;;  %v3569_v45 = vld [vmem:[#allocation2 + $0x28] sm:$0xf]  ;;  %v2074_v46 = vor.u32 %v2073_v34, %v2070_v12 }
 0x19e   : > { %v2083_v1 = vrot.slane %v2081_v10, 4  ;;  %v2089_v39 = vrot.slane %v2087_v35, 5  ;;  %v5913_v28 = vrot.slane %v4609_v3, 9  ;;  %2779 = vrot.lane.b32.xlu0 %v5802_v38, %s6363_s28  ;;  %v4122_v56 = vsel %vm6617_vm8, %v4117_v15, %v4121_v2  ;;  %v3570_v48 = vld [vmem:[#allocation2 + $0x2c] sm:$0x1]  ;;  %v6292_v30 = vld [vmem:[#allocation2 + $0x30] sm:$0xff]  }
 0x19f   : > { %v4132_v57 = vsel %vm6617_vm8, %v4127_v44, %v4131_v5  ;;  %v4711_v51 = vrot.slane %v4610_v50, 5  ;;  %v4714_v32 = vrot.slane %v4611_v6, 5  ;;  %v2075_v59 = vrot.slane %v2074_v46, 4  ;;  %v7223_v60 = vpop.permute.xlu0 %1608  ;;  %v7225_v52 = vpop.permute.xlu1 %1610  ;;  %v1753_v62 = vld [vmem:[#allocation2 + $0x54] sm:$0xf] }
 0x1a0   : > { %v5896_v26 = vcombine.low %v4122_v56, %v4132_v57  ;;  %v2084_v29 = vor.u32 %v2083_v1, %v2079_v37  ;;  %v5787_v27 = vrot.slane %v2525_v21, 9  ;;  %v2638_v38 = vrot.slane %v2526_v63, 5  ;;  %3499 = vrot.lane.b32.xlu1 %v5833_v25, %s6370_s16  ;;  %v4064_v4 = vld [vmem:[#allocation2 + $0x24] sm:$0xf]  ;;  %v4065_v11 = vld [vmem:[#allocation2 + $0x28] sm:$0xf] }
 0x1a1   : > { %v7229_v53 = vsel %vm6484_vm5, %v5913_v28, %v4711_v51  ;;  %v4713_v9 = vrot.slane %v4711_v51, 4  ;;  %v2641_v43 = vrot.slane %v2527_v20, 5  ;;  %v2080_v47 = vsel %vm6617_vm8, %v2075_v59, %v2079_v37  ;;  %v4066_v58 = vld [vmem:[#allocation2 + $0x2c] sm:$0x1]  ;;  %v1757_v35 = vld [vmem:[#allocation2 + $0x5c] sm:$0x1] }
 0x1a2   : > { %v2085_v55 = vrot.slane %v2084_v29, 4  ;;  %v5850_v0 = vrot.slane %v3568_v41, 9  ;;  %v3674_v2 = vrot.slane %v3569_v45, 5  ;;  %4000 = vrot.lane.b32.xlu0 %v6292_v30, %s6364_s6  ;;  %v2639_v22 = vsel %vm6484_vm5, %v5787_v27, %v2638_v38  ;;  %v3023_v63 = vld [vmem:[#allocation2 + $0x24] sm:$0xf] }
 0x1a3   : > { %v4715_v3 = vsel %vm6484_vm5, %v4713_v9, %v4714_v32  ;;  %v2640_v5 = vrot.slane %v2638_v38, 4  ;;  %v3677_v12 = vrot.slane %v3570_v48, 5  ;;  %v1607_v6 = vpop.permute.xlu0 %1606  ;;  %v1613_v21 = vpop.permute.xlu1 %1612  ;;  %v1754_v34 = vsel %vm7074_vm1, %v7193_v7, %v1753_v62  ;;  %v3024_v37 = vld [vmem:[#allocation2 + $0x28] sm:$0xf]  ;;  %v3025_v1 = vld [vmem:[#allocation2 + $0x2c] sm:$0x1] }
 0x1a4   : > { %v2090_v50 = vsel %vm6617_vm8, %v2085_v55, %v2089_v39  ;;  %v5929_v42 = vcombine.low %v7229_v53, %v4715_v3  ;;  %v7244_v17 = vsel %vm6484_vm5, %v5850_v0, %v3674_v2  ;;  %v3676_v18 = vrot.slane %v3674_v2, 4  ;;  %1763 = vst.msk [vmem:[#allocation2 + $0x64] sm:$0xf] %vm1706_vm6, %v1607_v6  ;;  %1770 = vst.msk [vmem:[#allocation2 + $0x70] sm:$0xf] %vm1706_vm6, %v1613_v21 }
 0x1a5   : > { %v5770_v33 = vcombine.low %v2080_v47, %v2090_v50  ;;  %v2642_v31 = vsel %vm6484_vm5, %v2640_v5, %v2641_v43  ;;  %v4134_v10 = vshrl.u32 %v4064_v4, 16  ;;  %1755 = vst [vmem:[#allocation2 + $0x54] sm:$0xf] %v1754_v34  ;;  %v4137_v15 = vshll.u32 %v4064_v4, 16  ;;  %v1977_v51 = vld [vmem:[#allocation2 + $0x24] sm:$0xf] }
 0x1a6   : > { %v5803_v20 = vcombine.low %v2639_v22, %v2642_v31  ;;  %v3678_v25 = vsel %vm6484_vm5, %v3676_v18, %v3677_v12  ;;  %v4143_v44 = vshll.u32 %v4065_v11, 16  ;;  %4541 = vrot.lane.b32.xlu0 %v5896_v26, %s6366_s8  ;;  %v4147_v45 = vshrl.u32 %v4065_v11, 16  ;;  %v6319_v26 = vld [vmem:[#allocation2 + $0x30] sm:$0xff]   ;;  %v1978_v62 = vld [vmem:[#allocation2 + $0x28] sm:$0xf]  ;;  %v6293_v18 = vld [vmem:[#allocation2 + $0x3c] sm:$0xff]  }
 0x1a7   : > { %2455 = vrot.lane.b32.xlu1 %v5770_v33, %s6365_s7  ;;  %v5866_v7 = vcombine.low %v7244_v17, %v3678_v25  ;;  %v4136_v41 = vrot.slane %v4134_v10, 4  ;;  %v4153_v46 = vshll.u32 %v4066_v58, 16  ;;  %v4139_v39 = vrot.slane %v4137_v15, 5  ;;  %v7261_v32 = vpop.permute.xlu0 %1614  ;;  %v7263_v59 = vpop.permute.xlu1 %1616  ;;  %1956 = vst.msk [vmem:[#allocation3 + $0x20] sm:$0xff] %vm1951_vm9, %v6319_v26  ;;  %v1979_v22 = vld [vmem:[#allocation2 + $0x2c] sm:$0x1] }
 0x1a8   : > { %v4145_v28 = vrot.slane %v4143_v44, 5  ;;  %v1758_v56 = vsel %vm7068_vm7, %v7210_v36, %v1757_v35  ;;  %v3114_v57 = vshrl.u32 %v3023_v63, 16  ;;  %v4149_v29 = vrot.slane %v4147_v45, 4  ;;  %v1764_v12 = vld [vmem:[#allocation2 + $0x68] sm:$0x1]  ;;  %v6294_v25 = vld [vmem:[#allocation2 + $0x3c] sm:$0xff]  }
 0x1a9   : > { %v4155_v27 = vrot.slane %v4153_v46, 5  ;;  %1759 = vst [vmem:[#allocation2 + $0x5c] sm:$0x1] %v1758_v56  ;;  %v3117_v48 = vshll.u32 %v3023_v63, 16  ;;  %v3123_v30 = vshll.u32 %v3024_v37, 16  ;;  %v4140_v53 = vor.u32 %v4139_v39, %v4136_v41 }
 0x1aa   : > { %v3116_v9 = vrot.slane %v3114_v57, 4  ;;  %v3127_v38 = vshrl.u32 %v3024_v37, 16  ;;  %v3133_v43 = vshll.u32 %v3025_v1, 16  ;;  %4864 = vrot.lane.b32.xlu0 %v5929_v42, %s6371_s17  ;;  %v4150_v36 = vor.u32 %v4149_v29, %v4145_v28  ;;  %v1760_v11 = vld [vmem:[#allocation2 + $0x60] sm:$0xf] }
 0x1ab   : > { %2781 = vrot.lane.b32.xlu1 %v5803_v20, %s6363_s28  ;;  %v3119_v47 = vrot.slane %v3117_v48, 5  ;;  %v3125_v55 = vrot.slane %v3123_v30, 5  ;;  %v2092_v0 = vshrl.u32 %v1977_v51, 16  ;;  %v4141_v2 = vrot.slane %v4140_v53, 4  ;;  %v7268_v50 = vpop.permute.xlu0 %1620  ;;  %v7270_v17 = vpop.permute.xlu1 %1622  ;;  %v4612_v33 = vld [vmem:[#allocation2 + $0x30] sm:$0xe] }
 0x1ac   : > { %v3129_v4 = vrot.slane %v3127_v38, 4  ;;  %v3135_v3 = vrot.slane %v3133_v43, 5  ;;  %v2095_v5 = vshll.u32 %v1977_v51, 16  ;;  %v4151_v58 = vrot.slane %v4150_v36, 4  ;;  %v4613_v63 = vld [vmem:[#allocation2 + $0x34] sm:$0xf] }
 0x1ad   : > { %v3120_v42 = vor.u32 %v3119_v47, %v3116_v9  ;;  %v2094_v6 = vrot.slane %v2092_v0, 4  ;;  %v2101_v21 = vshll.u32 %v1978_v62, 16  ;;  %v4146_v31 = vsel %vm6617_vm8, %v4141_v2, %v4145_v28  ;;  %v7274_v20 = vld [vmem:[#allocation2 + $0x38] sm:$0x1]  ;;  %v3571_v28 = vld [vmem:[#allocation2 + $0x30] sm:$0xe] }
 0x1ae   : > { %v3130_v34 = vor.u32 %v3129_v4, %v3125_v55  ;;  %v2097_v10 = vrot.slane %v2095_v5, 5  ;;  %v2105_v35 = vshrl.u32 %v1978_v62, 16  ;;  %3822 = vrot.lane.b32.xlu0 %v5866_v7, %s6369_s15  ;;  %v4156_v15 = vsel %vm6617_vm8, %v4151_v58, %v4155_v27  ;;  %v1767_v56 = vld [vmem:[#allocation2 + $0x6c] sm:$0xf]  ;;  %v3572_v48 = vld [vmem:[#allocation2 + $0x34] sm:$0xf] }
 0x1af   : > { %4002 = vrot.lane.b32.xlu1 %v6293_v18, %s6364_s6  ;;  %v3121_v44 = vrot.slane %v3120_v42, 4  ;;  %v2103_v37 = vrot.slane %v2101_v21, 5  ;;  %v2111_v41 = vshll.u32 %v1979_v22, 16  ;;  %v5897_v45 = vcombine.low %v4146_v31, %v4156_v15  ;;  %v1619_v57 = vpop.permute.xlu0 %1618  ;;  %v1625_v51 = vpop.permute.xlu1 %1624  ;;  %v3573_v30 = vld [vmem:[#allocation2 + $0x38] sm:$0x1]  ;;  %v6309_v53 = vld [vmem:[%s8249_s3] sm:$0xff]  }
 0x1b0   : > { %v3131_v46 = vrot.slane %v3130_v34, 4  ;;  %v2098_v1 = vor.u32 %v2097_v10, %v2094_v6  ;;  %v2107_v39 = vrot.slane %v2105_v35, 4  ;;  %v1765_v29 = vsel %vm7068_vm7, %v7223_v60, %v1764_v12  ;;  %1777 = vst.msk [vmem:[#allocation2 + $0x7c] sm:$0xf] %vm1706_vm6, %v1619_v57  ;;  %1784 = vst.msk [vmem:[#allocation2 + $0x88] sm:$0xf] %vm1706_vm6, %v1625_v51  ;;  %6191 = vmatprep.subr.bf16.mxu1 %v6309_v53 }
 0x1b1   : > { %v3126_v7 = vsel %vm6617_vm8, %v3121_v44, %v3125_v55  ;;  %v2113_v26 = vrot.slane %v2111_v41, 5  ;;  %v1761_v27 = vsel %vm7074_vm1, %v7212_v23, %v1760_v11  ;;  %1766 = vst [vmem:[#allocation2 + $0x68] sm:$0x1] %v1765_v29  ;;  %v5914_v60 = vrot.slane %v4612_v33, 9  ;;  %v2528_v62 = vld [vmem:[#allocation2 + $0x30] sm:$0xe]  ;;  %6192 = vmatpush3.bf16.msra.mxu1 %v6309_v53 }
 0x1b2   : > { %v3136_v9 = vsel %vm6617_vm8, %v3131_v46, %v3135_v3  ;;  %v2099_v38 = vrot.slane %v2098_v1, 4  ;;  %v2108_v43 = vor.u32 %v2107_v39, %v2103_v37  ;;  %1762 = vst [vmem:[#allocation2 + $0x60] sm:$0xf] %v1761_v27  ;;  %v1771_v23 = vld [vmem:[#allocation2 + $0x74] sm:$0x1]  ;;  %2960 = vrot.lane.b32.xlu0 %v6294_v25, %s6368_s14  ;;  %v4718_v47 = vrot.slane %v4613_v63, 5 }
 0x1b3   : > { %4543 = vrot.lane.b32.xlu1 %v5897_v45, %s6366_s8  ;;  %v5834_v36 = vcombine.low %v3126_v7, %v3136_v9  ;;  %v4721_v55 = vrot.slane %v7274_v20, 5  ;;  %v5851_v0 = vrot.slane %v3571_v28, 9  ;;  %v2529_v2 = vld [vmem:[#allocation2 + $0x34] sm:$0xf]  ;;  %v6310_v4 = vld [vmem:[%s8249_s3 + $0x8] sm:$0xff]   ;;  %v3681_v5 = vrot.slane %v3572_v48, 5  ;;  %v7303_v18 = vpop.permute.xlu0 %1626  ;;  %v7305_v58 = vpop.permute.xlu1 %1628 }
 0x1b4   : > { %v2104_v3 = vsel %vm6617_vm8, %v2099_v38, %v2103_v37  ;;  %v2109_v22 = vrot.slane %v2108_v43, 4  ;;  %v3684_v12 = vrot.slane %v3573_v30, 5  ;;  %v2530_v11 = vld [vmem:[#allocation2 + $0x38] sm:$0x1]  ;;  %v4719_v42 = vsel %vm6484_vm5, %v5914_v60, %v4718_v47  ;;  %v3026_v31 = vld [vmem:[#allocation2 + $0x30] sm:$0xf]  ;;  %6193 = vmatprep.subr.bf16.mxu1 %v6310_v4 }
 0x1b5   : > { %v4720_v6 = vrot.slane %v4718_v47, 4  ;;  %v1768_v21 = vsel %vm7074_vm1, %v7225_v52, %v1767_v56  ;;  %v5788_v33 = vrot.slane %v2528_v62, 9  ;;  %v1778_v34 = vld [vmem:[#allocation2 + $0x80] sm:$0x1]  ;;  %v3682_v35 = vsel %vm6484_vm5, %v5851_v0, %v3681_v5  ;;  %v3027_v25 = vld [vmem:[#allocation2 + $0x34] sm:$0xf]  ;;  %6194 = vmatpush3.bf16.msra.mxu1 %v6310_v4 }
 0x1b6   : > { %v2114_v10 = vsel %vm6617_vm8, %v2109_v22, %v2113_v26  ;;  %v3683_v63 = vrot.slane %v3681_v5, 4  ;;  %1769 = vst [vmem:[#allocation2 + $0x6c] sm:$0xf] %v1768_v21  ;;  %v2645_v20 = vrot.slane %v2529_v2, 5  ;;  %v6312_v15 = vld [vmem:[%s8249_s3 + $0x10] sm:$0xff]   ;;  %3501 = vrot.lane.b32.xlu0 %v5834_v36, %s6370_s16  ;;  %v2648_v37 = vrot.slane %v2530_v11, 5 }
 0x1b7   : > { %v5771_v52 = vcombine.low %v2104_v3, %v2114_v10  ;;  %v4722_v44 = vsel %vm6484_vm5, %v4720_v6, %v4721_v55  ;;  %v1772_v41 = vsel %vm7068_vm7, %v7261_v32, %v1771_v23  ;;  %v3028_v45 = vld [vmem:[#allocation2 + $0x38] sm:$0x1]  ;;  %v4067_v57 = vld [vmem:[#allocation2 + $0x30] sm:$0xf]  ;;  %v4068_v51 = vld [vmem:[#allocation2 + $0x34] sm:$0xf]  ;;  %v7329_v7 = vpop.permute.xlu0 %1632  ;;  %v7331_v26 = vpop.permute.xlu1 %1634  ;;  %v1779_v43 = vsel %vm7068_vm7, %v7268_v50, %v1778_v34  ;;  %6195 = vmatprep.subr.bf16.mxu1 %v6312_v15 }
 0x1b8   : > { %v1774_v46 = vld [vmem:[#allocation2 + $0x78] sm:$0xf]  ;;  %v5930_v1 = vcombine.low %v4719_v42, %v4722_v44  ;;  %v3685_v39 = vsel %vm6484_vm5, %v3683_v63, %v3684_v12  ;;  %v2646_v28 = vsel %vm6484_vm5, %v5788_v33, %v2645_v20  ;;  %v2647_v56 = vrot.slane %v2645_v20, 4  ;;  %1773 = vst [vmem:[#allocation2 + $0x74] sm:$0x1] %v1772_v41  ;;  %v6322_v12 = vld [vmem:[#allocation2 + $0x3c] sm:$0xff]  }
 0x1b9   : > { %2457 = vrot.lane.b32.xlu1 %v5771_v52, %s6365_s7  ;;  %v5867_v32 = vcombine.low %v3682_v35, %v3685_v39  ;;  %v3138_v29 = vshrl.u32 %v3026_v31, 16  ;;  %v3141_v27 = vshll.u32 %v3026_v31, 16  ;;  %v3147_v48 = vshll.u32 %v3027_v25, 16  ;;  %v4069_v30 = vld [vmem:[#allocation2 + $0x38] sm:$0x1]  ;;  %6196 = vmatpush3.bf16.msra.mxu1 %v6312_v15  ;;  %v6295_v33 = vld [vmem:[#allocation2 + $0x48] sm:$0xff]  }
 0x1ba   : > { %v2649_v53 = vsel %vm6484_vm5, %v2647_v56, %v2648_v37  ;;  %v3151_v9 = vshrl.u32 %v3027_v25, 16  ;;  %v3157_v38 = vshll.u32 %v3028_v45, 16  ;;  %v1980_v60 = vld [vmem:[#allocation2 + $0x30] sm:$0xf]  ;;  %v6314_v62 = vld [vmem:[%s8249_s3 + $0x18] sm:$0xff]   ;;  %4866 = vrot.lane.b32.xlu0 %v5930_v1, %s6371_s17  ;;  %v1775_v4 = vsel %vm7074_vm1, %v7263_v59, %v1774_v46  ;;  %1957 = vst.msk [vmem:[#allocation3 + $0x28] sm:$0xff] %vm1951_vm9, %v6322_v12 }
 0x1bb   : > { %v5804_v23 = vcombine.low %v2646_v28, %v2649_v53  ;;  %v3140_v36 = vrot.slane %v3138_v29, 4  ;;  %v3143_v47 = vrot.slane %v3141_v27, 5  ;;  %v3149_v55 = vrot.slane %v3147_v48, 5  ;;  %1780 = vst [vmem:[#allocation2 + $0x80] sm:$0x1] %v1779_v43  ;;  %v1631_v22 = vpop.permute.xlu0 %1630  ;;  %v1637_v5 = vpop.permute.xlu1 %1636  ;;  %6197 = vmatprep.subr.bf16.mxu1 %v6314_v62  ;;  %v6296_v1 = vld [vmem:[#allocation2 + $0x48] sm:$0xff]  }
 0x1bc   : > { %v3153_v0 = vrot.slane %v3151_v9, 4  ;;  %v3159_v2 = vrot.slane %v3157_v38, 5  ;;  %v4158_v50 = vshrl.u32 %v4067_v57, 16  ;;  %v1981_v3 = vld [vmem:[#allocation2 + $0x34] sm:$0xf]  ;;  %v4161_v42 = vshll.u32 %v4067_v57, 16 }
 0x1bd   : > { %3824 = vrot.lane.b32.xlu1 %v5867_v32, %s6369_s15  ;;  %v3144_v11 = vor.u32 %v3143_v47, %v3140_v36  ;;  %1776 = vst [vmem:[#allocation2 + $0x78] sm:$0xf] %v1775_v4  ;;  %v4167_v6 = vshll.u32 %v4068_v51, 16  ;;  %v4171_v21 = vshrl.u32 %v4068_v51, 16  ;;  %1791 = vst.msk [vmem:[#allocation2 + $0x94] sm:$0xf] %vm1706_vm6, %v1631_v22  ;;  %6198 = vmatpush3.bf16.msra.mxu1 %v6314_v62 }
 0x1be   : > { %1798 = vst.msk [vmem:[#allocation2 + $0xa0] sm:$0xf] %vm1706_vm6, %v1637_v5  ;;  %v3154_v31 = vor.u32 %v3153_v0, %v3149_v55  ;;  %v4160_v59 = vrot.slane %v4158_v50, 4  ;;  %v4177_v34 = vshll.u32 %v4069_v30, 16  ;;  %v2116_v10 = vshrl.u32 %v1980_v60, 16  ;;  %2783 = vrot.lane.b32.xlu0 %v5804_v23, %s6363_s28  ;;  %v6302_v19 = vld [vmem:[#allocation2 + $0x6c] sm:$0xff]  }
 0x1bf   : > { %v3145_v35 = vrot.slane %v3144_v11, 4  ;;  %v4163_v63 = vrot.slane %v4161_v42, 5  ;;  %v4169_v20 = vrot.slane %v4167_v6, 5  ;;  %v4173_v25 = vrot.slane %v4171_v21, 4  ;;  %v1982_v52 = vld [vmem:[#allocation2 + $0x38] sm:$0x1]  ;;  %v7351_v15 = vpop.permute.xlu0 %1638  ;;  %v7353_v46 = vpop.permute.xlu1 %1640 }
 0x1c0   : > { %v3155_v44 = vrot.slane %v3154_v31, 4  ;;  %v4179_v37 = vrot.slane %v4177_v34, 5  ;;  %v2118_v41 = vrot.slane %v2116_v10, 4  ;;  %v2119_v45 = vshll.u32 %v1980_v60, 16  ;;  %v1781_v51 = vld [vmem:[#allocation2 + $0x84] sm:$0xf] }
 0x1c1   : > { %2962 = vrot.lane.b32.xlu1 %v6295_v33, %s6368_s14  ;;  %v3150_v39 = vsel %vm6617_vm8, %v3145_v35, %v3149_v55  ;;  %v4164_v28 = vor.u32 %v4163_v63, %v4160_v59  ;;  %v4174_v56 = vor.u32 %v4173_v25, %v4169_v20  ;;  %v2125_v57 = vshll.u32 %v1981_v3, 16  ;;  %v4615_v32 = vld [vmem:[#allocation2 + $0x3c] sm:$0xe]  ;;  %v4616_v53 = vld [vmem:[#allocation2 + $0x40] sm:$0xf] }
 0x1c2   : > { %v3160_v29 = vsel %vm6617_vm8, %v3155_v44, %v3159_v2  ;;  %v2121_v27 = vrot.slane %v2119_v45, 5  ;;  %v2129_v48 = vshrl.u32 %v1981_v3, 16  ;;  %v2135_v30 = vshll.u32 %v1982_v52, 16  ;;  %4004 = vrot.lane.b32.xlu0 %v6296_v1, %s6364_s6  ;;  %v4617_v23 = vld [vmem:[#allocation2 + $0x44] sm:$0x1] }
 0x1c3   : > { %v5835_v9 = vcombine.low %v3150_v39, %v3160_v29  ;;  %v4165_v38 = vrot.slane %v4164_v28, 4  ;;  %v4175_v43 = vrot.slane %v4174_v56, 4  ;;  %v2127_v60 = vrot.slane %v2125_v57, 5  ;;  %v2531_v0 = vld [vmem:[#allocation2 + $0x3c] sm:$0xe]  ;;  %v7364_v4 = vpop.permute.xlu0 %1644  ;;  %v7366_v50 = vpop.permute.xlu1 %1646 }
 0x1c4   : > { %v2122_v36 = vor.u32 %v2121_v27, %v2118_v41  ;;  %v2131_v47 = vrot.slane %v2129_v48, 4  ;;  %v2137_v55 = vrot.slane %v2135_v30, 5  ;;  %v1782_v62 = vsel %vm7074_vm1, %v7270_v17, %v1781_v51  ;;  %v2532_v2 = vld [vmem:[#allocation2 + $0x40] sm:$0xf]  ;;  %v2533_v11 = vld [vmem:[#allocation2 + $0x44] sm:$0x1] }
 0x1c5   : > { %3503 = vrot.lane.b32.xlu1 %v5835_v9, %s6370_s16  ;;  %v4170_v3 = vsel %vm6617_vm8, %v4165_v38, %v4169_v20  ;;  %v4180_v22 = vsel %vm6617_vm8, %v4175_v43, %v4179_v37  ;;  %1783 = vst [vmem:[#allocation2 + $0x84] sm:$0xf] %v1782_v62  ;;  %v5915_v5 = vrot.slane %v4615_v32, 9  ;;  %v4725_v12 = vrot.slane %v4616_v53, 5  ;;  %v1785_v42 = vld [vmem:[#allocation2 + $0x8c] sm:$0x1] }
 0x1c6   : > { %v5898_v17 = vcombine.low %v4170_v3, %v4180_v22  ;;  %v2123_v6 = vrot.slane %v2122_v36, 4  ;;  %v2132_v21 = vor.u32 %v2131_v47, %v2127_v60  ;;  %v4728_v33 = vrot.slane %v4617_v23, 5  ;;  %v3574_v31 = vld [vmem:[#allocation2 + $0x3c] sm:$0xe]  ;;  %v3575_v59 = vld [vmem:[#allocation2 + $0x40] sm:$0xf] }
 0x1c7   : > { %v1792_v34 = vld [vmem:[#allocation2 + $0x98] sm:$0x1]  ;;  %v4726_v10 = vsel %vm6484_vm5, %v5915_v5, %v4725_v12  ;;  %v4727_v35 = vrot.slane %v4725_v12, 4  ;;  %v5789_v63 = vrot.slane %v2531_v0, 9  ;;  %v2652_v20 = vrot.slane %v2532_v2, 5  ;;  %v1643_v39 = vpop.permute.xlu0 %1642  ;;  %v1649_v28 = vpop.permute.xlu1 %1648 }
 0x1c8   : > { %v3576_v25 = vld [vmem:[#allocation2 + $0x44] sm:$0x1]  ;;  %4545 = vrot.lane.b32.xlu0 %v5898_v17, %s6366_s8  ;;  %v2128_v52 = vsel %vm6617_vm8, %v2123_v6, %v2127_v60  ;;  %v2133_v44 = vrot.slane %v2132_v21, 4  ;;  %v2655_v37 = vrot.slane %v2533_v11, 5  ;;  %v1786_v41 = vsel %vm7068_vm7, %v7303_v18, %v1785_v42  ;;  %v1788_v45 = vld [vmem:[#allocation2 + $0x90] sm:$0xf] }
 0x1c9   : > { %v4070_v1 = vld [vmem:[#allocation2 + $0x3c] sm:$0xf]  ;;  %v4729_v56 = vsel %vm6484_vm5, %v4727_v35, %v4728_v33  ;;  %v2653_v57 = vsel %vm6484_vm5, %v5789_v63, %v2652_v20  ;;  %v2654_v51 = vrot.slane %v2652_v20, 4  ;;  %1787 = vst [vmem:[#allocation2 + $0x8c] sm:$0x1] %v1786_v41  ;;  %v5852_v32 = vrot.slane %v3574_v31, 9 }
 0x1ca   : > { %v4071_v29 = vld [vmem:[#allocation2 + $0x40] sm:$0xf]  ;;  %v4072_v27 = vld [vmem:[#allocation2 + $0x44] sm:$0x1]  ;;  %v1795_v48 = vld [vmem:[#allocation2 + $0x9c] sm:$0xf]  ;;  %v2138_v18 = vsel %vm6617_vm8, %v2133_v44, %v2137_v55  ;;  %v5931_v30 = vcombine.low %v4726_v10, %v4729_v56  ;;  %v1793_v23 = vsel %vm7068_vm7, %v7329_v7, %v1792_v34  ;;  %v1789_v36 = vsel %vm7074_vm1, %v7305_v58, %v1788_v45 }
 0x1cb   : > { %1805 = vst.msk [vmem:[#allocation2 + $0xac] sm:$0xf] %vm1706_vm6, %v1643_v39  ;;  %1812 = vst.msk [vmem:[#allocation2 + $0xb8] sm:$0xf] %vm1706_vm6, %v1649_v28  ;;  %v3688_v53 = vrot.slane %v3575_v59, 5  ;;  %v3691_v9 = vrot.slane %v3576_v25, 5  ;;  %v5772_v43 = vcombine.low %v2128_v52, %v2138_v18  ;;  %v2656_v60 = vsel %vm6484_vm5, %v2654_v51, %v2655_v37 }
 0x1cc   : > { %v3029_v38 = vld [vmem:[#allocation2 + $0x3c] sm:$0xf]  ;;  %4868 = vrot.lane.b32.xlu0 %v5931_v30, %s6371_s17  ;;  %v5805_v47 = vcombine.low %v2653_v57, %v2656_v60  ;;  %1794 = vst [vmem:[#allocation2 + $0x98] sm:$0x1] %v1793_v23  ;;  %1790 = vst [vmem:[#allocation2 + $0x90] sm:$0xf] %v1789_v36  ;;  %v1796_v11 = vsel %vm7074_vm1, %v7331_v26, %v1795_v48 }
 0x1cd   : > { %v3689_v55 = vsel %vm6484_vm5, %v5852_v32, %v3688_v53  ;;  %v3690_v62 = vrot.slane %v3688_v53, 4  ;;  %v4182_v0 = vshrl.u32 %v4070_v1, 16  ;;  %2459 = vrot.lane.b32.xlu1 %v5772_v43, %s6365_s7  ;;  %v4185_v2 = vshll.u32 %v4070_v1, 16  ;;  %v3030_v5 = vld [vmem:[#allocation2 + $0x40] sm:$0xf]  ;;  %v6297_v37 = vld [vmem:[#allocation2 + $0x54] sm:$0xff]  }
 0x1ce   : > { %v4191_v3 = vshll.u32 %v4071_v29, 16  ;;  %v4195_v22 = vshrl.u32 %v4071_v29, 16  ;;  %v4201_v7 = vshll.u32 %v4072_v27, 16  ;;  %v3031_v42 = vld [vmem:[#allocation2 + $0x44] sm:$0x1]  ;;  %v3162_v17 = vshrl.u32 %v3029_v38, 16 }
 0x1cf   : > { %v3692_v58 = vsel %vm6484_vm5, %v3690_v62, %v3691_v9  ;;  %v4184_v12 = vrot.slane %v4182_v0, 4  ;;  %v4187_v21 = vrot.slane %v4185_v2, 5  ;;  %1797 = vst [vmem:[#allocation2 + $0x9c] sm:$0xf] %v1796_v11  ;;  %v1983_v59 = vld [vmem:[#allocation2 + $0x3c] sm:$0xf] }
 0x1d0   : > { %v5868_v6 = vcombine.low %v3689_v55, %v3692_v58  ;;  %v4193_v33 = vrot.slane %v4191_v3, 5  ;;  %v4197_v31 = vrot.slane %v4195_v22, 4  ;;  %v4203_v34 = vrot.slane %v4201_v7, 5  ;;  %v1984_v44 = vld [vmem:[#allocation2 + $0x40] sm:$0xf]  ;;  %v6298_v41 = vld [vmem:[#allocation2 + $0x54] sm:$0xff]  }
 0x1d1   : > { %v3164_v10 = vrot.slane %v3162_v17, 4  ;;  %v3165_v35 = vshll.u32 %v3029_v38, 16  ;;  %v3171_v63 = vshll.u32 %v3030_v5, 16  ;;  %2785 = vrot.lane.b32.xlu1 %v5805_v47, %s6363_s28  ;;  %v4188_v20 = vor.u32 %v4187_v21, %v4184_v12  ;;  %v1799_v56 = vld [vmem:[#allocation2 + $0xa4] sm:$0x1] }
 0x1d2   : > { %3826 = vrot.lane.b32.xlu0 %v5868_v6, %s6369_s15  ;;  %v4198_v25 = vor.u32 %v4197_v31, %v4193_v33  ;;  %v3175_v52 = vshrl.u32 %v3030_v5, 16  ;;  %v3181_v26 = vshll.u32 %v3031_v42, 16  ;;  %v2140_v39 = vshrl.u32 %v1983_v59, 16  ;;  %v1985_v27 = vld [vmem:[#allocation2 + $0x44] sm:$0x1] }
 0x1d3   : > { %v3167_v45 = vrot.slane %v3165_v35, 5  ;;  %v3173_v1 = vrot.slane %v3171_v63, 5  ;;  %v2143_v28 = vshll.u32 %v1983_v59, 16  ;;  %v4189_v57 = vrot.slane %v4188_v20, 4  ;;  %v4618_v9 = vld [vmem:[#allocation2 + $0x48] sm:$0xe] }
 0x1d4   : > { %v4199_v51 = vrot.slane %v4198_v25, 4  ;;  %v3177_v32 = vrot.slane %v3175_v52, 4  ;;  %v3183_v29 = vrot.slane %v3181_v26, 5  ;;  %v2142_v18 = vrot.slane %v2140_v39, 4  ;;  %v4619_v36 = vld [vmem:[#allocation2 + $0x4c] sm:$0xf] }
 0x1d5   : > { %v3168_v48 = vor.u32 %v3167_v45, %v3164_v10  ;;  %v2145_v30 = vrot.slane %v2143_v28, 5  ;;  %v2149_v53 = vshll.u32 %v1984_v44, 16  ;;  %4006 = vrot.lane.b32.xlu1 %v6297_v37, %s6364_s6  ;;  %v4194_v38 = vsel %vm6617_vm8, %v4189_v57, %v4193_v33  ;;  %v4620_v47 = vld [vmem:[#allocation2 + $0x50] sm:$0x1]  ;;  %v3577_v3 = vld [vmem:[#allocation2 + $0x48] sm:$0xe] }
 0x1d6   : > { %2964 = vrot.lane.b32.xlu0 %v6298_v41, %s6368_s14  ;;  %v4204_v43 = vsel %vm6617_vm8, %v4199_v51, %v4203_v34  ;;  %v3178_v60 = vor.u32 %v3177_v32, %v3173_v1  ;;  %v2153_v23 = vshrl.u32 %v1984_v44, 16  ;;  %v3578_v22 = vld [vmem:[#allocation2 + $0x4c] sm:$0xf]  ;;  %v2159_v58 = vshll.u32 %v1985_v27, 16  ;;  %v3579_v11 = vld [vmem:[#allocation2 + $0x50] sm:$0x1] }
 0x1d7   : > { %v5899_v55 = vcombine.low %v4194_v38, %v4204_v43  ;;  %v3169_v62 = vrot.slane %v3168_v48, 4  ;;  %v2146_v0 = vor.u32 %v2145_v30, %v2142_v18  ;;  %v2151_v2 = vrot.slane %v2149_v53, 5  ;;  %v1806_v42 = vld [vmem:[#allocation2 + $0xb0] sm:$0x1]  ;;  %v1802_v17 = vld [vmem:[#allocation2 + $0xa8] sm:$0xf] }
 0x1d8   : > { %v3179_v7 = vrot.slane %v3178_v60, 4  ;;  %v2155_v5 = vrot.slane %v2153_v23, 4  ;;  %v1800_v12 = vsel %vm7068_vm7, %v7351_v15, %v1799_v56  ;;  %v5916_v33 = vrot.slane %v4618_v9, 9  ;;  %v2534_v59 = vld [vmem:[#allocation2 + $0x48] sm:$0xe] }
 0x1d9   : > { %v3174_v6 = vsel %vm6617_vm8, %v3169_v62, %v3173_v1  ;;  %v2147_v21 = vrot.slane %v2146_v0, 4  ;;  %1801 = vst [vmem:[#allocation2 + $0xa4] sm:$0x1] %v1800_v12  ;;  %v4732_v31 = vrot.slane %v4619_v36, 5  ;;  %4547 = vrot.lane.b32.xlu1 %v5899_v55, %s6366_s8  ;;  %v2161_v35 = vrot.slane %v2159_v58, 5  ;;  %v6325_v53 = vld [vmem:[#allocation2 + $0x48] sm:$0xff]  }
 0x1da   : > { %v3184_v34 = vsel %vm6617_vm8, %v3179_v7, %v3183_v29  ;;  %v2156_v10 = vor.u32 %v2155_v5, %v2151_v2  ;;  %v4735_v63 = vrot.slane %v4620_v47, 5  ;;  %v2535_v15 = vld [vmem:[#allocation2 + $0x4c] sm:$0xf]  ;;  %v2536_v20 = vld [vmem:[#allocation2 + $0x50] sm:$0x1]  ;;  %v5853_v39 = vrot.slane %v3577_v3, 9 }
 0x1db   : > { %v1809_v25 = vld [vmem:[#allocation2 + $0xb4] sm:$0xf]  ;;  %v5836_v52 = vcombine.low %v3174_v6, %v3184_v34  ;;  %v2152_v26 = vsel %vm6617_vm8, %v2147_v21, %v2151_v2  ;;  %v4733_v44 = vsel %vm6484_vm5, %v5916_v33, %v4732_v31  ;;  %v4734_v37 = vrot.slane %v4732_v31, 4  ;;  %v3032_v41 = vld [vmem:[#allocation2 + $0x48] sm:$0xf]  ;;  %1958 = vst.msk [vmem:[#allocation3 + $0x30] sm:$0xff] %vm1951_vm9, %v6325_v53 }
 0x1dc   : > { %v3033_v45 = vld [vmem:[#allocation2 + $0x4c] sm:$0xf]  ;;  %v2157_v1 = vrot.slane %v2156_v10, 4  ;;  %v3695_v28 = vrot.slane %v3578_v22, 5  ;;  %v3698_v56 = vrot.slane %v3579_v11, 5  ;;  %v1807_v51 = vsel %vm7068_vm7, %v7364_v4, %v1806_v42  ;;  %v6328_v62 = vld [vmem:[#allocation2 + $0x54] sm:$0xff]  }
 0x1dd   : > { %3505 = vrot.lane.b32.xlu0 %v5836_v52, %s6370_s16  ;;  %v4736_v57 = vsel %vm6484_vm5, %v4734_v37, %v4735_v63  ;;  %v1803_v32 = vsel %vm7074_vm1, %v7353_v46, %v1802_v17  ;;  %v5790_v29 = vrot.slane %v2534_v59, 9  ;;  %1808 = vst [vmem:[#allocation2 + $0xb0] sm:$0x1] %v1807_v51  ;;  %v2659_v38 = vrot.slane %v2535_v15, 5  ;;  %v3034_v46 = vld [vmem:[#allocation2 + $0x50] sm:$0x1]  ;;  %v1657_v51 = vpop.permute.xlu1 %1656 }
 0x1de   : > { %v2162_v27 = vsel %vm6617_vm8, %v2157_v1, %v2161_v35  ;;  %v5932_v48 = vcombine.low %v4733_v44, %v4736_v57  ;;  %v3696_v18 = vsel %vm6484_vm5, %v5853_v39, %v3695_v28  ;;  %v3697_v30 = vrot.slane %v3695_v28, 4  ;;  %1804 = vst [vmem:[#allocation2 + $0xa8] sm:$0xf] %v1803_v32  ;;  %v4073_v55 = vld [vmem:[#allocation2 + $0x48] sm:$0xf]  ;;  %1959 = vst.msk [vmem:[#allocation3 + $0x38] sm:$0xff] %vm1951_vm9, %v6328_v62 }
 0x1df   : > { %v5773_v9 = vcombine.low %v2152_v26, %v2162_v27  ;;  %v2662_v43 = vrot.slane %v2536_v20, 5  ;;  %v1810_v4 = vsel %vm7074_vm1, %v7366_v50, %v1809_v25  ;;  %v3186_v23 = vshrl.u32 %v3032_v41, 16  ;;  %v4074_v22 = vld [vmem:[#allocation2 + $0x4c] sm:$0xf]  ;;  %v4075_v11 = vld [vmem:[#allocation2 + $0x50] sm:$0x1] }
 0x1e0   : > { %v3699_v60 = vsel %vm6484_vm5, %v3697_v30, %v3698_v56  ;;  %1811 = vst [vmem:[#allocation2 + $0xb4] sm:$0xf] %v1810_v4  ;;  %v3189_v36 = vshll.u32 %v3032_v41, 16  ;;  %v3195_v47 = vshll.u32 %v3033_v45, 16  ;;  %v2660_v50 = vsel %vm6484_vm5, %v5790_v29, %v2659_v38  ;;  %v1986_v33 = vld [vmem:[#allocation2 + $0x48] sm:$0xf] }
 0x1e1   : > { %2461 = vrot.lane.b32.xlu1 %v5773_v9, %s6365_s7  ;;  %4870 = vrot.lane.b32.xlu0 %v5932_v48, %s6371_s17  ;;  %v5869_v0 = vcombine.low %v3696_v18, %v3699_v60  ;;  %v2661_v2 = vrot.slane %v2659_v38, 4  ;;  %v3199_v3 = vshrl.u32 %v3033_v45, 16  ;;  %v3188_v7 = vrot.slane %v3186_v23, 4  ;;  %v1987_v35 = vld [vmem:[#allocation2 + $0x4c] sm:$0xf]  ;;  %v6299_v1 = vld [vmem:[#allocation2 + $0x60] sm:$0xff]   ;;  %v1651_v9 = vpop.permute.xlu0 %1650 }
 0x1e2   : > { %v3191_v5 = vrot.slane %v3189_v36, 5  ;;  %v3197_v58 = vrot.slane %v3195_v47, 5  ;;  %v3205_v12 = vshll.u32 %v3034_v46, 16  ;;  %v4206_v6 = vshrl.u32 %v4073_v55, 16  ;;  %v1988_v52 = vld [vmem:[#allocation2 + $0x50] sm:$0x1] }
 0x1e3   : > { %v2663_v42 = vsel %vm6484_vm5, %v2661_v2, %v2662_v43  ;;  %v3201_v17 = vrot.slane %v3199_v3, 4  ;;  %v4209_v21 = vshll.u32 %v4073_v55, 16  ;;  %v4215_v10 = vshll.u32 %v4074_v22, 16  ;;  %v1813_v45 = vld [vmem:[#allocation2 + $0xbc] sm:$0x1]  ;;  %v6300_v27 = vld [vmem:[#allocation2 + $0x60] sm:$0xff]  }
 0x1e4   : > { %v5806_v31 = vcombine.low %v2660_v50, %v2663_v42  ;;  %v3192_v59 = vor.u32 %v3191_v5, %v3188_v7  ;;  %v3207_v34 = vrot.slane %v3205_v12, 5  ;;  %v4208_v15 = vrot.slane %v4206_v6, 4  ;;  %v1820_v32 = vld [vmem:[#allocation2 + $0xc8] sm:$0x1]  ;;  %v4621_v29 = vld [vmem:[#allocation2 + $0x54] sm:$0xe] }
 0x1e5   : > { %3828 = vrot.lane.b32.xlu1 %v5869_v0, %s6369_s15  ;;  %v3202_v63 = vor.u32 %v3201_v17, %v3197_v58  ;;  %v4211_v20 = vrot.slane %v4209_v21, 5  ;;  %v4219_v25 = vshrl.u32 %v4074_v22, 16  ;;  %v4217_v44 = vrot.slane %v4215_v10, 5  ;;  %v4622_v38 = vld [vmem:[#allocation2 + $0x58] sm:$0xf] }
 0x1e6   : > { %2787 = vrot.lane.b32.xlu0 %v5806_v31, %s6363_s28  ;;  %v3193_v26 = vrot.slane %v3192_v59, 4  ;;  %v4225_v37 = vshll.u32 %v4075_v11, 16  ;;  %v2164_v41 = vshrl.u32 %v1986_v33, 16  ;;  %v2167_v57 = vshll.u32 %v1986_v33, 16  ;;  %v4623_v43 = vld [vmem:[#allocation2 + $0x5c] sm:$0x1] }
 0x1e7   : > { %v3203_v39 = vrot.slane %v3202_v63, 4  ;;  %v4212_v28 = vor.u32 %v4211_v20, %v4208_v15  ;;  %v4221_v56 = vrot.slane %v4219_v25, 4  ;;  %v2173_v53 = vshll.u32 %v1987_v35, 16  ;;  %v2537_v36 = vld [vmem:[#allocation2 + $0x54] sm:$0xe] }
 0x1e8   : > { %v3198_v48 = vsel %vm6617_vm8, %v3193_v26, %v3197_v58  ;;  %v4227_v18 = vrot.slane %v4225_v37, 5  ;;  %v2166_v30 = vrot.slane %v2164_v41, 4  ;;  %v2169_v23 = vrot.slane %v2167_v57, 5  ;;  %v2538_v47 = vld [vmem:[#allocation2 + $0x58] sm:$0xf]  ;;  %v1655_v37 = vpop.permute.xlu0 %1654 }
 0x1e9   : > { %2966 = vrot.lane.b32.xlu1 %v6299_v1, %s6368_s14  ;;  %v3208_v4 = vsel %vm6617_vm8, %v3203_v39, %v3207_v34  ;;  %v4213_v46 = vrot.slane %v4212_v28, 4  ;;  %v4222_v60 = vor.u32 %v4221_v56, %v4217_v44  ;;  %v2175_v62 = vrot.slane %v2173_v53, 5  ;;  %v2539_v2 = vld [vmem:[#allocation2 + $0x5c] sm:$0x1]  ;;  %v1816_v58 = vld [vmem:[#allocation2 + $0xc0] sm:$0xf]  ;;  %v1653_v34 = vpop.permute.xlu1 %1652 }
 0x1ea   : > { %4008 = vrot.lane.b32.xlu0 %v6300_v27, %s6364_s6  ;;  %v5837_v55 = vcombine.low %v3198_v48, %v3208_v4  ;;  %v2177_v0 = vshrl.u32 %v1987_v35, 16  ;;  %v2183_v50 = vshll.u32 %v1988_v52, 16  ;;  %v2170_v7 = vor.u32 %v2169_v23, %v2166_v30  ;;  %v3580_v6 = vld [vmem:[#allocation2 + $0x54] sm:$0xe]  ;;  %v3581_v20 = vld [vmem:[#allocation2 + $0x58] sm:$0xf] }
 0x1eb   : > { %v4218_v3 = vsel %vm6617_vm8, %v4213_v46, %v4217_v44  ;;  %v4223_v22 = vrot.slane %v4222_v60, 4  ;;  %v1814_v5 = vsel %vm7068_vm7, %v1651_v9, %v1813_v45  ;;  %v1821_v42 = vsel %vm7068_vm7, %v1657_v51, %v1820_v32  ;;  %v3582_v25 = vld [vmem:[#allocation2 + $0x5c] sm:$0x1]  ;;  %v4076_v28 = vld [vmem:[#allocation2 + $0x54] sm:$0xf]  ;;  %v6329_v27 = vld [vmem:[#allocation2 + $0x60] sm:$0xff]  }
 0x1ec   : > { %v2179_v12 = vrot.slane %v2177_v0, 4  ;;  %v2185_v11 = vrot.slane %v2183_v50, 5  ;;  %1815 = vst [vmem:[#allocation2 + $0xbc] sm:$0x1] %v1814_v5  ;;  %v5917_v17 = vrot.slane %v4621_v29, 9  ;;  %v2171_v33 = vrot.slane %v2170_v7, 4 }
 0x1ed   : > { %3507 = vrot.lane.b32.xlu1 %v5837_v55, %s6370_s16  ;;  %v4228_v21 = vsel %vm6617_vm8, %v4223_v22, %v4227_v18  ;;  %1822 = vst [vmem:[#allocation2 + $0xc8] sm:$0x1] %v1821_v42  ;;  %v4739_v31 = vrot.slane %v4622_v38, 5  ;;  %v4742_v59 = vrot.slane %v4623_v43, 5  ;;  %v5791_v63 = vrot.slane %v2537_v36, 9  ;;  %1960 = vst.msk [vmem:[#allocation3 + $0x40] sm:$0xff] %vm1951_vm9, %v6329_v27 }
 0x1ee   : > { %v5900_v10 = vcombine.low %v4218_v3, %v4228_v21  ;;  %v2180_v35 = vor.u32 %v2179_v12, %v2175_v62  ;;  %v2666_v15 = vrot.slane %v2538_v47, 5  ;;  %v2176_v24 = vsel %vm6617_vm8, %v2171_v33, %v2175_v62  ;;  %v4077_v29 = vld [vmem:[#allocation2 + $0x58] sm:$0xf]  ;;  %v6337_v53 = vld [vmem:[%s6639_s12 + $0x7c] sm:$0xf] }
 0x1ef   : > { %v4740_v52 = vsel %vm6484_vm5, %v5917_v17, %v4739_v31  ;;  %v4741_v26 = vrot.slane %v4739_v31, 4  ;;  %v2669_v44 = vrot.slane %v2539_v2, 5  ;;  %v1817_v39 = vsel %vm7074_vm1, %v1653_v34, %v1816_v58  ;;  %v4078_v9 = vld [vmem:[#allocation2 + $0x5c] sm:$0x1]  ;;  %v3035_v55 = vld [vmem:[#allocation2 + $0x54] sm:$0xf] }
 0x1f0   : > { %4549 = vrot.lane.b32.xlu0 %v5900_v10, %s6366_s8  ;;  %v2181_v41 = vrot.slane %v2180_v35, 4  ;;  %v2667_v45 = vsel %vm6484_vm5, %v5791_v63, %v2666_v15  ;;  %v2668_v1 = vrot.slane %v2666_v15, 4  ;;  %1818 = vst [vmem:[#allocation2 + $0xc0] sm:$0xf] %v1817_v39  ;;  %v5854_v57 = vrot.slane %v3580_v6, 9 }
 0x1f1   : > { %v4743_v56 = vsel %vm6484_vm5, %v4741_v26, %v4742_v59  ;;  %v3702_v51 = vrot.slane %v3581_v20, 5  ;;  %v3705_v32 = vrot.slane %v3582_v25, 5  ;;  %v660_v40 = vshll.u32 %v6337_v53, 16  ;;  %v3036_v3 = vld [vmem:[#allocation2 + $0x58] sm:$0xf]  ;;  %v6301_v59 = vld [vmem:[#allocation2 + $0x6c] sm:$0xff]  }
 0x1f2   : > { %v2186_v48 = vsel %vm6617_vm8, %v2181_v41, %v2185_v11  ;;  %v5933_v18 = vcombine.low %v4740_v52, %v4743_v56  ;;  %v2670_v30 = vsel %vm6484_vm5, %v2668_v1, %v2669_v44  ;;  %v4230_v23 = vshrl.u32 %v4076_v28, 16  ;;  %v3037_v58 = vld [vmem:[#allocation2 + $0x5c] sm:$0x1]  ;;  %v1989_v12 = vld [vmem:[#allocation2 + $0x54] sm:$0xf]  ;;  %v6330_v20 = vld [vmem:[#allocation2 + $0x6c] sm:$0xff]  }
 0x1f3   : > { %v5774_v38 = vcombine.low %v2176_v24, %v2186_v48  ;;  %v5807_v43 = vcombine.low %v2667_v45, %v2670_v30  ;;  %v3703_v4 = vsel %vm6484_vm5, %v5854_v57, %v3702_v51  ;;  %v3704_v46 = vrot.slane %v3702_v51, 4  ;;  %v1990_v31 = vld [vmem:[#allocation2 + $0x58] sm:$0xf]  ;;  %v1991_v63 = vld [vmem:[#allocation2 + $0x5c] sm:$0x1]  ;;  %1961 = vst.msk [vmem:[#allocation3 + $0x48] sm:$0xff] %vm1951_vm9, %v6330_v20 }
 0x1f4   : > { %4872 = vrot.lane.b32.xlu0 %v5933_v18, %s6371_s17  ;;  %v662_v60 = vor.u32 %v660_v40, %v7088_v8  ;;  %v4233_v36 = vshll.u32 %v4076_v28, 16  ;;  %v4239_v47 = vshll.u32 %v4077_v29, 16  ;;  %v4243_v0 = vshrl.u32 %v4077_v29, 16  ;;  %v2953_v2 = vpop.permute.xlu0 %2952  ;;  %v4624_v44 = vld [vmem:[#allocation2 + $0x60] sm:$0xe] }
 0x1f5   : > { %2463 = vrot.lane.b32.xlu1 %v5774_v38, %s6365_s7  ;;  %v3706_v62 = vsel %vm6484_vm5, %v3704_v46, %v3705_v32  ;;  %v4249_v50 = vshll.u32 %v4078_v9, 16  ;;  %v4232_v7 = vrot.slane %v4230_v23, 4  ;;  %3001 = vst.msk [vmem:[#allocation3] sm:$0xff] %vm3000_vm11, %v2953_v2  ;;  %v3210_v6 = vshrl.u32 %v3035_v55, 16  ;;  %v4625_v39 = vld [vmem:[#allocation2 + $0x64] sm:$0xf] }
 0x1f6   : > { %v5870_v22 = vcombine.low %v3703_v4, %v3706_v62  ;;  %v663_v8 = vsel %vm6679_vm2, %v655_v49, %v662_v60  ;;  %v4235_v5 = vrot.slane %v4233_v36, 5  ;;  %v4241_v11 = vrot.slane %v4239_v47, 5  ;;  %v4626_v28 = vld [vmem:[#allocation2 + $0x68] sm:$0x1]  ;;  %v3583_v29 = vld [vmem:[#allocation2 + $0x60] sm:$0xe] }
 0x1f7   : > { %828 = vst.msk [vmem:[#allocation2 + $0xc4] sm:$0xf] %vm714_vm14, %v663_v8  ;;  %v4245_v42 = vrot.slane %v4243_v0, 4  ;;  %v4251_v17 = vrot.slane %v4249_v50, 5  ;;  %v3213_v13 = vshll.u32 %v3035_v55, 16  ;;  %v3219_v49 = vshll.u32 %v3036_v3, 16 }
 0x1f8   : > { %3830 = vrot.lane.b32.xlu0 %v5870_v22, %s6369_s15  ;;  %1819 = vst.msk [vmem:[#allocation2 + $0xc4] sm:$0xf] %vm1706_vm6, %v1655_v37  ;;  %v4236_v21 = vor.u32 %v4235_v5, %v4232_v7  ;;  %v3223_v33 = vshrl.u32 %v3036_v3, 16  ;;  %v3212_v10 = vrot.slane %v3210_v6, 4  ;;  %v3229_v35 = vshll.u32 %v3037_v58, 16 }
 0x1f9   : > { %2789 = vrot.lane.b32.xlu1 %v5807_v43, %s6363_s28  ;;  %v4246_v34 = vor.u32 %v4245_v42, %v4241_v11  ;;  %v2188_v15 = vshrl.u32 %v1989_v12, 16  ;;  %v3215_v24 = vrot.slane %v3213_v13, 5  ;;  %v3221_v52 = vrot.slane %v3219_v49, 5  ;;  %v3584_v53 = vld [vmem:[#allocation2 + $0x64] sm:$0xf] }
 0x1fa   : > { %v4237_v25 = vrot.slane %v4236_v21, 4  ;;  %v3225_v26 = vrot.slane %v3223_v33, 4  ;;  %v3231_v41 = vrot.slane %v3229_v35, 5  ;;  %v2191_v1 = vshll.u32 %v1989_v12, 16  ;;  %v7509_v40 = vpop.permute.xlu1 %2954  ;;  %v3585_v55 = vld [vmem:[#allocation2 + $0x68] sm:$0x1] }
 0x1fb   : > { %v4247_v37 = vrot.slane %v4246_v34, 4  ;;  %v2190_v45 = vrot.slane %v2188_v15, 4  ;;  %v3216_v57 = vor.u32 %v3215_v24, %v3212_v10  ;;  %v2197_v32 = vshll.u32 %v1990_v31, 16  ;;  %v2540_v3 = vld [vmem:[#allocation2 + $0x60] sm:$0xe]  ;;  %v6331_v34 = vld [vmem:[#allocation2 + $0x78] sm:$0xff]  }
 0x1fc   : > { %2968 = vrot.lane.b32.xlu0 %v6302_v19, %s6368_s14  ;;  %v4242_v56 = vsel %vm6617_vm8, %v4237_v25, %v4241_v11  ;;  %v3226_v51 = vor.u32 %v3225_v26, %v3221_v52  ;;  %v2193_v48 = vrot.slane %v2191_v1, 5  ;;  %v2201_v18 = vshrl.u32 %v1990_v31, 16  ;;  %v7511_v46 = vpop.permute.xlu0 %3996  ;;  %v2541_v22 = vld [vmem:[#allocation2 + $0x64] sm:$0xf]  ;;  %v2542_v12 = vld [vmem:[#allocation2 + $0x68] sm:$0x1] }
 0x1fd   : > { %4010 = vrot.lane.b32.xlu1 %v6301_v59, %s6364_s6  ;;  %v4252_v27 = vsel %vm6617_vm8, %v4247_v37, %v4251_v17  ;;  %v2207_v30 = vshll.u32 %v1991_v63, 16  ;;  %v3217_v38 = vrot.slane %v3216_v57, 4  ;;  %v2199_v4 = vrot.slane %v2197_v32, 5  ;;  %v3038_v59 = vld [vmem:[#allocation2 + $0x60] sm:$0xf]  ;;  %1962 = vst.msk [vmem:[#allocation3 + $0x50] sm:$0xff] %vm1951_vm9, %v6331_v34 }
 0x1fe   : > { %v5901_v9 = vcombine.low %v4242_v56, %v4252_v27  ;;  %v3227_v43 = vrot.slane %v3226_v51, 4  ;;  %v2194_v60 = vor.u32 %v2193_v48, %v2190_v45  ;;  %v2203_v23 = vrot.slane %v2201_v18, 4  ;;  %v7518_v11 = vpop.permute.xlu1 %2777  ;;  %v3039_v20 = vld [vmem:[#allocation2 + $0x64] sm:$0xf]  ;;  %v3040_v25 = vld [vmem:[#allocation2 + $0x68] sm:$0x1] }
 0x1ff   : > { %v2209_v36 = vrot.slane %v2207_v30, 5  ;;  %v5918_v47 = vrot.slane %v4624_v44, 9  ;;  %v3222_v62 = vsel %vm6617_vm8, %v3217_v38, %v3221_v52  ;;  %v4746_v50 = vrot.slane %v4625_v39, 5  ;;  %v4079_v57 = vld [vmem:[#allocation2 + $0x60] sm:$0xf] }
 0x200   : > { %v3232_v0 = vsel %vm6617_vm8, %v3227_v43, %v3231_v41  ;;  %v4749_v2 = vrot.slane %v4626_v28, 5  ;;  %v2195_v7 = vrot.slane %v2194_v60, 4  ;;  %v2204_v5 = vor.u32 %v2203_v23, %v2199_v4  ;;  %v7522_v21 = vpop.permute.xlu0 %3818  ;;  %v6332_v41 = vld [vmem:[#allocation2 + $0x84] sm:$0xff]   ;;  %v4627_v34 = vld [vmem:[#allocation2 + $0x6c] sm:$0xe] }
 0x201   : > { %4551 = vrot.lane.b32.xlu1 %v5901_v9, %s6366_s8  ;;  %v5838_v8 = vcombine.low %v3222_v62, %v3232_v0  ;;  %v5855_v58 = vrot.slane %v3583_v29, 9  ;;  %v4747_v42 = vsel %vm6484_vm5, %v5918_v47, %v4746_v50  ;;  %v4748_v17 = vrot.slane %v4746_v50, 4  ;;  %v4080_v48 = vld [vmem:[#allocation2 + $0x64] sm:$0xf]  ;;  %1963 = vst.msk [vmem:[#allocation3 + $0x58] sm:$0xff] %vm1951_vm9, %v6332_v41 }
 0x202   : > { %v3709_v6 = vrot.slane %v3584_v53, 5  ;;  %v3712_v19 = vrot.slane %v3585_v55, 5  ;;  %v2200_v13 = vsel %vm6617_vm8, %v2195_v7, %v2199_v4  ;;  %v2205_v49 = vrot.slane %v2204_v5, 4  ;;  %v7535_v37 = vpop.permute.xlu1 %3998  ;;  %v4081_v38 = vld [vmem:[#allocation2 + $0x68] sm:$0x1] }
 0x203   : > { %3509 = vrot.lane.b32.xlu0 %v5838_v8, %s6370_s16  ;;  %v5792_v33 = vrot.slane %v2540_v3, 9  ;;  %v2673_v31 = vrot.slane %v2541_v22, 5  ;;  %v4750_v10 = vsel %vm6484_vm5, %v4748_v17, %v4749_v2  ;;  %v2676_v15 = vrot.slane %v2542_v12, 5  ;;  %v6304_v3 = vld [vmem:[#allocation2 + $0x78] sm:$0xff]   ;;  %v4629_v41 = vld [vmem:[#allocation2 + $0x74] sm:$0x1] }
 0x204   : > { %v3710_v35 = vsel %vm6484_vm5, %v5855_v58, %v3709_v6  ;;  %v3711_v63 = vrot.slane %v3709_v6, 4  ;;  %v2210_v24 = vsel %vm6617_vm8, %v2205_v49, %v2209_v36  ;;  %v5934_v52 = vcombine.low %v4747_v42, %v4750_v10  ;;  %v7540_v56 = vpop.permute.xlu0 %2956  ;;  %v1992_v36 = vld [vmem:[#allocation2 + $0x60] sm:$0xf]  ;;  %v1993_v58 = vld [vmem:[#allocation2 + $0x64] sm:$0xf]  ;;  %v6303_v12 = vld [vmem:[#allocation2 + $0x78] sm:$0xff]  }
 0x205   : > { %v2674_v26 = vsel %vm6484_vm5, %v5792_v33, %v2673_v31  ;;  %v2675_v44 = vrot.slane %v2673_v31, 4  ;;  %v5775_v45 = vcombine.low %v2200_v13, %v2210_v24  ;;  %v3234_v39 = vshrl.u32 %v3038_v59, 16 }
 0x206   : > { %v3713_v1 = vsel %vm6484_vm5, %v3711_v63, %v3712_v19  ;;  %v3237_v28 = vshll.u32 %v3038_v59, 16  ;;  %v3243_v29 = vshll.u32 %v3039_v20, 16  ;;  %v3247_v27 = vshrl.u32 %v3039_v20, 16  ;;  %v2454_v47 = vpop.permute.xlu1 %2453  ;;  %v1994_v19 = vld [vmem:[#allocation2 + $0x68] sm:$0x1] }
 0x207   : > { %4874 = vrot.lane.b32.xlu0 %v5934_v52, %s6371_s17  ;;  %v5871_v51 = vcombine.low %v3710_v35, %v3713_v1  ;;  %v2677_v32 = vsel %vm6484_vm5, %v2675_v44, %v2676_v15  ;;  %2465 = vrot.lane.b32.xlu1 %v5775_v45, %s6365_s7  ;;  %v3236_v30 = vrot.slane %v3234_v39, 4  ;;  %v3253_v9 = vshll.u32 %v3040_v25, 16  ;;  %2501 = vst.msk [vmem:[#allocation3 + $0x8] sm:$0xff] %vm2499_vm13, %v2454_v47  ;;  %v6333_v35 = vld [vmem:[#allocation2 + $0x90] sm:$0xff]  }
 0x208   : > { %v5808_v18 = vcombine.low %v2674_v26, %v2677_v32  ;;  %v3239_v53 = vrot.slane %v3237_v28, 5  ;;  %v3245_v43 = vrot.slane %v3243_v29, 5  ;;  %v3249_v4 = vrot.slane %v3247_v27, 4  ;;  %v3498_v2 = vpop.permute.xlu0 %3497  ;;  %2825 = vst.msk [vmem:[#allocation3 + $0x8] sm:$0xff] %vm2823_vm3, %v7518_v11  ;;  %v4628_v25 = vld [vmem:[#allocation2 + $0x70] sm:$0xf] }
 0x209   : > { %v4254_v60 = vshrl.u32 %v4079_v57, 16  ;;  %v4257_v23 = vshll.u32 %v4079_v57, 16  ;;  %v3255_v62 = vrot.slane %v3253_v9, 5  ;;  %v4263_v0 = vshll.u32 %v4080_v48, 16  ;;  %3002 = vst.msk [vmem:[#allocation3 + $0x8] sm:$0xff] %vm3000_vm11, %v7509_v40 }
 0x20a   : > { %v3240_v55 = vor.u32 %v3239_v53, %v3236_v30  ;;  %v4267_v50 = vshrl.u32 %v4080_v48, 16  ;;  %v3250_v22 = vor.u32 %v3249_v4, %v3245_v43  ;;  %v4273_v5 = vshll.u32 %v4081_v38, 16  ;;  %v7554_v10 = vpop.permute.xlu1 %3820  ;;  %1964 = vst.msk [vmem:[#allocation3 + $0x60] sm:$0xff] %vm1951_vm9, %v6333_v35  ;;  %v2543_v57 = vld [vmem:[#allocation2 + $0x6c] sm:$0xe]  ;;  %v6334_v4 = vld [vmem:[#allocation2 + $0x9c] sm:$0xff]  }
 0x20b   : > { %2791 = vrot.lane.b32.xlu0 %v5808_v18, %s6363_s28  ;;  %v4256_v8 = vrot.slane %v4254_v60, 4  ;;  %v4259_v7 = vrot.slane %v4257_v23, 5  ;;  %3832 = vrot.lane.b32.xlu1 %v5871_v51, %s6369_s15  ;;  %v4265_v17 = vrot.slane %v4263_v0, 5  ;;  %v2212_v13 = vshrl.u32 %v1992_v36, 16  ;;  %v2544_v27 = vld [vmem:[#allocation2 + $0x70] sm:$0xf] }
 0x20c   : > { %v3241_v42 = vrot.slane %v3240_v55, 4  ;;  %v4269_v6 = vrot.slane %v4267_v50, 4  ;;  %v3251_v49 = vrot.slane %v3250_v22, 4  ;;  %v4275_v31 = vrot.slane %v4273_v5, 5  ;;  %v7558_v24 = vpop.permute.xlu0 %4862  ;;  %v2545_v48 = vld [vmem:[#allocation2 + $0x74] sm:$0x1] }
 0x20d   : > { %v4260_v33 = vor.u32 %v4259_v7, %v4256_v8  ;;  %v2215_v59 = vshll.u32 %v1992_v36, 16  ;;  %v2214_v15 = vrot.slane %v2212_v13, 4  ;;  %v2221_v20 = vshll.u32 %v1993_v58, 16  ;;  %3546 = vst.msk [vmem:[#allocation3] sm:$0xff] %vm3545_vm12, %v3498_v2  ;;  %v3586_v38 = vld [vmem:[#allocation2 + $0x6c] sm:$0xe] }
 0x20e   : > { %v3246_v11 = vsel %vm6617_vm8, %v3241_v42, %v3245_v43  ;;  %v4270_v63 = vor.u32 %v4269_v6, %v4265_v17  ;;  %v3256_v40 = vsel %vm6617_vm8, %v3251_v49, %v3255_v62  ;;  %v2225_v44 = vshrl.u32 %v1993_v58, 16  ;;  %v7567_v18 = vpop.permute.xlu1 %2958  ;;  %3867 = vst.msk [vmem:[#allocation3] sm:$0xff] %vm3866_vm15, %v7522_v21  ;;  %v3587_v55 = vld [vmem:[#allocation2 + $0x70] sm:$0xf]  ;;  %v3588_v62 = vld [vmem:[#allocation2 + $0x74] sm:$0x1] }
 0x20f   : > { %4012 = vrot.lane.b32.xlu0 %v6304_v3, %s6364_s6  ;;  %v4261_v52 = vrot.slane %v4260_v33, 4  ;;  %v2217_v26 = vrot.slane %v2215_v59, 5  ;;  %2970 = vrot.lane.b32.xlu1 %v6303_v12, %s6368_s14  ;;  %v5839_v45 = vcombine.low %v3246_v11, %v3256_v40  ;;  %v2223_v39 = vrot.slane %v2221_v20, 5  ;;  %v4082_v22 = vld [vmem:[#allocation2 + $0x6c] sm:$0xf]  ;;  %1965 = vst.msk [vmem:[#allocation3 + $0x68] sm:$0xff] %vm1951_vm9, %v6334_v4 }
 0x210   : > { %v4271_v1 = vrot.slane %v4270_v63, 4  ;;  %v2231_v28 = vshll.u32 %v1994_v19, 16  ;;  %v2227_v29 = vrot.slane %v2225_v44, 4  ;;  %v5919_v9 = vrot.slane %v4627_v34, 9  ;;  %v7572_v43 = vpop.permute.xlu0 %2779  ;;  %v4083_v58 = vld [vmem:[#allocation2 + $0x70] sm:$0xf] }
 0x211   : > { %v4266_v51 = vsel %vm6617_vm8, %v4261_v52, %v4265_v17  ;;  %v2218_v32 = vor.u32 %v2217_v26, %v2214_v15  ;;  %v4753_v47 = vrot.slane %v4628_v25, 5  ;;  %v4756_v0 = vrot.slane %v4629_v41, 5  ;;  %v4084_v12 = vld [vmem:[#allocation2 + $0x74] sm:$0x1]  ;;  %v3041_v35 = vld [vmem:[#allocation2 + $0x6c] sm:$0xf] }
 0x212   : > { %v4276_v30 = vsel %vm6617_vm8, %v4271_v1, %v4275_v31  ;;  %v2233_v53 = vrot.slane %v2231_v28, 5  ;;  %v2228_v36 = vor.u32 %v2227_v29, %v2223_v39  ;;  %v5793_v50 = vrot.slane %v2543_v57, 9  ;;  %v3500_v42 = vpop.permute.xlu1 %3499  ;;  %v3042_v25 = vld [vmem:[#allocation2 + $0x70] sm:$0xf]  ;;  %v6335_v41 = vld [vmem:[#allocation2 + $0xa8] sm:$0xff]  }
 0x213   : > { %v5902_v60 = vcombine.low %v4266_v51, %v4276_v30  ;;  %v2219_v23 = vrot.slane %v2218_v32, 4  ;;  %3511 = vrot.lane.b32.xlu1 %v5839_v45, %s6370_s16  ;;  %v2680_v3 = vrot.slane %v2544_v27, 5  ;;  %v2683_v2 = vrot.slane %v2545_v48, 5  ;;  %3547 = vst.msk [vmem:[#allocation3 + $0x8] sm:$0xff] %vm3545_vm12, %v3500_v42  ;;  %v1995_v30 = vld [vmem:[#allocation2 + $0x6c] sm:$0xf] }
 0x214   : > { %v2229_v7 = vrot.slane %v2228_v36, 4  ;;  %v4754_v21 = vsel %vm6484_vm5, %v5919_v9, %v4753_v47  ;;  %v4755_v5 = vrot.slane %v4753_v47, 4  ;;  %v5856_v19 = vrot.slane %v3586_v38, 9  ;;  %v7585_v49 = vpop.permute.xlu0 %4000  ;;  %3868 = vst.msk [vmem:[#allocation3 + $0x8] sm:$0xff] %vm3866_vm15, %v7554_v10 }
 0x215   : > { %4553 = vrot.lane.b32.xlu0 %v5902_v60, %s6366_s8  ;;  %v2224_v8 = vsel %vm6617_vm8, %v2219_v23, %v2223_v39  ;;  %v2681_v17 = vsel %vm6484_vm5, %v5793_v50, %v2680_v3  ;;  %v2682_v6 = vrot.slane %v2680_v3, 4  ;;  %v3716_v13 = vrot.slane %v3587_v55, 5  ;;  %v3043_v39 = vld [vmem:[#allocation2 + $0x74] sm:$0x1]  ;;  %1966 = vst.msk [vmem:[#allocation3 + $0x70] sm:$0xff] %vm1951_vm9, %v6335_v41 }
 0x216   : > { %v2234_v33 = vsel %vm6617_vm8, %v2229_v7, %v2233_v53  ;;  %v4757_v31 = vsel %vm6484_vm5, %v4755_v5, %v4756_v0  ;;  %v3719_v59 = vrot.slane %v3588_v62, 5  ;;  %v4278_v34 = vshrl.u32 %v4082_v22, 16  ;;  %v1996_v60 = vld [vmem:[#allocation2 + $0x70] sm:$0xf]  ;;  %v6336_v62 = vld [vmem:[#allocation2 + $0xb4] sm:$0xff]   ;;  %v6306_v0 = vld [vmem:[#allocation2 + $0x84] sm:$0xff]  }
 0x217   : > { %v5776_v11 = vcombine.low %v2224_v8, %v2234_v33  ;;  %v5935_v63 = vcombine.low %v4754_v21, %v4757_v31  ;;  %v2684_v15 = vsel %vm6484_vm5, %v2682_v6, %v2683_v2  ;;  %v3717_v20 = vsel %vm6484_vm5, %v5856_v19, %v3716_v13  ;;  %v6307_v21 = vld [vmem:[#allocation2 + $0x84] sm:$0xff]   ;;  %1967 = vst.msk [vmem:[#allocation3 + $0x78] sm:$0xff] %vm1951_vm9, %v6336_v62  ;;  %v4631_v33 = vld [vmem:[#allocation2 + $0x7c] sm:$0xf] }
 0x218   : > { %v5809_v40 = vcombine.low %v2681_v17, %v2684_v15  ;;  %v3718_v52 = vrot.slane %v3716_v13, 4  ;;  %v4280_v26 = vrot.slane %v4278_v34, 4  ;;  %v4281_v44 = vshll.u32 %v4082_v22, 16  ;;  %v7600_v57 = vpop.permute.xlu0 %4541  ;;  %v1997_v22 = vld [vmem:[#allocation2 + $0x74] sm:$0x1] }
 0x219   : > { %2467 = vrot.lane.b32.xlu1 %v5776_v11, %s6365_s7  ;;  %4876 = vrot.lane.b32.xlu0 %v5935_v63, %s6371_s17  ;;  %v4287_v10 = vshll.u32 %v4083_v58, 16  ;;  %v4291_v45 = vshrl.u32 %v4083_v58, 16  ;;  %v4297_v1 = vshll.u32 %v4084_v12, 16  ;;  %v3258_v28 = vshrl.u32 %v3041_v35, 16  ;;  %v2456_v51 = vpop.permute.xlu1 %2455  ;;  %v4630_v13 = vld [vmem:[#allocation2 + $0x78] sm:$0xe] }
 0x21a   : > { %v3720_v32 = vsel %vm6484_vm5, %v3718_v52, %v3719_v59  ;;  %v4283_v29 = vrot.slane %v4281_v44, 5  ;;  %v3261_v27 = vshll.u32 %v3041_v35, 16  ;;  %v3267_v48 = vshll.u32 %v3042_v25, 16  ;;  %2502 = vst.msk [vmem:[#allocation3 + $0x10] sm:$0xff] %vm2499_vm13, %v2456_v51  ;;  %v3591_v51 = vld [vmem:[#allocation2 + $0x80] sm:$0x1] }
 0x21b   : > { %v5872_v53 = vcombine.low %v3717_v20, %v3720_v32  ;;  %v4289_v9 = vrot.slane %v4287_v10, 5  ;;  %v4293_v38 = vrot.slane %v4291_v45, 4  ;;  %v4299_v4 = vrot.slane %v4297_v1, 5  ;;  %2826 = vst.msk [vmem:[#allocation3 + $0x10] sm:$0xff] %vm2823_vm3, %v7572_v43  ;;  %v3589_v10 = vld [vmem:[#allocation2 + $0x78] sm:$0xe] }
 0x21c   : > { %v4284_v23 = vor.u32 %v4283_v29, %v4280_v26  ;;  %v3260_v36 = vrot.slane %v3258_v28, 4  ;;  %v3263_v47 = vrot.slane %v3261_v27, 5  ;;  %v7608_v55 = vrot.slane %v3267_v48, 5  ;;  %3003 = vst.msk [vmem:[#allocation3 + $0x10] sm:$0xff] %vm3000_vm11, %v7540_v56  ;;  %v7614_v43 = vpop.permute.xlu0 %4864  ;;  %v3590_v45 = vld [vmem:[#allocation2 + $0x7c] sm:$0xf] }
 0x21d   : > { %2793 = vrot.lane.b32.xlu1 %v5809_v40, %s6363_s28  ;;  %3834 = vrot.lane.b32.xlu0 %v5872_v53, %s6369_s15  ;;  %v4294_v50 = vor.u32 %v4293_v38, %v4289_v9  ;;  %v3271_v3 = vshrl.u32 %v3042_v25, 16  ;;  %v3277_v2 = vshll.u32 %v3043_v39, 16  ;;  %v2236_v8 = vshrl.u32 %v1995_v30, 16  ;;  %v7616_v7 = vpop.permute.xlu1 %2781  ;;  %v4632_v25 = vld [vmem:[#allocation2 + $0x80] sm:$0x1] }
 0x21e   : > { %v4285_v5 = vrot.slane %v4284_v23, 4  ;;  %v3264_v58 = vor.u32 %v3263_v47, %v3260_v36  ;;  %v2239_v12 = vshll.u32 %v1995_v30, 16  ;;  %v2245_v56 = vshll.u32 %v1996_v60, 16  ;;  %v2546_v48 = vld [vmem:[#allocation2 + $0x78] sm:$0xe] }
 0x21f   : > { %v4295_v42 = vrot.slane %v4294_v50, 4  ;;  %v3273_v17 = vrot.slane %v3271_v3, 4  ;;  %v3279_v6 = vrot.slane %v3277_v2, 5  ;;  %v2238_v19 = vrot.slane %v2236_v8, 4  ;;  %v2548_v38 = vld [vmem:[#allocation2 + $0x80] sm:$0x1] }
 0x220   : > { %v4290_v31 = vsel %vm6617_vm8, %v4285_v5, %v4289_v9  ;;  %v3265_v59 = vrot.slane %v3264_v58, 4  ;;  %v2241_v34 = vrot.slane %v2239_v12, 5  ;;  %v7621_v35 = vrot.slane %v2245_v56, 5  ;;  %v7628_v40 = vpop.permute.xlu0 %3822  ;;  %v2547_v9 = vld [vmem:[#allocation2 + $0x7c] sm:$0xf] }
 0x221   : > { %4014 = vrot.lane.b32.xlu1 %v6306_v0, %s6364_s6  ;;  %2972 = vrot.lane.b32.xlu0 %v6307_v21, %s6368_s14  ;;  %v4300_v11 = vsel %vm6617_vm8, %v4295_v42, %v4299_v4  ;;  %v3274_v63 = vor.u32 %v3273_v17, %v7608_v55  ;;  %v2249_v15 = vshrl.u32 %v1996_v60, 16  ;;  %v2255_v20 = vshll.u32 %v1997_v22, 16  ;;  %v7630_v52 = vpop.permute.xlu1 %4002  ;;  %v3045_v62 = vld [vmem:[#allocation2 + $0x7c] sm:$0xf]  ;;  %v3046_v56 = vld [vmem:[#allocation2 + $0x80] sm:$0x1] }
 0x222   : > { %v5903_v26 = vcombine.low %v4290_v31, %v4300_v11  ;;  %v3270_v44 = vsel %vm6617_vm8, %v3265_v59, %v7608_v55  ;;  %v2242_v41 = vor.u32 %v2241_v34, %v2238_v19  ;;  %vm4044_vm9 = vcmask 458112   ;;  %v3044_v55 = vld [vmem:[#allocation2 + $0x78] sm:$0xf] }
 0x223   : > { %v3275_v1 = vrot.slane %v3274_v63, 4  ;;  %v2251_v39 = vrot.slane %v2249_v15, 4  ;;  %v2257_v28 = vrot.slane %v2255_v20, 5  ;;  %4045 = vst.msk [vmem:[#allocation3] sm:$0xff] %vm4044_vm9, %v7511_v46  ;;  %4046 = vst.msk [vmem:[#allocation3 + $0x8] sm:$0xff] %vm4044_vm9, %v7535_v37  ;;  %vm4910_vm2 = vcmask 589312  }
 0x224   : > { %v2243_v32 = vrot.slane %v2242_v41, 4  ;;  %4590 = vst.msk [vmem:[#allocation3] sm:$0xff] %vm4589_vm0, %v7600_v57  ;;  %v5920_v29 = vrot.slane %v4630_v13, 9  ;;  %v4760_v27 = vrot.slane %v4631_v33, 5  ;;  %v4763_v37 = vrot.slane %v4632_v25, 5  ;;  %v7647_v4 = vpop.permute.xlu0 %2960 }
 0x225   : > { %4555 = vrot.lane.b32.xlu1 %v5903_v26, %s6366_s8  ;;  %v3280_v30 = vsel %vm6617_vm8, %v3275_v1, %v3279_v6  ;;  %v2252_v46 = vor.u32 %v2251_v39, %v7621_v35  ;;  %4911 = vst.msk [vmem:[#allocation3] sm:$0xff] %vm4910_vm2, %v7558_v24  ;;  %v5857_v53 = vrot.slane %v3589_v10, 9  ;;  %v4544_v57 = vpop.permute.xlu1 %4543  ;;  %v3723_v0 = vrot.slane %v3590_v45, 5  ;;  %v4085_v13 = vld [vmem:[#allocation2 + $0x78] sm:$0xf] }
 0x226   : > { %v5840_v60 = vcombine.low %v3270_v44, %v3280_v30  ;;  %v2248_v23 = vsel %vm6617_vm8, %v2243_v32, %v7621_v35  ;;  %v4761_v36 = vsel %vm6484_vm5, %v5920_v29, %v4760_v27  ;;  %v4762_v47 = vrot.slane %v4760_v27, 4  ;;  %4591 = vst.msk [vmem:[#allocation3 + $0x8] sm:$0xff] %vm4589_vm0, %v4544_v57  ;;  %v4086_v35 = vld [vmem:[#allocation2 + $0x7c] sm:$0xf]  ;;  %v4087_v44 = vld [vmem:[#allocation2 + $0x80] sm:$0x1] }
 0x227   : > { %v2253_v24 = vrot.slane %v2252_v46, 4  ;;  %v3726_v50 = vrot.slane %v3591_v51, 5  ;;  %v5794_v3 = vrot.slane %v2546_v48, 9  ;;  %4912 = vst.msk [vmem:[#allocation3 + $0x8] sm:$0xff] %vm4910_vm2, %v7614_v43  ;;  %v2687_v22 = vrot.slane %v2547_v9, 5 }
 0x228   : > { %3513 = vrot.lane.b32.xlu0 %v5840_v60, %s6370_s16  ;;  %v4764_v2 = vsel %vm6484_vm5, %v4762_v47, %v4763_v37  ;;  %v2690_v8 = vrot.slane %v2548_v38, 5  ;;  %v3724_v58 = vsel %vm6484_vm5, %v5857_v53, %v3723_v0  ;;  %v3725_v12 = vrot.slane %v3723_v0, 4  ;;  %v3502_v42 = vpop.permute.xlu0 %3501  ;;  %v1998_v1 = vld [vmem:[#allocation2 + $0x78] sm:$0xf]  ;;  %v1999_v46 = vld [vmem:[#allocation2 + $0x7c] sm:$0xf] }
 0x229   : > { %v2258_v21 = vsel %vm6617_vm8, %v2253_v24, %v2257_v28  ;;  %v5936_v5 = vcombine.low %v4761_v36, %v4764_v2  ;;  %v2688_v43 = vsel %vm6484_vm5, %v5794_v3, %v2687_v22  ;;  %v2689_v6 = vrot.slane %v2687_v22, 4  ;;  %3548 = vst.msk [vmem:[#allocation3 + $0x10] sm:$0xff] %vm3545_vm12, %v3502_v42  ;;  %v2000_v57 = vld [vmem:[#allocation2 + $0x80] sm:$0x1]  ;;  %v6313_v0 = vld [vmem:[#allocation2 + $0x90] sm:$0xff]  }
 0x22a   : > { %v5777_v17 = vcombine.low %v2248_v23, %v2258_v21  ;;  %v3282_v19 = vshrl.u32 %v3044_v55, 16  ;;  %v3727_v33 = vsel %vm6484_vm5, %v3725_v12, %v3726_v50  ;;  %v3285_v31 = vshll.u32 %v3044_v55, 16  ;;  %3869 = vst.msk [vmem:[#allocation3 + $0x10] sm:$0xff] %vm3866_vm15, %v7628_v40  ;;  %v4634_v12 = vld [vmem:[#allocation2 + $0x88] sm:$0xf] }
 0x22b   : > { %v3291_v59 = vshll.u32 %v3045_v62, 16  ;;  %v3295_v34 = vshrl.u32 %v3045_v62, 16  ;;  %v2458_v11 = vpop.permute.xlu1 %2457  ;;  %v5873_v63 = vcombine.low %v3724_v58, %v3727_v33  ;;  %v2691_v15 = vsel %vm6484_vm5, %v2689_v6, %v2690_v8  ;;  %4047 = vst.msk [vmem:[#allocation3 + $0x10] sm:$0xff] %vm4044_vm9, %v7585_v49  ;;  %v4633_v62 = vld [vmem:[#allocation2 + $0x84] sm:$0xe] }
 0x22c   : > { %2469 = vrot.lane.b32.xlu1 %v5777_v17, %s6365_s7  ;;  %4878 = vrot.lane.b32.xlu0 %v5936_v5, %s6371_s17  ;;  %v4927_v20 = vld [vmem:[#allocation3] sm:$0xff]  ;;  %v3284_v25 = vrot.slane %v3282_v19, 4  ;;  %v3301_v26 = vshll.u32 %v3046_v56, 16  ;;  %2503 = vst.msk [vmem:[#allocation3 + $0x18] sm:$0xff] %vm2499_vm13, %v2458_v11  ;;  %v5810_v41 = vcombine.low %v2688_v43, %v2691_v15  ;;  %v3287_v40 = vrot.slane %v3285_v31, 5  ;;  %v7681_v39 = vpop.permute.xlu0 %4866 }
 0x22d   : > { %6201 = vmatprep.mubr.msk.bf16.mxu1 %vm4979_vm4, %v4927_v20  ;;  %v3293_v10 = vrot.slane %v3291_v59, 5  ;;  %v3297_v45 = vrot.slane %v3295_v34, 4  ;;  %2827 = vst.msk [vmem:[#allocation3 + $0x18] sm:$0xff] %vm2823_vm3, %v7616_v7  ;;  %v4302_v51 = vshrl.u32 %v4085_v13, 16  ;;  %v4305_v32 = vshll.u32 %v4085_v13, 16  ;;  %v6311_v7 = vld [vmem:[#allocation2 + $0x90] sm:$0xff]  }
 0x22e   : > { %v3303_v28 = vrot.slane %v3301_v26, 5  ;;  %v4311_v29 = vshll.u32 %v4086_v35, 16  ;;  %3004 = vst.msk [vmem:[#allocation3 + $0x18] sm:$0xff] %vm3000_vm11, %v7567_v18  ;;  %v3288_v49 = vor.u32 %v3287_v40, %v3284_v25  ;;  %v4315_v48 = vshrl.u32 %v4086_v35, 16  ;;  %v6316_v18 = vld [vmem:[%s8249_s3 + $0x20] ss:$0 sps:$4 sm:$0xff]  }
 0x22f   : > { %v3298_v27 = vor.u32 %v3297_v45, %v3293_v10  ;;  %v4321_v30 = vshll.u32 %v4087_v44, 16  ;;  %v7685_v37 = vpop.permute.xlu1 %3824  ;;  %v4304_v53 = vrot.slane %v4302_v51, 4  ;;  %v4307_v9 = vrot.slane %v4305_v32, 5  ;;  %v4635_v19 = vld [vmem:[#allocation2 + $0x8c] sm:$0x1] }
 0x230   : > { %3836 = vrot.lane.b32.xlu1 %v5873_v63, %s6369_s15  ;;  %2795 = vrot.lane.b32.xlu0 %v5810_v41, %s6363_s28  ;;  %v4313_v38 = vrot.slane %v4311_v29, 5  ;;  %v2260_v60 = vshrl.u32 %v1998_v1, 16  ;;  %v3289_v23 = vrot.slane %v3288_v49, 4  ;;  %v4317_v47 = vrot.slane %v4315_v48, 4  ;;  %v7692_v24 = vpop.permute.xlu0 %2783  ;;  %v2549_v59 = vld [vmem:[#allocation2 + $0x84] sm:$0xe] }
 0x231   : > { %v3299_v36 = vrot.slane %v3298_v27, 4  ;;  %v4323_v55 = vrot.slane %v4321_v30, 5  ;;  %v4308_v50 = vor.u32 %v4307_v9, %v4304_v53  ;;  %v2263_v2 = vshll.u32 %v1998_v1, 16  ;;  %v2550_v20 = vld [vmem:[#allocation2 + $0x88] sm:$0xf] }
 0x232   : > { %v2262_v3 = vrot.slane %v2260_v60, 4  ;;  %v2269_v22 = vshll.u32 %v1999_v46, 16  ;;  %v3294_v8 = vsel %vm6617_vm8, %v3289_v23, %v3293_v10  ;;  %v4318_v5 = vor.u32 %v4317_v47, %v4313_v38  ;;  %v2551_v25 = vld [vmem:[#allocation2 + $0x8c] sm:$0x1]  ;;  %v3592_v10 = vld [vmem:[#allocation2 + $0x84] sm:$0xe] }
 0x233   : > { %v3304_v21 = vsel %vm6617_vm8, %v3299_v36, %v3303_v28  ;;  %v2273_v58 = vshrl.u32 %v1999_v46, 16  ;;  %v7698_v56 = vpop.permute.xlu1 %2962  ;;  %v4309_v17 = vrot.slane %v4308_v50, 4  ;;  %v2265_v43 = vrot.slane %v2263_v2, 5  ;;  %v3593_v45 = vld [vmem:[#allocation2 + $0x88] sm:$0xf] }
 0x234   : > { %2974 = vrot.lane.b32.xlu1 %v6311_v7, %s6368_s14  ;;  %4016 = vrot.lane.b32.xlu0 %v6313_v0, %s6364_s6  ;;  %v5841_v42 = vcombine.low %v3294_v8, %v3304_v21  ;;  %v2271_v6 = vrot.slane %v2269_v22, 5  ;;  %v4319_v13 = vrot.slane %v4318_v5, 4  ;;  %v2279_v31 = vshll.u32 %v2000_v57, 16  ;;  %v7702_v34 = vpop.permute.xlu0 %4004  ;;  %v3594_v49 = vld [vmem:[#allocation2 + $0x8c] sm:$0x1] }
 0x235   : > { %v2275_v33 = vrot.slane %v2273_v58, 4  ;;  %vm5028_vm6 = vcmask 1043456   ;;  %v4314_v35 = vsel %vm6617_vm8, %v4309_v17, %v4313_v38  ;;  %v2266_v11 = vor.u32 %v2265_v43, %v2262_v3  ;;  %v4088_v27 = vld [vmem:[#allocation2 + $0x84] sm:$0xf]  ;;  %v4089_v60 = vld [vmem:[#allocation2 + $0x88] sm:$0xf] }
 0x236   : > { %6249 = vmatprep.subr.msk.bf16.mxu1 %vm5028_vm6, %v6316_v18  ;;  %v5921_v63 = vrot.slane %v4633_v62, 9  ;;  %v4767_v15 = vrot.slane %v4634_v12, 5  ;;  %v4324_v26 = vsel %vm6617_vm8, %v4319_v13, %v4323_v55  ;;  %v2281_v41 = vrot.slane %v2279_v31, 5  ;;  %v4090_v62 = vld [vmem:[#allocation2 + $0x8c] sm:$0x1]  ;;  %v4928_v3 = vld [vmem:[#allocation3 + $0x8] sm:$0xff] }
 0x237   : > { %v2276_v44 = vor.u32 %v2275_v33, %v2271_v6  ;;  %v4770_v40 = vrot.slane %v4635_v19, 5  ;;  %v3504_v1 = vpop.permute.xlu1 %3503  ;;  %v5904_v28 = vcombine.low %v4314_v35, %v4324_v26  ;;  %v2267_v51 = vrot.slane %v2266_v11, 4  ;;  %v3047_v22 = vld [vmem:[#allocation2 + $0x84] sm:$0xf]  ;;  %v3048_v58 = vld [vmem:[#allocation2 + $0x88] sm:$0xf] }
 0x238   : > { %3515 = vrot.lane.b32.xlu1 %v5841_v42, %s6370_s16  ;;  %v4768_v32 = vsel %vm6484_vm5, %v5921_v63, %v4767_v15  ;;  %v4769_v29 = vrot.slane %v4767_v15, 4  ;;  %3549 = vst.msk [vmem:[#allocation3 + $0x18] sm:$0xff] %vm3545_vm12, %v3504_v1  ;;  %v5795_v30 = vrot.slane %v2549_v59, 9  ;;  %v2694_v46 = vrot.slane %v2550_v20, 5  ;;  %v2001_v59 = vld [vmem:[#allocation2 + $0x84] sm:$0xf] }
 0x239   : > { %v2277_v48 = vrot.slane %v2276_v44, 4  ;;  %v2697_v7 = vrot.slane %v2551_v25, 5  ;;  %3870 = vst.msk [vmem:[#allocation3 + $0x18] sm:$0xff] %vm3866_vm15, %v7685_v37  ;;  %4557 = vrot.lane.b32.xlu0 %v5904_v28, %s6366_s8  ;;  %v2272_v53 = vsel %vm6617_vm8, %v2267_v51, %v2271_v6  ;;  %v5030_v38 = vsel %vm5028_vm6, %v6316_v18, 0  ;;  %v3049_v6 = vld [vmem:[#allocation2 + $0x8c] sm:$0x1] }
 0x23a   : > { %v4771_v9 = vsel %vm6484_vm5, %v4769_v29, %v4770_v40  ;;  %v5858_v57 = vrot.slane %v3592_v10, 9  ;;  %4048 = vst.msk [vmem:[#allocation3 + $0x18] sm:$0xff] %vm4044_vm9, %v7630_v52  ;;  %v4546_v23 = vpop.permute.xlu0 %4545  ;;  %v2695_v47 = vsel %vm6484_vm5, %v5795_v30, %v2694_v46  ;;  %v2696_v55 = vrot.slane %v2694_v46, 4  ;;  %6200 = vmatpush3.bf16.msra.mxu1 %v5030_v38  ;;  %v2002_v25 = vld [vmem:[#allocation2 + $0x88] sm:$0xf] }
 0x23b   : > { %v2282_v36 = vsel %vm6617_vm8, %v2277_v48, %v2281_v41  ;;  %v5937_v37 = vcombine.low %v4768_v32, %v4771_v9  ;;  %4592 = vst.msk [vmem:[#allocation3 + $0x10] sm:$0xff] %vm4589_vm0, %v4546_v23  ;;  %v3730_v18 = vrot.slane %v3593_v45, 5  ;;  %v3733_v50 = vrot.slane %v3594_v49, 5  ;;  %v2003_v51 = vld [vmem:[#allocation2 + $0x8c] sm:$0x1] }
 0x23c   : > { %v5778_v0 = vcombine.low %v2272_v53, %v2282_v36  ;;  %v4326_v2 = vshrl.u32 %v4088_v27, 16  ;;  %4913 = vst.msk [vmem:[#allocation3 + $0x10] sm:$0xff] %vm4910_vm2, %v7681_v39  ;;  %v2698_v52 = vsel %vm6484_vm5, %v2696_v55, %v2697_v7  ;;  %v4329_v8 = vshll.u32 %v4088_v27, 16  ;;  %v4636_v32 = vld [vmem:[#allocation2 + $0x90] sm:$0xe]  ;;  %v6317_v7 = vld [vmem:[#allocation2 + $0x9c] sm:$0xff]  }
 0x23d   : > { %v4335_v21 = vshll.u32 %v4089_v60, 16  ;;  %v4339_v5 = vshrl.u32 %v4089_v60, 16  ;;  %4880 = vrot.lane.b32.xlu0 %v5937_v37, %s6371_s17  ;;  %v5811_v12 = vcombine.low %v2695_v47, %v2698_v52  ;;  %v3731_v42 = vsel %vm6484_vm5, %v5858_v57, %v3730_v18  ;;  %6202 = vmatmul.mubr.msk.bf16.vlgmr.msra.gmra.mrb[0].mxu1 %vm4979_vm4, %v4928_v3  ;;  %v4637_v47 = vld [vmem:[#allocation2 + $0x94] sm:$0xf]  ;;  %v3595_v3 = vld [vmem:[#allocation2 + $0x90] sm:$0xe] }
 0x23e   : > { %2471 = vrot.lane.b32.xlu1 %v5778_v0, %s6365_s7  ;;  %v3732_v17 = vrot.slane %v3730_v18, 4  ;;  %v4328_v43 = vrot.slane %v4326_v2, 4  ;;  %v7736_v19 = vpop.permute.xlu0 %4868  ;;  %v4331_v39 = vrot.slane %v4329_v8, 5  ;;  %v4345_v31 = vshll.u32 %v4090_v62, 16 }
 0x23f   : > { %v4337_v13 = vrot.slane %v4335_v21, 5  ;;  %v4341_v33 = vrot.slane %v4339_v5, 4  ;;  %v2460_v35 = vpop.permute.xlu1 %2459  ;;  %v3306_v63 = vshrl.u32 %v3047_v22, 16  ;;  %v3309_v15 = vshll.u32 %v3047_v22, 16  ;;  %v3596_v21 = vld [vmem:[#allocation2 + $0x94] sm:$0xf] }
 0x240   : > { %v3734_v11 = vsel %vm6484_vm5, %v3732_v17, %v3733_v50  ;;  %v3315_v20 = vshll.u32 %v3048_v58, 16  ;;  %2504 = vst.msk [vmem:[#allocation3 + $0x20] sm:$0xff] %vm2499_vm13, %v2460_v35  ;;  %v4332_v44 = vor.u32 %v4331_v39, %v4328_v43  ;;  %v4347_v40 = vrot.slane %v4345_v31, 5  ;;  %v4638_v50 = vld [vmem:[#allocation2 + $0x98] sm:$0x1] }
 0x241   : > { %v5874_v26 = vcombine.low %v3731_v42, %v3734_v11  ;;  %v4342_v41 = vor.u32 %v4341_v33, %v4337_v13  ;;  %2828 = vst.msk [vmem:[#allocation3 + $0x20] sm:$0xff] %vm2823_vm3, %v7692_v24  ;;  %v3308_v10 = vrot.slane %v3306_v63, 4  ;;  %v3311_v45 = vrot.slane %v3309_v15, 5  ;;  %v3597_v43 = vld [vmem:[#allocation2 + $0x98] sm:$0x1] }
 0x242   : > { %2797 = vrot.lane.b32.xlu1 %v5811_v12, %s6363_s28  ;;  %v3317_v1 = vrot.slane %v3315_v20, 5  ;;  %v3319_v28 = vshrl.u32 %v3048_v58, 16  ;;  %3005 = vst.msk [vmem:[#allocation3 + $0x20] sm:$0xff] %vm3000_vm11, %v7647_v4  ;;  %v4333_v29 = vrot.slane %v4332_v44, 4  ;;  %v3325_v27 = vshll.u32 %v3049_v6, 16  ;;  %v6318_v4 = vld [vmem:[#allocation2 + $0x9c] sm:$0xff]  }
 0x243   : > { %3838 = vrot.lane.b32.xlu0 %v5874_v26, %s6369_s15  ;;  %v4343_v49 = vrot.slane %v4342_v41, 4  ;;  %v2284_v48 = vshrl.u32 %v2001_v59, 16  ;;  %v7748_v30 = vpop.permute.xlu1 %2785  ;;  %v4929_v46 = vld [vmem:[#allocation3 + $0x10] sm:$0xff]  ;;  %v3312_v53 = vor.u32 %v3311_v45, %v3308_v10  ;;  %v2287_v38 = vshll.u32 %v2001_v59, 16  ;;  %v2552_v6 = vld [vmem:[#allocation2 + $0x90] sm:$0xe] }
 0x244   : > { %v7750_v24 = vpop.permute.xlu0 %3826  ;;  %v3321_v9 = vrot.slane %v3319_v28, 4  ;;  %v2293_v57 = vshll.u32 %v2002_v25, 16  ;;  %6205 = vmatprep.mubr.msk.bf16.mxu1 %vm4979_vm4, %v4929_v46  ;;  %v4338_v60 = vsel %vm6617_vm8, %v4333_v29, %v4337_v13  ;;  %v3327_v36 = vrot.slane %v3325_v27, 5  ;;  %v2553_v35 = vld [vmem:[#allocation2 + $0x94] sm:$0xf] }
 0x245   : > { %v4348_v23 = vsel %vm6617_vm8, %v4343_v49, %v4347_v40  ;;  %v2286_v37 = vrot.slane %v2284_v48, 4  ;;  %v3313_v62 = vrot.slane %v3312_v53, 4  ;;  %v2289_v18 = vrot.slane %v2287_v38, 5  ;;  %v3050_v10 = vld [vmem:[#allocation2 + $0x90] sm:$0xf] }
 0x246   : > { %4018 = vrot.lane.b32.xlu1 %v6317_v7, %s6364_s6  ;;  %v5905_v55 = vcombine.low %v4338_v60, %v4348_v23  ;;  %v3322_v0 = vor.u32 %v3321_v9, %v3317_v1  ;;  %v2295_v2 = vrot.slane %v2293_v57, 5  ;;  %v2297_v22 = vshrl.u32 %v2002_v25, 16  ;;  %v2554_v25 = vld [vmem:[#allocation2 + $0x98] sm:$0x1]  ;;  %v3051_v29 = vld [vmem:[#allocation2 + $0x94] sm:$0xf] }
 0x247   : > { %2976 = vrot.lane.b32.xlu0 %v6318_v4, %s6368_s14  ;;  %v2303_v52 = vshll.u32 %v2003_v51, 16  ;;  %v5922_v8 = vrot.slane %v4636_v32, 9  ;;  %v7759_v5 = vpop.permute.xlu1 %4006  ;;  %v3318_v58 = vsel %vm6617_vm8, %v3313_v62, %v3317_v1  ;;  %v2290_v42 = vor.u32 %v2289_v18, %v2286_v37  ;;  %v3052_v38 = vld [vmem:[#allocation2 + $0x98] sm:$0x1] }
 0x248   : > { %v3323_v12 = vrot.slane %v3322_v0, 4  ;;  %v4774_v17 = vrot.slane %v4637_v47, 5  ;;  %v7763_v39 = vpop.permute.xlu0 %2964  ;;  %v2299_v13 = vrot.slane %v2297_v22, 4  ;;  %v4777_v31 = vrot.slane %v4638_v50, 5  ;;  %v4091_v47 = vld [vmem:[#allocation2 + $0x90] sm:$0xf] }
 0x249   : > { %v2305_v33 = vrot.slane %v2303_v52, 5  ;;  %v5859_v59 = vrot.slane %v3595_v3, 9  ;;  %v2291_v63 = vrot.slane %v2290_v42, 4  ;;  %v3737_v41 = vrot.slane %v3596_v21, 5  ;;  %v4093_v50 = vld [vmem:[#allocation2 + $0x98] sm:$0x1] }
 0x24a   : > { %4559 = vrot.lane.b32.xlu1 %v5905_v55, %s6366_s8  ;;  %v3328_v11 = vsel %vm6617_vm8, %v3323_v12, %v3327_v36  ;;  %v4775_v15 = vsel %vm6484_vm5, %v5922_v8, %v4774_v17  ;;  %v4776_v20 = vrot.slane %v4774_v17, 4  ;;  %v2300_v44 = vor.u32 %v2299_v13, %v2295_v2  ;;  %v4092_v55 = vld [vmem:[#allocation2 + $0x94] sm:$0xf]  ;;  %v2004_v8 = vld [vmem:[#allocation2 + $0x90] sm:$0xf] }
 0x24b   : > { %v5842_v26 = vcombine.low %v3318_v58, %v3328_v11  ;;  %v3740_v40 = vrot.slane %v3597_v43, 5  ;;  %v4548_v45 = vpop.permute.xlu1 %4547  ;;  %v2296_v1 = vsel %vm6617_vm8, %v2291_v63, %v2295_v2  ;;  %v5796_v51 = vrot.slane %v2552_v6, 9  ;;  %v2005_v21 = vld [vmem:[#allocation2 + $0x94] sm:$0xf] }
 0x24c   : > { %v4778_v28 = vsel %vm6484_vm5, %v4776_v20, %v4777_v31  ;;  %v2701_v32 = vrot.slane %v2553_v35, 5  ;;  %4593 = vst.msk [vmem:[#allocation3 + $0x18] sm:$0xff] %vm4589_vm0, %v4548_v45  ;;  %v2301_v49 = vrot.slane %v2300_v44, 4  ;;  %v3738_v48 = vsel %vm6484_vm5, %v5859_v59, %v3737_v41  ;;  %v2006_v44 = vld [vmem:[#allocation2 + $0x98] sm:$0x1] }
 0x24d   : > { %3517 = vrot.lane.b32.xlu0 %v5842_v26, %s6370_s16  ;;  %v5938_v27 = vcombine.low %v4775_v15, %v4778_v28  ;;  %v3739_v46 = vrot.slane %v3737_v41, 4  ;;  %4914 = vst.msk [vmem:[#allocation3 + $0x18] sm:$0xff] %vm4910_vm2, %v7736_v19  ;;  %v2704_v9 = vrot.slane %v2554_v25, 5  ;;  %v3330_v57 = vshrl.u32 %v3050_v10, 16  ;;  %v6320_v41 = vld [vmem:[#allocation2 + $0xa8] sm:$0xff]  }
 0x24e   : > { %v2702_v7 = vsel %vm6484_vm5, %v5796_v51, %v2701_v32  ;;  %v2703_v53 = vrot.slane %v2701_v32, 4  ;;  %v2306_v60 = vsel %vm6617_vm8, %v2301_v49, %v2305_v33  ;;  %v3333_v36 = vshll.u32 %v3050_v10, 16  ;;  %v4639_v28 = vld [vmem:[#allocation2 + $0x9c] sm:$0xe] }
 0x24f   : > { %v3506_v4 = vpop.permute.xlu0 %3505  ;;  %v3741_v23 = vsel %vm6484_vm5, %v3739_v46, %v3740_v40  ;;  %v3339_v37 = vshll.u32 %v3051_v29, 16  ;;  %v5779_v19 = vcombine.low %v2296_v1, %v2306_v60  ;;  %v3332_v18 = vrot.slane %v3330_v57, 4  ;;  %v6321_v40 = vld [vmem:[#allocation2 + $0xa8] sm:$0xff]   ;;  %v2555_v57 = vld [vmem:[#allocation2 + $0x9c] sm:$0xe] }
 0x250   : > { %3550 = vst.msk [vmem:[#allocation3 + $0x20] sm:$0xff] %vm3545_vm12, %v3506_v4  ;;  %v5875_v62 = vcombine.low %v3738_v48, %v3741_v23  ;;  %v2705_v0 = vsel %vm6484_vm5, %v2703_v53, %v2704_v9  ;;  %v3335_v2 = vrot.slane %v3333_v36, 5  ;;  %v3343_v52 = vshrl.u32 %v3051_v29, 16  ;;  %v4640_v48 = vld [vmem:[#allocation2 + $0xa0] sm:$0xf] }
 0x251   : > { %3871 = vst.msk [vmem:[#allocation3 + $0x20] sm:$0xff] %vm3866_vm15, %v7750_v24  ;;  %4882 = vrot.lane.b32.xlu0 %v5938_v27, %s6371_s17  ;;  %v5812_v3 = vcombine.low %v2702_v7, %v2705_v0  ;;  %v3341_v22 = vrot.slane %v3339_v37, 5  ;;  %2473 = vrot.lane.b32.xlu1 %v5779_v19, %s6365_s7  ;;  %v3349_v58 = vshll.u32 %v3052_v38, 16  ;;  %v4350_v12 = vshrl.u32 %v4091_v47, 16  ;;  %v2556_v37 = vld [vmem:[#allocation2 + $0xa0] sm:$0xf] }
 0x252   : > { %4049 = vst.msk [vmem:[#allocation3 + $0x20] sm:$0xff] %vm4044_vm9, %v7702_v34  ;;  %v4353_v42 = vshll.u32 %v4091_v47, 16  ;;  %v4359_v17 = vshll.u32 %v4092_v55, 16  ;;  %v3336_v24 = vor.u32 %v3335_v2, %v3332_v18  ;;  %v3345_v13 = vrot.slane %v3343_v52, 4  ;;  %v2557_v0 = vld [vmem:[#allocation2 + $0xa4] sm:$0x1] }
 0x253   : > { %v2462_v43 = vpop.permute.xlu1 %2461  ;;  %v7795_v6 = vpop.permute.xlu0 %4870  ;;  %v4363_v33 = vshrl.u32 %v4092_v55, 16  ;;  %v4369_v31 = vshll.u32 %v4093_v50, 16  ;;  %v3351_v59 = vrot.slane %v3349_v58, 5  ;;  %v4352_v35 = vrot.slane %v4350_v12, 4  ;;  %v3598_v18 = vld [vmem:[#allocation2 + $0x9c] sm:$0xe] }
 0x254   : > { %2505 = vst.msk [vmem:[#allocation3 + $0x28] sm:$0xff] %vm2499_vm13, %v2462_v43  ;;  %v4355_v11 = vrot.slane %v4353_v42, 5  ;;  %v4361_v63 = vrot.slane %v4359_v17, 5  ;;  %v4930_v34 = vld [vmem:[#allocation3 + $0x18] sm:$0xff]  ;;  %v3337_v15 = vrot.slane %v3336_v24, 4  ;;  %v3346_v20 = vor.u32 %v3345_v13, %v3341_v22 }
 0x255   : > { %2829 = vst.msk [vmem:[#allocation3 + $0x28] sm:$0xff] %vm2823_vm3, %v7748_v30  ;;  %2799 = vrot.lane.b32.xlu0 %v5812_v3, %s6363_s28  ;;  %v4365_v25 = vrot.slane %v4363_v33, 4  ;;  %v4371_v26 = vrot.slane %v4369_v31, 5  ;;  %6206 = vmatmul.mubr.msk.bf16.gmra.mrb[4].mxu1 %vm4979_vm4, %v4930_v34  ;;  %v2308_v45 = vshrl.u32 %v2004_v8, 16  ;;  %v2311_v30 = vshll.u32 %v2004_v8, 16 }
 0x256   : > { %3006 = vst.msk [vmem:[#allocation3 + $0x28] sm:$0xff] %vm3000_vm11, %v7698_v56  ;;  %3840 = vrot.lane.b32.xlu1 %v5875_v62, %s6369_s15  ;;  %v4356_v10 = vor.u32 %v4355_v11, %v4352_v35  ;;  %v2317_v1 = vshll.u32 %v2005_v21, 16  ;;  %v3342_v32 = vsel %vm6617_vm8, %v3337_v15, %v3341_v22  ;;  %v3347_v29 = vrot.slane %v3346_v20, 4  ;;  %v4641_v56 = vld [vmem:[#allocation2 + $0xa4] sm:$0x1] }
 0x257   : > { %v3829_v51 = vpop.permute.xlu1 %3828  ;;  %v4366_v49 = vor.u32 %v4365_v25, %v4361_v63  ;;  %v2321_v27 = vshrl.u32 %v2005_v21, 16  ;;  %v2310_v53 = vrot.slane %v2308_v45, 4  ;;  %v2313_v9 = vrot.slane %v2311_v30, 5  ;;  %v3599_v8 = vld [vmem:[#allocation2 + $0xa0] sm:$0xf] }
 0x258   : > { %v7807_v46 = vpop.permute.xlu0 %2787  ;;  %v4357_v7 = vrot.slane %v4356_v10, 4  ;;  %v2319_v38 = vrot.slane %v2317_v1, 5  ;;  %v3352_v4 = vsel %vm6617_vm8, %v3347_v29, %v3351_v59  ;;  %v2327_v36 = vshll.u32 %v2006_v44, 16  ;;  %v3600_v31 = vld [vmem:[#allocation2 + $0xa4] sm:$0x1] }
 0x259   : > { %4020 = vrot.lane.b32.xlu0 %v6321_v40, %s6364_s6  ;;  %v4367_v60 = vrot.slane %v4366_v49, 4  ;;  %v2323_v23 = vrot.slane %v2321_v27, 4  ;;  %v5843_v47 = vcombine.low %v3342_v32, %v3352_v4  ;;  %v2314_v19 = vor.u32 %v2313_v9, %v2310_v53  ;;  %v4094_v34 = vld [vmem:[#allocation2 + $0x9c] sm:$0xf]  ;;  %v4096_v40 = vld [vmem:[#allocation2 + $0xa4] sm:$0x1] }
 0x25a   : > { %2978 = vrot.lane.b32.xlu1 %v6320_v41, %s6368_s14  ;;  %v4362_v55 = vsel %vm6617_vm8, %v4357_v7, %v4361_v63  ;;  %v5923_v62 = vrot.slane %v4639_v28, 9  ;;  %v2329_v22 = vrot.slane %v2327_v36, 5  ;;  %v4781_v52 = vrot.slane %v4640_v48, 5  ;;  %v4095_v41 = vld [vmem:[#allocation2 + $0xa0] sm:$0xf] }
 0x25b   : > { %v7815_v50 = vpop.permute.xlu1 %2966  ;;  %v4372_v3 = vsel %vm6617_vm8, %v4367_v60, %v4371_v26  ;;  %v2324_v2 = vor.u32 %v2323_v23, %v2319_v38  ;;  %v2315_v12 = vrot.slane %v2314_v19, 4  ;;  %v4784_v42 = vrot.slane %v4641_v56, 5  ;;  %v3053_v28 = vld [vmem:[#allocation2 + $0x9c] sm:$0xf]  ;;  %v3054_v48 = vld [vmem:[#allocation2 + $0xa0] sm:$0xf] }
 0x25c   : > { %v7819_v21 = vpop.permute.xlu0 %4008  ;;  %v5906_v58 = vcombine.low %v4362_v55, %v4372_v3  ;;  %v5797_v17 = vrot.slane %v2555_v57, 9  ;;  %v4782_v24 = vsel %vm6484_vm5, %v5923_v62, %v4781_v52  ;;  %v4783_v13 = vrot.slane %v4781_v52, 4 }
 0x25d   : > { %v2325_v43 = vrot.slane %v2324_v2, 4  ;;  %v2708_v33 = vrot.slane %v2556_v37, 5  ;;  %v2320_v59 = vsel %vm6617_vm8, %v2315_v12, %v2319_v38  ;;  %v2711_v35 = vrot.slane %v2557_v0, 5  ;;  %v3055_v38 = vld [vmem:[#allocation2 + $0xa4] sm:$0x1] }
 0x25e   : > { %3519 = vrot.lane.b32.xlu1 %v5843_v47, %s6370_s16  ;;  %4561 = vrot.lane.b32.xlu0 %v5906_v58, %s6366_s8  ;;  %v5860_v11 = vrot.slane %v3598_v18, 9  ;;  %v3744_v63 = vrot.slane %v3599_v8, 5  ;;  %v4785_v25 = vsel %vm6484_vm5, %v4783_v13, %v4784_v42  ;;  %v3747_v29 = vrot.slane %v3600_v31, 5  ;;  %v2008_v8 = vld [vmem:[#allocation2 + $0xa0] sm:$0xf]  ;;  %v6323_v13 = vld [vmem:[#allocation2 + $0xb4] sm:$0xff]  }
 0x25f   : > { %v3508_v15 = vpop.permute.xlu1 %3507  ;;  %v2330_v20 = vsel %vm6617_vm8, %v2325_v43, %v2329_v22  ;;  %v2709_v26 = vsel %vm6484_vm5, %v5797_v17, %v2708_v33  ;;  %v2710_v44 = vrot.slane %v2708_v33, 4  ;;  %v5939_v45 = vcombine.low %v4782_v24, %v4785_v25  ;;  %v2009_v43 = vld [vmem:[#allocation2 + $0xa4] sm:$0x1]  ;;  %v6324_v33 = vld [vmem:[#allocation2 + $0xb4] sm:$0xff]   ;;  %v4642_v25 = vld [vmem:[#allocation2 + $0xa8] sm:$0xe] }
 0x260   : > { %3551 = vst.msk [vmem:[#allocation3 + $0x28] sm:$0xff] %vm3545_vm12, %v3508_v15  ;;  %v5780_v10 = vcombine.low %v2320_v59, %v2330_v20  ;;  %v3745_v30 = vsel %vm6484_vm5, %v5860_v11, %v3744_v63  ;;  %v3746_v1 = vrot.slane %v3744_v63, 4  ;;  %v4374_v49 = vshrl.u32 %v4094_v34, 16 }
 0x261   : > { %3872 = vst.msk [vmem:[#allocation3 + $0x28] sm:$0xff] %vm3866_vm15, %v3829_v51  ;;  %v2712_v32 = vsel %vm6484_vm5, %v2710_v44, %v2711_v35  ;;  %v4377_v27 = vshll.u32 %v4094_v34, 16  ;;  %v4383_v53 = vshll.u32 %v4095_v41, 16  ;;  %v4387_v9 = vshrl.u32 %v4095_v41, 16 }
 0x262   : > { %4050 = vst.msk [vmem:[#allocation3 + $0x28] sm:$0xff] %vm4044_vm9, %v7759_v5  ;;  %v4550_v56 = vpop.permute.xlu0 %4549  ;;  %2475 = vrot.lane.b32.xlu1 %v5780_v10, %s6365_s7  ;;  %4884 = vrot.lane.b32.xlu0 %v5939_v45, %s6371_s17  ;;  %v5813_v7 = vcombine.low %v2709_v26, %v2712_v32  ;;  %v4393_v51 = vshll.u32 %v4096_v40, 16  ;;  %v3748_v57 = vsel %vm6484_vm5, %v3746_v1, %v3747_v29  ;;  %v4376_v4 = vrot.slane %v4374_v49, 4  ;;  %v2007_v5 = vld [vmem:[#allocation2 + $0x9c] sm:$0xf] }
 0x263   : > { %4594 = vst.msk [vmem:[#allocation3 + $0x20] sm:$0xff] %vm4589_vm0, %v4550_v56  ;;  %v4379_v60 = vrot.slane %v4377_v27, 5  ;;  %v3354_v23 = vshrl.u32 %v3053_v28, 16  ;;  %v5876_v36 = vcombine.low %v3745_v30, %v3748_v57  ;;  %v4385_v37 = vrot.slane %v4383_v53, 5  ;;  %v4643_v26 = vld [vmem:[#allocation2 + $0xac] sm:$0xf] }
 0x264   : > { %4915 = vst.msk [vmem:[#allocation3 + $0x20] sm:$0xff] %vm4910_vm2, %v7795_v6  ;;  %v4389_v47 = vrot.slane %v4387_v9, 4  ;;  %v4395_v55 = vrot.slane %v4393_v51, 5  ;;  %v3357_v0 = vshll.u32 %v3053_v28, 16  ;;  %v3363_v18 = vshll.u32 %v3054_v48, 16 }
 0x265   : > { %v4380_v19 = vor.u32 %v4379_v60, %v4376_v4  ;;  %v3356_v62 = vrot.slane %v3354_v23, 4  ;;  %v3367_v22 = vshrl.u32 %v3054_v48, 16  ;;  %v3373_v52 = vshll.u32 %v3055_v38, 16  ;;  %v4644_v45 = vld [vmem:[#allocation2 + $0xb0] sm:$0x1] }
 0x266   : > { %v7848_v3 = vpop.permute.xlu0 %4872  ;;  %2801 = vrot.lane.b32.xlu1 %v5813_v7, %s6363_s28  ;;  %3842 = vrot.lane.b32.xlu0 %v5876_v36, %s6369_s15  ;;  %v4390_v2 = vor.u32 %v4389_v47, %v4385_v37  ;;  %v2332_v58 = vshrl.u32 %v2007_v5, 16  ;;  %v3359_v42 = vrot.slane %v3357_v0, 5  ;;  %v3365_v17 = vrot.slane %v3363_v18, 5  ;;  %v3601_v49 = vld [vmem:[#allocation2 + $0xa8] sm:$0xe] }
 0x267   : > { %v2464_v6 = vpop.permute.xlu1 %2463  ;;  %v4381_v12 = vrot.slane %v4380_v19, 4  ;;  %v2335_v24 = vshll.u32 %v2007_v5, 16  ;;  %v3369_v59 = vrot.slane %v3367_v22, 4  ;;  %v3375_v35 = vrot.slane %v3373_v52, 5  ;;  %v3602_v27 = vld [vmem:[#allocation2 + $0xac] sm:$0xf] }
 0x268   : > { %2506 = vst.msk [vmem:[#allocation3 + $0x30] sm:$0xff] %vm2499_vm13, %v2464_v6  ;;  %v4391_v31 = vrot.slane %v4390_v2, 4  ;;  %v2334_v11 = vrot.slane %v2332_v58, 4  ;;  %v3360_v34 = vor.u32 %v3359_v42, %v3356_v62  ;;  %v2341_v20 = vshll.u32 %v2008_v8, 16  ;;  %v3603_v9 = vld [vmem:[#allocation2 + $0xb0] sm:$0x1] }
 0x269   : > { %2830 = vst.msk [vmem:[#allocation3 + $0x30] sm:$0xff] %vm2823_vm3, %v7807_v46  ;;  %v4386_v63 = vsel %vm6617_vm8, %v4381_v12, %v4385_v37  ;;  %v2337_v15 = vrot.slane %v2335_v24, 5  ;;  %v3370_v41 = vor.u32 %v3369_v59, %v3365_v17  ;;  %v2345_v40 = vshrl.u32 %v2008_v8, 16  ;;  %v2558_v60 = vld [vmem:[#allocation2 + $0xa8] sm:$0xe] }
 0x26a   : > { %3007 = vst.msk [vmem:[#allocation3 + $0x30] sm:$0xff] %vm3000_vm11, %v7763_v39  ;;  %v7859_v44 = vpop.permute.xlu0 %3830  ;;  %4022 = vrot.lane.b32.xlu1 %v6323_v13, %s6364_s6  ;;  %2980 = vrot.lane.b32.xlu0 %v6324_v33, %s6368_s14  ;;  %v4396_v46 = vsel %vm6617_vm8, %v4391_v31, %v4395_v55  ;;  %v2351_v10 = vshll.u32 %v2009_v43, 16  ;;  %v3361_v39 = vrot.slane %v3360_v34, 4  ;;  %v2343_v29 = vrot.slane %v2341_v20, 5  ;;  %v2559_v47 = vld [vmem:[#allocation2 + $0xac] sm:$0xf] }
 0x26b   : > { %v7865_v30 = vpop.permute.xlu1 %2789  ;;  %v4931_v1 = vld [vmem:[#allocation3 + $0x20] sm:$0xff]  ;;  %v5907_v28 = vcombine.low %v4386_v63, %v4396_v46  ;;  %v2338_v32 = vor.u32 %v2337_v15, %v2334_v11  ;;  %v3371_v48 = vrot.slane %v3370_v41, 4  ;;  %v2347_v56 = vrot.slane %v2345_v40, 4  ;;  %v2560_v55 = vld [vmem:[#allocation2 + $0xb0] sm:$0x1] }
 0x26c   : > { %6209 = vmatprep.mubr.msk.bf16.mxu1 %vm4979_vm4, %v4931_v1  ;;  %v2353_v7 = vrot.slane %v2351_v10, 5  ;;  %v5924_v53 = vrot.slane %v4642_v25, 9  ;;  %v3366_v51 = vsel %vm6617_vm8, %v3361_v39, %v3365_v17  ;;  %v4788_v57 = vrot.slane %v4643_v26, 5  ;;  %v3056_v52 = vld [vmem:[#allocation2 + $0xa8] sm:$0xf] }
 0x26d   : > { %v2339_v38 = vrot.slane %v2338_v32, 4  ;;  %v4791_v4 = vrot.slane %v4644_v45, 5  ;;  %v3376_v23 = vsel %vm6617_vm8, %v3371_v48, %v3375_v35  ;;  %v2348_v5 = vor.u32 %v2347_v56, %v2343_v29  ;;  %v3057_v13 = vld [vmem:[#allocation2 + $0xac] sm:$0xf]  ;;  %v3058_v35 = vld [vmem:[#allocation2 + $0xb0] sm:$0x1] }
 0x26e   : > { %4563 = vrot.lane.b32.xlu1 %v5907_v28, %s6366_s8  ;;  %v5861_v36 = vrot.slane %v3601_v49, 9  ;;  %v3751_v37 = vrot.slane %v3602_v27, 5  ;;  %v7875_v62 = vpop.permute.xlu0 %2968  ;;  %v5844_v0 = vcombine.low %v3366_v51, %v3376_v23  ;;  %v4789_v2 = vsel %vm6484_vm5, %v5924_v53, %v4788_v57  ;;  %v4097_v34 = vld [vmem:[#allocation2 + $0xa8] sm:$0xf]  ;;  %v4098_v45 = vld [vmem:[#allocation2 + $0xac] sm:$0xf] }
 0x26f   : > { %v7873_v19 = vpop.permute.xlu1 %4010  ;;  %v2344_v18 = vsel %vm6617_vm8, %v2339_v38, %v2343_v29  ;;  %v4790_v22 = vrot.slane %v4788_v57, 4  ;;  %v2349_v8 = vrot.slane %v2348_v5, 4  ;;  %v3754_v12 = vrot.slane %v3603_v9, 5  ;;  %v4099_v32 = vld [vmem:[#allocation2 + $0xb0] sm:$0x1] }
 0x270   : > { %v3752_v58 = vsel %vm6484_vm5, %v5861_v36, %v3751_v37  ;;  %v3753_v6 = vrot.slane %v3751_v37, 4  ;;  %3521 = vrot.lane.b32.xlu0 %v5844_v0, %s6370_s16  ;;  %v5798_v17 = vrot.slane %v2558_v60, 9  ;;  %v2715_v43 = vrot.slane %v2559_v47, 5  ;;  %v2011_v57 = vld [vmem:[#allocation2 + $0xac] sm:$0xf]  ;;  %v6326_v37 = vld [vmem:[#allocation2 + $0xc0] sm:$0xff]  }
 0x271   : > { %v4792_v42 = vsel %vm6484_vm5, %v4790_v22, %v4791_v4  ;;  %v2718_v24 = vrot.slane %v2560_v55, 5  ;;  %v2354_v33 = vsel %vm6617_vm8, %v2349_v8, %v2353_v7  ;;  %v3378_v11 = vshrl.u32 %v3056_v52, 16  ;;  %v2012_v55 = vld [vmem:[#allocation2 + $0xb0] sm:$0x1]  ;;  %v4645_v22 = vld [vmem:[#allocation2 + $0xb4] sm:$0xe] }
 0x272   : > { %v5940_v31 = vcombine.low %v4789_v2, %v4792_v42  ;;  %v3755_v59 = vsel %vm6484_vm5, %v3753_v6, %v3754_v12  ;;  %v5781_v15 = vcombine.low %v2344_v18, %v2354_v33  ;;  %v2716_v25 = vsel %vm6484_vm5, %v5798_v17, %v2715_v43  ;;  %v4646_v6 = vld [vmem:[#allocation2 + $0xb8] sm:$0xf]  ;;  %v4647_v12 = vld [vmem:[#allocation2 + $0xbc] sm:$0x1]  ;;  %v2561_v42 = vld [vmem:[#allocation2 + $0xb4] sm:$0xe] }
 0x273   : > { %v4552_v63 = vpop.permute.xlu1 %4551  ;;  %v5877_v20 = vcombine.low %v3752_v58, %v3755_v59  ;;  %v2717_v26 = vrot.slane %v2715_v43, 4  ;;  %v3380_v46 = vrot.slane %v3378_v11, 4  ;;  %v3381_v41 = vshll.u32 %v3056_v52, 16  ;;  %v6327_v17 = vld [vmem:[#allocation2 + $0xc0] sm:$0xff]  }
 0x274   : > { %4595 = vst.msk [vmem:[#allocation3 + $0x28] sm:$0xff] %vm4589_vm0, %v4552_v63  ;;  %v3387_v40 = vshll.u32 %v3057_v13, 16  ;;  %v3391_v10 = vshrl.u32 %v3057_v13, 16  ;;  %2477 = vrot.lane.b32.xlu1 %v5781_v15, %s6365_s7  ;;  %4886 = vrot.lane.b32.xlu0 %v5940_v31, %s6371_s17  ;;  %v3397_v39 = vshll.u32 %v3058_v35, 16  ;;  %v4398_v29 = vshrl.u32 %v4097_v34, 16 }
 0x275   : > { %4916 = vst.msk [vmem:[#allocation3 + $0x28] sm:$0xff] %vm4910_vm2, %v7848_v3  ;;  %v3510_v1 = vpop.permute.xlu0 %3509  ;;  %v2719_v28 = vsel %vm6484_vm5, %v2717_v26, %v2718_v24  ;;  %v4401_v49 = vshll.u32 %v4097_v34, 16  ;;  %v3383_v48 = vrot.slane %v3381_v41, 5  ;;  %v2010_v3 = vld [vmem:[#allocation2 + $0xa8] sm:$0xf]  ;;  %v4407_v38 = vshll.u32 %v4098_v45, 16 }
 0x276   : > { %3552 = vst.msk [vmem:[#allocation3 + $0x30] sm:$0xff] %vm3545_vm12, %v3510_v1  ;;  %v5814_v27 = vcombine.low %v2716_v25, %v2719_v28  ;;  %v3389_v56 = vrot.slane %v3387_v40, 5  ;;  %v3393_v7 = vrot.slane %v3391_v10, 4  ;;  %v3399_v53 = vrot.slane %v3397_v39, 5  ;;  %v2562_v31 = vld [vmem:[#allocation2 + $0xb8] sm:$0xf] }
 0x277   : > { %3873 = vst.msk [vmem:[#allocation3 + $0x30] sm:$0xff] %vm3866_vm15, %v7859_v44  ;;  %v4400_v9 = vrot.slane %v4398_v29, 4  ;;  %v4403_v51 = vrot.slane %v4401_v49, 5  ;;  %v3384_v4 = vor.u32 %v3383_v48, %v3380_v46  ;;  %v4411_v23 = vshrl.u32 %v4098_v45, 16  ;;  %v2563_v46 = vld [vmem:[#allocation2 + $0xbc] sm:$0x1] }
 0x278   : > { %4051 = vst.msk [vmem:[#allocation3 + $0x30] sm:$0xff] %vm4044_vm9, %v7819_v21  ;;  %v3394_v60 = vor.u32 %v3393_v7, %v3389_v56  ;;  %v4417_v5 = vshll.u32 %v4099_v32, 16  ;;  %3844 = vrot.lane.b32.xlu1 %v5877_v20, %s6369_s15  ;;  %2803 = vrot.lane.b32.xlu0 %v5814_v27, %s6363_s28  ;;  %v4409_v47 = vrot.slane %v4407_v38, 5  ;;  %v2356_v0 = vshrl.u32 %v2010_v3, 16  ;;  %v3604_v1 = vld [vmem:[#allocation2 + $0xb4] sm:$0xe] }
 0x279   : > { %v7904_v36 = vpop.permute.xlu0 %4874  ;;  %v4404_v44 = vor.u32 %v4403_v51, %v4400_v9  ;;  %v2359_v18 = vshll.u32 %v2010_v3, 16  ;;  %v2466_v2 = vpop.permute.xlu1 %2465  ;;  %v3385_v52 = vrot.slane %v3384_v4, 4  ;;  %v4413_v8 = vrot.slane %v4411_v23, 4  ;;  %v3605_v28 = vld [vmem:[#allocation2 + $0xb8] sm:$0xf] }
 0x27a   : > { %v3395_v21 = vrot.slane %v3394_v60, 4  ;;  %v4419_v58 = vrot.slane %v4417_v5, 5  ;;  %2507 = vst.msk [vmem:[#allocation3 + $0x38] sm:$0xff] %vm2499_vm13, %v2466_v2  ;;  %v2358_v24 = vrot.slane %v2356_v0, 4  ;;  %v2365_v33 = vshll.u32 %v2011_v57, 16 }
 0x27b   : > { %v4405_v43 = vrot.slane %v4404_v44, 4  ;;  %v2361_v13 = vrot.slane %v2359_v18, 5  ;;  %2831 = vst.msk [vmem:[#allocation3 + $0x38] sm:$0xff] %vm2823_vm3, %v7865_v30  ;;  %v3390_v35 = vsel %vm6617_vm8, %v3385_v52, %v3389_v56  ;;  %v4414_v63 = vor.u32 %v4413_v8, %v4409_v47  ;;  %v3606_v39 = vld [vmem:[#allocation2 + $0xbc] sm:$0x1] }
 0x27c   : > { %v4932_v59 = vld [vmem:[#allocation3 + $0x28] sm:$0xff]  ;;  %v3400_v11 = vsel %vm6617_vm8, %v3395_v21, %v3399_v53  ;;  %v2369_v34 = vshrl.u32 %v2011_v57, 16  ;;  %3008 = vst.msk [vmem:[#allocation3 + $0x38] sm:$0xff] %vm3000_vm11, %v7815_v50  ;;  %2982 = vrot.lane.b32.xlu1 %v6326_v37, %s6368_s14  ;;  %4024 = vrot.lane.b32.xlu0 %v6327_v17, %s6364_s6  ;;  %v2367_v26 = vrot.slane %v2365_v33, 5  ;;  %v2375_v45 = vshll.u32 %v2012_v55, 16 }
 0x27d   : > { %6210 = vmatmul.mubr.msk.bf16.gmra.mrb[8].mxu1 %vm4979_vm4, %v4932_v59  ;;  %v7918_v15 = vpop.permute.xlu0 %2791  ;;  %v5845_v30 = vcombine.low %v3390_v35, %v3400_v11  ;;  %v4410_v20 = vsel %vm6617_vm8, %v4405_v43, %v4409_v47  ;;  %v2362_v25 = vor.u32 %v2361_v13, %v2358_v24  ;;  %v3833_v41 = vpop.permute.xlu1 %3832  ;;  %v4415_v40 = vrot.slane %v4414_v63, 4  ;;  %v4100_v48 = vld [vmem:[#allocation2 + $0xb4] sm:$0xf]  ;;  %v4101_v2 = vld [vmem:[#allocation2 + $0xb8] sm:$0xf] }
 0x27e   : > { %v2371_v10 = vrot.slane %v2369_v34, 4  ;;  %v5925_v50 = vrot.slane %v4645_v22, 9  ;;  %v4795_v29 = vrot.slane %v4646_v6, 5  ;;  %v4798_v49 = vrot.slane %v4647_v12, 5  ;;  %v4102_v8 = vld [vmem:[#allocation2 + $0xbc] sm:$0x1] }
 0x27f   : > { %v2363_v32 = vrot.slane %v2362_v25, 4  ;;  %v5799_v27 = vrot.slane %v2561_v42, 9  ;;  %v4420_v56 = vsel %vm6617_vm8, %v4415_v40, %v4419_v58  ;;  %v2377_v3 = vrot.slane %v2375_v45, 5  ;;  %v3059_v6 = vld [vmem:[#allocation2 + $0xb4] sm:$0xf] }
 0x280   : > { %v2372_v7 = vor.u32 %v2371_v10, %v2367_v26  ;;  %v2722_v53 = vrot.slane %v2562_v31, 5  ;;  %3523 = vrot.lane.b32.xlu1 %v5845_v30, %s6370_s16  ;;  %v5908_v51 = vcombine.low %v4410_v20, %v4420_v56  ;;  %v4796_v57 = vsel %vm6484_vm5, %v5925_v50, %v4795_v29  ;;  %v3060_v35 = vld [vmem:[#allocation2 + $0xb8] sm:$0xf]  ;;  %v3061_v30 = vld [vmem:[#allocation2 + $0xbc] sm:$0x1] }
 0x281   : > { %v7926_v9 = vpop.permute.xlu0 %4012  ;;  %v2368_v38 = vsel %vm6617_vm8, %v2363_v32, %v2367_v26  ;;  %v4797_v4 = vrot.slane %v4795_v29, 4  ;;  %v7933_v60 = vpop.permute.xlu1 %2970  ;;  %v2725_v44 = vrot.slane %v2563_v46, 5  ;;  %v5862_v55 = vrot.slane %v3604_v1, 9  ;;  %v2013_v45 = vld [vmem:[#allocation2 + $0xb4] sm:$0xf] }
 0x282   : > { %v2373_v23 = vrot.slane %v2372_v7, 4  ;;  %v2723_v5 = vsel %vm6484_vm5, %v5799_v27, %v2722_v53  ;;  %v2724_v37 = vrot.slane %v2722_v53, 4  ;;  %4565 = vrot.lane.b32.xlu0 %v5908_v51, %s6366_s8  ;;  %v3758_v0 = vrot.slane %v3605_v28, 5  ;;  %v2014_v27 = vld [vmem:[#allocation2 + $0xb8] sm:$0xf] }
 0x283   : > { %v4799_v47 = vsel %vm6484_vm5, %v4797_v4, %v4798_v49  ;;  %v3761_v18 = vrot.slane %v3606_v39, 5  ;;  %v4422_v58 = vshrl.u32 %v4100_v48, 16  ;;  %v4425_v33 = vshll.u32 %v4100_v48, 16  ;;  %v2015_v4 = vld [vmem:[#allocation2 + $0xbc] sm:$0x1] }
 0x284   : > { %v2378_v22 = vsel %vm6617_vm8, %v2373_v23, %v2377_v3  ;;  %v5941_v52 = vcombine.low %v4796_v57, %v4799_v47  ;;  %v2726_v21 = vsel %vm6484_vm5, %v2724_v37, %v2725_v44  ;;  %v3759_v17 = vsel %vm6484_vm5, %v5862_v55, %v3758_v0  ;;  %v4103_v47 = vld [vmem:[#allocation2 + $0xc0] sm:$0xf] }
 0x285   : > { %v5782_v12 = vcombine.low %v2368_v38, %v2378_v22  ;;  %v5815_v42 = vcombine.low %v2723_v5, %v2726_v21  ;;  %v3760_v43 = vrot.slane %v3758_v0, 4  ;;  %v3512_v24 = vpop.permute.xlu1 %3511  ;;  %v4424_v13 = vrot.slane %v4422_v58, 4  ;;  %v4104_v22 = vld [vmem:[#allocation2 + $0xc4] sm:$0xf] }
 0x286   : > { %v4431_v31 = vshll.u32 %v4101_v2, 16  ;;  %v4435_v59 = vshrl.u32 %v4101_v2, 16  ;;  %3553 = vst.msk [vmem:[#allocation3 + $0x38] sm:$0xff] %vm3545_vm12, %v3512_v24  ;;  %4888 = vrot.lane.b32.xlu0 %v5941_v52, %s6371_s17  ;;  %v4441_v34 = vshll.u32 %v4102_v8, 16  ;;  %v3402_v20 = vshrl.u32 %v3059_v6, 16 }
 0x287   : > { %v4554_v11 = vpop.permute.xlu0 %4553  ;;  %2479 = vrot.lane.b32.xlu1 %v5782_v12, %s6365_s7  ;;  %v3762_v63 = vsel %vm6484_vm5, %v3760_v43, %v3761_v18  ;;  %v3405_v25 = vshll.u32 %v3059_v6, 16  ;;  %3874 = vst.msk [vmem:[#allocation3 + $0x38] sm:$0xff] %vm3866_vm15, %v3833_v41  ;;  %v4427_v46 = vrot.slane %v4425_v33, 5  ;;  %v3411_v39 = vshll.u32 %v3060_v35, 16  ;;  %v4105_v6 = vld [vmem:[#allocation2 + $0xc8] sm:$0x1] }
 0x288   : > { %4596 = vst.msk [vmem:[#allocation3 + $0x30] sm:$0xff] %vm4589_vm0, %v4554_v11  ;;  %v5878_v26 = vcombine.low %v3759_v17, %v3762_v63  ;;  %v4433_v40 = vrot.slane %v4431_v31, 5  ;;  %v4437_v10 = vrot.slane %v4435_v59, 4  ;;  %v4443_v50 = vrot.slane %v4441_v34, 5  ;;  %v3607_v33 = vld [vmem:[#allocation2 + $0xc0] sm:$0xe] }
 0x289   : > { %4052 = vst.msk [vmem:[#allocation3 + $0x38] sm:$0xff] %vm4044_vm9, %v7873_v19  ;;  %v3404_v1 = vrot.slane %v3402_v20, 4  ;;  %v3407_v28 = vrot.slane %v3405_v25, 5  ;;  %v4428_v32 = vor.u32 %v4427_v46, %v4424_v13  ;;  %v3415_v41 = vshrl.u32 %v3060_v35, 16  ;;  %v3608_v11 = vld [vmem:[#allocation2 + $0xc4] sm:$0xf] }
 0x28a   : > { %4917 = vst.msk [vmem:[#allocation3 + $0x30] sm:$0xff] %vm4910_vm2, %v7904_v36  ;;  %v4438_v29 = vor.u32 %v4437_v10, %v4433_v40  ;;  %v3421_v49 = vshll.u32 %v3061_v30, 16  ;;  %3846 = vrot.lane.b32.xlu0 %v5878_v26, %s6369_s15  ;;  %v3413_v56 = vrot.slane %v3411_v39, 5  ;;  %v2380_v7 = vshrl.u32 %v2013_v45, 16  ;;  %v3609_v25 = vld [vmem:[#allocation2 + $0xc8] sm:$0x1] }
 0x28b   : > { %2805 = vrot.lane.b32.xlu1 %v5815_v42, %s6363_s28  ;;  %v3408_v48 = vor.u32 %v3407_v28, %v3404_v1  ;;  %v2383_v19 = vshll.u32 %v2013_v45, 16  ;;  %v2468_v3 = vpop.permute.xlu1 %2467  ;;  %v7959_v53 = vpop.permute.xlu0 %4876  ;;  %v4429_v36 = vrot.slane %v4428_v32, 4  ;;  %v3417_v38 = vrot.slane %v3415_v41, 4  ;;  %v4648_v26 = vld [vmem:[#allocation2 + $0xc0] sm:$0xe] }
 0x28c   : > { %v4439_v51 = vrot.slane %v4438_v29, 4  ;;  %v3423_v57 = vrot.slane %v3421_v49, 5  ;;  %2508 = vst.msk [vmem:[#allocation3 + $0x40] sm:$0xff] %vm2499_vm13, %v2468_v3  ;;  %v2382_v5 = vrot.slane %v2380_v7, 4  ;;  %v2389_v44 = vshll.u32 %v2014_v27, 16 }
 0x28d   : > { %v3409_v23 = vrot.slane %v3408_v48, 4  ;;  %v2385_v37 = vrot.slane %v2383_v19, 5  ;;  %2832 = vst.msk [vmem:[#allocation3 + $0x40] sm:$0xff] %vm2823_vm3, %v7918_v15  ;;  %v4434_v55 = vsel %vm6617_vm8, %v4429_v36, %v4433_v40  ;;  %v3418_v18 = vor.u32 %v3417_v38, %v3413_v56  ;;  %v3062_v38 = vld [vmem:[#allocation2 + $0xc0] sm:$0xf] }
 0x28e   : > { %v4444_v0 = vsel %vm6617_vm8, %v4439_v51, %v4443_v50  ;;  %v2393_v2 = vshrl.u32 %v2014_v27, 16  ;;  %3009 = vst.msk [vmem:[#allocation3 + $0x40] sm:$0xff] %vm3000_vm11, %v7875_v62  ;;  %v2391_v58 = vrot.slane %v2389_v44, 5  ;;  %v2399_v24 = vshll.u32 %v2015_v4, 16  ;;  %v4649_v50 = vld [vmem:[#allocation2 + $0xc4] sm:$0xf] }
 0x28f   : > { %v5909_v52 = vcombine.low %v4434_v55, %v4444_v0  ;;  %v3414_v21 = vsel %vm6617_vm8, %v3409_v23, %v3413_v56  ;;  %v2386_v8 = vor.u32 %v2385_v37, %v2382_v5  ;;  %v7972_v15 = vpop.permute.xlu1 %2793  ;;  %v7974_v12 = vpop.permute.xlu0 %3834  ;;  %v3419_v17 = vrot.slane %v3418_v18, 4  ;;  %v4650_v56 = vld [vmem:[#allocation2 + $0xc8] sm:$0x1]  ;;  %v3063_v5 = vld [vmem:[#allocation2 + $0xc4] sm:$0xf] }
 0x290   : > { %v2395_v43 = vrot.slane %v2393_v2, 4  ;;  %v4446_v13 = vshrl.u32 %v4103_v47, 16  ;;  %v4449_v31 = vshll.u32 %v4103_v47, 16  ;;  %v4455_v59 = vshll.u32 %v4104_v22, 16 }
 0x291   : > { %v4933_v42 = vld [vmem:[#allocation3 + $0x30] sm:$0xff]  ;;  %4567 = vrot.lane.b32.xlu1 %v5909_v52, %s6366_s8  ;;  %v2387_v62 = vrot.slane %v2386_v8, 4  ;;  %v4459_v35 = vshrl.u32 %v4104_v22, 16  ;;  %v3424_v63 = vsel %vm6617_vm8, %v3419_v17, %v3423_v57  ;;  %v2401_v30 = vrot.slane %v2399_v24, 5 }
 0x292   : > { %6213 = vmatprep.mubr.msk.bf16.mxu1 %vm4979_vm4, %v4933_v42  ;;  %v2396_v34 = vor.u32 %v2395_v43, %v2391_v58  ;;  %v4448_v20 = vrot.slane %v4446_v13, 4  ;;  %v5846_v46 = vcombine.low %v3414_v21, %v3424_v63  ;;  %v4451_v10 = vrot.slane %v4449_v31, 5  ;;  %v3064_v22 = vld [vmem:[#allocation2 + $0xc8] sm:$0x1]  ;;  %v4652_v42 = vld [vmem:[#allocation2 + $0xd0] sm:$0xf] }
 0x293   : > { %v2392_v40 = vsel %vm6617_vm8, %v2387_v62, %v2391_v58  ;;  %v4457_v45 = vrot.slane %v4455_v59, 5  ;;  %v7982_v1 = vpop.permute.xlu1 %4014  ;;  %v4461_v39 = vrot.slane %v4459_v35, 4  ;;  %v4465_v32 = vshll.u32 %v4105_v6, 16  ;;  %v7984_v41 = vpop.permute.xlu0 %2972  ;;  %v4651_v35 = vld [vmem:[#allocation2 + $0xcc] sm:$0xe] }
 0x294   : > { %v2397_v28 = vrot.slane %v2396_v34, 4  ;;  %v5863_v29 = vrot.slane %v3607_v33, 9  ;;  %3525 = vrot.lane.b32.xlu0 %v5846_v46, %s6370_s16  ;;  %v4452_v49 = vor.u32 %v4451_v10, %v4448_v20  ;;  %v3765_v27 = vrot.slane %v3608_v11, 5  ;;  %v4653_v63 = vld [vmem:[#allocation2 + $0xd4] sm:$0x1] }
 0x295   : > { %v3768_v48 = vrot.slane %v3609_v25, 5  ;;  %v5926_v7 = vrot.slane %v4648_v26, 9  ;;  %v4462_v3 = vor.u32 %v4461_v39, %v4457_v45  ;;  %v4467_v36 = vrot.slane %v4465_v32, 5 }
 0x296   : > { %v2402_v19 = vsel %vm6617_vm8, %v2397_v28, %v2401_v30  ;;  %v4802_v51 = vrot.slane %v4649_v50, 5  ;;  %v4453_v4 = vrot.slane %v4452_v49, 4  ;;  %v3767_v23 = vrot.slane %v3765_v27, 4 }
 0x297   : > { %v5783_v57 = vcombine.low %v2392_v40, %v2402_v19  ;;  %v4556_v37 = vpop.permute.xlu1 %4555  ;;  %v4463_v44 = vrot.slane %v4462_v3, 4  ;;  %v3766_v47 = vsel %vm6484_vm5, %v5863_v29, %v3765_v27  ;;  %v4805_v0 = vrot.slane %v4650_v56, 5 }
 0x298   : > { %v4804_v55 = vrot.slane %v4802_v51, 4  ;;  %4597 = vst.msk [vmem:[#allocation3 + $0x38] sm:$0xff] %vm4589_vm0, %v4556_v37  ;;  %v4458_v18 = vsel %vm6617_vm8, %v4453_v4, %v4457_v45  ;;  %v3769_v2 = vsel %vm6484_vm5, %v3767_v23, %v3768_v48  ;;  %v3426_v52 = vshrl.u32 %v3062_v38, 16 }
 0x299   : > { %2481 = vrot.lane.b32.xlu1 %v5783_v57, %s6365_s7  ;;  %v3429_v21 = vshll.u32 %v3062_v38, 16  ;;  %4918 = vst.msk [vmem:[#allocation3 + $0x38] sm:$0xff] %vm4910_vm2, %v7959_v53  ;;  %v4468_v8 = vsel %vm6617_vm8, %v4463_v44, %v4467_v36  ;;  %v4803_v58 = vsel %vm6484_vm5, %v5926_v7, %v4802_v51  ;;  %v3435_v6 = vshll.u32 %v3063_v5, 16  ;;  %s8091_s7 = scalar_lea.vmem %s8250_s4, %s5999_s9 }
 0x29a   : > { %v3514_v17 = vpop.permute.xlu0 %3513  ;;  %v5910_v43 = vcombine.low %v4458_v18, %v4468_v8  ;;  %v5879_v24 = vcombine.low %v3766_v47, %v3769_v2  ;;  %v3428_v13 = vrot.slane %v3426_v52, 4  ;;  %v4806_v62 = vsel %vm6484_vm5, %v4804_v55, %v4805_v0 }
 0x29b   : > { %v3431_v33 = vrot.slane %v3429_v21, 5  ;;  %3554 = vst.msk [vmem:[#allocation3 + $0x40] sm:$0xff] %vm3545_vm12, %v3514_v17  ;;  %v3437_v31 = vrot.slane %v3435_v6, 5  ;;  %v3439_v53 = vshrl.u32 %v3063_v5, 16  ;;  %v3445_v59 = vshll.u32 %v3064_v22, 16 }
 0x29c   : > { %3875 = vst.msk [vmem:[#allocation3 + $0x40] sm:$0xff] %vm3866_vm15, %v7974_v12  ;;  %4569 = vrot.lane.b32.xlu0 %v5910_v43, %s6366_s8  ;;  %v4809_v34 = vrot.slane %v4652_v42, 5  ;;  %v5942_v26 = vcombine.low %v4803_v58, %v4806_v62  ;;  %v5927_v40 = vrot.slane %v4651_v35, 9  ;;  %v4812_v50 = vrot.slane %v4653_v63, 5  ;;  %s5687_s8 = sshll.u32 %s8271_s18, 1 }
 0x29d   : > { %3848 = vrot.lane.b32.xlu1 %v5879_v24, %s6369_s15  ;;  %v3432_v11 = vor.u32 %v3431_v33, %v3428_v13  ;;  %4053 = vst.msk [vmem:[#allocation3 + $0x40] sm:$0xff] %vm4044_vm9, %v7926_v9  ;;  %v3441_v30 = vrot.slane %v3439_v53, 4  ;;  %v3447_v12 = vrot.slane %v3445_v59, 5  ;;  %s300_s13 = scalar_lea.vmem %s8251_s5, %s5687_s8 }
 0x29e   : > { %v2470_v20 = vpop.permute.xlu1 %2469  ;;  %v4879_v25 = vpop.permute.xlu0 %4878  ;;  %v4811_v45 = vrot.slane %v4809_v34, 4 }
 0x29f   : > { %v3433_v46 = vrot.slane %v3432_v11, 4  ;;  %2509 = vst.msk [vmem:[#allocation3 + $0x48] sm:$0xff] %vm2499_vm13, %v2470_v20  ;;  %v3442_v10 = vor.u32 %v3441_v30, %v3437_v31 }
 0x2a0   : > { %2833 = vst.msk [vmem:[#allocation3 + $0x48] sm:$0xff] %vm2823_vm3, %v7972_v15  ;;  %v4934_v28 = vld [vmem:[#allocation3 + $0x38] sm:$0xff]  ;;  %4890 = vrot.lane.b32.xlu0 %v5942_v26, %s6371_s17  ;;  %v4810_v15 = vsel %vm6484_vm5, %v5927_v40, %v4809_v34  ;;  %v4813_v27 = vsel %vm6484_vm5, %v4811_v45, %v4812_v50  ;;  %vm5353_vm5 = vcmask 31744  }
 0x2a1   : > { %3010 = vst.msk [vmem:[#allocation3 + $0x48] sm:$0xff] %vm3000_vm11, %v7933_v60  ;;  %6214 = vmatmul.mubr.msk.bf16.gmra.mrb[12].mxu1 %vm4979_vm4, %v4934_v28  ;;  %v3438_v9 = vsel %vm6617_vm8, %v3433_v46, %v3437_v31  ;;  %v3443_v39 = vrot.slane %v3442_v10, 4  ;;  %v5943_v7 = vcombine.low %v4810_v15, %v4813_v27 }
 0x2a2   : > { %v3837_v32 = vpop.permute.xlu1 %3836  ;;  %v2796_v29 = vpop.permute.xlu0 %2795 }
 0x2a3   : > { %v3448_v49 = vsel %vm6617_vm8, %v3443_v39, %v3447_v12 }
 0x2a4   : > { %v5847_v48 = vcombine.low %v3438_v9, %v3448_v49 }
 0x2a6   : > { %v2975_v56 = vpop.permute.xlu1 %2974  ;;  %v4017_v60 = vpop.permute.xlu0 %4016  ;;  %3527 = vrot.lane.b32.xlu1 %v5847_v48, %s6370_s16 }
 0x2aa   : > { %v3516_v19 = vpop.permute.xlu1 %3515  ;;  %4892 = vrot.lane.b32.xlu1 %v5943_v7, %s6371_s17 }
 0x2ab   : > { %3555 = vst.msk [vmem:[#allocation3 + $0x48] sm:$0xff] %vm3545_vm12, %v3516_v19  ;;  %v4558_v14 = vpop.permute.xlu0 %4557 }
 0x2ac   : > { %3876 = vst.msk [vmem:[#allocation3 + $0x48] sm:$0xff] %vm3866_vm15, %v3837_v32 }
 0x2ad   : > { %4054 = vst.msk [vmem:[#allocation3 + $0x48] sm:$0xff] %vm4044_vm9, %v7982_v1 }
 0x2ae   : > { %4598 = vst.msk [vmem:[#allocation3 + $0x40] sm:$0xff] %vm4589_vm0, %v4558_v14 }
 0x2af   : > { %4919 = vst.msk [vmem:[#allocation3 + $0x40] sm:$0xff] %vm4910_vm2, %v4879_v25  ;;  %v4881_v3 = vpop.permute.xlu0 %4880 }
 0x2b0   : > { %v2472_v16 = vpop.permute.xlu1 %2471 }
 0x2b1   : > { %2510 = vst.msk [vmem:[#allocation3 + $0x50] sm:$0xff] %vm2499_vm13, %v2472_v16 }
 0x2b2   : > { %2834 = vst.msk [vmem:[#allocation3 + $0x50] sm:$0xff] %vm2823_vm3, %v2796_v29 }
 0x2b3   : > { %3011 = vst.msk [vmem:[#allocation3 + $0x50] sm:$0xff] %vm3000_vm11, %v7984_v41 }
 0x2b4   : > { %v2798_v36 = vpop.permute.xlu1 %2797 }
 0x2b5   : > { %v3839_v51 = vpop.permute.xlu0 %3838 }
 0x2b6   : > { %v4935_v38 = vld [vmem:[#allocation3 + $0x40] sm:$0xff] }
 0x2b7   : > { %6217 = vmatprep.mubr.msk.bf16.mxu1 %vm4979_vm4, %v4935_v38 }
 0x2b8   : > { %v4019_v57 = vpop.permute.xlu1 %4018 }
 0x2b9   : > { %v2977_v1 = vpop.permute.xlu0 %2976 }
 0x2bc   : > { %v4560_v4 = vpop.permute.xlu1 %4559 }
 0x2bd   : > { %4599 = vst.msk [vmem:[#allocation3 + $0x48] sm:$0xff] %vm4589_vm0, %v4560_v4 }
 0x2be   : > { %4920 = vst.msk [vmem:[#allocation3 + $0x48] sm:$0xff] %vm4910_vm2, %v4881_v3 }
 0x2bf   : > { %v3518_v23 = vpop.permute.xlu0 %3517 }
 0x2c0   : > { %3556 = vst.msk [vmem:[#allocation3 + $0x50] sm:$0xff] %vm3545_vm12, %v3518_v23 }
 0x2c1   : > { %3877 = vst.msk [vmem:[#allocation3 + $0x50] sm:$0xff] %vm3866_vm15, %v3839_v51 }
 0x2c2   : > { %4055 = vst.msk [vmem:[#allocation3 + $0x50] sm:$0xff] %vm4044_vm9, %v4017_v60 }
 0x2c3   : > { %v4883_v41 = vpop.permute.xlu0 %4882  ;;  %v2474_v5 = vpop.permute.xlu1 %2473 }
 0x2c4   : > { %2511 = vst.msk [vmem:[#allocation3 + $0x58] sm:$0xff] %vm2499_vm13, %v2474_v5 }
 0x2c5   : > { %v4936_v37 = vld [vmem:[#allocation3 + $0x48] sm:$0xff]  ;;  %2835 = vst.msk [vmem:[#allocation3 + $0x58] sm:$0xff] %vm2823_vm3, %v2798_v36 }
 0x2c6   : > { %6218 = vmatmul.mubr.msk.bf16.gmra.mrb[16].mxu1 %vm4979_vm4, %v4936_v37  ;;  %3012 = vst.msk [vmem:[#allocation3 + $0x58] sm:$0xff] %vm3000_vm11, %v2975_v56 }
 0x2c7   : > { %v2800_v44 = vpop.permute.xlu0 %2799 }
 0x2c8   : > { %v3841_v47 = vpop.permute.xlu1 %3840 }
 0x2cb   : > { %v4021_v55 = vpop.permute.xlu0 %4020 }
 0x2cc   : > { %v2979_v0 = vpop.permute.xlu1 %2978 }
 0x2d0   : > { %v3520_v18 = vpop.permute.xlu1 %3519  ;;  %v4562_v2 = vpop.permute.xlu0 %4561 }
 0x2d1   : > { %3557 = vst.msk [vmem:[#allocation3 + $0x58] sm:$0xff] %vm3545_vm12, %v3520_v18 }
 0x2d2   : > { %4600 = vst.msk [vmem:[#allocation3 + $0x50] sm:$0xff] %vm4589_vm0, %v4562_v2 }
 0x2d3   : > { %3878 = vst.msk [vmem:[#allocation3 + $0x58] sm:$0xff] %vm3866_vm15, %v3841_v47 }
 0x2d4   : > { %4921 = vst.msk [vmem:[#allocation3 + $0x50] sm:$0xff] %vm4910_vm2, %v4883_v41  ;;  %v2476_v22 = vpop.permute.xlu1 %2475  ;;  %v4885_v52 = vpop.permute.xlu0 %4884 }
 0x2d5   : > { %4056 = vst.msk [vmem:[#allocation3 + $0x58] sm:$0xff] %vm4044_vm9, %v4019_v57 }
 0x2d6   : > { %2512 = vst.msk [vmem:[#allocation3 + $0x60] sm:$0xff] %vm2499_vm13, %v2476_v22 }
 0x2d7   : > { %2836 = vst.msk [vmem:[#allocation3 + $0x60] sm:$0xff] %vm2823_vm3, %v2800_v44 }
 0x2d8   : > { %3013 = vst.msk [vmem:[#allocation3 + $0x60] sm:$0xff] %vm3000_vm11, %v2977_v1  ;;  %v2802_v21 = vpop.permute.xlu1 %2801  ;;  %v3843_v8 = vpop.permute.xlu0 %3842 }
 0x2db   : > { %v4937_v58 = vld [vmem:[#allocation3 + $0x50] sm:$0xff] }
 0x2dc   : > { %6221 = vmatprep.mubr.msk.bf16.mxu1 %vm4979_vm4, %v4937_v58  ;;  %v4023_v6 = vpop.permute.xlu1 %4022  ;;  %v2981_v42 = vpop.permute.xlu0 %2980 }
 0x2e0   : > { %v4564_v17 = vpop.permute.xlu1 %4563 }
 0x2e1   : > { %4601 = vst.msk [vmem:[#allocation3 + $0x58] sm:$0xff] %vm4589_vm0, %v4564_v17 }
 0x2e2   : > { %4922 = vst.msk [vmem:[#allocation3 + $0x58] sm:$0xff] %vm4910_vm2, %v4885_v52  ;;  %v3522_v43 = vpop.permute.xlu0 %3521 }
 0x2e3   : > { %3558 = vst.msk [vmem:[#allocation3 + $0x60] sm:$0xff] %vm3545_vm12, %v3522_v43 }
 0x2e4   : > { %3879 = vst.msk [vmem:[#allocation3 + $0x60] sm:$0xff] %vm3866_vm15, %v3843_v8 }
 0x2e5   : > { %4057 = vst.msk [vmem:[#allocation3 + $0x60] sm:$0xff] %vm4044_vm9, %v4021_v55 }
 0x2e6   : > { %v2478_v24 = vpop.permute.xlu1 %2477  ;;  %v4887_v13 = vpop.permute.xlu0 %4886 }
 0x2e7   : > { %2513 = vst.msk [vmem:[#allocation3 + $0x68] sm:$0xff] %vm2499_vm13, %v2478_v24 }
 0x2e8   : > { %2837 = vst.msk [vmem:[#allocation3 + $0x68] sm:$0xff] %vm2823_vm3, %v2802_v21 }
 0x2e9   : > { %v4938_v33 = vld [vmem:[#allocation3 + $0x58] sm:$0xff]  ;;  %3014 = vst.msk [vmem:[#allocation3 + $0x68] sm:$0xff] %vm3000_vm11, %v2979_v0 }
 0x2ea   : > { %6222 = vmatmul.mubr.msk.bf16.gmra.mrb[20].mxu1 %vm4979_vm4, %v4938_v33  ;;  %v3845_v62 = vpop.permute.xlu1 %3844  ;;  %v2804_v31 = vpop.permute.xlu0 %2803 }
 0x2ee   : > { %v2983_v53 = vpop.permute.xlu1 %2982  ;;  %v4025_v59 = vpop.permute.xlu0 %4024 }
 0x2f2   : > { %v3524_v35 = vpop.permute.xlu1 %3523 }
 0x2f3   : > { %3559 = vst.msk [vmem:[#allocation3 + $0x68] sm:$0xff] %vm3545_vm12, %v3524_v35 }
 0x2f4   : > { %3880 = vst.msk [vmem:[#allocation3 + $0x68] sm:$0xff] %vm3866_vm15, %v3845_v62  ;;  %v4566_v11 = vpop.permute.xlu0 %4565 }
 0x2f5   : > { %4058 = vst.msk [vmem:[#allocation3 + $0x68] sm:$0xff] %vm4044_vm9, %v4023_v6 }
 0x2f6   : > { %4602 = vst.msk [vmem:[#allocation3 + $0x60] sm:$0xff] %vm4589_vm0, %v4566_v11 }
 0x2f7   : > { %4923 = vst.msk [vmem:[#allocation3 + $0x60] sm:$0xff] %vm4910_vm2, %v4887_v13 }
 0x2f8   : > { %v4889_v34 = vpop.permute.xlu0 %4888 }
 0x2f9   : > { %v2480_v63 = vpop.permute.xlu1 %2479 }
 0x2fa   : > { %2514 = vst.msk [vmem:[#allocation3 + $0x70] sm:$0xff] %vm2499_vm13, %v2480_v63 }
 0x2fb   : > { %2838 = vst.msk [vmem:[#allocation3 + $0x70] sm:$0xff] %vm2823_vm3, %v2804_v31 }
 0x2fc   : > { %3015 = vst.msk [vmem:[#allocation3 + $0x70] sm:$0xff] %vm3000_vm11, %v2981_v42  ;;  %v3847_v25 = vpop.permute.xlu0 %3846 }
 0x2fd   : > { %v2806_v30 = vpop.permute.xlu1 %2805 }
 0x2fe   : > { %v4939_v20 = vld [vmem:[#allocation3 + $0x60] sm:$0xff] }
 0x2ff   : > { %6225 = vmatprep.mubr.msk.bf16.mxu1 %vm4979_vm4, %v4939_v20 }
 0x303   : > { %v4568_v26 = vpop.permute.xlu1 %4567 }
 0x304   : > { %4603 = vst.msk [vmem:[#allocation3 + $0x68] sm:$0xff] %vm4589_vm0, %v4568_v26 }
 0x305   : > { %4924 = vst.msk [vmem:[#allocation3 + $0x68] sm:$0xff] %vm4910_vm2, %v4889_v34 }
 0x306   : > { %v3526_v46 = vpop.permute.xlu0 %3525 }
 0x307   : > { %3560 = vst.msk [vmem:[#allocation3 + $0x70] sm:$0xff] %vm3545_vm12, %v3526_v46 }
 0x308   : > { %3881 = vst.msk [vmem:[#allocation3 + $0x70] sm:$0xff] %vm3866_vm15, %v3847_v25 }
 0x309   : > { %4059 = vst.msk [vmem:[#allocation3 + $0x70] sm:$0xff] %vm4044_vm9, %v4025_v59 }
 0x30b   : > { %v2482_v40 = vpop.permute.xlu1 %2481 }
 0x30c   : > { %2515 = vst.msk [vmem:[#allocation3 + $0x78] sm:$0xff] %vm2499_vm13, %v2482_v40  ;;  %v4940_v10 = vld [vmem:[#allocation3 + $0x68] sm:$0xff] }
 0x30d   : > { %2839 = vst.msk [vmem:[#allocation3 + $0x78] sm:$0xff] %vm2823_vm3, %v2806_v30  ;;  %6226 = vmatmul.mubr.msk.bf16.gmra.mrb[24].mxu1 %vm4979_vm4, %v4940_v10 }
 0x30e   : > { %3016 = vst.msk [vmem:[#allocation3 + $0x78] sm:$0xff] %vm3000_vm11, %v2983_v53  ;;  %v4570_v12 = vpop.permute.xlu0 %4569 }
 0x30f   : > { %4604 = vst.msk [vmem:[#allocation3 + $0x70] sm:$0xff] %vm4589_vm0, %v4570_v12  ;;  %v3849_v45 = vpop.permute.xlu1 %3848 }
 0x310   : > { %v6203_v50 = vpop.f32.mrb[0].mxu1 }
 0x311   : > { %v6036_v9 = vpack.c.bf16 %v6203_v50, %v6203_v50  ;;  %v5066_v39 = vpop.f32.mrb[1].mxu1  ;;  %v5426_v15 = vmul.f32 %v6203_v50, %v6203_v50  ;;  %v5357_v16 = vsel %vm5353_vm5, %v6203_v50, 0.0 }
 0x312   : > { %v4891_v28 = vpop.permute.xlu0 %4890  ;;  %v6034_v32 = vpack.c.bf16 %v5066_v39, %v5066_v39  ;;  %v5424_v29 = vmul.f32 %v5066_v39, %v5066_v39  ;;  %v6204_v49 = vpop.f32.mrb[2].mxu1  ;;  %v5354_v56 = vsel %vm5353_vm5, %v5066_v39, 0.0 }
 0x313   : > { %4925 = vst.msk [vmem:[#allocation3 + $0x70] sm:$0xff] %vm4910_vm2, %v4891_v28  ;;  %v6037_v27 = vpack.c.bf16 %v6204_v49, %v6204_v49  ;;  %v5069_v48 = vpop.f32.mrb[3].mxu1  ;;  %v5427_v36 = vmul.f32 %v6204_v49, %v6204_v49  ;;  %v5459_v4 = vsel %vm5353_vm5, %v5426_v15, 0.0  ;;  %v5359_v23 = vsel %vm5353_vm5, %v6204_v49, 0.0 }
 0x314   : > { %5323 = vst.msk [vmem:[%s8091_s7 + $0x8] sm:$0xf] %vm714_vm14, %v6036_v9  ;;  %5321 = vst.msk [vmem:[%s8091_s7] sm:$0xf] %vm714_vm14, %v6034_v32  ;;  %v6035_v60 = vpack.c.bf16 %v5069_v48, %v5069_v48  ;;  %v5355_v7 = vsel %vm5353_vm5, %v5069_v48, 0.0  ;;  %v5425_v19 = vmul.f32 %v5069_v48, %v5069_v48  ;;  %v5456_v3 = vsel %vm5353_vm5, %v5424_v29, 0.0 }
 0x315   : > { %5324 = vst.msk [vmem:[%s8091_s7 + $0xc] sm:$0xf] %vm714_vm14, %v6037_v27  ;;  %v5356_v14 = vadd.f32 %v5355_v7, %v5354_v56  ;;  %v5461_v44 = vsel %vm5353_vm5, %v5427_v36, 0.0 }
 0x316   : > { %5322 = vst.msk [vmem:[%s8091_s7 + $0x4] sm:$0xf] %vm714_vm14, %v6035_v60  ;;  %v5457_v51 = vsel %vm5353_vm5, %v5425_v19, 0.0 }
 0x317   : > { %v5358_v57 = vadd.f32 %v5357_v16, %v5356_v14  ;;  %v5458_v1 = vadd.f32 %v5457_v51, %v5456_v3 }
 0x318   : > { %v3528_v38 = vpop.permute.xlu1 %3527 }
 0x319   : > { %3561 = vst.msk [vmem:[#allocation3 + $0x78] sm:$0xff] %vm3545_vm12, %v3528_v38  ;;  %v5460_v5 = vadd.f32 %v5459_v4, %v5458_v1  ;;  %v5360_v37 = vadd.f32 %v5359_v23, %v5358_v57 }
 0x31a   : > { %3882 = vst.msk [vmem:[#allocation3 + $0x78] sm:$0xff] %vm3866_vm15, %v3849_v45  ;;  %v4941_v41 = vld [vmem:[#allocation3 + $0x70] sm:$0xff] }
 0x31b   : > { %4060 = vst.msk [vmem:[#allocation3 + $0x78] sm:$0xff] %vm4044_vm9, %v7047_v54  ;;  %6229 = vmatprep.mubr.msk.bf16.mxu1 %vm4979_vm4, %v4941_v41  ;;  %v5462_v55 = vadd.f32 %v5461_v44, %v5460_v5 }
 0x31c   : > { %4605 = vst.msk [vmem:[#allocation3 + $0x78] sm:$0xff] %vm4589_vm0, %v7058_v61  ;;  %v4893_v47 = vpop.permute.xlu1 %4892 }
 0x31d   : > { %4926 = vst.msk [vmem:[#allocation3 + $0x78] sm:$0xff] %vm4910_vm2, %v4893_v47 }
 0x324   : > { %v4942_v0 = vld [vmem:[#allocation3 + $0x78] sm:$0xff] }
 0x325   : > { %6230 = vmatmul.mubr.msk.bf16.gmra.mrb[28].mxu1 %vm4979_vm4, %v4942_v0 }
 0x328   : > { %v6207_v18 = vpop.f32.mrb[4].mxu1 }
 0x329   : > { %v6040_v2 = vpack.c.bf16 %v6207_v18, %v6207_v18  ;;  %v5082_v54 = vpop.f32.mrb[5].mxu1  ;;  %v5430_v24 = vmul.f32 %v6207_v18, %v6207_v18  ;;  %v5365_v31 = vsel %vm5353_vm5, %v6207_v18, 0.0 }
 0x32a   : > { %v6038_v22 = vpack.c.bf16 %v5082_v54, %v5082_v54  ;;  %v5361_v52 = vsel %vm5353_vm5, %v5082_v54, 0.0  ;;  %v5428_v21 = vmul.f32 %v5082_v54, %v5082_v54  ;;  %v6208_v8 = vpop.f32.mrb[6].mxu1 }
 0x32b   : > { %5327 = vst.msk [vmem:[%s8091_s7 + $0x18] sm:$0xf] %vm714_vm14, %v6040_v2  ;;  %v5362_v61 = vadd.f32 %v5361_v52, %v5360_v37  ;;  %v6041_v58 = vpack.c.bf16 %v6208_v8, %v6208_v8  ;;  %v5085_v6 = vpop.f32.mrb[7].mxu1  ;;  %v5431_v53 = vmul.f32 %v6208_v8, %v6208_v8  ;;  %v5367_v11 = vsel %vm5353_vm5, %v6208_v8, 0.0 }
 0x32c   : > { %5325 = vst.msk [vmem:[%s8091_s7 + $0x10] sm:$0xf] %vm714_vm14, %v6038_v22  ;;  %v5463_v42 = vsel %vm5353_vm5, %v5428_v21, 0.0  ;;  %v6039_v17 = vpack.c.bf16 %v5085_v6, %v5085_v6  ;;  %v5363_v43 = vsel %vm5353_vm5, %v5085_v6, 0.0  ;;  %v5429_v62 = vmul.f32 %v5085_v6, %v5085_v6 }
 0x32d   : > { %v5464_v13 = vadd.f32 %v5463_v42, %v5462_v55  ;;  %5328 = vst.msk [vmem:[%s8091_s7 + $0x1c] sm:$0xf] %vm714_vm14, %v6041_v58  ;;  %v5364_v33 = vadd.f32 %v5363_v43, %v5362_v61  ;;  %v5467_v34 = vsel %vm5353_vm5, %v5430_v24, 0.0  ;;  %v5469_v25 = vsel %vm5353_vm5, %v5431_v53, 0.0 }
 0x32e   : > { %5326 = vst.msk [vmem:[%s8091_s7 + $0x14] sm:$0xf] %vm714_vm14, %v6039_v17  ;;  %v5465_v35 = vsel %vm5353_vm5, %v5429_v62, 0.0 }
 0x32f   : > { %v5366_v59 = vadd.f32 %v5365_v31, %v5364_v33  ;;  %v5466_v63 = vadd.f32 %v5465_v35, %v5464_v13 }
 0x331   : > { %v5368_v30 = vadd.f32 %v5367_v11, %v5366_v59  ;;  %v5468_v20 = vadd.f32 %v5467_v34, %v5466_v63 }
 0x333   : > { %v5470_v26 = vadd.f32 %v5469_v25, %v5468_v20 }
 0x350   : > { %v6211_v46 = vpop.f32.mrb[8].mxu1 }
 0x351   : > { %v6044_v40 = vpack.c.bf16 %v6211_v46, %v6211_v46  ;;  %v5098_v10 = vpop.f32.mrb[9].mxu1  ;;  %v5434_v27 = vmul.f32 %v6211_v46, %v6211_v46  ;;  %v5373_v7 = vsel %vm5353_vm5, %v6211_v46, 0.0 }
 0x352   : > { %v6042_v12 = vpack.c.bf16 %v5098_v10, %v5098_v10  ;;  %v5369_v45 = vsel %vm5353_vm5, %v5098_v10, 0.0  ;;  %v5432_v50 = vmul.f32 %v5098_v10, %v5098_v10  ;;  %v6212_v28 = vpop.f32.mrb[10].mxu1 }
 0x353   : > { %5331 = vst.msk [vmem:[%s8091_s7 + $0x28] sm:$0xf] %vm714_vm14, %v6044_v40  ;;  %v5370_v9 = vadd.f32 %v5369_v45, %v5368_v30  ;;  %v6045_v39 = vpack.c.bf16 %v6212_v28, %v6212_v28  ;;  %v5101_v32 = vpop.f32.mrb[11].mxu1  ;;  %v5435_v19 = vmul.f32 %v6212_v28, %v6212_v28  ;;  %v5375_v3 = vsel %vm5353_vm5, %v6212_v28, 0.0 }
 0x354   : > { %5329 = vst.msk [vmem:[%s8091_s7 + $0x20] sm:$0xf] %vm714_vm14, %v6042_v12  ;;  %v5471_v29 = vsel %vm5353_vm5, %v5432_v50, 0.0  ;;  %v6043_v49 = vpack.c.bf16 %v5101_v32, %v5101_v32  ;;  %v5371_v15 = vsel %vm5353_vm5, %v5101_v32, 0.0  ;;  %v5433_v60 = vmul.f32 %v5101_v32, %v5101_v32 }
 0x355   : > { %v5472_v48 = vadd.f32 %v5471_v29, %v5470_v26  ;;  %5332 = vst.msk [vmem:[%s8091_s7 + $0x2c] sm:$0xf] %vm714_vm14, %v6045_v39  ;;  %v5372_v56 = vadd.f32 %v5371_v15, %v5370_v9  ;;  %v5475_v51 = vsel %vm5353_vm5, %v5434_v27, 0.0  ;;  %v5477_v1 = vsel %vm5353_vm5, %v5435_v19, 0.0 }
 0x356   : > { %5330 = vst.msk [vmem:[%s8091_s7 + $0x24] sm:$0xf] %vm714_vm14, %v6043_v49  ;;  %v5473_v16 = vsel %vm5353_vm5, %v5433_v60, 0.0 }
 0x357   : > { %v5374_v14 = vadd.f32 %v5373_v7, %v5372_v56  ;;  %v5474_v36 = vadd.f32 %v5473_v16, %v5472_v48 }
 0x359   : > { %v5376_v38 = vadd.f32 %v5375_v3, %v5374_v14  ;;  %v5476_v57 = vadd.f32 %v5475_v51, %v5474_v36 }
 0x35b   : > { %v5478_v4 = vadd.f32 %v5477_v1, %v5476_v57 }
 0x374   : > { %v6215_v23 = vpop.f32.mrb[12].mxu1 }
 0x375   : > { %v6048_v41 = vpack.c.bf16 %v6215_v23, %v6215_v23  ;;  %v5114_v5 = vpop.f32.mrb[13].mxu1  ;;  %v5438_v21 = vmul.f32 %v6215_v23, %v6215_v23  ;;  %v5381_v6 = vsel %vm5353_vm5, %v6215_v23, 0.0 }
 0x376   : > { %v6046_v37 = vpack.c.bf16 %v5114_v5, %v5114_v5  ;;  %v5377_v44 = vsel %vm5353_vm5, %v5114_v5, 0.0  ;;  %v5436_v47 = vmul.f32 %v5114_v5, %v5114_v5  ;;  %v6216_v55 = vpop.f32.mrb[14].mxu1 }
 0x377   : > { %5335 = vst.msk [vmem:[%s8091_s7 + $0x38] sm:$0xf] %vm714_vm14, %v6048_v41  ;;  %v5378_v0 = vadd.f32 %v5377_v44, %v5376_v38  ;;  %v6049_v18 = vpack.c.bf16 %v6216_v55, %v6216_v55  ;;  %v5117_v2 = vpop.f32.mrb[15].mxu1  ;;  %v5439_v42 = vmul.f32 %v6216_v55, %v6216_v55  ;;  %v5383_v24 = vsel %vm5353_vm5, %v6216_v55, 0.0 }
 0x378   : > { %5333 = vst.msk [vmem:[%s8091_s7 + $0x30] sm:$0xf] %vm714_vm14, %v6046_v37  ;;  %v5479_v54 = vsel %vm5353_vm5, %v5436_v47, 0.0  ;;  %v6047_v22 = vpack.c.bf16 %v5117_v2, %v5117_v2  ;;  %v5379_v52 = vsel %vm5353_vm5, %v5117_v2, 0.0  ;;  %v5437_v58 = vmul.f32 %v5117_v2, %v5117_v2 }
 0x379   : > { %v5480_v8 = vadd.f32 %v5479_v54, %v5478_v4  ;;  %5336 = vst.msk [vmem:[%s8091_s7 + $0x3c] sm:$0xf] %vm714_vm14, %v6049_v18  ;;  %v5380_v61 = vadd.f32 %v5379_v52, %v5378_v0  ;;  %v5483_v33 = vsel %vm5353_vm5, %v5438_v21, 0.0  ;;  %v5485_v53 = vsel %vm5353_vm5, %v5439_v42, 0.0 }
 0x37a   : > { %5334 = vst.msk [vmem:[%s8091_s7 + $0x34] sm:$0xf] %vm714_vm14, %v6047_v22  ;;  %v5481_v43 = vsel %vm5353_vm5, %v5437_v58, 0.0 }
 0x37b   : > { %v5382_v17 = vadd.f32 %v5381_v6, %v5380_v61  ;;  %v5482_v13 = vadd.f32 %v5481_v43, %v5480_v8 }
 0x37d   : > { %v5384_v62 = vadd.f32 %v5383_v24, %v5382_v17  ;;  %v5484_v31 = vadd.f32 %v5483_v33, %v5482_v13 }
 0x37f   : > { %v5486_v59 = vadd.f32 %v5485_v53, %v5484_v31 }
 0x399   : > { %v6219_v35 = vpop.f32.mrb[16].mxu1 }
 0x39a   : > { %v6052_v11 = vpack.c.bf16 %v6219_v35, %v6219_v35  ;;  %v5130_v63 = vpop.f32.mrb[17].mxu1  ;;  %v5442_v50 = vmul.f32 %v6219_v35, %v6219_v35  ;;  %v5389_v32 = vsel %vm5353_vm5, %v6219_v35, 0.0 }
 0x39b   : > { %v6050_v34 = vpack.c.bf16 %v5130_v63, %v5130_v63  ;;  %v5385_v30 = vsel %vm5353_vm5, %v5130_v63, 0.0  ;;  %v5440_v20 = vmul.f32 %v5130_v63, %v5130_v63  ;;  %v6220_v25 = vpop.f32.mrb[18].mxu1 }
 0x39c   : > { %5339 = vst.msk [vmem:[%s8091_s7 + $0x48] sm:$0xf] %vm714_vm14, %v6052_v11  ;;  %v5386_v26 = vadd.f32 %v5385_v30, %v5384_v62  ;;  %v6053_v46 = vpack.c.bf16 %v6220_v25, %v6220_v25  ;;  %v5133_v40 = vpop.f32.mrb[19].mxu1  ;;  %v5443_v29 = vmul.f32 %v6220_v25, %v6220_v25  ;;  %v5391_v27 = vsel %vm5353_vm5, %v6220_v25, 0.0 }
 0x39d   : > { %5337 = vst.msk [vmem:[%s8091_s7 + $0x40] sm:$0xf] %vm714_vm14, %v6050_v34  ;;  %v5487_v10 = vsel %vm5353_vm5, %v5440_v20, 0.0  ;;  %v6051_v12 = vpack.c.bf16 %v5133_v40, %v5133_v40  ;;  %v5387_v45 = vsel %vm5353_vm5, %v5133_v40, 0.0  ;;  %v5441_v39 = vmul.f32 %v5133_v40, %v5133_v40 }
 0x39e   : > { %v5488_v28 = vadd.f32 %v5487_v10, %v5486_v59  ;;  %5340 = vst.msk [vmem:[%s8091_s7 + $0x4c] sm:$0xf] %vm714_vm14, %v6053_v46  ;;  %v5388_v9 = vadd.f32 %v5387_v45, %v5386_v26  ;;  %v5491_v56 = vsel %vm5353_vm5, %v5442_v50, 0.0  ;;  %v5493_v19 = vsel %vm5353_vm5, %v5443_v29, 0.0 }
 0x39f   : > { %5338 = vst.msk [vmem:[%s8091_s7 + $0x44] sm:$0xf] %vm714_vm14, %v6051_v12  ;;  %v5489_v15 = vsel %vm5353_vm5, %v5441_v39, 0.0 }
 0x3a0   : > { %v5390_v49 = vadd.f32 %v5389_v32, %v5388_v9  ;;  %v5490_v48 = vadd.f32 %v5489_v15, %v5488_v28 }
 0x3a2   : > { %v5392_v60 = vadd.f32 %v5391_v27, %v5390_v49  ;;  %v5492_v7 = vadd.f32 %v5491_v56, %v5490_v48 }
 0x3a4   : > { %v5494_v14 = vadd.f32 %v5493_v19, %v5492_v7 }
 0x3bd   : > { %v6223_v16 = vpop.f32.mrb[20].mxu1 }
 0x3be   : > { %v6056_v3 = vpack.c.bf16 %v6223_v16, %v6223_v16  ;;  %v5146_v36 = vpop.f32.mrb[21].mxu1  ;;  %v5446_v47 = vmul.f32 %v6223_v16, %v6223_v16  ;;  %v5397_v2 = vsel %vm5353_vm5, %v6223_v16, 0.0 }
 0x3bf   : > { %v6054_v51 = vpack.c.bf16 %v5146_v36, %v5146_v36  ;;  %v5393_v38 = vsel %vm5353_vm5, %v5146_v36, 0.0  ;;  %v5444_v57 = vmul.f32 %v5146_v36, %v5146_v36  ;;  %v6224_v1 = vpop.f32.mrb[22].mxu1 }
 0x3c0   : > { %5343 = vst.msk [vmem:[%s8091_s7 + $0x58] sm:$0xf] %vm714_vm14, %v6056_v3  ;;  %v5394_v4 = vadd.f32 %v5393_v38, %v5392_v60  ;;  %v6057_v23 = vpack.c.bf16 %v6224_v1, %v6224_v1  ;;  %v5149_v41 = vpop.f32.mrb[23].mxu1  ;;  %v5447_v54 = vmul.f32 %v6224_v1, %v6224_v1  ;;  %v5399_v21 = vsel %vm5353_vm5, %v6224_v1, 0.0 }
 0x3c1   : > { %5341 = vst.msk [vmem:[%s8091_s7 + $0x50] sm:$0xf] %vm714_vm14, %v6054_v51  ;;  %v5495_v5 = vsel %vm5353_vm5, %v5444_v57, 0.0  ;;  %v6055_v37 = vpack.c.bf16 %v5149_v41, %v5149_v41  ;;  %v5395_v44 = vsel %vm5353_vm5, %v5149_v41, 0.0  ;;  %v5445_v18 = vmul.f32 %v5149_v41, %v5149_v41 }
 0x3c2   : > { %v5496_v55 = vadd.f32 %v5495_v5, %v5494_v14  ;;  %5344 = vst.msk [vmem:[%s8091_s7 + $0x5c] sm:$0xf] %vm714_vm14, %v6057_v23  ;;  %v5396_v0 = vadd.f32 %v5395_v44, %v5394_v4  ;;  %v5499_v61 = vsel %vm5353_vm5, %v5446_v47, 0.0  ;;  %v5501_v42 = vsel %vm5353_vm5, %v5447_v54, 0.0 }
 0x3c3   : > { %5342 = vst.msk [vmem:[%s8091_s7 + $0x54] sm:$0xf] %vm714_vm14, %v6055_v37  ;;  %v5497_v52 = vsel %vm5353_vm5, %v5445_v18, 0.0 }
 0x3c4   : > { %v5398_v22 = vadd.f32 %v5397_v2, %v5396_v0  ;;  %v5498_v8 = vadd.f32 %v5497_v52, %v5496_v55 }
 0x3c6   : > { %v5400_v58 = vadd.f32 %v5399_v21, %v5398_v22  ;;  %v5500_v6 = vadd.f32 %v5499_v61, %v5498_v8 }
 0x3c8   : > { %v5502_v17 = vadd.f32 %v5501_v42, %v5500_v6 }
 0x3e0   : > { %v6227_v43 = vpop.f32.mrb[24].mxu1 }
 0x3e1   : > { %v6060_v24 = vpack.c.bf16 %v6227_v43, %v6227_v43  ;;  %v5162_v13 = vpop.f32.mrb[25].mxu1  ;;  %v5450_v20 = vmul.f32 %v6227_v43, %v6227_v43  ;;  %v5405_v40 = vsel %vm5353_vm5, %v6227_v43, 0.0 }
 0x3e2   : > { %v6058_v33 = vpack.c.bf16 %v5162_v13, %v5162_v13  ;;  %v5401_v62 = vsel %vm5353_vm5, %v5162_v13, 0.0  ;;  %v5448_v31 = vmul.f32 %v5162_v13, %v5162_v13  ;;  %v6228_v53 = vpop.f32.mrb[26].mxu1 }
 0x3e3   : > { %5347 = vst.msk [vmem:[%s8091_s7 + $0x68] sm:$0xf] %vm714_vm14, %v6060_v24  ;;  %v5402_v59 = vadd.f32 %v5401_v62, %v5400_v58  ;;  %v6061_v35 = vpack.c.bf16 %v6228_v53, %v6228_v53  ;;  %v5165_v11 = vpop.f32.mrb[27].mxu1  ;;  %v5451_v10 = vmul.f32 %v6228_v53, %v6228_v53  ;;  %v5407_v50 = vsel %vm5353_vm5, %v6228_v53, 0.0 }
 0x3e4   : > { %5345 = vst.msk [vmem:[%s8091_s7 + $0x60] sm:$0xf] %vm714_vm14, %v6058_v33  ;;  %v5503_v63 = vsel %vm5353_vm5, %v5448_v31, 0.0  ;;  %v6059_v34 = vpack.c.bf16 %v5165_v11, %v5165_v11  ;;  %v5403_v30 = vsel %vm5353_vm5, %v5165_v11, 0.0  ;;  %v5449_v46 = vmul.f32 %v5165_v11, %v5165_v11 }
 0x3e5   : > { %v5504_v25 = vadd.f32 %v5503_v63, %v5502_v17  ;;  %5348 = vst.msk [vmem:[%s8091_s7 + $0x6c] sm:$0xf] %vm714_vm14, %v6061_v35  ;;  %v5404_v26 = vadd.f32 %v5403_v30, %v5402_v59  ;;  %v5507_v9 = vsel %vm5353_vm5, %v5450_v20, 0.0  ;;  %v5509_v29 = vsel %vm5353_vm5, %v5451_v10, 0.0 }
 0x3e6   : > { %5346 = vst.msk [vmem:[%s8091_s7 + $0x64] sm:$0xf] %vm714_vm14, %v6059_v34  ;;  %v5505_v45 = vsel %vm5353_vm5, %v5449_v46, 0.0 }
 0x3e7   : > { %v5406_v12 = vadd.f32 %v5405_v40, %v5404_v26  ;;  %v5506_v28 = vadd.f32 %v5505_v45, %v5504_v25 }
 0x3e9   : > { %v5408_v39 = vadd.f32 %v5407_v50, %v5406_v12  ;;  %v5508_v32 = vadd.f32 %v5507_v9, %v5506_v28 }
 0x3eb   : > { %v5510_v49 = vadd.f32 %v5509_v29, %v5508_v32 }
 0x3f8   : > { %v6231_v15 = vpop.f32.mrb[28].mxu1 }
 0x3f9   : > { %v6064_v27 = vpack.c.bf16 %v6231_v15, %v6231_v15  ;;  %v5178_v48 = vpop.f32.mrb[29].mxu1  ;;  %v5454_v57 = vmul.f32 %v6231_v15, %v6231_v15  ;;  %v5413_v41 = vsel %vm5353_vm5, %v6231_v15, 0.0 }
 0x3fa   : > { %v6062_v56 = vpack.c.bf16 %v5178_v48, %v5178_v48  ;;  %v5409_v60 = vsel %vm5353_vm5, %v5178_v48, 0.0  ;;  %v5452_v7 = vmul.f32 %v5178_v48, %v5178_v48  ;;  %v6232_v19 = vpop.f32.mrb[30].mxu1 }
 0x3fb   : > { %5351 = vst.msk [vmem:[%s8091_s7 + $0x78] sm:$0xf] %vm714_vm14, %v6064_v27  ;;  %v5410_v14 = vadd.f32 %v5409_v60, %v5408_v39  ;;  %v6065_v16 = vpack.c.bf16 %v6232_v19, %v6232_v19  ;;  %v5181_v3 = vpop.f32.mrb[31].mxu1  ;;  %v5455_v5 = vmul.f32 %v6232_v19, %v6232_v19  ;;  %v5415_v47 = vsel %vm5353_vm5, %v6232_v19, 0.0 }
 0x3fc   : > { %5349 = vst.msk [vmem:[%s8091_s7 + $0x70] sm:$0xf] %vm714_vm14, %v6062_v56  ;;  %v5511_v36 = vsel %vm5353_vm5, %v5452_v7, 0.0  ;;  %v6063_v51 = vpack.c.bf16 %v5181_v3, %v5181_v3  ;;  %v5411_v38 = vsel %vm5353_vm5, %v5181_v3, 0.0  ;;  %v5453_v23 = vmul.f32 %v5181_v3, %v5181_v3 }
 0x3fd   : > { %v5512_v1 = vadd.f32 %v5511_v36, %v5510_v49  ;;  %5352 = vst.msk [vmem:[%s8091_s7 + $0x7c] sm:$0xf] %vm714_vm14, %v6065_v16  ;;  %v5412_v4 = vadd.f32 %v5411_v38, %v5410_v14  ;;  %v5515_v0 = vsel %vm5353_vm5, %v5454_v57, 0.0  ;;  %v5517_v54 = vsel %vm5353_vm5, %v5455_v5, 0.0 }
 0x3fe   : > { %5350 = vst.msk [vmem:[%s8091_s7 + $0x74] sm:$0xf] %vm714_vm14, %v6063_v51  ;;  %v5513_v44 = vsel %vm5353_vm5, %v5453_v23, 0.0 }
 0x3ff   : > { %v5414_v37 = vadd.f32 %v5413_v41, %v5412_v4  ;;  %v5514_v55 = vadd.f32 %v5513_v44, %v5512_v1 }
 0x401   : > { %v5416_v18 = vadd.f32 %v5415_v47, %v5414_v37  ;;  %v5516_v2 = vadd.f32 %v5515_v0, %v5514_v55 }
 0x403   : > { %v5417_v22 = vrot.slane %v5416_v18, 4  ;;  %v5518_v52 = vadd.f32 %v5517_v54, %v5516_v2 }
 0x405   : > { %v5418_v21 = vadd.f32 %v5417_v22, %v5416_v18  ;;  %v5519_v8 = vrot.slane %v5518_v52, 4 }
 0x407   : > { %v5419_v61 = vrot.slane %v5418_v21, 2  ;;  %v5520_v58 = vadd.f32 %v5519_v8, %v5518_v52 }
 0x409   : > { %v5420_v6 = vadd.f32 %v5419_v61, %v5418_v21  ;;  %v5521_v42 = vrot.slane %v5520_v58, 2 }
 0x40b   : > { %v5421_v17 = vrot.slane %v5420_v6, 1  ;;  %v5522_v43 = vadd.f32 %v5521_v42, %v5520_v58 }
 0x40d   : > { %v5422_v24 = vadd.f32 %v5421_v17, %v5420_v6  ;;  %v5523_v13 = vrot.slane %v5522_v43, 1 }
 0x40f   : > { %5527 = vst.msk [vmem:[%s300_s13] sm:$0x1] %vm722_vm10, %v5422_v24  ;;  %v5524_v33 = vadd.f32 %v5523_v13, %v5522_v43 }
 0x411   : > { %5528 = vst.msk [vmem:[%s300_s13 + $0x1] sm:$0x1] %vm722_vm10, %v5524_v33 }
 0x412 PF: > { %s16_s20 = sadd.s32 1, %s6360_s20   ;;  %s8266_s18 = smov %s6356_s19 }
 0x413   : > { %p13_p5 = scmp.ge.s32.totalorder %s16_s20, 4   ;;  %s8267_s19 = smov %s8269_s21 }
 0x415   :  { %15 = sbr.rel (!%p13_p5) target bundleno = 2 (0x2), region = 86 }

</bundles_post_ra>
